<compile_context>
chip_gen: v5e
topology: v5e:2x2
jax: 0.10.0
libtpu: 0.0.40
codegen_flags: <defaults>
</compile_context>

<pallas_src>
import jax
import jax.numpy as jnp
from jax.experimental import pallas as pl
from jax.experimental.pallas import tpu as pltpu


def _round_up(v, m):
    return (v + m - 1) // m * m


def _pad_axis(a, axis, target):
    if a.shape[axis] == target:
        return a
    widths = [(0, 0)] * a.ndim
    widths[axis] = (0, target - a.shape[axis])
    return jnp.pad(a, widths)


def _pick_hw_tile(hw):
    # Largest tile (<=1024 rows) that divides HW exactly; exact division keeps the
    # global-average-pool denominator correct without masking padded rows.
    for t in (1024, 512, 256, 128):
        if hw % t == 0:
            return t
    return hw


def rgb_single_head_forward(x_nchw, params, mode=0):
    """mode 0/1 -> normalized head output (N, feat_dim); mode 2 -> encoder feature (N, dim_in)."""
    we, be, wh, bh = params            # (C, D), (1, D), (D, F), (1, F)  float32
    N, C, H, W = x_nchw.shape
    HW = H * W
    D, F = we.shape[1], wh.shape[1]

    D_pad = _round_up(D, 128)
    F_pad = _round_up(F, 128)
    B_TILE = min(8, N)
    N_pad = _round_up(N, B_TILE)
    T_HW = _pick_hw_tile(HW)
    num_hw = HW // T_HW
    inv_hw = 1.0 / float(HW)

    # NCHW -> (N, HW, C); x travels HBM->VMEM as bf16 (dominant stream), compute in f32.
    x_hwc = jnp.transpose(x_nchw, (0, 2, 3, 1)).reshape(N, HW, C)
    x_bf = _pad_axis(x_hwc.astype(jnp.bfloat16), 0, N_pad)

    we_p = _pad_axis(we.astype(jnp.float32), 1, D_pad)
    be_p = _pad_axis(be.astype(jnp.float32), 1, D_pad)

    grid = (N_pad // B_TILE, num_hw)
    x_spec = pl.BlockSpec((B_TILE, T_HW, C), lambda b, s: (b, s, 0))
    we_spec = pl.BlockSpec((C, D_pad), lambda b, s: (0, 0))
    be_spec = pl.BlockSpec((1, D_pad), lambda b, s: (0, 0))
    cparams = pltpu.CompilerParams(dimension_semantics=("parallel", "arbitrary"))

    def accumulate_conv_pool(x_ref, we_ref, be_ref, acc_ref):
        # Stand-in encoder body for one (batch block, HW tile):
        #   y = ReLU(x @ We + be);  acc += sum_hw y   (mean finalized by inv_hw later)
        we_blk = we_ref[...]
        be_blk = be_ref[...]
        for b in range(x_ref.shape[0]):                       # static unroll over B_TILE
            xb = x_ref[b].astype(jnp.float32)                 # (T_HW, C)
            y = jnp.dot(xb, we_blk, preferred_element_type=jnp.float32)  # (T_HW, D_pad)
            y = jnp.maximum(y + be_blk, 0.0)                  # bias + ReLU (per-tile, exact)
            acc_ref[b:b + 1, :] += jnp.sum(y, axis=0, keepdims=True)

    if mode in (0, 1):
        wh_p = _pad_axis(_pad_axis(wh.astype(jnp.float32), 0, D_pad), 1, F_pad)
        bh_p = _pad_axis(bh.astype(jnp.float32), 1, F_pad)

        def head_kernel(x_ref, we_ref, be_ref, wh_ref, bh_ref, out_ref, acc_ref):
            s = pl.program_id(1)

            @pl.when(s == 0)
            def _():
                acc_ref[...] = jnp.zeros_like(acc_ref)

            accumulate_conv_pool(x_ref, we_ref, be_ref, acc_ref)

            @pl.when(s == pl.num_programs(1) - 1)
            def _():
                feat = acc_ref[...] * inv_hw                                   # (B_TILE, D_pad)
                h = jnp.dot(feat, wh_ref[...], preferred_element_type=jnp.float32)
                h = h + bh_ref[...]                                            # (B_TILE, F_pad)
                ssq = jnp.sum(h * h, axis=1, keepdims=True)                    # (B_TILE, 1)
                # F.normalize(p=2, eps=1e-12): h / max(||h||, 1e-12) == h * rsqrt(max(ssq, 1e-24))
                out_ref[...] = h * jax.lax.rsqrt(jnp.maximum(ssq, 1e-24))

        out = pl.pallas_call(
            head_kernel,
            out_shape=jax.ShapeDtypeStruct((N_pad, F_pad), jnp.float32),
            grid_spec=pltpu.PrefetchScalarGridSpec(
                num_scalar_prefetch=0,
                grid=grid,
                in_specs=[x_spec, we_spec, be_spec,
                          pl.BlockSpec((D_pad, F_pad), lambda b, s: (0, 0)),
                          pl.BlockSpec((1, F_pad), lambda b, s: (0, 0))],
                out_specs=pl.BlockSpec((B_TILE, F_pad), lambda b, s: (b, 0)),
                scratch_shapes=[pltpu.VMEM((B_TILE, D_pad), jnp.float32)],
            ),
            compiler_params=cparams,
        )(x_bf, we_p, be_p, wh_p, bh_p)
        return out[:N, :F]

    # mode == 2: encoder feature only; accumulate straight into the resident output block
    # (its block index is constant along the "arbitrary" HW axis), no head work at all.
    def enc_kernel(x_ref, we_ref, be_ref, enc_ref):
        s = pl.program_id(1)

        @pl.when(s == 0)
        def _():
            enc_ref[...] = jnp.zeros_like(enc_ref)

        accumulate_conv_pool(x_ref, we_ref, be_ref, enc_ref)

        @pl.when(s == pl.num_programs(1) - 1)
        def _():
            enc_ref[...] = enc_ref[...] * inv_hw

    enc = pl.pallas_call(
        enc_kernel,
        out_shape=jax.ShapeDtypeStruct((N_pad, D_pad), jnp.float32),
        grid_spec=pltpu.PrefetchScalarGridSpec(
            num_scalar_prefetch=0,
            grid=grid,
            in_specs=[x_spec, we_spec, be_spec],
            out_specs=pl.BlockSpec((B_TILE, D_pad), lambda b, s: (b, 0)),
        ),
        compiler_params=cparams,
    )(x_bf, we_p, be_p)
    return enc[:N, :D]


def reference_forward(x_nchw, params, mode=0):
    """Pure-JAX reference with identical module semantics.  x is rounded to bf16 to
    mirror the kernel's bf16 input transport; all arithmetic is f32."""
    we, be, wh, bh = params
    N, C, H, W = x_nchw.shape
    x = jnp.transpose(x_nchw, (0, 2, 3, 1)).reshape(N, H * W, C)
    x = x.astype(jnp.bfloat16).astype(jnp.float32)
    y = jnp.maximum(jnp.einsum('npc,cd->npd', x, we) + be, 0.0)
    feat = jnp.mean(y, axis=1)                                 # (N, D)
    if mode == 2:
        return feat
    h = feat @ wh + bh                                         # (N, F)
    norm = jnp.sqrt(jnp.sum(h * h, axis=1, keepdims=True))
    return h / jnp.maximum(norm, 1e-12)


def init_params(key, c_in, dim_in, feat_dim):
    """Deterministic synthetic parameters (no checkpoint load)."""
    k1, k2, k3, k4 = jax.random.split(key, 4)
    we = 0.05 * jax.random.normal(k1, (c_in, dim_in), jnp.float32)      # encoder 1x1 conv (C, D)
    be = 0.05 * jax.random.normal(k2, (1, dim_in), jnp.float32)
    wh = 0.05 * jax.random.normal(k3, (dim_in, feat_dim), jnp.float32)  # head Linear (D, F)
    bh = 0.05 * jax.random.normal(k4, (1, feat_dim), jnp.float32)
    return we, be, wh, bh


if __name__ == "__main__":
    # Small shapes consistent with the module: RGB NCHW input, scaled-down dim_in
    # (=2048*width in the real module) and the module-default feat_dim=128.
    N, C, H, W = 4, 3, 32, 32
    DIM_IN, FEAT_DIM = 256, 128

    key = jax.random.PRNGKey(0)
    kx, kp = jax.random.split(key)
    x = jax.random.normal(kx, (N, C, H, W), jnp.float32)
    params = init_params(kp, C, DIM_IN, FEAT_DIM)

    out = jax.block_until_ready(rgb_single_head_forward(x, params, mode=0))
    ref = reference_forward(x, params, mode=0)
    assert out.shape == (N, FEAT_DIM)
    assert jnp.allclose(out, ref, atol=1e-4, rtol=1e-4)

    enc = jax.block_until_ready(rgb_single_head_forward(x, params, mode=2))
    ref_enc = reference_forward(x, params, mode=2)
    assert enc.shape == (N, DIM_IN)
    assert jnp.allclose(enc, ref_enc, atol=1e-4, rtol=1e-4)

    print("KERNEL_OK")
</pallas_src>

<mosaic_0001>
module attributes {stable_mosaic.version = 11 : i64} {
  func.func @head_kernel(%arg0: i32, %arg1: i32, %arg2: memref<4x1024x3xbf16, #tpu.memory_space<vmem>>, %arg3: memref<3x256xf32, #tpu.memory_space<vmem>>, %arg4: memref<1x256xf32, #tpu.memory_space<vmem>>, %arg5: memref<256x128xf32, #tpu.memory_space<vmem>>, %arg6: memref<1x128xf32, #tpu.memory_space<vmem>>, %arg7: memref<4x128xf32, #tpu.memory_space<vmem>>, %arg8: memref<4x256xf32, #tpu.memory_space<vmem>>) attributes {dimension_semantics = [#tpu.dimension_semantics<parallel>, #tpu.dimension_semantics<arbitrary>], iteration_bounds = array<i64: 1, 1>, scalar_prefetch = 0 : i64, scratch_operands = 1 : i64, tpu.core_type = #tpu.core_type<tc>, window_params = [{transform_indices = @transform_0, window_bounds = array<i64: 4, 1024, 3>}, {pipeline_mode = #tpu.pipeline_mode<synchronous>, transform_indices = @transform_1, window_bounds = array<i64: 3, 256>}, {pipeline_mode = #tpu.pipeline_mode<synchronous>, transform_indices = @transform_2, window_bounds = array<i64: 1, 256>}, {pipeline_mode = #tpu.pipeline_mode<synchronous>, transform_indices = @transform_3, window_bounds = array<i64: 256, 128>}, {pipeline_mode = #tpu.pipeline_mode<synchronous>, transform_indices = @transform_4, window_bounds = array<i64: 1, 128>}, {transform_indices = @transform_5, window_bounds = array<i64: 4, 128>}]} {
    %c0_i32 = arith.constant 0 : i32
    %0 = arith.cmpi eq, %arg1, %c0_i32 : i32
    %1 = arith.extui %0 : i1 to i32
    %c0_i32_0 = arith.constant 0 : i32
    %2 = arith.cmpi ne, %1, %c0_i32_0 : i32
    scf.if %2 {
      %cst_42 = arith.constant 0.000000e+00 : f32
      %60 = vector.broadcast %cst_42 : f32 to vector<4x256xf32>
      %c0_43 = arith.constant 0 : index
      %c0_44 = arith.constant 0 : index
      %61 = vector.load %arg8[%c0_43, %c0_44] : memref<4x256xf32, #tpu.memory_space<vmem>>, vector<4x256xf32>
      tpu.vector_store %arg8[%c0_43, %c0_44], %60 {strides = array<i32>} : memref<4x256xf32, #tpu.memory_space<vmem>>, vector<4x256xf32>,
    } else {
    }
    %c0 = arith.constant 0 : index
    %c0_1 = arith.constant 0 : index
    %3 = vector.load %arg3[%c0, %c0_1] : memref<3x256xf32, #tpu.memory_space<vmem>>, vector<3x256xf32>
    %c0_2 = arith.constant 0 : index
    %c0_3 = arith.constant 0 : index
    %4 = vector.load %arg4[%c0_2, %c0_3] : memref<1x256xf32, #tpu.memory_space<vmem>>, vector<1x256xf32>
    %c0_4 = arith.constant 0 : index
    %c0_5 = arith.constant 0 : index
    %c0_6 = arith.constant 0 : index
    %5 = vector.load %arg2[%c0_4, %c0_5, %c0_6] : memref<4x1024x3xbf16, #tpu.memory_space<vmem>>, vector<1x1024x3xbf16>
    %6 = vector.shape_cast %5 : vector<1x1024x3xbf16> to vector<1024x3xbf16>
    %7 = arith.extf %6 : vector<1024x3xbf16> to vector<1024x3xf32>
    %cst = arith.constant dense<0.000000e+00> : vector<1024x256xf32>
    %8 = tpu.matmul %7, %3, %cst {dimension_numbers = #tpu.dot_dimension_numbers<[1], [0], [0], [1], [0, 0, 1, 1], [], []>} : vector<1024x3xf32>, vector<3x256xf32>, vector<1024x256xf32> -> vector<1024x256xf32>
    %9 = vector.broadcast %4 : vector<1x256xf32> to vector<1024x256xf32>
    %10 = arith.addf %8, %9 : vector<1024x256xf32>
    %cst_7 = arith.constant 0.000000e+00 : f32
    %11 = vector.broadcast %cst_7 : f32 to vector<1024x256xf32>
    %12 = arith.maximumf %10, %11 : vector<1024x256xf32>
    %c0_8 = arith.constant 0 : index
    %c0_9 = arith.constant 0 : index
    %13 = vector.load %arg8[%c0_8, %c0_9] : memref<4x256xf32, #tpu.memory_space<vmem>>, vector<1x256xf32>
    %cst_10 = arith.constant dense<0.000000e+00> : vector<256xf32>
    %14 = vector.multi_reduction <add>, %12, %cst_10 [0] : vector<1024x256xf32> to vector<256xf32>
    %15 = vector.shape_cast %14 : vector<256xf32> to vector<1x256xf32>
    %16 = arith.addf %13, %15 : vector<1x256xf32>
    %c0_11 = arith.constant 0 : index
    %c0_12 = arith.constant 0 : index
    %17 = vector.load %arg8[%c0_11, %c0_12] : memref<4x256xf32, #tpu.memory_space<vmem>>, vector<1x256xf32>
    tpu.vector_store %arg8[%c0_11, %c0_12], %16 {strides = array<i32>} : memref<4x256xf32, #tpu.memory_space<vmem>>, vector<1x256xf32>,
    %c1 = arith.constant 1 : index
    %c0_13 = arith.constant 0 : index
    %c0_14 = arith.constant 0 : index
    %18 = vector.load %arg2[%c1, %c0_13, %c0_14] : memref<4x1024x3xbf16, #tpu.memory_space<vmem>>, vector<1x1024x3xbf16>
    %19 = vector.shape_cast %18 : vector<1x1024x3xbf16> to vector<1024x3xbf16>
    %20 = arith.extf %19 : vector<1024x3xbf16> to vector<1024x3xf32>
    %cst_15 = arith.constant dense<0.000000e+00> : vector<1024x256xf32>
    %21 = tpu.matmul %20, %3, %cst_15 {dimension_numbers = #tpu.dot_dimension_numbers<[1], [0], [0], [1], [0, 0, 1, 1], [], []>} : vector<1024x3xf32>, vector<3x256xf32>, vector<1024x256xf32> -> vector<1024x256xf32>
    %22 = vector.broadcast %4 : vector<1x256xf32> to vector<1024x256xf32>
    %23 = arith.addf %21, %22 : vector<1024x256xf32>
    %cst_16 = arith.constant 0.000000e+00 : f32
    %24 = vector.broadcast %cst_16 : f32 to vector<1024x256xf32>
    %25 = arith.maximumf %23, %24 : vector<1024x256xf32>
    %c1_17 = arith.constant 1 : index
    %c0_18 = arith.constant 0 : index
    %26 = vector.load %arg8[%c1_17, %c0_18] : memref<4x256xf32, #tpu.memory_space<vmem>>, vector<1x256xf32>
    %cst_19 = arith.constant dense<0.000000e+00> : vector<256xf32>
    %27 = vector.multi_reduction <add>, %25, %cst_19 [0] : vector<1024x256xf32> to vector<256xf32>
    %28 = vector.shape_cast %27 : vector<256xf32> to vector<1x256xf32>
    %29 = arith.addf %26, %28 : vector<1x256xf32>
    %c1_20 = arith.constant 1 : index
    %c0_21 = arith.constant 0 : index
    %30 = vector.load %arg8[%c1_20, %c0_21] : memref<4x256xf32, #tpu.memory_space<vmem>>, vector<1x256xf32>
    tpu.vector_store %arg8[%c1_20, %c0_21], %29 {strides = array<i32>} : memref<4x256xf32, #tpu.memory_space<vmem>>, vector<1x256xf32>,
    %c2 = arith.constant 2 : index
    %c0_22 = arith.constant 0 : index
    %c0_23 = arith.constant 0 : index
    %31 = vector.load %arg2[%c2, %c0_22, %c0_23] : memref<4x1024x3xbf16, #tpu.memory_space<vmem>>, vector<1x1024x3xbf16>
    %32 = vector.shape_cast %31 : vector<1x1024x3xbf16> to vector<1024x3xbf16>
    %33 = arith.extf %32 : vector<1024x3xbf16> to vector<1024x3xf32>
    %cst_24 = arith.constant dense<0.000000e+00> : vector<1024x256xf32>
    %34 = tpu.matmul %33, %3, %cst_24 {dimension_numbers = #tpu.dot_dimension_numbers<[1], [0], [0], [1], [0, 0, 1, 1], [], []>} : vector<1024x3xf32>, vector<3x256xf32>, vector<1024x256xf32> -> vector<1024x256xf32>
    %35 = vector.broadcast %4 : vector<1x256xf32> to vector<1024x256xf32>
    %36 = arith.addf %34, %35 : vector<1024x256xf32>
    %cst_25 = arith.constant 0.000000e+00 : f32
    %37 = vector.broadcast %cst_25 : f32 to vector<1024x256xf32>
    %38 = arith.maximumf %36, %37 : vector<1024x256xf32>
    %c2_26 = arith.constant 2 : index
    %c0_27 = arith.constant 0 : index
    %39 = vector.load %arg8[%c2_26, %c0_27] : memref<4x256xf32, #tpu.memory_space<vmem>>, vector<1x256xf32>
    %cst_28 = arith.constant dense<0.000000e+00> : vector<256xf32>
    %40 = vector.multi_reduction <add>, %38, %cst_28 [0] : vector<1024x256xf32> to vector<256xf32>
    %41 = vector.shape_cast %40 : vector<256xf32> to vector<1x256xf32>
    %42 = arith.addf %39, %41 : vector<1x256xf32>
    %c2_29 = arith.constant 2 : index
    %c0_30 = arith.constant 0 : index
    %43 = vector.load %arg8[%c2_29, %c0_30] : memref<4x256xf32, #tpu.memory_space<vmem>>, vector<1x256xf32>
    tpu.vector_store %arg8[%c2_29, %c0_30], %42 {strides = array<i32>} : memref<4x256xf32, #tpu.memory_space<vmem>>, vector<1x256xf32>,
    %c3 = arith.constant 3 : index
    %c0_31 = arith.constant 0 : index
    %c0_32 = arith.constant 0 : index
    %44 = vector.load %arg2[%c3, %c0_31, %c0_32] : memref<4x1024x3xbf16, #tpu.memory_space<vmem>>, vector<1x1024x3xbf16>
    %45 = vector.shape_cast %44 : vector<1x1024x3xbf16> to vector<1024x3xbf16>
    %46 = arith.extf %45 : vector<1024x3xbf16> to vector<1024x3xf32>
    %cst_33 = arith.constant dense<0.000000e+00> : vector<1024x256xf32>
    %47 = tpu.matmul %46, %3, %cst_33 {dimension_numbers = #tpu.dot_dimension_numbers<[1], [0], [0], [1], [0, 0, 1, 1], [], []>} : vector<1024x3xf32>, vector<3x256xf32>, vector<1024x256xf32> -> vector<1024x256xf32>
    %48 = vector.broadcast %4 : vector<1x256xf32> to vector<1024x256xf32>
    %49 = arith.addf %47, %48 : vector<1024x256xf32>
    %cst_34 = arith.constant 0.000000e+00 : f32
    %50 = vector.broadcast %cst_34 : f32 to vector<1024x256xf32>
    %51 = arith.maximumf %49, %50 : vector<1024x256xf32>
    %c3_35 = arith.constant 3 : index
    %c0_36 = arith.constant 0 : index
    %52 = vector.load %arg8[%c3_35, %c0_36] : memref<4x256xf32, #tpu.memory_space<vmem>>, vector<1x256xf32>
    %cst_37 = arith.constant dense<0.000000e+00> : vector<256xf32>
    %53 = vector.multi_reduction <add>, %51, %cst_37 [0] : vector<1024x256xf32> to vector<256xf32>
    %54 = vector.shape_cast %53 : vector<256xf32> to vector<1x256xf32>
    %55 = arith.addf %52, %54 : vector<1x256xf32>
    %c3_38 = arith.constant 3 : index
    %c0_39 = arith.constant 0 : index
    %56 = vector.load %arg8[%c3_38, %c0_39] : memref<4x256xf32, #tpu.memory_space<vmem>>, vector<1x256xf32>
    tpu.vector_store %arg8[%c3_38, %c0_39], %55 {strides = array<i32>} : memref<4x256xf32, #tpu.memory_space<vmem>>, vector<1x256xf32>,
    %c0_i32_40 = arith.constant 0 : i32
    %57 = arith.cmpi eq, %arg1, %c0_i32_40 : i32
    %58 = arith.extui %57 : i1 to i32
    %c0_i32_41 = arith.constant 0 : i32
    %59 = arith.cmpi ne, %58, %c0_i32_41 : i32
    scf.if %59 {
      %c0_42 = arith.constant 0 : index
      %c0_43 = arith.constant 0 : index
      %60 = vector.load %arg8[%c0_42, %c0_43] : memref<4x256xf32, #tpu.memory_space<vmem>>, vector<4x256xf32>
      %cst_44 = arith.constant 9.765625E-4 : f32
      %61 = vector.broadcast %cst_44 : f32 to vector<4x256xf32>
      %62 = arith.mulf %60, %61 : vector<4x256xf32>
      %c0_45 = arith.constant 0 : index
      %c0_46 = arith.constant 0 : index
      %63 = vector.load %arg5[%c0_45, %c0_46] : memref<256x128xf32, #tpu.memory_space<vmem>>, vector<256x128xf32>
      %cst_47 = arith.constant dense<0.000000e+00> : vector<4x128xf32>
      %64 = tpu.matmul %62, %63, %cst_47 {dimension_numbers = #tpu.dot_dimension_numbers<[1], [0], [0], [1], [0, 0, 1, 1], [], []>} : vector<4x256xf32>, vector<256x128xf32>, vector<4x128xf32> -> vector<4x128xf32>
      %c0_48 = arith.constant 0 : index
      %c0_49 = arith.constant 0 : index
      %65 = vector.load %arg6[%c0_48, %c0_49] : memref<1x128xf32, #tpu.memory_space<vmem>>, vector<1x128xf32>
      %66 = vector.broadcast %65 : vector<1x128xf32> to vector<4x128xf32>
      %67 = arith.addf %64, %66 : vector<4x128xf32>
      %68 = arith.mulf %67, %67 : vector<4x128xf32>
      %cst_50 = arith.constant dense<0.000000e+00> : vector<4xf32>
      %69 = vector.multi_reduction <add>, %68, %cst_50 [1] : vector<4x128xf32> to vector<4xf32>
      %70 = vector.shape_cast %69 : vector<4xf32> to vector<4x1xf32>
      %cst_51 = arith.constant 1.000000e-24 : f32
      %71 = vector.broadcast %cst_51 : f32 to vector<4x1xf32>
      %72 = arith.maximumf %70, %71 : vector<4x1xf32>
      %73 = math.rsqrt %72 : vector<4x1xf32>
      %74 = vector.broadcast %73 : vector<4x1xf32> to vector<4x128xf32>
      %75 = arith.mulf %67, %74 : vector<4x128xf32>
      %c0_52 = arith.constant 0 : index
      %c0_53 = arith.constant 0 : index
      %76 = vector.load %arg7[%c0_52, %c0_53] : memref<4x128xf32, #tpu.memory_space<vmem>>, vector<4x128xf32>
      tpu.vector_store %arg7[%c0_52, %c0_53], %75 {strides = array<i32>} : memref<4x128xf32, #tpu.memory_space<vmem>>, vector<4x128xf32>,
    } else {
    }
    return
  }
  func.func @transform_0(%arg0: i32, %arg1: i32) -> (i32, i32, i32) {
    %c0_i32 = arith.constant 0 : i32
    %c0_i32_0 = arith.constant 0 : i32
    return %arg0, %arg1, %c0_i32 : i32, i32, i32
  }
  func.func @transform_1(%arg0: i32, %arg1: i32) -> (i32, i32) {
    %c0_i32 = arith.constant 0 : i32
    %c0_i32_0 = arith.constant 0 : i32
    %c0_i32_1 = arith.constant 0 : i32
    return %c0_i32, %c0_i32_0 : i32, i32
  }
  func.func @transform_2(%arg0: i32, %arg1: i32) -> (i32, i32) {
    %c0_i32 = arith.constant 0 : i32
    %c0_i32_0 = arith.constant 0 : i32
    %c0_i32_1 = arith.constant 0 : i32
    return %c0_i32, %c0_i32_0 : i32, i32
  }
  func.func @transform_3(%arg0: i32, %arg1: i32) -> (i32, i32) {
    %c0_i32 = arith.constant 0 : i32
    %c0_i32_0 = arith.constant 0 : i32
    %c0_i32_1 = arith.constant 0 : i32
    return %c0_i32, %c0_i32_0 : i32, i32
  }
  func.func @transform_4(%arg0: i32, %arg1: i32) -> (i32, i32) {
    %c0_i32 = arith.constant 0 : i32
    %c0_i32_0 = arith.constant 0 : i32
    %c0_i32_1 = arith.constant 0 : i32
    return %c0_i32, %c0_i32_0 : i32, i32
  }
  func.func @transform_5(%arg0: i32, %arg1: i32) -> (i32, i32) {
    %c0_i32 = arith.constant 0 : i32
    %c0_i32_0 = arith.constant 0 : i32
    return %arg0, %c0_i32 : i32, i32
  }
}

</mosaic_0001>

<bundles_post_ra>
// kernel: tpu_custom_call.1
= control target key start
LH: loop header
LB: loop body
LE: loop exit
PB: predicated region body
PF: predicated region fallthrough
CT: control target
= control target key end

     0   :  { %s15524_s0 = inlined_call_operand.vmem [shape: bf16[4,1024,3], index: 0, kind: input, shape index: {}]   ;;  %s15525_s1 = inlined_call_operand.vmem [shape: f32[3,256], index: 1, kind: input, shape index: {}]   ;;  %s15526_s2 = inlined_call_operand.vmem [shape: f32[1,256], index: 2, kind: input, shape index: {}]   ;;  %s15527_s3 = inlined_call_operand.vmem [shape: f32[256,128], index: 3, kind: input, shape index: {}]   ;;  %s15528_s4 = inlined_call_operand.vmem [shape: f32[1,128], index: 4, kind: input, shape index: {}]   ;;  %s15529_s5 = inlined_call_operand.hbm [shape: f32[4,128], index: 5, kind: output, shape index: {}]  }
   0x1   :  { %v26_v0 = vld [vmem:[%s15525_s1] sm:$0x77] }
   0x2   :  { %290 = vst [vmem:[#allocation1] ss:$2 sm:$0xff] %v26_v0 }
   0x3   :  { %10 = vsyncpa [#allocation4], 0  ;;  %v9501_v1 = vld [vmem:[%s15524_s0] sm:$0xff]   ;;  %vm678_vm0 = vcmask 1042432   ;;  %vm293_vm1 = vcmask 23552   ;;  %v10524_v10 = vld [vmem:[%s15524_s0 + $0x8] sm:$0xff]  }
   0x4   :  { %v9502_v2 = vunpack.c.l.bf16 %v9501_v1  ;;  %v10587_v5 = vld [vmem:[%s15524_s0 + $0x200] sm:$0xff]   ;;  %v9503_v6 = vunpack.c.h.bf16 %v9501_v1  ;;  %v9506_v11 = vunpack.c.l.bf16 %v10524_v10  ;;  %v10588_v15 = vld [vmem:[%s15524_s0 + $0x208] sm:$0xff]   ;;  %v9507_v16 = vunpack.c.h.bf16 %v10524_v10  ;;  %v10525_v20 = vld [vmem:[%s15524_s0 + $0x10] sm:$0xff]   ;;  %s8075_s8 = sshll.u32 %s15529_s5, 4  ;;  %s8076_s8 = int_to_ptr.hbm [resolvable:$true] %s8075_s8 }
   0x5   :  { %v9758_v7 = vunpack.c.l.bf16 %v10587_v5  ;;  %v9759_v12 = vunpack.c.h.bf16 %v10587_v5  ;;  %v9762_v17 = vunpack.c.l.bf16 %v10588_v15  ;;  %v9510_v21 = vunpack.c.l.bf16 %v10525_v20  ;;  %v10589_v23 = vld [vmem:[%s15524_s0 + $0x210] sm:$0xff]   ;;  %v10526_v26 = vld [vmem:[%s15524_s0 + $0x18] sm:$0xff]   ;;  %v10527_v32 = vld [vmem:[%s15524_s0 + $0x20] sm:$0xff]  }
   0x6   :  { %v9763_v22 = vunpack.c.h.bf16 %v10588_v15  ;;  %v9511_v24 = vunpack.c.h.bf16 %v10525_v20  ;;  %v9766_v25 = vunpack.c.l.bf16 %v10589_v23  ;;  %v9514_v27 = vunpack.c.l.bf16 %v10526_v26  ;;  %v10590_v29 = vld [vmem:[%s15524_s0 + $0x218] sm:$0xff]   ;;  %v10591_v35 = vld [vmem:[%s15524_s0 + $0x220] sm:$0xff]   ;;  %v10528_v38 = vld [vmem:[%s15524_s0 + $0x28] sm:$0xff]  }
   0x7   :  { %v9767_v28 = vunpack.c.h.bf16 %v10589_v23  ;;  %v9515_v30 = vunpack.c.h.bf16 %v10526_v26  ;;  %v9770_v31 = vunpack.c.l.bf16 %v10590_v29  ;;  %v9518_v33 = vunpack.c.l.bf16 %v10527_v32  ;;  %v10592_v41 = vld [vmem:[%s15524_s0 + $0x228] sm:$0xff]   ;;  %v10529_v44 = vld [vmem:[%s15524_s0 + $0x30] sm:$0xff]   ;;  %v10530_v50 = vld [vmem:[%s15524_s0 + $0x38] sm:$0xff]  }
   0x8   :  { %v9771_v34 = vunpack.c.h.bf16 %v10590_v29  ;;  %v9519_v36 = vunpack.c.h.bf16 %v10527_v32  ;;  %v9774_v37 = vunpack.c.l.bf16 %v10591_v35  ;;  %v9522_v39 = vunpack.c.l.bf16 %v10528_v38  ;;  %v10593_v47 = vld [vmem:[%s15524_s0 + $0x230] sm:$0xff]   ;;  %v10594_v53 = vld [vmem:[%s15524_s0 + $0x238] sm:$0xff]   ;;  %v10531_v56 = vld [vmem:[%s15524_s0 + $0x40] sm:$0xff]  }
   0x9   :  { %v291_v3 = vld.sshfl [vmem:[#allocation1] sm:$0xff pattern:$0x75316420]  ;;  %v292_v4 = vld.sshfl [vmem:[#allocation1 + $0x8] sm:$0xff pattern:$0x75316420]  ;;  %v9775_v40 = vunpack.c.h.bf16 %v10591_v35  ;;  %v9523_v42 = vunpack.c.h.bf16 %v10528_v38  ;;  %v9778_v43 = vunpack.c.l.bf16 %v10592_v41  ;;  %v9526_v45 = vunpack.c.l.bf16 %v10529_v44 }
   0xa   :  { %8084 = vmatpush.msk.msra.mxu0 %vm678_vm0, %v291_v3  ;;  %8213 = vmatpush.msk.msra.mxu1 %vm678_vm0, %v292_v4  ;;  %2277 = vst [vmem:[#allocation1] ss:$2 sm:$0xff] %v26_v0  ;;  %v9779_v46 = vunpack.c.h.bf16 %v10592_v41  ;;  %v9527_v48 = vunpack.c.h.bf16 %v10529_v44  ;;  %v9782_v49 = vunpack.c.l.bf16 %v10593_v47  ;;  %v9530_v51 = vunpack.c.l.bf16 %v10530_v50  ;;  %v10595_v61 = vld [vmem:[%s15524_s0 + $0x240] sm:$0xff]   ;;  %v10533_v29 = vld [vmem:[%s15524_s0 + $0x50] sm:$0xff]  }
   0xb   :  { %8085 = vmatmul.msk.f32.vlgmr.msra.gmra.mxu0 %vm293_vm1, %v9502_v2  ;;  %8214 = vmatmul.msk.f32.vlgmr.msra.gmra.mxu1 %vm293_vm1, %v9502_v2  ;;  %v9783_v52 = vunpack.c.h.bf16 %v10593_v47  ;;  %v9531_v54 = vunpack.c.h.bf16 %v10530_v50  ;;  %v9786_v55 = vunpack.c.l.bf16 %v10594_v53  ;;  %v9534_v57 = vunpack.c.l.bf16 %v10531_v56  ;;  %v10532_v2 = vld [vmem:[%s15524_s0 + $0x48] sm:$0xff]   ;;  %v27_v3 = vld [vmem:[%s15526_s2] sm:$0x3] }
   0xc   :  { %v9787_v60 = vunpack.c.h.bf16 %v10594_v53  ;;  %v9535_v62 = vunpack.c.h.bf16 %v10531_v56  ;;  %v9790_v1 = vunpack.c.l.bf16 %v10595_v61  ;;  %v10995_v10 = vperm.slane %v27_v3, 0 }
   0xd   :  { %v9542_v32 = vunpack.c.l.bf16 %v10533_v29  ;;  %vm2011_vm2 = vcmask 1040384   ;;  %vm8051_vm4 = vcmask 1043456  }
  0x11   :  { %v2278_v8 = vld.sshfl [vmem:[#allocation1] sm:$0xff pattern:$0x75316420]  ;;  %v2279_v9 = vld.sshfl [vmem:[#allocation1 + $0x8] sm:$0xff pattern:$0x75316420] }
  0x12   :  { %8470 = vmatpush.msk.msra.mxu2 %vm678_vm0, %v2278_v8  ;;  %8599 = vmatpush.msk.msra.mxu3 %vm678_vm0, %v2279_v9  ;;  %4258 = vst [vmem:[#allocation1] ss:$2 sm:$0xff] %v26_v0  ;;  %v9791_v9 = vunpack.c.h.bf16 %v10595_v61 }
  0x13   :  { %8086 = vmatmul.msk.f32.gmra.mxu0 %vm293_vm1, %v9503_v6  ;;  %8215 = vmatmul.msk.f32.gmra.mxu1 %vm293_vm1, %v9503_v6  ;;  %v9538_v6 = vunpack.c.l.bf16 %v10532_v2 }
  0x14   :  { %8471 = vmatmul.msk.f32.vlgmr.msra.gmra.mxu2 %vm293_vm1, %v9758_v7  ;;  %8600 = vmatmul.msk.f32.vlgmr.msra.gmra.mxu3 %vm293_vm1, %v9758_v7 }
  0x19   :  { %v4259_v13 = vld.sshfl [vmem:[#allocation1] sm:$0xff pattern:$0x75316420]  ;;  %v4260_v14 = vld.sshfl [vmem:[#allocation1 + $0x8] sm:$0xff pattern:$0x75316420] }
  0x1a   :  { %6239 = vst [vmem:[#allocation1] ss:$2 sm:$0xff] %v26_v0  ;;  %8985 = vmatpush.msk.msrb.mxu1 %vm678_vm0, %v4260_v14  ;;  %8856 = vmatpush.msk.msrb.mxu0 %vm678_vm0, %v4259_v13 }
  0x1b   :  { %8087 = vmatmul.msk.f32.gmra.mxu0 %vm293_vm1, %v9506_v11  ;;  %8216 = vmatmul.msk.f32.gmra.mxu1 %vm293_vm1, %v9506_v11  ;;  %v10997_v11 = vperm.slane %v27_v3, 1 }
  0x1c   :  { %8472 = vmatmul.msk.f32.gmra.mxu2 %vm293_vm1, %v9759_v12  ;;  %8601 = vmatmul.msk.f32.gmra.mxu3 %vm293_vm1, %v9759_v12  ;;  %v10596_v12 = vld [vmem:[%s15524_s0 + $0x248] sm:$0xff]  }
  0x21   :  { %v6241_v18 = vld.sshfl [vmem:[#allocation1 + $0x8] sm:$0xff pattern:$0x75316420]  ;;  %v6240_v19 = vld.sshfl [vmem:[#allocation1] sm:$0xff pattern:$0x75316420] }
  0x22   :  { %9371 = vmatpush.msk.msrb.mxu3 %vm678_vm0, %v6241_v18  ;;  %9242 = vmatpush.msk.msrb.mxu2 %vm678_vm0, %v6240_v19 }
  0x23   :  { %8088 = vmatmul.msk.f32.gmra.mxu0 %vm293_vm1, %v9507_v16  ;;  %8217 = vmatmul.msk.f32.gmra.mxu1 %vm293_vm1, %v9507_v16 }
  0x24   :  { %8473 = vmatmul.msk.f32.gmra.mxu2 %vm293_vm1, %v9762_v17  ;;  %8602 = vmatmul.msk.f32.gmra.mxu3 %vm293_vm1, %v9762_v17  ;;  %v9539_v17 = vunpack.c.h.bf16 %v10532_v2 }
  0x2b   :  { %8089 = vmatmul.msk.f32.gmra.mxu0 %vm293_vm1, %v9510_v21  ;;  %8218 = vmatmul.msk.f32.gmra.mxu1 %vm293_vm1, %v9510_v21 }
  0x2c   :  { %8474 = vmatmul.msk.f32.gmra.mxu2 %vm293_vm1, %v9763_v22  ;;  %8603 = vmatmul.msk.f32.gmra.mxu3 %vm293_vm1, %v9763_v22  ;;  %v9794_v22 = vunpack.c.l.bf16 %v10596_v12 }
  0x33   :  { %8090 = vmatmul.msk.f32.gmra.mxu0 %vm293_vm1, %v9511_v24  ;;  %8219 = vmatmul.msk.f32.gmra.mxu1 %vm293_vm1, %v9511_v24 }
  0x34   :  { %8475 = vmatmul.msk.f32.gmra.mxu2 %vm293_vm1, %v9766_v25  ;;  %8604 = vmatmul.msk.f32.gmra.mxu3 %vm293_vm1, %v9766_v25 }
  0x3b   :  { %8091 = vmatmul.msk.f32.gmra.mxu0 %vm293_vm1, %v9514_v27  ;;  %8220 = vmatmul.msk.f32.gmra.mxu1 %vm293_vm1, %v9514_v27 }
  0x3c   :  { %8476 = vmatmul.msk.f32.gmra.mxu2 %vm293_vm1, %v9767_v28  ;;  %8605 = vmatmul.msk.f32.gmra.mxu3 %vm293_vm1, %v9767_v28 }
  0x43   :  { %8092 = vmatmul.msk.f32.gmra.mxu0 %vm293_vm1, %v9515_v30  ;;  %8221 = vmatmul.msk.f32.gmra.mxu1 %vm293_vm1, %v9515_v30 }
  0x44   :  { %8477 = vmatmul.msk.f32.gmra.mxu2 %vm293_vm1, %v9770_v31  ;;  %8606 = vmatmul.msk.f32.gmra.mxu3 %vm293_vm1, %v9770_v31 }
  0x4b   :  { %8093 = vmatmul.msk.f32.gmra.mxu0 %vm293_vm1, %v9518_v33  ;;  %8222 = vmatmul.msk.f32.gmra.mxu1 %vm293_vm1, %v9518_v33 }
  0x4c   :  { %8478 = vmatmul.msk.f32.gmra.mxu2 %vm293_vm1, %v9771_v34  ;;  %8607 = vmatmul.msk.f32.gmra.mxu3 %vm293_vm1, %v9771_v34 }
  0x53   :  { %8094 = vmatmul.msk.f32.gmra.mxu0 %vm293_vm1, %v9519_v36  ;;  %8223 = vmatmul.msk.f32.gmra.mxu1 %vm293_vm1, %v9519_v36 }
  0x54   :  { %8479 = vmatmul.msk.f32.gmra.mxu2 %vm293_vm1, %v9774_v37  ;;  %8608 = vmatmul.msk.f32.gmra.mxu3 %vm293_vm1, %v9774_v37  ;;  %v9795_v37 = vunpack.c.h.bf16 %v10596_v12  ;;  %v10598_v12 = vld [vmem:[%s15524_s0 + $0x258] sm:$0xff]  }
  0x5b   :  { %8095 = vmatmul.msk.f32.gmra.mxu0 %vm293_vm1, %v9522_v39  ;;  %8224 = vmatmul.msk.f32.gmra.mxu1 %vm293_vm1, %v9522_v39 }
  0x5c   :  { %8480 = vmatmul.msk.f32.gmra.mxu2 %vm293_vm1, %v9775_v40  ;;  %8609 = vmatmul.msk.f32.gmra.mxu3 %vm293_vm1, %v9775_v40 }
  0x63   :  { %8096 = vmatmul.msk.f32.gmra.mxu0 %vm293_vm1, %v9523_v42  ;;  %8225 = vmatmul.msk.f32.gmra.mxu1 %vm293_vm1, %v9523_v42  ;;  %v10597_v42 = vld [vmem:[%s15524_s0 + $0x250] sm:$0xff]  }
  0x64   :  { %8481 = vmatmul.msk.f32.gmra.mxu2 %vm293_vm1, %v9778_v43  ;;  %8610 = vmatmul.msk.f32.gmra.mxu3 %vm293_vm1, %v9778_v43  ;;  %v9798_v50 = vunpack.c.l.bf16 %v10597_v42  ;;  %v9799_v3 = vunpack.c.h.bf16 %v10597_v42  ;;  %v10599_v42 = vld [vmem:[%s15524_s0 + $0x260] sm:$0xff]  }
  0x6b   :  { %8097 = vmatmul.msk.f32.gmra.mxu0 %vm293_vm1, %v9526_v45  ;;  %8226 = vmatmul.msk.f32.gmra.mxu1 %vm293_vm1, %v9526_v45  ;;  %v9543_v45 = vunpack.c.h.bf16 %v10533_v29 }
  0x6c   :  { %8482 = vmatmul.msk.f32.gmra.mxu2 %vm293_vm1, %v9779_v46  ;;  %8611 = vmatmul.msk.f32.gmra.mxu3 %vm293_vm1, %v9779_v46 }
  0x73   :  { %8098 = vmatmul.msk.f32.gmra.mxu0 %vm293_vm1, %v9527_v48  ;;  %8227 = vmatmul.msk.f32.gmra.mxu1 %vm293_vm1, %v9527_v48 }
  0x74   :  { %8483 = vmatmul.msk.f32.gmra.mxu2 %vm293_vm1, %v9782_v49  ;;  %8612 = vmatmul.msk.f32.gmra.mxu3 %vm293_vm1, %v9782_v49 }
  0x7b   :  { %8099 = vmatmul.msk.f32.gmra.mxu0 %vm293_vm1, %v9530_v51  ;;  %8228 = vmatmul.msk.f32.gmra.mxu1 %vm293_vm1, %v9530_v51 }
  0x7c   :  { %8484 = vmatmul.msk.f32.gmra.mxu2 %vm293_vm1, %v9783_v52  ;;  %8613 = vmatmul.msk.f32.gmra.mxu3 %vm293_vm1, %v9783_v52 }
  0x83   :  { %8100 = vmatmul.msk.f32.gmra.mxu0 %vm293_vm1, %v9531_v54  ;;  %8229 = vmatmul.msk.f32.gmra.mxu1 %vm293_vm1, %v9531_v54 }
  0x84   :  { %8485 = vmatmul.msk.f32.gmra.mxu2 %vm293_vm1, %v9786_v55  ;;  %8614 = vmatmul.msk.f32.gmra.mxu3 %vm293_vm1, %v9786_v55  ;;  %v10534_v55 = vld [vmem:[%s15524_s0 + $0x58] sm:$0xff]  }
  0x88   :  { %v10966_v58 = vpop.f32.mrf.mxu0  ;;  %v10968_v59 = vpop.f32.mrf.mxu1 }
  0x8b   :  { %8101 = vmatmul.msk.f32.gmra.mxu0 %vm293_vm1, %v9534_v57  ;;  %8230 = vmatmul.msk.f32.gmra.mxu1 %vm293_vm1, %v9534_v57 }
  0x8c   :  { %8486 = vmatmul.msk.f32.gmra.mxu2 %vm293_vm1, %v9787_v60  ;;  %8615 = vmatmul.msk.f32.gmra.mxu3 %vm293_vm1, %v9787_v60  ;;  %v9546_v60 = vunpack.c.l.bf16 %v10534_v55 }
  0x90   :  { %v10977_v63 = vpop.f32.mrf.mxu0  ;;  %v10979_v0 = vpop.f32.mrf.mxu1 }
  0x93   :  { %8102 = vmatmul.msk.f32.gmra.mxu0 %vm293_vm1, %v9535_v62  ;;  %8231 = vmatmul.msk.f32.gmra.mxu1 %vm293_vm1, %v9535_v62 }
  0x94   :  { %8487 = vmatmul.msk.f32.gmra.mxu2 %vm293_vm1, %v9790_v1  ;;  %8616 = vmatmul.msk.f32.gmra.mxu3 %vm293_vm1, %v9790_v1 }
  0x97   :  { %v2685_v4 = vpop.f32.mrf.mxu2  ;;  %v3086_v5 = vpop.f32.mrf.mxu3 }
  0x98   :  { %v10991_v7 = vpop.f32.mrf.mxu0  ;;  %v10993_v8 = vpop.f32.mrf.mxu1  ;;  %v2686_v13 = vadd.f32 %v2685_v4, %v10995_v10  ;;  %v3087_v14 = vadd.f32 %v3086_v5, %v10997_v11 }
  0x9a   :  { %v3470_v23 = vmax.f32 %v2686_v13, 0.0  ;;  %v3471_v24 = vmax.f32 %v3087_v14, 0.0 }
  0x9b   :  { %8103 = vmatmul.msk.f32.gmra.mxu0 %vm293_vm1, %v9538_v6  ;;  %8232 = vmatmul.msk.f32.gmra.mxu1 %vm293_vm1, %v9538_v6 }
  0x9c   :  { %8488 = vmatmul.msk.f32.gmra.mxu2 %vm293_vm1, %v9791_v9  ;;  %8617 = vmatmul.msk.f32.gmra.mxu3 %vm293_vm1, %v9791_v9 }
  0x9f   :  { %v2688_v15 = vpop.f32.mrf.mxu2  ;;  %v3089_v16 = vpop.f32.mrf.mxu3 }
  0xa0   :  { %v2689_v18 = vadd.f32 %v2688_v15, %v10995_v10  ;;  %v3090_v19 = vadd.f32 %v3089_v16, %v10997_v11  ;;  %v11010_v20 = vpop.f32.mrf.mxu0  ;;  %v11012_v21 = vpop.f32.mrf.mxu1  ;;  %v9547_v15 = vunpack.c.h.bf16 %v10534_v55 }
  0xa2   :  { %v3472_v25 = vmax.f32 %v2689_v18, 0.0  ;;  %v3473_v26 = vmax.f32 %v3090_v19, 0.0 }
  0xa3   :  { %8104 = vmatmul.msk.f32.gmra.mxu0 %vm293_vm1, %v9539_v17  ;;  %8233 = vmatmul.msk.f32.gmra.mxu1 %vm293_vm1, %v9539_v17 }
  0xa4   :  { %v3728_v27 = vadd.f32 %v3472_v25, %v3470_v23  ;;  %v3861_v28 = vadd.f32 %v3473_v26, %v3471_v24  ;;  %8489 = vmatmul.msk.f32.gmra.mxu2 %vm293_vm1, %v9794_v22  ;;  %8618 = vmatmul.msk.f32.gmra.mxu3 %vm293_vm1, %v9794_v22  ;;  %v9802_v22 = vunpack.c.l.bf16 %v10598_v12 }
  0xa7   :  { %v2691_v30 = vpop.f32.mrf.mxu2  ;;  %v3092_v31 = vpop.f32.mrf.mxu3 }
  0xa8   :  { %v2692_v33 = vadd.f32 %v2691_v30, %v10995_v10  ;;  %v3093_v34 = vadd.f32 %v3092_v31, %v10997_v11  ;;  %v11023_v35 = vpop.f32.mrf.mxu0  ;;  %v11025_v36 = vpop.f32.mrf.mxu1 }
  0xaa   :  { %v3474_v38 = vmax.f32 %v2692_v33, 0.0  ;;  %v3475_v39 = vmax.f32 %v3093_v34, 0.0 }
  0xab   :  { %8105 = vmatmul.msk.f32.gmra.mxu0 %vm293_vm1, %v9542_v32  ;;  %8234 = vmatmul.msk.f32.gmra.mxu1 %vm293_vm1, %v9542_v32 }
  0xac   :  { %v3729_v40 = vadd.f32 %v3728_v27, %v3474_v38  ;;  %v3862_v41 = vadd.f32 %v3861_v28, %v3475_v39  ;;  %8490 = vmatmul.msk.f32.gmra.mxu2 %vm293_vm1, %v9795_v37  ;;  %8619 = vmatmul.msk.f32.gmra.mxu3 %vm293_vm1, %v9795_v37  ;;  %v10535_v27 = vld [vmem:[%s15524_s0 + $0x60] sm:$0xff]   ;;  %v9803_v37 = vunpack.c.h.bf16 %v10598_v12 }
  0xad   :  { %v9550_v30 = vunpack.c.l.bf16 %v10535_v27 }
  0xaf   :  { %v2694_v43 = vpop.f32.mrf.mxu2  ;;  %v3095_v44 = vpop.f32.mrf.mxu3 }
  0xb0   :  { %v2695_v46 = vadd.f32 %v2694_v43, %v10995_v10  ;;  %v3096_v47 = vadd.f32 %v3095_v44, %v10997_v11  ;;  %v11036_v48 = vpop.f32.mrf.mxu0  ;;  %v11038_v49 = vpop.f32.mrf.mxu1 }
  0xb2   :  { %v3476_v51 = vmax.f32 %v2695_v46, 0.0  ;;  %v3477_v52 = vmax.f32 %v3096_v47, 0.0 }
  0xb3   :  { %8106 = vmatmul.msk.f32.gmra.mxu0 %vm293_vm1, %v9543_v45  ;;  %8235 = vmatmul.msk.f32.gmra.mxu1 %vm293_vm1, %v9543_v45  ;;  %v9551_v45 = vunpack.c.h.bf16 %v10535_v27 }
  0xb4   :  { %v3730_v53 = vadd.f32 %v3729_v40, %v3476_v51  ;;  %v3863_v54 = vadd.f32 %v3862_v41, %v3477_v52  ;;  %8491 = vmatmul.msk.f32.gmra.mxu2 %vm293_vm1, %v9798_v50  ;;  %8620 = vmatmul.msk.f32.gmra.mxu3 %vm293_vm1, %v9798_v50  ;;  %v9806_v52 = vunpack.c.l.bf16 %v10599_v42 }
  0xb7   :  { %v2697_v56 = vpop.f32.mrf.mxu2  ;;  %v3098_v57 = vpop.f32.mrf.mxu3 }
  0xb8   :  { %v2698_v61 = vadd.f32 %v2697_v56, %v10995_v10  ;;  %v3099_v62 = vadd.f32 %v3098_v57, %v10997_v11  ;;  %v11049_v1 = vpop.f32.mrf.mxu0  ;;  %v11051_v2 = vpop.f32.mrf.mxu1  ;;  %v10536_v57 = vld [vmem:[%s15524_s0 + $0x68] sm:$0xff]  }
  0xba   :  { %v3478_v4 = vmax.f32 %v2698_v61, 0.0  ;;  %v3479_v5 = vmax.f32 %v3099_v62, 0.0  ;;  %v9554_v62 = vunpack.c.l.bf16 %v10536_v57 }
  0xbb   :  { %8107 = vmatmul.msk.f32.gmra.mxu0 %vm293_vm1, %v9546_v60  ;;  %8236 = vmatmul.msk.f32.gmra.mxu1 %vm293_vm1, %v9546_v60 }
  0xbc   :  { %v3731_v6 = vadd.f32 %v3730_v53, %v3478_v4  ;;  %v3864_v9 = vadd.f32 %v3863_v54, %v3479_v5  ;;  %8492 = vmatmul.msk.f32.gmra.mxu2 %vm293_vm1, %v9799_v3  ;;  %8621 = vmatmul.msk.f32.gmra.mxu3 %vm293_vm1, %v9799_v3 }
  0xbf   :  { %v2700_v13 = vpop.f32.mrf.mxu2  ;;  %v3101_v14 = vpop.f32.mrf.mxu3 }
  0xc0   :  { %v2701_v16 = vadd.f32 %v2700_v13, %v10995_v10  ;;  %v3102_v17 = vadd.f32 %v3101_v14, %v10997_v11  ;;  %v11062_v18 = vpop.f32.mrf.mxu0  ;;  %v11064_v19 = vpop.f32.mrf.mxu1 }
  0xc2   :  { %v3480_v23 = vmax.f32 %v2701_v16, 0.0  ;;  %v3481_v24 = vmax.f32 %v3102_v17, 0.0  ;;  %v10600_v16 = vld [vmem:[%s15524_s0 + $0x268] sm:$0xff]  }
  0xc3   :  { %8108 = vmatmul.msk.f32.gmra.mxu0 %vm293_vm1, %v9547_v15  ;;  %8237 = vmatmul.msk.f32.gmra.mxu1 %vm293_vm1, %v9547_v15 }
  0xc4   :  { %v3732_v25 = vadd.f32 %v3731_v6, %v3480_v23  ;;  %v3865_v26 = vadd.f32 %v3864_v9, %v3481_v24  ;;  %8493 = vmatmul.msk.f32.gmra.mxu2 %vm293_vm1, %v9802_v22  ;;  %8622 = vmatmul.msk.f32.gmra.mxu3 %vm293_vm1, %v9802_v22  ;;  %v9807_v9 = vunpack.c.h.bf16 %v10599_v42  ;;  %v9555_v23 = vunpack.c.h.bf16 %v10536_v57 }
  0xc7   :  { %v2703_v28 = vpop.f32.mrf.mxu2  ;;  %v3104_v29 = vpop.f32.mrf.mxu3 }
  0xc8   :  { %v2704_v31 = vadd.f32 %v2703_v28, %v10995_v10  ;;  %v3105_v32 = vadd.f32 %v3104_v29, %v10997_v11  ;;  %v11075_v33 = vpop.f32.mrf.mxu0  ;;  %v11077_v34 = vpop.f32.mrf.mxu1  ;;  %v9810_v28 = vunpack.c.l.bf16 %v10600_v16 }
  0xca   :  { %v3482_v38 = vmax.f32 %v2704_v31, 0.0  ;;  %v3483_v39 = vmax.f32 %v3105_v32, 0.0 }
  0xcb   :  { %8109 = vmatmul.msk.f32.gmra.mxu0 %vm293_vm1, %v9550_v30  ;;  %8238 = vmatmul.msk.f32.gmra.mxu1 %vm293_vm1, %v9550_v30 }
  0xcc   :  { %v3733_v40 = vadd.f32 %v3732_v25, %v3482_v38  ;;  %v3866_v41 = vadd.f32 %v3865_v26, %v3483_v39  ;;  %8494 = vmatmul.msk.f32.gmra.mxu2 %vm293_vm1, %v9803_v37  ;;  %8623 = vmatmul.msk.f32.gmra.mxu3 %vm293_vm1, %v9803_v37  ;;  %v10537_v37 = vld [vmem:[%s15524_s0 + $0x70] sm:$0xff]  }
  0xcd   :  { %v9559_v57 = vunpack.c.h.bf16 %v10537_v37 }
  0xcf   :  { %v2706_v43 = vpop.f32.mrf.mxu2  ;;  %v3107_v44 = vpop.f32.mrf.mxu3 }
  0xd0   :  { %v2707_v46 = vadd.f32 %v2706_v43, %v10995_v10  ;;  %v3108_v47 = vadd.f32 %v3107_v44, %v10997_v11  ;;  %v11088_v50 = vpop.f32.mrf.mxu0  ;;  %v11090_v51 = vpop.f32.mrf.mxu1 }
  0xd2   :  { %v3484_v53 = vmax.f32 %v2707_v46, 0.0  ;;  %v3485_v54 = vmax.f32 %v3108_v47, 0.0 }
  0xd3   :  { %8110 = vmatmul.msk.f32.gmra.mxu0 %vm293_vm1, %v9551_v45  ;;  %8239 = vmatmul.msk.f32.gmra.mxu1 %vm293_vm1, %v9551_v45  ;;  %v9811_v45 = vunpack.c.h.bf16 %v10600_v16 }
  0xd4   :  { %v3734_v55 = vadd.f32 %v3733_v40, %v3484_v53  ;;  %v3867_v56 = vadd.f32 %v3866_v41, %v3485_v54  ;;  %8495 = vmatmul.msk.f32.gmra.mxu2 %vm293_vm1, %v9806_v52  ;;  %8624 = vmatmul.msk.f32.gmra.mxu3 %vm293_vm1, %v9806_v52  ;;  %v9558_v40 = vunpack.c.l.bf16 %v10537_v37  ;;  %v10601_v54 = vld [vmem:[%s15524_s0 + $0x270] sm:$0xff]  }
  0xd7   :  { %v2709_v60 = vpop.f32.mrf.mxu2  ;;  %v3110_v61 = vpop.f32.mrf.mxu3 }
  0xd8   :  { %v2710_v3 = vadd.f32 %v2709_v60, %v10995_v10  ;;  %v3111_v4 = vadd.f32 %v3110_v61, %v10997_v11  ;;  %v11101_v5 = vpop.f32.mrf.mxu0  ;;  %v11103_v6 = vpop.f32.mrf.mxu1 }
  0xda   :  { %v3486_v12 = vmax.f32 %v2710_v3, 0.0  ;;  %v3487_v13 = vmax.f32 %v3111_v4, 0.0  ;;  %v9814_v4 = vunpack.c.l.bf16 %v10601_v54 }
  0xdb   :  { %8111 = vmatmul.msk.f32.gmra.mxu0 %vm293_vm1, %v9554_v62  ;;  %8240 = vmatmul.msk.f32.gmra.mxu1 %vm293_vm1, %v9554_v62 }
  0xdc   :  { %v3735_v14 = vadd.f32 %v3734_v55, %v3486_v12  ;;  %v3868_v15 = vadd.f32 %v3867_v56, %v3487_v13  ;;  %8496 = vmatmul.msk.f32.gmra.mxu2 %vm293_vm1, %v9807_v9  ;;  %8625 = vmatmul.msk.f32.gmra.mxu3 %vm293_vm1, %v9807_v9 }
  0xdf   :  { %v2712_v17 = vpop.f32.mrf.mxu2  ;;  %v3113_v22 = vpop.f32.mrf.mxu3 }
  0xe0   :  { %v2713_v24 = vadd.f32 %v2712_v17, %v10995_v10  ;;  %v3114_v25 = vadd.f32 %v3113_v22, %v10997_v11  ;;  %v11114_v26 = vpop.f32.mrf.mxu0  ;;  %v11116_v27 = vpop.f32.mrf.mxu1 }
  0xe2   :  { %v3488_v29 = vmax.f32 %v2713_v24, 0.0  ;;  %v3489_v30 = vmax.f32 %v3114_v25, 0.0 }
  0xe3   :  { %8112 = vmatmul.msk.f32.gmra.mxu0 %vm293_vm1, %v9555_v23  ;;  %8241 = vmatmul.msk.f32.gmra.mxu1 %vm293_vm1, %v9555_v23 }
  0xe4   :  { %v3736_v31 = vadd.f32 %v3735_v14, %v3488_v29  ;;  %v3869_v32 = vadd.f32 %v3868_v15, %v3489_v30  ;;  %8497 = vmatmul.msk.f32.gmra.mxu2 %vm293_vm1, %v9810_v28  ;;  %8626 = vmatmul.msk.f32.gmra.mxu3 %vm293_vm1, %v9810_v28  ;;  %v10538_v15 = vld [vmem:[%s15524_s0 + $0x78] sm:$0xff]   ;;  %v9815_v29 = vunpack.c.h.bf16 %v10601_v54 }
  0xe5   :  { %v9562_v22 = vunpack.c.l.bf16 %v10538_v15 }
  0xe7   :  { %v2715_v38 = vpop.f32.mrf.mxu2  ;;  %v3116_v39 = vpop.f32.mrf.mxu3 }
  0xe8   :  { %v2716_v41 = vadd.f32 %v2715_v38, %v10995_v10  ;;  %v3117_v42 = vadd.f32 %v3116_v39, %v10997_v11  ;;  %v11127_v43 = vpop.f32.mrf.mxu0  ;;  %v11129_v44 = vpop.f32.mrf.mxu1  ;;  %v10602_v38 = vld [vmem:[%s15524_s0 + $0x278] sm:$0xff]  }
  0xea   :  { %v3490_v46 = vmax.f32 %v2716_v41, 0.0  ;;  %v3491_v47 = vmax.f32 %v3117_v42, 0.0  ;;  %v9563_v41 = vunpack.c.h.bf16 %v10538_v15  ;;  %v9819_v15 = vunpack.c.h.bf16 %v10602_v38 }
  0xeb   :  { %8113 = vmatmul.msk.f32.gmra.mxu0 %vm293_vm1, %v9558_v40  ;;  %8242 = vmatmul.msk.f32.gmra.mxu1 %vm293_vm1, %v9558_v40 }
  0xec   :  { %v3737_v52 = vadd.f32 %v3736_v31, %v3490_v46  ;;  %v3870_v53 = vadd.f32 %v3869_v32, %v3491_v47  ;;  %8498 = vmatmul.msk.f32.gmra.mxu2 %vm293_vm1, %v9811_v45  ;;  %8627 = vmatmul.msk.f32.gmra.mxu3 %vm293_vm1, %v9811_v45 }
  0xef   :  { %v2718_v55 = vpop.f32.mrf.mxu2  ;;  %v3119_v56 = vpop.f32.mrf.mxu3 }
  0xf0   :  { %v2719_v60 = vadd.f32 %v2718_v55, %v10995_v10  ;;  %v3120_v61 = vadd.f32 %v3119_v56, %v10997_v11  ;;  %v11140_v62 = vpop.f32.mrf.mxu0  ;;  %v11142_v3 = vpop.f32.mrf.mxu1 }
  0xf2   :  { %v3492_v9 = vmax.f32 %v2719_v60, 0.0  ;;  %v3493_v12 = vmax.f32 %v3120_v61, 0.0 }
  0xf3   :  { %8114 = vmatmul.msk.f32.gmra.mxu0 %vm293_vm1, %v9559_v57  ;;  %8243 = vmatmul.msk.f32.gmra.mxu1 %vm293_vm1, %v9559_v57  ;;  %v10539_v57 = vld [vmem:[%s15524_s0 + $0x80] sm:$0xff]  }
  0xf4   :  { %v3738_v13 = vadd.f32 %v3737_v52, %v3492_v9  ;;  %v3871_v14 = vadd.f32 %v3870_v53, %v3493_v12  ;;  %8499 = vmatmul.msk.f32.gmra.mxu2 %vm293_vm1, %v9814_v4  ;;  %8628 = vmatmul.msk.f32.gmra.mxu3 %vm293_vm1, %v9814_v4  ;;  %v9818_v52 = vunpack.c.l.bf16 %v10602_v38  ;;  %v9566_v4 = vunpack.c.l.bf16 %v10539_v57 }
  0xf7   :  { %v2721_v16 = vpop.f32.mrf.mxu2  ;;  %v3122_v17 = vpop.f32.mrf.mxu3 }
  0xf8   :  { %v2722_v23 = vadd.f32 %v2721_v16, %v10995_v10  ;;  %v3123_v24 = vadd.f32 %v3122_v17, %v10997_v11  ;;  %v11153_v25 = vpop.f32.mrf.mxu0  ;;  %v11155_v28 = vpop.f32.mrf.mxu1 }
  0xfa   :  { %v3494_v30 = vmax.f32 %v2722_v23, 0.0  ;;  %v3495_v31 = vmax.f32 %v3123_v24, 0.0  ;;  %v10603_v24 = vld [vmem:[%s15524_s0 + $0x280] sm:$0xff]  }
  0xfb   :  { %8115 = vmatmul.msk.f32.gmra.mxu0 %vm293_vm1, %v9562_v22  ;;  %8244 = vmatmul.msk.f32.gmra.mxu1 %vm293_vm1, %v9562_v22 }
  0xfc   :  { %v3739_v32 = vadd.f32 %v3738_v13, %v3494_v30  ;;  %v3872_v37 = vadd.f32 %v3871_v14, %v3495_v31  ;;  %8500 = vmatmul.msk.f32.gmra.mxu2 %vm293_vm1, %v9815_v29  ;;  %8629 = vmatmul.msk.f32.gmra.mxu3 %vm293_vm1, %v9815_v29  ;;  %v9567_v31 = vunpack.c.h.bf16 %v10539_v57 }
  0xff   :  { %v2724_v39 = vpop.f32.mrf.mxu2  ;;  %v3125_v40 = vpop.f32.mrf.mxu3 }
 0x100   :  { %v2725_v42 = vadd.f32 %v2724_v39, %v10995_v10  ;;  %v3126_v45 = vadd.f32 %v3125_v40, %v10997_v11  ;;  %v11166_v46 = vpop.f32.mrf.mxu0  ;;  %v11168_v47 = vpop.f32.mrf.mxu1  ;;  %v9822_v40 = vunpack.c.l.bf16 %v10603_v24 }
 0x102   :  { %v3496_v53 = vmax.f32 %v2725_v42, 0.0  ;;  %v3497_v54 = vmax.f32 %v3126_v45, 0.0 }
 0x103   :  { %8116 = vmatmul.msk.f32.gmra.mxu0 %vm293_vm1, %v9563_v41  ;;  %8245 = vmatmul.msk.f32.gmra.mxu1 %vm293_vm1, %v9563_v41 }
 0x104   :  { %v3740_v55 = vadd.f32 %v3739_v32, %v3496_v53  ;;  %v3873_v56 = vadd.f32 %v3872_v37, %v3497_v54  ;;  %8501 = vmatmul.msk.f32.gmra.mxu2 %vm293_vm1, %v9818_v52  ;;  %8630 = vmatmul.msk.f32.gmra.mxu3 %vm293_vm1, %v9818_v52  ;;  %v10540_v53 = vld [vmem:[%s15524_s0 + $0x88] sm:$0xff]  }
 0x107   :  { %v2727_v60 = vpop.f32.mrf.mxu2  ;;  %v3128_v61 = vpop.f32.mrf.mxu3 }
 0x108   :  { %v2728_v9 = vadd.f32 %v2727_v60, %v10995_v10  ;;  %v3129_v12 = vadd.f32 %v3128_v61, %v10997_v11  ;;  %v11179_v13 = vpop.f32.mrf.mxu0  ;;  %v11181_v14 = vpop.f32.mrf.mxu1 }
 0x10a   :  { %v3498_v16 = vmax.f32 %v2728_v9, 0.0  ;;  %v3499_v17 = vmax.f32 %v3129_v12, 0.0  ;;  %v9823_v9 = vunpack.c.h.bf16 %v10603_v24 }
 0x10b   :  { %8117 = vmatmul.msk.f32.gmra.mxu0 %vm293_vm1, %v9566_v4  ;;  %8246 = vmatmul.msk.f32.gmra.mxu1 %vm293_vm1, %v9566_v4 }
 0x10c   :  { %v3741_v22 = vadd.f32 %v3740_v55, %v3498_v16  ;;  %v3874_v23 = vadd.f32 %v3873_v56, %v3499_v17  ;;  %8502 = vmatmul.msk.f32.gmra.mxu2 %vm293_vm1, %v9819_v15  ;;  %8631 = vmatmul.msk.f32.gmra.mxu3 %vm293_vm1, %v9819_v15  ;;  %v9570_v56 = vunpack.c.l.bf16 %v10540_v53 }
 0x10f   :  { %v2730_v29 = vpop.f32.mrf.mxu2  ;;  %v3131_v30 = vpop.f32.mrf.mxu3 }
 0x110   :  { %v2731_v32 = vadd.f32 %v2730_v29, %v10995_v10  ;;  %v3132_v37 = vadd.f32 %v3131_v30, %v10997_v11  ;;  %v11192_v38 = vpop.f32.mrf.mxu0  ;;  %v11194_v39 = vpop.f32.mrf.mxu1  ;;  %v9571_v30 = vunpack.c.h.bf16 %v10540_v53  ;;  %v10541_v53 = vld [vmem:[%s15524_s0 + $0x90] sm:$0xff]  }
 0x112   :  { %v3500_v41 = vmax.f32 %v2731_v32, 0.0  ;;  %v3501_v42 = vmax.f32 %v3132_v37, 0.0 }
 0x113   :  { %8118 = vmatmul.msk.f32.gmra.mxu0 %vm293_vm1, %v9567_v31  ;;  %8247 = vmatmul.msk.f32.gmra.mxu1 %vm293_vm1, %v9567_v31 }
 0x114   :  { %v3742_v45 = vadd.f32 %v3741_v22, %v3500_v41  ;;  %v3875_v52 = vadd.f32 %v3874_v23, %v3501_v42  ;;  %8503 = vmatmul.msk.f32.gmra.mxu2 %vm293_vm1, %v9822_v40  ;;  %8632 = vmatmul.msk.f32.gmra.mxu3 %vm293_vm1, %v9822_v40  ;;  %v10604_v22 = vld [vmem:[%s15524_s0 + $0x288] sm:$0xff]  }
 0x115   :  { %v9826_v40 = vunpack.c.l.bf16 %v10604_v22 }
 0x117   :  { %v2733_v54 = vpop.f32.mrf.mxu2  ;;  %v3134_v55 = vpop.f32.mrf.mxu3 }
 0x118   :  { %v2734_v57 = vadd.f32 %v2733_v54, %v10995_v10  ;;  %v3135_v60 = vadd.f32 %v3134_v55, %v10997_v11  ;;  %v11205_v61 = vpop.f32.mrf.mxu0  ;;  %v11207_v4 = vpop.f32.mrf.mxu1 }
 0x11a   :  { %v3502_v12 = vmax.f32 %v2734_v57, 0.0  ;;  %v3503_v15 = vmax.f32 %v3135_v60, 0.0 }
 0x11b   :  { %8119 = vmatmul.msk.f32.gmra.mxu0 %vm293_vm1, %v9570_v56  ;;  %8248 = vmatmul.msk.f32.gmra.mxu1 %vm293_vm1, %v9570_v56  ;;  %v9574_v56 = vunpack.c.l.bf16 %v10541_v53 }
 0x11c   :  { %v3743_v16 = vadd.f32 %v3742_v45, %v3502_v12  ;;  %v3876_v17 = vadd.f32 %v3875_v52, %v3503_v15  ;;  %8504 = vmatmul.msk.f32.gmra.mxu2 %vm293_vm1, %v9823_v9  ;;  %8633 = vmatmul.msk.f32.gmra.mxu3 %vm293_vm1, %v9823_v9  ;;  %v9827_v15 = vunpack.c.h.bf16 %v10604_v22 }
 0x11f   :  { %v2736_v23 = vpop.f32.mrf.mxu2  ;;  %v3137_v29 = vpop.f32.mrf.mxu3 }
 0x120   :  { %v2737_v24 = vadd.f32 %v2736_v23, %v10995_v10  ;;  %v3138_v31 = vadd.f32 %v3137_v29, %v10997_v11  ;;  %v11218_v32 = vpop.f32.mrf.mxu0  ;;  %v11220_v37 = vpop.f32.mrf.mxu1 }
 0x122   :  { %v3504_v41 = vmax.f32 %v2737_v24, 0.0  ;;  %v3505_v42 = vmax.f32 %v3138_v31, 0.0 }
 0x123   :  { %8120 = vmatmul.msk.f32.gmra.mxu0 %vm293_vm1, %v9571_v30  ;;  %8249 = vmatmul.msk.f32.gmra.mxu1 %vm293_vm1, %v9571_v30  ;;  %v10605_v30 = vld [vmem:[%s15524_s0 + $0x290] sm:$0xff]  }
 0x124   :  { %v3744_v45 = vadd.f32 %v3743_v16, %v3504_v41  ;;  %v3877_v52 = vadd.f32 %v3876_v17, %v3505_v42  ;;  %8505 = vmatmul.msk.f32.gmra.mxu2 %vm293_vm1, %v9826_v40  ;;  %8634 = vmatmul.msk.f32.gmra.mxu3 %vm293_vm1, %v9826_v40  ;;  %v9575_v40 = vunpack.c.h.bf16 %v10541_v53  ;;  %v10542_v53 = vld [vmem:[%s15524_s0 + $0x98] sm:$0xff]  }
 0x127   :  { %v2739_v54 = vpop.f32.mrf.mxu2  ;;  %v3140_v55 = vpop.f32.mrf.mxu3 }
 0x128   :  { %v2740_v57 = vadd.f32 %v2739_v54, %v10995_v10  ;;  %v3141_v60 = vadd.f32 %v3140_v55, %v10997_v11  ;;  %v11231_v9 = vpop.f32.mrf.mxu0  ;;  %v11233_v12 = vpop.f32.mrf.mxu1 }
 0x12a   :  { %v3506_v16 = vmax.f32 %v2740_v57, 0.0  ;;  %v3507_v17 = vmax.f32 %v3141_v60, 0.0 }
 0x12b   :  { %8121 = vmatmul.msk.f32.gmra.mxu0 %vm293_vm1, %v9574_v56  ;;  %8250 = vmatmul.msk.f32.gmra.mxu1 %vm293_vm1, %v9574_v56 }
 0x12c   :  { %v3745_v23 = vadd.f32 %v3744_v45, %v3506_v16  ;;  %v3878_v29 = vadd.f32 %v3877_v52, %v3507_v17  ;;  %8506 = vmatmul.msk.f32.gmra.mxu2 %vm293_vm1, %v9827_v15  ;;  %8635 = vmatmul.msk.f32.gmra.mxu3 %vm293_vm1, %v9827_v15  ;;  %v9830_v45 = vunpack.c.l.bf16 %v10605_v30  ;;  %v9578_v16 = vunpack.c.l.bf16 %v10542_v53 }
 0x12f   :  { %v2742_v24 = vpop.f32.mrf.mxu2  ;;  %v3143_v31 = vpop.f32.mrf.mxu3 }
 0x130   :  { %v2743_v22 = vadd.f32 %v2742_v24, %v10995_v10  ;;  %v3144_v41 = vadd.f32 %v3143_v31, %v10997_v11  ;;  %v11244_v42 = vpop.f32.mrf.mxu0  ;;  %v11246_v54 = vpop.f32.mrf.mxu1 }
 0x131   :  { %15532 = vst [vmem:[#allocation6_spill] sm:$0xff] %v11246_v54 }
 0x132   :  { %v3508_v52 = vmax.f32 %v2743_v22, 0.0  ;;  %v3509_v55 = vmax.f32 %v3144_v41, 0.0 }
 0x133   :  { %8122 = vmatmul.msk.f32.gmra.mxu0 %vm293_vm1, %v9575_v40  ;;  %8251 = vmatmul.msk.f32.gmra.mxu1 %vm293_vm1, %v9575_v40 }
 0x134   :  { %v3746_v56 = vadd.f32 %v3745_v23, %v3508_v52  ;;  %v3879_v57 = vadd.f32 %v3878_v29, %v3509_v55  ;;  %8507 = vmatmul.msk.f32.gmra.mxu2 %vm293_vm1, %v9830_v45  ;;  %8636 = vmatmul.msk.f32.gmra.mxu3 %vm293_vm1, %v9830_v45  ;;  %v9831_v23 = vunpack.c.h.bf16 %v10605_v30  ;;  %v10606_v52 = vld [vmem:[%s15524_s0 + $0x298] sm:$0xff]  }
 0x137   :  { %v2745_v60 = vpop.f32.mrf.mxu2  ;;  %v3146_v15 = vpop.f32.mrf.mxu3 }
 0x138   :  { %v2746_v17 = vadd.f32 %v2745_v60, %v10995_v10  ;;  %v3147_v24 = vadd.f32 %v3146_v15, %v10997_v11  ;;  %v11257_v31 = vpop.f32.mrf.mxu0  ;;  %v11259_v40 = vpop.f32.mrf.mxu1  ;;  %v9579_v15 = vunpack.c.h.bf16 %v10542_v53  ;;  %v10543_v53 = vld [vmem:[%s15524_s0 + $0xa0] sm:$0xff]  }
 0x139   :  { %15533 = vst [vmem:[#allocation7_spill] sm:$0xff] %v11257_v31 }
 0x13a   :  { %15534 = vst [vmem:[#allocation8_spill] sm:$0xff] %v11259_v40  ;;  %v3510_v29 = vmax.f32 %v2746_v17, 0.0  ;;  %v3511_v22 = vmax.f32 %v3147_v24, 0.0 }
 0x13b   :  { %8123 = vmatmul.msk.f32.gmra.mxu0 %vm293_vm1, %v9578_v16  ;;  %8252 = vmatmul.msk.f32.gmra.mxu1 %vm293_vm1, %v9578_v16 }
 0x13c   :  { %v3747_v41 = vadd.f32 %v3746_v56, %v3510_v29  ;;  %v3880_v45 = vadd.f32 %v3879_v57, %v3511_v22  ;;  %8508 = vmatmul.msk.f32.gmra.mxu2 %vm293_vm1, %v9831_v23  ;;  %8637 = vmatmul.msk.f32.gmra.mxu3 %vm293_vm1, %v9831_v23  ;;  %v9834_v56 = vunpack.c.l.bf16 %v10606_v52 }
 0x13f   :  { %v2748_v55 = vpop.f32.mrf.mxu2  ;;  %v3149_v60 = vpop.f32.mrf.mxu3 }
 0x140   :  { %v2749_v30 = vadd.f32 %v2748_v55, %v10995_v10  ;;  %v3150_v17 = vadd.f32 %v3149_v60, %v10997_v11  ;;  %v11270_v24 = vpop.f32.mrf.mxu0  ;;  %v11272_v16 = vpop.f32.mrf.mxu1 }
 0x141   :  { %15535 = vst [vmem:[#allocation9_spill] sm:$0xff] %v11270_v24 }
 0x142   :  { %15536 = vst [vmem:[#allocation10_spill] sm:$0xff] %v11272_v16  ;;  %v3512_v57 = vmax.f32 %v2749_v30, 0.0  ;;  %v3513_v29 = vmax.f32 %v3150_v17, 0.0  ;;  %v9582_v16 = vunpack.c.l.bf16 %v10543_v53 }
 0x143   :  { %8124 = vmatmul.msk.f32.gmra.mxu0 %vm293_vm1, %v9579_v15  ;;  %8253 = vmatmul.msk.f32.gmra.mxu1 %vm293_vm1, %v9579_v15 }
 0x144   :  { %v3748_v23 = vadd.f32 %v3747_v41, %v3512_v57  ;;  %v3881_v22 = vadd.f32 %v3880_v45, %v3513_v29  ;;  %8509 = vmatmul.msk.f32.gmra.mxu2 %vm293_vm1, %v9834_v56  ;;  %8638 = vmatmul.msk.f32.gmra.mxu3 %vm293_vm1, %v9834_v56  ;;  %v9835_v41 = vunpack.c.h.bf16 %v10606_v52 }
 0x147   :  { %v2751_v55 = vpop.f32.mrf.mxu2  ;;  %v3152_v60 = vpop.f32.mrf.mxu3 }
 0x148   :  { %v2752_v30 = vadd.f32 %v2751_v55, %v10995_v10  ;;  %v3153_v17 = vadd.f32 %v3152_v60, %v10997_v11  ;;  %v11283_v24 = vpop.f32.mrf.mxu0  ;;  %v11285_v15 = vpop.f32.mrf.mxu1  ;;  %v10607_v55 = vld [vmem:[%s15524_s0 + $0x2a0] sm:$0xff]  }
 0x149   :  { %15537 = vst [vmem:[#allocation11_spill] sm:$0xff] %v11283_v24 }
 0x14a   :  { %15538 = vst [vmem:[#allocation12_spill] sm:$0xff] %v11285_v15  ;;  %v3514_v45 = vmax.f32 %v2752_v30, 0.0  ;;  %v3515_v57 = vmax.f32 %v3153_v17, 0.0  ;;  %v9583_v15 = vunpack.c.h.bf16 %v10543_v53 }
 0x14b   :  { %8125 = vmatmul.msk.f32.gmra.mxu0 %vm293_vm1, %v9582_v16  ;;  %8254 = vmatmul.msk.f32.gmra.mxu1 %vm293_vm1, %v9582_v16 }
 0x14c   :  { %v3749_v56 = vadd.f32 %v3748_v23, %v3514_v45  ;;  %v3882_v29 = vadd.f32 %v3881_v22, %v3515_v57  ;;  %8510 = vmatmul.msk.f32.gmra.mxu2 %vm293_vm1, %v9835_v41  ;;  %8639 = vmatmul.msk.f32.gmra.mxu3 %vm293_vm1, %v9835_v41  ;;  %v9838_v23 = vunpack.c.l.bf16 %v10607_v55 }
 0x14f   :  { %v2754_v60 = vpop.f32.mrf.mxu2  ;;  %v3155_v24 = vpop.f32.mrf.mxu3 }
 0x150   :  { %v2755_v52 = vadd.f32 %v2754_v60, %v10995_v10  ;;  %v3156_v30 = vadd.f32 %v3155_v24, %v10997_v11  ;;  %v11296_v17 = vpop.f32.mrf.mxu0  ;;  %v11298_v16 = vpop.f32.mrf.mxu1  ;;  %v10544_v24 = vld [vmem:[%s15524_s0 + $0xa8] sm:$0xff]  }
 0x151   :  { %15539 = vst [vmem:[#allocation13_spill] sm:$0xff] %v11296_v17 }
 0x152   :  { %15540 = vst [vmem:[#allocation14_spill] sm:$0xff] %v11298_v16  ;;  %v3516_v22 = vmax.f32 %v2755_v52, 0.0  ;;  %v3517_v45 = vmax.f32 %v3156_v30, 0.0  ;;  %v9586_v16 = vunpack.c.l.bf16 %v10544_v24 }
 0x153   :  { %8126 = vmatmul.msk.f32.gmra.mxu0 %vm293_vm1, %v9583_v15  ;;  %8255 = vmatmul.msk.f32.gmra.mxu1 %vm293_vm1, %v9583_v15 }
 0x154   :  { %v3750_v41 = vadd.f32 %v3749_v56, %v3516_v22  ;;  %v3883_v57 = vadd.f32 %v3882_v29, %v3517_v45  ;;  %8511 = vmatmul.msk.f32.gmra.mxu2 %vm293_vm1, %v9838_v23  ;;  %8640 = vmatmul.msk.f32.gmra.mxu3 %vm293_vm1, %v9838_v23  ;;  %v9839_v56 = vunpack.c.h.bf16 %v10607_v55 }
 0x157   :  { %v2757_v53 = vpop.f32.mrf.mxu2  ;;  %v3158_v60 = vpop.f32.mrf.mxu3 }
 0x158   :  { %v2758_v52 = vadd.f32 %v2757_v53, %v10995_v10  ;;  %v3159_v30 = vadd.f32 %v3158_v60, %v10997_v11  ;;  %v11309_v17 = vpop.f32.mrf.mxu0  ;;  %v11311_v15 = vpop.f32.mrf.mxu1  ;;  %v10608_v53 = vld [vmem:[%s15524_s0 + $0x2a8] sm:$0xff]  }
 0x159   :  { %15541 = vst [vmem:[#allocation15_spill] sm:$0xff] %v11309_v17 }
 0x15a   :  { %15542 = vst [vmem:[#allocation16_spill] sm:$0xff] %v11311_v15  ;;  %v3518_v29 = vmax.f32 %v2758_v52, 0.0  ;;  %v3519_v22 = vmax.f32 %v3159_v30, 0.0  ;;  %v9587_v15 = vunpack.c.h.bf16 %v10544_v24 }
 0x15b   :  { %8127 = vmatmul.msk.f32.gmra.mxu0 %vm293_vm1, %v9586_v16  ;;  %8256 = vmatmul.msk.f32.gmra.mxu1 %vm293_vm1, %v9586_v16 }
 0x15c   :  { %v3751_v23 = vadd.f32 %v3750_v41, %v3518_v29  ;;  %v3884_v45 = vadd.f32 %v3883_v57, %v3519_v22  ;;  %8512 = vmatmul.msk.f32.gmra.mxu2 %vm293_vm1, %v9839_v56  ;;  %8641 = vmatmul.msk.f32.gmra.mxu3 %vm293_vm1, %v9839_v56  ;;  %v9842_v41 = vunpack.c.l.bf16 %v10608_v53 }
 0x15f   :  { %v2760_v60 = vpop.f32.mrf.mxu2  ;;  %v3161_v17 = vpop.f32.mrf.mxu3 }
 0x160   :  { %v2761_v55 = vadd.f32 %v2760_v60, %v10995_v10  ;;  %v3162_v52 = vadd.f32 %v3161_v17, %v10997_v11  ;;  %v11322_v30 = vpop.f32.mrf.mxu0  ;;  %v11324_v16 = vpop.f32.mrf.mxu1  ;;  %v10545_v17 = vld [vmem:[%s15524_s0 + $0xb0] sm:$0xff]  }
 0x161   :  { %15543 = vst [vmem:[#allocation17_spill] sm:$0xff] %v11322_v30 }
 0x162   :  { %15544 = vst [vmem:[#allocation18_spill] sm:$0xff] %v11324_v16  ;;  %v3520_v57 = vmax.f32 %v2761_v55, 0.0  ;;  %v3521_v29 = vmax.f32 %v3162_v52, 0.0  ;;  %v9590_v16 = vunpack.c.l.bf16 %v10545_v17 }
 0x163   :  { %8128 = vmatmul.msk.f32.gmra.mxu0 %vm293_vm1, %v9587_v15  ;;  %8257 = vmatmul.msk.f32.gmra.mxu1 %vm293_vm1, %v9587_v15 }
 0x164   :  { %v3752_v56 = vadd.f32 %v3751_v23, %v3520_v57  ;;  %v3885_v22 = vadd.f32 %v3884_v45, %v3521_v29  ;;  %8513 = vmatmul.msk.f32.gmra.mxu2 %vm293_vm1, %v9842_v41  ;;  %8642 = vmatmul.msk.f32.gmra.mxu3 %vm293_vm1, %v9842_v41  ;;  %v9843_v23 = vunpack.c.h.bf16 %v10608_v53 }
 0x167   :  { %v2763_v24 = vpop.f32.mrf.mxu2  ;;  %v3164_v60 = vpop.f32.mrf.mxu3 }
 0x168   :  { %v2764_v55 = vadd.f32 %v2763_v24, %v10995_v10  ;;  %v3165_v52 = vadd.f32 %v3164_v60, %v10997_v11  ;;  %v11335_v30 = vpop.f32.mrf.mxu0  ;;  %v11337_v15 = vpop.f32.mrf.mxu1  ;;  %v10609_v24 = vld [vmem:[%s15524_s0 + $0x2b0] sm:$0xff]  }
 0x169   :  { %15545 = vst [vmem:[#allocation19_spill] sm:$0xff] %v11335_v30 }
 0x16a   :  { %15546 = vst [vmem:[#allocation20_spill] sm:$0xff] %v11337_v15  ;;  %v3522_v45 = vmax.f32 %v2764_v55, 0.0  ;;  %v3523_v57 = vmax.f32 %v3165_v52, 0.0  ;;  %v9591_v15 = vunpack.c.h.bf16 %v10545_v17 }
 0x16b   :  { %8129 = vmatmul.msk.f32.gmra.mxu0 %vm293_vm1, %v9590_v16  ;;  %8258 = vmatmul.msk.f32.gmra.mxu1 %vm293_vm1, %v9590_v16 }
 0x16c   :  { %v3753_v41 = vadd.f32 %v3752_v56, %v3522_v45  ;;  %v3886_v29 = vadd.f32 %v3885_v22, %v3523_v57  ;;  %8514 = vmatmul.msk.f32.gmra.mxu2 %vm293_vm1, %v9843_v23  ;;  %8643 = vmatmul.msk.f32.gmra.mxu3 %vm293_vm1, %v9843_v23  ;;  %v9846_v56 = vunpack.c.l.bf16 %v10609_v24 }
 0x16f   :  { %v2766_v60 = vpop.f32.mrf.mxu2  ;;  %v3167_v30 = vpop.f32.mrf.mxu3 }
 0x170   :  { %v2767_v53 = vadd.f32 %v2766_v60, %v10995_v10  ;;  %v3168_v55 = vadd.f32 %v3167_v30, %v10997_v11  ;;  %v11348_v52 = vpop.f32.mrf.mxu0  ;;  %v11350_v16 = vpop.f32.mrf.mxu1  ;;  %v10546_v30 = vld [vmem:[%s15524_s0 + $0xb8] sm:$0xff]  }
 0x171   :  { %15547 = vst [vmem:[#allocation21_spill] sm:$0xff] %v11348_v52 }
 0x172   :  { %15548 = vst [vmem:[#allocation22_spill] sm:$0xff] %v11350_v16  ;;  %v3524_v22 = vmax.f32 %v2767_v53, 0.0  ;;  %v3525_v45 = vmax.f32 %v3168_v55, 0.0  ;;  %v9594_v16 = vunpack.c.l.bf16 %v10546_v30 }
 0x173   :  { %8130 = vmatmul.msk.f32.gmra.mxu0 %vm293_vm1, %v9591_v15  ;;  %8259 = vmatmul.msk.f32.gmra.mxu1 %vm293_vm1, %v9591_v15 }
 0x174   :  { %v3754_v23 = vadd.f32 %v3753_v41, %v3524_v22  ;;  %v3887_v57 = vadd.f32 %v3886_v29, %v3525_v45  ;;  %8515 = vmatmul.msk.f32.gmra.mxu2 %vm293_vm1, %v9846_v56  ;;  %8644 = vmatmul.msk.f32.gmra.mxu3 %vm293_vm1, %v9846_v56  ;;  %v9847_v41 = vunpack.c.h.bf16 %v10609_v24 }
 0x177   :  { %v2769_v17 = vpop.f32.mrf.mxu2  ;;  %v3170_v60 = vpop.f32.mrf.mxu3 }
 0x178   :  { %v2770_v53 = vadd.f32 %v2769_v17, %v10995_v10  ;;  %v3171_v55 = vadd.f32 %v3170_v60, %v10997_v11  ;;  %v11361_v52 = vpop.f32.mrf.mxu0  ;;  %v11363_v15 = vpop.f32.mrf.mxu1  ;;  %v10610_v17 = vld [vmem:[%s15524_s0 + $0x2b8] sm:$0xff]  }
 0x179   :  { %15549 = vst [vmem:[#allocation23_spill] sm:$0xff] %v11361_v52 }
 0x17a   :  { %15550 = vst [vmem:[#allocation24_spill] sm:$0xff] %v11363_v15  ;;  %v3526_v29 = vmax.f32 %v2770_v53, 0.0  ;;  %v3527_v22 = vmax.f32 %v3171_v55, 0.0  ;;  %v9595_v15 = vunpack.c.h.bf16 %v10546_v30 }
 0x17b   :  { %8131 = vmatmul.msk.f32.gmra.mxu0 %vm293_vm1, %v9594_v16  ;;  %8260 = vmatmul.msk.f32.gmra.mxu1 %vm293_vm1, %v9594_v16 }
 0x17c   :  { %v3755_v56 = vadd.f32 %v3754_v23, %v3526_v29  ;;  %v3888_v45 = vadd.f32 %v3887_v57, %v3527_v22  ;;  %8516 = vmatmul.msk.f32.gmra.mxu2 %vm293_vm1, %v9847_v41  ;;  %8645 = vmatmul.msk.f32.gmra.mxu3 %vm293_vm1, %v9847_v41  ;;  %v9850_v23 = vunpack.c.l.bf16 %v10610_v17 }
 0x17f   :  { %v2772_v60 = vpop.f32.mrf.mxu2  ;;  %v3173_v52 = vpop.f32.mrf.mxu3 }
 0x180   :  { %v2773_v24 = vadd.f32 %v2772_v60, %v10995_v10  ;;  %v3174_v53 = vadd.f32 %v3173_v52, %v10997_v11  ;;  %v11374_v55 = vpop.f32.mrf.mxu0  ;;  %v11376_v16 = vpop.f32.mrf.mxu1  ;;  %v10547_v52 = vld [vmem:[%s15524_s0 + $0xc0] sm:$0xff]  }
 0x181   :  { %15551 = vst [vmem:[#allocation25_spill] sm:$0xff] %v11374_v55 }
 0x182   :  { %15552 = vst [vmem:[#allocation26_spill] sm:$0xff] %v11376_v16  ;;  %v3528_v57 = vmax.f32 %v2773_v24, 0.0  ;;  %v3529_v29 = vmax.f32 %v3174_v53, 0.0  ;;  %v9598_v16 = vunpack.c.l.bf16 %v10547_v52 }
 0x183   :  { %8132 = vmatmul.msk.f32.gmra.mxu0 %vm293_vm1, %v9595_v15  ;;  %8261 = vmatmul.msk.f32.gmra.mxu1 %vm293_vm1, %v9595_v15 }
 0x184   :  { %v3756_v41 = vadd.f32 %v3755_v56, %v3528_v57  ;;  %v3889_v22 = vadd.f32 %v3888_v45, %v3529_v29  ;;  %8517 = vmatmul.msk.f32.gmra.mxu2 %vm293_vm1, %v9850_v23  ;;  %8646 = vmatmul.msk.f32.gmra.mxu3 %vm293_vm1, %v9850_v23  ;;  %v9851_v56 = vunpack.c.h.bf16 %v10610_v17 }
 0x187   :  { %v2775_v30 = vpop.f32.mrf.mxu2  ;;  %v3176_v60 = vpop.f32.mrf.mxu3 }
 0x188   :  { %v2776_v24 = vadd.f32 %v2775_v30, %v10995_v10  ;;  %v3177_v53 = vadd.f32 %v3176_v60, %v10997_v11  ;;  %v11387_v55 = vpop.f32.mrf.mxu0  ;;  %v11389_v15 = vpop.f32.mrf.mxu1  ;;  %v10611_v30 = vld [vmem:[%s15524_s0 + $0x2c0] sm:$0xff]  }
 0x189   :  { %15553 = vst [vmem:[#allocation27_spill] sm:$0xff] %v11387_v55 }
 0x18a   :  { %15554 = vst [vmem:[#allocation28_spill] sm:$0xff] %v11389_v15  ;;  %v3530_v45 = vmax.f32 %v2776_v24, 0.0  ;;  %v3531_v57 = vmax.f32 %v3177_v53, 0.0  ;;  %v9599_v15 = vunpack.c.h.bf16 %v10547_v52 }
 0x18b   :  { %8133 = vmatmul.msk.f32.gmra.mxu0 %vm293_vm1, %v9598_v16  ;;  %8262 = vmatmul.msk.f32.gmra.mxu1 %vm293_vm1, %v9598_v16 }
 0x18c   :  { %v3757_v23 = vadd.f32 %v3756_v41, %v3530_v45  ;;  %v3890_v29 = vadd.f32 %v3889_v22, %v3531_v57  ;;  %8518 = vmatmul.msk.f32.gmra.mxu2 %vm293_vm1, %v9851_v56  ;;  %8647 = vmatmul.msk.f32.gmra.mxu3 %vm293_vm1, %v9851_v56  ;;  %v9854_v41 = vunpack.c.l.bf16 %v10611_v30 }
 0x18f   :  { %v2778_v60 = vpop.f32.mrf.mxu2  ;;  %v3179_v55 = vpop.f32.mrf.mxu3 }
 0x190   :  { %v2779_v17 = vadd.f32 %v2778_v60, %v10995_v10  ;;  %v3180_v24 = vadd.f32 %v3179_v55, %v10997_v11  ;;  %v11400_v53 = vpop.f32.mrf.mxu0  ;;  %v11402_v16 = vpop.f32.mrf.mxu1  ;;  %v10548_v55 = vld [vmem:[%s15524_s0 + $0xc8] sm:$0xff]  }
 0x191   :  { %15555 = vst [vmem:[#allocation29_spill] sm:$0xff] %v11400_v53 }
 0x192   :  { %15556 = vst [vmem:[#allocation30_spill] sm:$0xff] %v11402_v16  ;;  %v3532_v22 = vmax.f32 %v2779_v17, 0.0  ;;  %v3533_v45 = vmax.f32 %v3180_v24, 0.0  ;;  %v9602_v16 = vunpack.c.l.bf16 %v10548_v55 }
 0x193   :  { %8134 = vmatmul.msk.f32.gmra.mxu0 %vm293_vm1, %v9599_v15  ;;  %8263 = vmatmul.msk.f32.gmra.mxu1 %vm293_vm1, %v9599_v15 }
 0x194   :  { %v3758_v56 = vadd.f32 %v3757_v23, %v3532_v22  ;;  %v3891_v57 = vadd.f32 %v3890_v29, %v3533_v45  ;;  %8519 = vmatmul.msk.f32.gmra.mxu2 %vm293_vm1, %v9854_v41  ;;  %8648 = vmatmul.msk.f32.gmra.mxu3 %vm293_vm1, %v9854_v41  ;;  %v9855_v23 = vunpack.c.h.bf16 %v10611_v30 }
 0x197   :  { %v2781_v52 = vpop.f32.mrf.mxu2  ;;  %v3182_v60 = vpop.f32.mrf.mxu3 }
 0x198   :  { %v2782_v17 = vadd.f32 %v2781_v52, %v10995_v10  ;;  %v3183_v24 = vadd.f32 %v3182_v60, %v10997_v11  ;;  %v11413_v53 = vpop.f32.mrf.mxu0  ;;  %v11415_v15 = vpop.f32.mrf.mxu1  ;;  %v10612_v52 = vld [vmem:[%s15524_s0 + $0x2c8] sm:$0xff]  }
 0x199   :  { %15557 = vst [vmem:[#allocation31_spill] sm:$0xff] %v11413_v53 }
 0x19a   :  { %15558 = vst [vmem:[#allocation32_spill] sm:$0xff] %v11415_v15  ;;  %v3534_v29 = vmax.f32 %v2782_v17, 0.0  ;;  %v3535_v22 = vmax.f32 %v3183_v24, 0.0  ;;  %v9603_v15 = vunpack.c.h.bf16 %v10548_v55 }
 0x19b   :  { %8135 = vmatmul.msk.f32.gmra.mxu0 %vm293_vm1, %v9602_v16  ;;  %8264 = vmatmul.msk.f32.gmra.mxu1 %vm293_vm1, %v9602_v16 }
 0x19c   :  { %v3759_v41 = vadd.f32 %v3758_v56, %v3534_v29  ;;  %v3892_v45 = vadd.f32 %v3891_v57, %v3535_v22  ;;  %8520 = vmatmul.msk.f32.gmra.mxu2 %vm293_vm1, %v9855_v23  ;;  %8649 = vmatmul.msk.f32.gmra.mxu3 %vm293_vm1, %v9855_v23  ;;  %v9858_v56 = vunpack.c.l.bf16 %v10612_v52 }
 0x19f   :  { %v2784_v60 = vpop.f32.mrf.mxu2  ;;  %v3185_v53 = vpop.f32.mrf.mxu3 }
 0x1a0   :  { %v2785_v30 = vadd.f32 %v2784_v60, %v10995_v10  ;;  %v3186_v17 = vadd.f32 %v3185_v53, %v10997_v11  ;;  %v11426_v24 = vpop.f32.mrf.mxu0  ;;  %v11428_v16 = vpop.f32.mrf.mxu1  ;;  %v10549_v53 = vld [vmem:[%s15524_s0 + $0xd0] sm:$0xff]  }
 0x1a1   :  { %15559 = vst [vmem:[#allocation33_spill] sm:$0xff] %v11426_v24 }
 0x1a2   :  { %15560 = vst [vmem:[#allocation34_spill] sm:$0xff] %v11428_v16  ;;  %v3536_v57 = vmax.f32 %v2785_v30, 0.0  ;;  %v3537_v29 = vmax.f32 %v3186_v17, 0.0  ;;  %v9606_v16 = vunpack.c.l.bf16 %v10549_v53 }
 0x1a3   :  { %8136 = vmatmul.msk.f32.gmra.mxu0 %vm293_vm1, %v9603_v15  ;;  %8265 = vmatmul.msk.f32.gmra.mxu1 %vm293_vm1, %v9603_v15 }
 0x1a4   :  { %v3760_v23 = vadd.f32 %v3759_v41, %v3536_v57  ;;  %v3893_v22 = vadd.f32 %v3892_v45, %v3537_v29  ;;  %8521 = vmatmul.msk.f32.gmra.mxu2 %vm293_vm1, %v9858_v56  ;;  %8650 = vmatmul.msk.f32.gmra.mxu3 %vm293_vm1, %v9858_v56  ;;  %v9859_v41 = vunpack.c.h.bf16 %v10612_v52 }
 0x1a7   :  { %v2787_v55 = vpop.f32.mrf.mxu2  ;;  %v3188_v60 = vpop.f32.mrf.mxu3 }
 0x1a8   :  { %v2788_v30 = vadd.f32 %v2787_v55, %v10995_v10  ;;  %v3189_v17 = vadd.f32 %v3188_v60, %v10997_v11  ;;  %v11439_v24 = vpop.f32.mrf.mxu0  ;;  %v11441_v15 = vpop.f32.mrf.mxu1  ;;  %v10613_v55 = vld [vmem:[%s15524_s0 + $0x2d0] sm:$0xff]  }
 0x1a9   :  { %15561 = vst [vmem:[#allocation35_spill] sm:$0xff] %v11439_v24 }
 0x1aa   :  { %15562 = vst [vmem:[#allocation36_spill] sm:$0xff] %v11441_v15  ;;  %v3538_v45 = vmax.f32 %v2788_v30, 0.0  ;;  %v3539_v57 = vmax.f32 %v3189_v17, 0.0  ;;  %v9607_v15 = vunpack.c.h.bf16 %v10549_v53 }
 0x1ab   :  { %8137 = vmatmul.msk.f32.gmra.mxu0 %vm293_vm1, %v9606_v16  ;;  %8266 = vmatmul.msk.f32.gmra.mxu1 %vm293_vm1, %v9606_v16 }
 0x1ac   :  { %v3761_v56 = vadd.f32 %v3760_v23, %v3538_v45  ;;  %v3894_v29 = vadd.f32 %v3893_v22, %v3539_v57  ;;  %8522 = vmatmul.msk.f32.gmra.mxu2 %vm293_vm1, %v9859_v41  ;;  %8651 = vmatmul.msk.f32.gmra.mxu3 %vm293_vm1, %v9859_v41  ;;  %v9862_v23 = vunpack.c.l.bf16 %v10613_v55 }
 0x1af   :  { %v2790_v60 = vpop.f32.mrf.mxu2  ;;  %v3191_v24 = vpop.f32.mrf.mxu3 }
 0x1b0   :  { %v2791_v52 = vadd.f32 %v2790_v60, %v10995_v10  ;;  %v3192_v30 = vadd.f32 %v3191_v24, %v10997_v11  ;;  %v11452_v17 = vpop.f32.mrf.mxu0  ;;  %v11454_v16 = vpop.f32.mrf.mxu1  ;;  %v10550_v24 = vld [vmem:[%s15524_s0 + $0xd8] sm:$0xff]  }
 0x1b1   :  { %15563 = vst [vmem:[#allocation37_spill] sm:$0xff] %v11452_v17 }
 0x1b2   :  { %15564 = vst [vmem:[#allocation38_spill] sm:$0xff] %v11454_v16  ;;  %v3540_v22 = vmax.f32 %v2791_v52, 0.0  ;;  %v3541_v45 = vmax.f32 %v3192_v30, 0.0  ;;  %v9610_v16 = vunpack.c.l.bf16 %v10550_v24 }
 0x1b3   :  { %8138 = vmatmul.msk.f32.gmra.mxu0 %vm293_vm1, %v9607_v15  ;;  %8267 = vmatmul.msk.f32.gmra.mxu1 %vm293_vm1, %v9607_v15 }
 0x1b4   :  { %v3762_v41 = vadd.f32 %v3761_v56, %v3540_v22  ;;  %v3895_v57 = vadd.f32 %v3894_v29, %v3541_v45  ;;  %8523 = vmatmul.msk.f32.gmra.mxu2 %vm293_vm1, %v9862_v23  ;;  %8652 = vmatmul.msk.f32.gmra.mxu3 %vm293_vm1, %v9862_v23  ;;  %v9863_v56 = vunpack.c.h.bf16 %v10613_v55 }
 0x1b7   :  { %v2793_v53 = vpop.f32.mrf.mxu2  ;;  %v3194_v60 = vpop.f32.mrf.mxu3 }
 0x1b8   :  { %v2794_v52 = vadd.f32 %v2793_v53, %v10995_v10  ;;  %v3195_v30 = vadd.f32 %v3194_v60, %v10997_v11  ;;  %v11465_v17 = vpop.f32.mrf.mxu0  ;;  %v11467_v15 = vpop.f32.mrf.mxu1  ;;  %v10614_v53 = vld [vmem:[%s15524_s0 + $0x2d8] sm:$0xff]  }
 0x1b9   :  { %15565 = vst [vmem:[#allocation39_spill] sm:$0xff] %v11465_v17 }
 0x1ba   :  { %15566 = vst [vmem:[#allocation40_spill] sm:$0xff] %v11467_v15  ;;  %v3542_v29 = vmax.f32 %v2794_v52, 0.0  ;;  %v3543_v22 = vmax.f32 %v3195_v30, 0.0  ;;  %v9611_v15 = vunpack.c.h.bf16 %v10550_v24 }
 0x1bb   :  { %8139 = vmatmul.msk.f32.gmra.mxu0 %vm293_vm1, %v9610_v16  ;;  %8268 = vmatmul.msk.f32.gmra.mxu1 %vm293_vm1, %v9610_v16 }
 0x1bc   :  { %v3763_v23 = vadd.f32 %v3762_v41, %v3542_v29  ;;  %v3896_v45 = vadd.f32 %v3895_v57, %v3543_v22  ;;  %8524 = vmatmul.msk.f32.gmra.mxu2 %vm293_vm1, %v9863_v56  ;;  %8653 = vmatmul.msk.f32.gmra.mxu3 %vm293_vm1, %v9863_v56  ;;  %v9866_v41 = vunpack.c.l.bf16 %v10614_v53 }
 0x1bf   :  { %v2796_v60 = vpop.f32.mrf.mxu2  ;;  %v3197_v17 = vpop.f32.mrf.mxu3 }
 0x1c0   :  { %v2797_v55 = vadd.f32 %v2796_v60, %v10995_v10  ;;  %v3198_v52 = vadd.f32 %v3197_v17, %v10997_v11  ;;  %v11478_v30 = vpop.f32.mrf.mxu0  ;;  %v11480_v16 = vpop.f32.mrf.mxu1  ;;  %v10551_v17 = vld [vmem:[%s15524_s0 + $0xe0] sm:$0xff]  }
 0x1c1   :  { %15567 = vst [vmem:[#allocation41_spill] sm:$0xff] %v11478_v30 }
 0x1c2   :  { %15568 = vst [vmem:[#allocation42_spill] sm:$0xff] %v11480_v16  ;;  %v3544_v57 = vmax.f32 %v2797_v55, 0.0  ;;  %v3545_v29 = vmax.f32 %v3198_v52, 0.0  ;;  %v9614_v16 = vunpack.c.l.bf16 %v10551_v17 }
 0x1c3   :  { %8140 = vmatmul.msk.f32.gmra.mxu0 %vm293_vm1, %v9611_v15  ;;  %8269 = vmatmul.msk.f32.gmra.mxu1 %vm293_vm1, %v9611_v15 }
 0x1c4   :  { %v3764_v56 = vadd.f32 %v3763_v23, %v3544_v57  ;;  %v3897_v22 = vadd.f32 %v3896_v45, %v3545_v29  ;;  %8525 = vmatmul.msk.f32.gmra.mxu2 %vm293_vm1, %v9866_v41  ;;  %8654 = vmatmul.msk.f32.gmra.mxu3 %vm293_vm1, %v9866_v41  ;;  %v9867_v23 = vunpack.c.h.bf16 %v10614_v53 }
 0x1c7   :  { %v2799_v24 = vpop.f32.mrf.mxu2  ;;  %v3200_v60 = vpop.f32.mrf.mxu3 }
 0x1c8   :  { %v2800_v55 = vadd.f32 %v2799_v24, %v10995_v10  ;;  %v3201_v52 = vadd.f32 %v3200_v60, %v10997_v11  ;;  %v11491_v30 = vpop.f32.mrf.mxu0  ;;  %v11493_v15 = vpop.f32.mrf.mxu1  ;;  %v10615_v24 = vld [vmem:[%s15524_s0 + $0x2e0] sm:$0xff]  }
 0x1c9   :  { %15569 = vst [vmem:[#allocation43_spill] sm:$0xff] %v11491_v30 }
 0x1ca   :  { %15570 = vst [vmem:[#allocation44_spill] sm:$0xff] %v11493_v15  ;;  %v3546_v45 = vmax.f32 %v2800_v55, 0.0  ;;  %v3547_v57 = vmax.f32 %v3201_v52, 0.0  ;;  %v9615_v15 = vunpack.c.h.bf16 %v10551_v17 }
 0x1cb   :  { %8141 = vmatmul.msk.f32.gmra.mxu0 %vm293_vm1, %v9614_v16  ;;  %8270 = vmatmul.msk.f32.gmra.mxu1 %vm293_vm1, %v9614_v16 }
 0x1cc   :  { %v3765_v41 = vadd.f32 %v3764_v56, %v3546_v45  ;;  %v3898_v29 = vadd.f32 %v3897_v22, %v3547_v57  ;;  %8526 = vmatmul.msk.f32.gmra.mxu2 %vm293_vm1, %v9867_v23  ;;  %8655 = vmatmul.msk.f32.gmra.mxu3 %vm293_vm1, %v9867_v23  ;;  %v9870_v56 = vunpack.c.l.bf16 %v10615_v24 }
 0x1cf   :  { %v2802_v60 = vpop.f32.mrf.mxu2  ;;  %v3203_v30 = vpop.f32.mrf.mxu3 }
 0x1d0   :  { %v2803_v53 = vadd.f32 %v2802_v60, %v10995_v10  ;;  %v3204_v55 = vadd.f32 %v3203_v30, %v10997_v11  ;;  %v11504_v52 = vpop.f32.mrf.mxu0  ;;  %v11506_v16 = vpop.f32.mrf.mxu1  ;;  %v10552_v30 = vld [vmem:[%s15524_s0 + $0xe8] sm:$0xff]  }
 0x1d1   :  { %15571 = vst [vmem:[#allocation45_spill] sm:$0xff] %v11504_v52 }
 0x1d2   :  { %15572 = vst [vmem:[#allocation46_spill] sm:$0xff] %v11506_v16  ;;  %v3548_v22 = vmax.f32 %v2803_v53, 0.0  ;;  %v3549_v45 = vmax.f32 %v3204_v55, 0.0  ;;  %v9618_v16 = vunpack.c.l.bf16 %v10552_v30 }
 0x1d3   :  { %8142 = vmatmul.msk.f32.gmra.mxu0 %vm293_vm1, %v9615_v15  ;;  %8271 = vmatmul.msk.f32.gmra.mxu1 %vm293_vm1, %v9615_v15 }
 0x1d4   :  { %v3766_v23 = vadd.f32 %v3765_v41, %v3548_v22  ;;  %v3899_v57 = vadd.f32 %v3898_v29, %v3549_v45  ;;  %8527 = vmatmul.msk.f32.gmra.mxu2 %vm293_vm1, %v9870_v56  ;;  %8656 = vmatmul.msk.f32.gmra.mxu3 %vm293_vm1, %v9870_v56  ;;  %v9871_v41 = vunpack.c.h.bf16 %v10615_v24 }
 0x1d7   :  { %v2805_v17 = vpop.f32.mrf.mxu2  ;;  %v3206_v60 = vpop.f32.mrf.mxu3 }
 0x1d8   :  { %v2806_v53 = vadd.f32 %v2805_v17, %v10995_v10  ;;  %v3207_v55 = vadd.f32 %v3206_v60, %v10997_v11  ;;  %v11517_v52 = vpop.f32.mrf.mxu0  ;;  %v11519_v15 = vpop.f32.mrf.mxu1  ;;  %v10616_v17 = vld [vmem:[%s15524_s0 + $0x2e8] sm:$0xff]  }
 0x1d9   :  { %15573 = vst [vmem:[#allocation47_spill] sm:$0xff] %v11517_v52 }
 0x1da   :  { %15574 = vst [vmem:[#allocation48_spill] sm:$0xff] %v11519_v15  ;;  %v3550_v29 = vmax.f32 %v2806_v53, 0.0  ;;  %v3551_v22 = vmax.f32 %v3207_v55, 0.0  ;;  %v9619_v15 = vunpack.c.h.bf16 %v10552_v30 }
 0x1db   :  { %8143 = vmatmul.msk.f32.gmra.mxu0 %vm293_vm1, %v9618_v16  ;;  %8272 = vmatmul.msk.f32.gmra.mxu1 %vm293_vm1, %v9618_v16 }
 0x1dc   :  { %v3767_v56 = vadd.f32 %v3766_v23, %v3550_v29  ;;  %v3900_v45 = vadd.f32 %v3899_v57, %v3551_v22  ;;  %8528 = vmatmul.msk.f32.gmra.mxu2 %vm293_vm1, %v9871_v41  ;;  %8657 = vmatmul.msk.f32.gmra.mxu3 %vm293_vm1, %v9871_v41  ;;  %v9874_v23 = vunpack.c.l.bf16 %v10616_v17 }
 0x1df   :  { %v2808_v60 = vpop.f32.mrf.mxu2  ;;  %v3209_v52 = vpop.f32.mrf.mxu3 }
 0x1e0   :  { %v2809_v24 = vadd.f32 %v2808_v60, %v10995_v10  ;;  %v3210_v53 = vadd.f32 %v3209_v52, %v10997_v11  ;;  %v11530_v55 = vpop.f32.mrf.mxu0  ;;  %v11532_v16 = vpop.f32.mrf.mxu1  ;;  %v10553_v52 = vld [vmem:[%s15524_s0 + $0xf0] sm:$0xff]  }
 0x1e1   :  { %15575 = vst [vmem:[#allocation49_spill] sm:$0xff] %v11530_v55 }
 0x1e2   :  { %15576 = vst [vmem:[#allocation50_spill] sm:$0xff] %v11532_v16  ;;  %v3552_v57 = vmax.f32 %v2809_v24, 0.0  ;;  %v3553_v29 = vmax.f32 %v3210_v53, 0.0  ;;  %v9622_v16 = vunpack.c.l.bf16 %v10553_v52 }
 0x1e3   :  { %8144 = vmatmul.msk.f32.gmra.mxu0 %vm293_vm1, %v9619_v15  ;;  %8273 = vmatmul.msk.f32.gmra.mxu1 %vm293_vm1, %v9619_v15 }
 0x1e4   :  { %v3768_v41 = vadd.f32 %v3767_v56, %v3552_v57  ;;  %v3901_v22 = vadd.f32 %v3900_v45, %v3553_v29  ;;  %8529 = vmatmul.msk.f32.gmra.mxu2 %vm293_vm1, %v9874_v23  ;;  %8658 = vmatmul.msk.f32.gmra.mxu3 %vm293_vm1, %v9874_v23  ;;  %v9875_v56 = vunpack.c.h.bf16 %v10616_v17 }
 0x1e7   :  { %v2811_v30 = vpop.f32.mrf.mxu2  ;;  %v3212_v60 = vpop.f32.mrf.mxu3 }
 0x1e8   :  { %v2812_v24 = vadd.f32 %v2811_v30, %v10995_v10  ;;  %v3213_v53 = vadd.f32 %v3212_v60, %v10997_v11  ;;  %v11543_v55 = vpop.f32.mrf.mxu0  ;;  %v11545_v15 = vpop.f32.mrf.mxu1  ;;  %v10617_v30 = vld [vmem:[%s15524_s0 + $0x2f0] sm:$0xff]  }
 0x1e9   :  { %15577 = vst [vmem:[#allocation51_spill] sm:$0xff] %v11543_v55 }
 0x1ea   :  { %15578 = vst [vmem:[#allocation52_spill] sm:$0xff] %v11545_v15  ;;  %v3554_v45 = vmax.f32 %v2812_v24, 0.0  ;;  %v3555_v57 = vmax.f32 %v3213_v53, 0.0  ;;  %v9623_v15 = vunpack.c.h.bf16 %v10553_v52 }
 0x1eb   :  { %8145 = vmatmul.msk.f32.gmra.mxu0 %vm293_vm1, %v9622_v16  ;;  %8274 = vmatmul.msk.f32.gmra.mxu1 %vm293_vm1, %v9622_v16 }
 0x1ec   :  { %v3769_v23 = vadd.f32 %v3768_v41, %v3554_v45  ;;  %v3902_v29 = vadd.f32 %v3901_v22, %v3555_v57  ;;  %8530 = vmatmul.msk.f32.gmra.mxu2 %vm293_vm1, %v9875_v56  ;;  %8659 = vmatmul.msk.f32.gmra.mxu3 %vm293_vm1, %v9875_v56  ;;  %v9878_v41 = vunpack.c.l.bf16 %v10617_v30 }
 0x1ef   :  { %v2814_v60 = vpop.f32.mrf.mxu2  ;;  %v3215_v55 = vpop.f32.mrf.mxu3 }
 0x1f0   :  { %v2815_v17 = vadd.f32 %v2814_v60, %v10995_v10  ;;  %v3216_v24 = vadd.f32 %v3215_v55, %v10997_v11  ;;  %v11556_v53 = vpop.f32.mrf.mxu0  ;;  %v11558_v16 = vpop.f32.mrf.mxu1  ;;  %v10554_v55 = vld [vmem:[%s15524_s0 + $0xf8] sm:$0xff]  }
 0x1f1   :  { %15579 = vst [vmem:[#allocation53_spill] sm:$0xff] %v11556_v53 }
 0x1f2   :  { %15580 = vst [vmem:[#allocation54_spill] sm:$0xff] %v11558_v16  ;;  %v3556_v22 = vmax.f32 %v2815_v17, 0.0  ;;  %v3557_v45 = vmax.f32 %v3216_v24, 0.0  ;;  %v9626_v16 = vunpack.c.l.bf16 %v10554_v55 }
 0x1f3   :  { %8146 = vmatmul.msk.f32.gmra.mxu0 %vm293_vm1, %v9623_v15  ;;  %8275 = vmatmul.msk.f32.gmra.mxu1 %vm293_vm1, %v9623_v15 }
 0x1f4   :  { %v3770_v56 = vadd.f32 %v3769_v23, %v3556_v22  ;;  %v3903_v57 = vadd.f32 %v3902_v29, %v3557_v45  ;;  %8531 = vmatmul.msk.f32.gmra.mxu2 %vm293_vm1, %v9878_v41  ;;  %8660 = vmatmul.msk.f32.gmra.mxu3 %vm293_vm1, %v9878_v41  ;;  %v9879_v23 = vunpack.c.h.bf16 %v10617_v30 }
 0x1f7   :  { %v2817_v52 = vpop.f32.mrf.mxu2  ;;  %v3218_v60 = vpop.f32.mrf.mxu3 }
 0x1f8   :  { %v2818_v17 = vadd.f32 %v2817_v52, %v10995_v10  ;;  %v3219_v24 = vadd.f32 %v3218_v60, %v10997_v11  ;;  %v11569_v53 = vpop.f32.mrf.mxu0  ;;  %v11571_v15 = vpop.f32.mrf.mxu1  ;;  %v10618_v52 = vld [vmem:[%s15524_s0 + $0x2f8] sm:$0xff]  }
 0x1f9   :  { %15581 = vst [vmem:[#allocation55_spill] sm:$0xff] %v11569_v53 }
 0x1fa   :  { %15582 = vst [vmem:[#allocation56_spill] sm:$0xff] %v11571_v15  ;;  %v3558_v29 = vmax.f32 %v2818_v17, 0.0  ;;  %v3559_v22 = vmax.f32 %v3219_v24, 0.0  ;;  %v9627_v15 = vunpack.c.h.bf16 %v10554_v55 }
 0x1fb   :  { %8147 = vmatmul.msk.f32.gmra.mxu0 %vm293_vm1, %v9626_v16  ;;  %8276 = vmatmul.msk.f32.gmra.mxu1 %vm293_vm1, %v9626_v16 }
 0x1fc   :  { %v3771_v41 = vadd.f32 %v3770_v56, %v3558_v29  ;;  %v3904_v45 = vadd.f32 %v3903_v57, %v3559_v22  ;;  %8532 = vmatmul.msk.f32.gmra.mxu2 %vm293_vm1, %v9879_v23  ;;  %8661 = vmatmul.msk.f32.gmra.mxu3 %vm293_vm1, %v9879_v23  ;;  %v9882_v56 = vunpack.c.l.bf16 %v10618_v52 }
 0x1ff   :  { %v2820_v60 = vpop.f32.mrf.mxu2  ;;  %v3221_v53 = vpop.f32.mrf.mxu3 }
 0x200   :  { %v2821_v30 = vadd.f32 %v2820_v60, %v10995_v10  ;;  %v3222_v17 = vadd.f32 %v3221_v53, %v10997_v11  ;;  %v11582_v24 = vpop.f32.mrf.mxu0  ;;  %v11584_v16 = vpop.f32.mrf.mxu1  ;;  %v10555_v53 = vld [vmem:[%s15524_s0 + $0x100] sm:$0xff]  }
 0x201   :  { %15583 = vst [vmem:[#allocation57_spill] sm:$0xff] %v11582_v24 }
 0x202   :  { %15584 = vst [vmem:[#allocation58_spill] sm:$0xff] %v11584_v16  ;;  %v3560_v57 = vmax.f32 %v2821_v30, 0.0  ;;  %v3561_v29 = vmax.f32 %v3222_v17, 0.0  ;;  %v9630_v16 = vunpack.c.l.bf16 %v10555_v53 }
 0x203   :  { %8148 = vmatmul.msk.f32.gmra.mxu0 %vm293_vm1, %v9627_v15  ;;  %8277 = vmatmul.msk.f32.gmra.mxu1 %vm293_vm1, %v9627_v15 }
 0x204   :  { %v3772_v23 = vadd.f32 %v3771_v41, %v3560_v57  ;;  %v3905_v22 = vadd.f32 %v3904_v45, %v3561_v29  ;;  %8533 = vmatmul.msk.f32.gmra.mxu2 %vm293_vm1, %v9882_v56  ;;  %8662 = vmatmul.msk.f32.gmra.mxu3 %vm293_vm1, %v9882_v56  ;;  %v9883_v41 = vunpack.c.h.bf16 %v10618_v52 }
 0x207   :  { %v2823_v55 = vpop.f32.mrf.mxu2  ;;  %v3224_v60 = vpop.f32.mrf.mxu3 }
 0x208   :  { %v2824_v30 = vadd.f32 %v2823_v55, %v10995_v10  ;;  %v3225_v17 = vadd.f32 %v3224_v60, %v10997_v11  ;;  %v11595_v24 = vpop.f32.mrf.mxu0  ;;  %v11597_v15 = vpop.f32.mrf.mxu1  ;;  %v10619_v55 = vld [vmem:[%s15524_s0 + $0x300] sm:$0xff]  }
 0x209   :  { %15585 = vst [vmem:[#allocation59_spill] sm:$0xff] %v11595_v24 }
 0x20a   :  { %15586 = vst [vmem:[#allocation60_spill] sm:$0xff] %v11597_v15  ;;  %v3562_v45 = vmax.f32 %v2824_v30, 0.0  ;;  %v3563_v57 = vmax.f32 %v3225_v17, 0.0  ;;  %v9631_v15 = vunpack.c.h.bf16 %v10555_v53 }
 0x20b   :  { %8149 = vmatmul.msk.f32.gmra.mxu0 %vm293_vm1, %v9630_v16  ;;  %8278 = vmatmul.msk.f32.gmra.mxu1 %vm293_vm1, %v9630_v16 }
 0x20c   :  { %v3773_v56 = vadd.f32 %v3772_v23, %v3562_v45  ;;  %v3906_v29 = vadd.f32 %v3905_v22, %v3563_v57  ;;  %8534 = vmatmul.msk.f32.gmra.mxu2 %vm293_vm1, %v9883_v41  ;;  %8663 = vmatmul.msk.f32.gmra.mxu3 %vm293_vm1, %v9883_v41  ;;  %v9886_v23 = vunpack.c.l.bf16 %v10619_v55 }
 0x20f   :  { %v2826_v60 = vpop.f32.mrf.mxu2  ;;  %v3227_v24 = vpop.f32.mrf.mxu3 }
 0x210   :  { %v2827_v52 = vadd.f32 %v2826_v60, %v10995_v10  ;;  %v3228_v30 = vadd.f32 %v3227_v24, %v10997_v11  ;;  %v11608_v17 = vpop.f32.mrf.mxu0  ;;  %v11610_v16 = vpop.f32.mrf.mxu1  ;;  %v10556_v24 = vld [vmem:[%s15524_s0 + $0x108] sm:$0xff]  }
 0x211   :  { %15587 = vst [vmem:[#allocation61_spill] sm:$0xff] %v11608_v17 }
 0x212   :  { %15588 = vst [vmem:[#allocation62_spill] sm:$0xff] %v11610_v16  ;;  %v3564_v22 = vmax.f32 %v2827_v52, 0.0  ;;  %v3565_v45 = vmax.f32 %v3228_v30, 0.0  ;;  %v9634_v16 = vunpack.c.l.bf16 %v10556_v24 }
 0x213   :  { %8150 = vmatmul.msk.f32.gmra.mxu0 %vm293_vm1, %v9631_v15  ;;  %8279 = vmatmul.msk.f32.gmra.mxu1 %vm293_vm1, %v9631_v15 }
 0x214   :  { %v3774_v41 = vadd.f32 %v3773_v56, %v3564_v22  ;;  %v3907_v57 = vadd.f32 %v3906_v29, %v3565_v45  ;;  %8535 = vmatmul.msk.f32.gmra.mxu2 %vm293_vm1, %v9886_v23  ;;  %8664 = vmatmul.msk.f32.gmra.mxu3 %vm293_vm1, %v9886_v23  ;;  %v9887_v56 = vunpack.c.h.bf16 %v10619_v55 }
 0x217   :  { %v2829_v53 = vpop.f32.mrf.mxu2  ;;  %v3230_v60 = vpop.f32.mrf.mxu3 }
 0x218   :  { %v2830_v52 = vadd.f32 %v2829_v53, %v10995_v10  ;;  %v3231_v30 = vadd.f32 %v3230_v60, %v10997_v11  ;;  %v11621_v17 = vpop.f32.mrf.mxu0  ;;  %v11623_v15 = vpop.f32.mrf.mxu1  ;;  %v10620_v53 = vld [vmem:[%s15524_s0 + $0x308] sm:$0xff]  }
 0x219   :  { %15589 = vst [vmem:[#allocation63_spill] sm:$0xff] %v11621_v17 }
 0x21a   :  { %15590 = vst [vmem:[#allocation64_spill] sm:$0xff] %v11623_v15  ;;  %v3566_v29 = vmax.f32 %v2830_v52, 0.0  ;;  %v3567_v22 = vmax.f32 %v3231_v30, 0.0  ;;  %v9635_v15 = vunpack.c.h.bf16 %v10556_v24 }
 0x21b   :  { %8151 = vmatmul.msk.f32.gmra.mxu0 %vm293_vm1, %v9634_v16  ;;  %8280 = vmatmul.msk.f32.gmra.mxu1 %vm293_vm1, %v9634_v16 }
 0x21c   :  { %v3775_v23 = vadd.f32 %v3774_v41, %v3566_v29  ;;  %v3908_v45 = vadd.f32 %v3907_v57, %v3567_v22  ;;  %8536 = vmatmul.msk.f32.gmra.mxu2 %vm293_vm1, %v9887_v56  ;;  %8665 = vmatmul.msk.f32.gmra.mxu3 %vm293_vm1, %v9887_v56  ;;  %v9890_v41 = vunpack.c.l.bf16 %v10620_v53 }
 0x21f   :  { %v2832_v60 = vpop.f32.mrf.mxu2  ;;  %v3233_v17 = vpop.f32.mrf.mxu3 }
 0x220   :  { %v2833_v55 = vadd.f32 %v2832_v60, %v10995_v10  ;;  %v3234_v52 = vadd.f32 %v3233_v17, %v10997_v11  ;;  %v11634_v30 = vpop.f32.mrf.mxu0  ;;  %v11636_v16 = vpop.f32.mrf.mxu1  ;;  %v10557_v17 = vld [vmem:[%s15524_s0 + $0x110] sm:$0xff]  }
 0x221   :  { %15591 = vst [vmem:[#allocation65_spill] sm:$0xff] %v11634_v30 }
 0x222   :  { %15592 = vst [vmem:[#allocation66_spill] sm:$0xff] %v11636_v16  ;;  %v3568_v57 = vmax.f32 %v2833_v55, 0.0  ;;  %v3569_v29 = vmax.f32 %v3234_v52, 0.0  ;;  %v9638_v16 = vunpack.c.l.bf16 %v10557_v17 }
 0x223   :  { %8152 = vmatmul.msk.f32.gmra.mxu0 %vm293_vm1, %v9635_v15  ;;  %8281 = vmatmul.msk.f32.gmra.mxu1 %vm293_vm1, %v9635_v15 }
 0x224   :  { %v3776_v56 = vadd.f32 %v3775_v23, %v3568_v57  ;;  %v3909_v22 = vadd.f32 %v3908_v45, %v3569_v29  ;;  %8537 = vmatmul.msk.f32.gmra.mxu2 %vm293_vm1, %v9890_v41  ;;  %8666 = vmatmul.msk.f32.gmra.mxu3 %vm293_vm1, %v9890_v41  ;;  %v9891_v23 = vunpack.c.h.bf16 %v10620_v53 }
 0x227   :  { %v2835_v24 = vpop.f32.mrf.mxu2  ;;  %v3236_v60 = vpop.f32.mrf.mxu3 }
 0x228   :  { %v2836_v55 = vadd.f32 %v2835_v24, %v10995_v10  ;;  %v3237_v52 = vadd.f32 %v3236_v60, %v10997_v11  ;;  %v11647_v30 = vpop.f32.mrf.mxu0  ;;  %v11649_v15 = vpop.f32.mrf.mxu1  ;;  %v10621_v24 = vld [vmem:[%s15524_s0 + $0x310] sm:$0xff]  }
 0x229   :  { %15593 = vst [vmem:[#allocation67_spill] sm:$0xff] %v11647_v30 }
 0x22a   :  { %15594 = vst [vmem:[#allocation68_spill] sm:$0xff] %v11649_v15  ;;  %v3570_v45 = vmax.f32 %v2836_v55, 0.0  ;;  %v3571_v57 = vmax.f32 %v3237_v52, 0.0  ;;  %v9639_v15 = vunpack.c.h.bf16 %v10557_v17 }
 0x22b   :  { %8153 = vmatmul.msk.f32.gmra.mxu0 %vm293_vm1, %v9638_v16  ;;  %8282 = vmatmul.msk.f32.gmra.mxu1 %vm293_vm1, %v9638_v16 }
 0x22c   :  { %v3777_v41 = vadd.f32 %v3776_v56, %v3570_v45  ;;  %v3910_v29 = vadd.f32 %v3909_v22, %v3571_v57  ;;  %8538 = vmatmul.msk.f32.gmra.mxu2 %vm293_vm1, %v9891_v23  ;;  %8667 = vmatmul.msk.f32.gmra.mxu3 %vm293_vm1, %v9891_v23  ;;  %v9894_v56 = vunpack.c.l.bf16 %v10621_v24 }
 0x22f   :  { %v2838_v60 = vpop.f32.mrf.mxu2  ;;  %v3239_v30 = vpop.f32.mrf.mxu3 }
 0x230   :  { %v2839_v53 = vadd.f32 %v2838_v60, %v10995_v10  ;;  %v3240_v55 = vadd.f32 %v3239_v30, %v10997_v11  ;;  %v11660_v52 = vpop.f32.mrf.mxu0  ;;  %v11662_v16 = vpop.f32.mrf.mxu1  ;;  %v10558_v30 = vld [vmem:[%s15524_s0 + $0x118] sm:$0xff]  }
 0x231   :  { %15595 = vst [vmem:[#allocation69_spill] sm:$0xff] %v11660_v52 }
 0x232   :  { %15596 = vst [vmem:[#allocation70_spill] sm:$0xff] %v11662_v16  ;;  %v3572_v22 = vmax.f32 %v2839_v53, 0.0  ;;  %v3573_v45 = vmax.f32 %v3240_v55, 0.0  ;;  %v9642_v16 = vunpack.c.l.bf16 %v10558_v30 }
 0x233   :  { %8154 = vmatmul.msk.f32.gmra.mxu0 %vm293_vm1, %v9639_v15  ;;  %8283 = vmatmul.msk.f32.gmra.mxu1 %vm293_vm1, %v9639_v15 }
 0x234   :  { %v3778_v23 = vadd.f32 %v3777_v41, %v3572_v22  ;;  %v3911_v57 = vadd.f32 %v3910_v29, %v3573_v45  ;;  %8539 = vmatmul.msk.f32.gmra.mxu2 %vm293_vm1, %v9894_v56  ;;  %8668 = vmatmul.msk.f32.gmra.mxu3 %vm293_vm1, %v9894_v56  ;;  %v9895_v41 = vunpack.c.h.bf16 %v10621_v24 }
 0x237   :  { %v2841_v17 = vpop.f32.mrf.mxu2  ;;  %v3242_v60 = vpop.f32.mrf.mxu3 }
 0x238   :  { %v2842_v53 = vadd.f32 %v2841_v17, %v10995_v10  ;;  %v3243_v55 = vadd.f32 %v3242_v60, %v10997_v11  ;;  %v11673_v52 = vpop.f32.mrf.mxu0  ;;  %v11675_v15 = vpop.f32.mrf.mxu1  ;;  %v10622_v17 = vld [vmem:[%s15524_s0 + $0x318] sm:$0xff]  }
 0x239   :  { %15597 = vst [vmem:[#allocation71_spill] sm:$0xff] %v11673_v52 }
 0x23a   :  { %15598 = vst [vmem:[#allocation72_spill] sm:$0xff] %v11675_v15  ;;  %v3574_v29 = vmax.f32 %v2842_v53, 0.0  ;;  %v3575_v22 = vmax.f32 %v3243_v55, 0.0  ;;  %v9643_v15 = vunpack.c.h.bf16 %v10558_v30 }
 0x23b   :  { %8155 = vmatmul.msk.f32.gmra.mxu0 %vm293_vm1, %v9642_v16  ;;  %8284 = vmatmul.msk.f32.gmra.mxu1 %vm293_vm1, %v9642_v16 }
 0x23c   :  { %v3779_v56 = vadd.f32 %v3778_v23, %v3574_v29  ;;  %v3912_v45 = vadd.f32 %v3911_v57, %v3575_v22  ;;  %8540 = vmatmul.msk.f32.gmra.mxu2 %vm293_vm1, %v9895_v41  ;;  %8669 = vmatmul.msk.f32.gmra.mxu3 %vm293_vm1, %v9895_v41  ;;  %v9898_v23 = vunpack.c.l.bf16 %v10622_v17 }
 0x23f   :  { %v2844_v60 = vpop.f32.mrf.mxu2  ;;  %v3245_v52 = vpop.f32.mrf.mxu3 }
 0x240   :  { %v2845_v24 = vadd.f32 %v2844_v60, %v10995_v10  ;;  %v3246_v53 = vadd.f32 %v3245_v52, %v10997_v11  ;;  %v11686_v55 = vpop.f32.mrf.mxu0  ;;  %v11688_v16 = vpop.f32.mrf.mxu1  ;;  %v10559_v52 = vld [vmem:[%s15524_s0 + $0x120] sm:$0xff]  }
 0x241   :  { %15599 = vst [vmem:[#allocation73_spill] sm:$0xff] %v11686_v55 }
 0x242   :  { %15600 = vst [vmem:[#allocation74_spill] sm:$0xff] %v11688_v16  ;;  %v3576_v57 = vmax.f32 %v2845_v24, 0.0  ;;  %v3577_v29 = vmax.f32 %v3246_v53, 0.0  ;;  %v9646_v16 = vunpack.c.l.bf16 %v10559_v52 }
 0x243   :  { %8156 = vmatmul.msk.f32.gmra.mxu0 %vm293_vm1, %v9643_v15  ;;  %8285 = vmatmul.msk.f32.gmra.mxu1 %vm293_vm1, %v9643_v15 }
 0x244   :  { %v3780_v41 = vadd.f32 %v3779_v56, %v3576_v57  ;;  %v3913_v22 = vadd.f32 %v3912_v45, %v3577_v29  ;;  %8541 = vmatmul.msk.f32.gmra.mxu2 %vm293_vm1, %v9898_v23  ;;  %8670 = vmatmul.msk.f32.gmra.mxu3 %vm293_vm1, %v9898_v23  ;;  %v9899_v56 = vunpack.c.h.bf16 %v10622_v17 }
 0x247   :  { %v2847_v30 = vpop.f32.mrf.mxu2  ;;  %v3248_v60 = vpop.f32.mrf.mxu3 }
 0x248   :  { %v2848_v24 = vadd.f32 %v2847_v30, %v10995_v10  ;;  %v3249_v53 = vadd.f32 %v3248_v60, %v10997_v11  ;;  %v11699_v55 = vpop.f32.mrf.mxu0  ;;  %v11701_v15 = vpop.f32.mrf.mxu1  ;;  %v10623_v30 = vld [vmem:[%s15524_s0 + $0x320] sm:$0xff]  }
 0x249   :  { %15601 = vst [vmem:[#allocation75_spill] sm:$0xff] %v11699_v55 }
 0x24a   :  { %15602 = vst [vmem:[#allocation76_spill] sm:$0xff] %v11701_v15  ;;  %v3578_v45 = vmax.f32 %v2848_v24, 0.0  ;;  %v3579_v57 = vmax.f32 %v3249_v53, 0.0  ;;  %v9647_v15 = vunpack.c.h.bf16 %v10559_v52 }
 0x24b   :  { %8157 = vmatmul.msk.f32.gmra.mxu0 %vm293_vm1, %v9646_v16  ;;  %8286 = vmatmul.msk.f32.gmra.mxu1 %vm293_vm1, %v9646_v16 }
 0x24c   :  { %v3781_v23 = vadd.f32 %v3780_v41, %v3578_v45  ;;  %v3914_v29 = vadd.f32 %v3913_v22, %v3579_v57  ;;  %8542 = vmatmul.msk.f32.gmra.mxu2 %vm293_vm1, %v9899_v56  ;;  %8671 = vmatmul.msk.f32.gmra.mxu3 %vm293_vm1, %v9899_v56  ;;  %v9902_v41 = vunpack.c.l.bf16 %v10623_v30 }
 0x24f   :  { %v2850_v60 = vpop.f32.mrf.mxu2  ;;  %v3251_v55 = vpop.f32.mrf.mxu3 }
 0x250   :  { %v2851_v17 = vadd.f32 %v2850_v60, %v10995_v10  ;;  %v3252_v24 = vadd.f32 %v3251_v55, %v10997_v11  ;;  %v11712_v53 = vpop.f32.mrf.mxu0  ;;  %v11714_v16 = vpop.f32.mrf.mxu1  ;;  %v10560_v55 = vld [vmem:[%s15524_s0 + $0x128] sm:$0xff]  }
 0x251   :  { %15603 = vst [vmem:[#allocation77_spill] sm:$0xff] %v11712_v53 }
 0x252   :  { %15604 = vst [vmem:[#allocation78_spill] sm:$0xff] %v11714_v16  ;;  %v3580_v22 = vmax.f32 %v2851_v17, 0.0  ;;  %v3581_v45 = vmax.f32 %v3252_v24, 0.0  ;;  %v9650_v16 = vunpack.c.l.bf16 %v10560_v55 }
 0x253   :  { %8158 = vmatmul.msk.f32.gmra.mxu0 %vm293_vm1, %v9647_v15  ;;  %8287 = vmatmul.msk.f32.gmra.mxu1 %vm293_vm1, %v9647_v15 }
 0x254   :  { %v3782_v56 = vadd.f32 %v3781_v23, %v3580_v22  ;;  %v3915_v57 = vadd.f32 %v3914_v29, %v3581_v45  ;;  %8543 = vmatmul.msk.f32.gmra.mxu2 %vm293_vm1, %v9902_v41  ;;  %8672 = vmatmul.msk.f32.gmra.mxu3 %vm293_vm1, %v9902_v41  ;;  %v9903_v23 = vunpack.c.h.bf16 %v10623_v30 }
 0x257   :  { %v2853_v52 = vpop.f32.mrf.mxu2  ;;  %v3254_v60 = vpop.f32.mrf.mxu3 }
 0x258   :  { %v2854_v17 = vadd.f32 %v2853_v52, %v10995_v10  ;;  %v3255_v24 = vadd.f32 %v3254_v60, %v10997_v11  ;;  %v11725_v53 = vpop.f32.mrf.mxu0  ;;  %v11727_v15 = vpop.f32.mrf.mxu1  ;;  %v10624_v52 = vld [vmem:[%s15524_s0 + $0x328] sm:$0xff]  }
 0x259   :  { %15605 = vst [vmem:[#allocation79_spill] sm:$0xff] %v11725_v53 }
 0x25a   :  { %15606 = vst [vmem:[#allocation80_spill] sm:$0xff] %v11727_v15  ;;  %v3582_v29 = vmax.f32 %v2854_v17, 0.0  ;;  %v3583_v22 = vmax.f32 %v3255_v24, 0.0  ;;  %v9651_v15 = vunpack.c.h.bf16 %v10560_v55 }
 0x25b   :  { %8159 = vmatmul.msk.f32.gmra.mxu0 %vm293_vm1, %v9650_v16  ;;  %8288 = vmatmul.msk.f32.gmra.mxu1 %vm293_vm1, %v9650_v16 }
 0x25c   :  { %v3783_v41 = vadd.f32 %v3782_v56, %v3582_v29  ;;  %v3916_v45 = vadd.f32 %v3915_v57, %v3583_v22  ;;  %8544 = vmatmul.msk.f32.gmra.mxu2 %vm293_vm1, %v9903_v23  ;;  %8673 = vmatmul.msk.f32.gmra.mxu3 %vm293_vm1, %v9903_v23  ;;  %v9906_v56 = vunpack.c.l.bf16 %v10624_v52 }
 0x25f   :  { %v2856_v60 = vpop.f32.mrf.mxu2  ;;  %v3257_v53 = vpop.f32.mrf.mxu3 }
 0x260   :  { %v2857_v30 = vadd.f32 %v2856_v60, %v10995_v10  ;;  %v3258_v17 = vadd.f32 %v3257_v53, %v10997_v11  ;;  %v11738_v24 = vpop.f32.mrf.mxu0  ;;  %v11740_v16 = vpop.f32.mrf.mxu1  ;;  %v10561_v53 = vld [vmem:[%s15524_s0 + $0x130] sm:$0xff]  }
 0x261   :  { %15607 = vst [vmem:[#allocation81_spill] sm:$0xff] %v11738_v24 }
 0x262   :  { %15608 = vst [vmem:[#allocation82_spill] sm:$0xff] %v11740_v16  ;;  %v3584_v57 = vmax.f32 %v2857_v30, 0.0  ;;  %v3585_v29 = vmax.f32 %v3258_v17, 0.0  ;;  %v9654_v16 = vunpack.c.l.bf16 %v10561_v53 }
 0x263   :  { %8160 = vmatmul.msk.f32.gmra.mxu0 %vm293_vm1, %v9651_v15  ;;  %8289 = vmatmul.msk.f32.gmra.mxu1 %vm293_vm1, %v9651_v15 }
 0x264   :  { %v3784_v23 = vadd.f32 %v3783_v41, %v3584_v57  ;;  %v3917_v22 = vadd.f32 %v3916_v45, %v3585_v29  ;;  %8545 = vmatmul.msk.f32.gmra.mxu2 %vm293_vm1, %v9906_v56  ;;  %8674 = vmatmul.msk.f32.gmra.mxu3 %vm293_vm1, %v9906_v56  ;;  %v9907_v41 = vunpack.c.h.bf16 %v10624_v52 }
 0x267   :  { %v2859_v55 = vpop.f32.mrf.mxu2  ;;  %v3260_v60 = vpop.f32.mrf.mxu3 }
 0x268   :  { %v2860_v30 = vadd.f32 %v2859_v55, %v10995_v10  ;;  %v3261_v17 = vadd.f32 %v3260_v60, %v10997_v11  ;;  %v11751_v24 = vpop.f32.mrf.mxu0  ;;  %v11753_v15 = vpop.f32.mrf.mxu1  ;;  %v10625_v55 = vld [vmem:[%s15524_s0 + $0x330] sm:$0xff]  }
 0x269   :  { %15609 = vst [vmem:[#allocation83_spill] sm:$0xff] %v11751_v24 }
 0x26a   :  { %15610 = vst [vmem:[#allocation84_spill] sm:$0xff] %v11753_v15  ;;  %v3586_v45 = vmax.f32 %v2860_v30, 0.0  ;;  %v3587_v57 = vmax.f32 %v3261_v17, 0.0  ;;  %v9655_v15 = vunpack.c.h.bf16 %v10561_v53 }
 0x26b   :  { %8161 = vmatmul.msk.f32.gmra.mxu0 %vm293_vm1, %v9654_v16  ;;  %8290 = vmatmul.msk.f32.gmra.mxu1 %vm293_vm1, %v9654_v16 }
 0x26c   :  { %v3785_v56 = vadd.f32 %v3784_v23, %v3586_v45  ;;  %v3918_v29 = vadd.f32 %v3917_v22, %v3587_v57  ;;  %8546 = vmatmul.msk.f32.gmra.mxu2 %vm293_vm1, %v9907_v41  ;;  %8675 = vmatmul.msk.f32.gmra.mxu3 %vm293_vm1, %v9907_v41  ;;  %v9910_v23 = vunpack.c.l.bf16 %v10625_v55 }
 0x26f   :  { %v2862_v60 = vpop.f32.mrf.mxu2  ;;  %v3263_v24 = vpop.f32.mrf.mxu3 }
 0x270   :  { %v2863_v52 = vadd.f32 %v2862_v60, %v10995_v10  ;;  %v3264_v30 = vadd.f32 %v3263_v24, %v10997_v11  ;;  %v11764_v17 = vpop.f32.mrf.mxu0  ;;  %v11766_v16 = vpop.f32.mrf.mxu1  ;;  %v10562_v24 = vld [vmem:[%s15524_s0 + $0x138] sm:$0xff]  }
 0x271   :  { %15611 = vst [vmem:[#allocation85_spill] sm:$0xff] %v11764_v17 }
 0x272   :  { %15612 = vst [vmem:[#allocation86_spill] sm:$0xff] %v11766_v16  ;;  %v3588_v22 = vmax.f32 %v2863_v52, 0.0  ;;  %v3589_v45 = vmax.f32 %v3264_v30, 0.0  ;;  %v9658_v16 = vunpack.c.l.bf16 %v10562_v24 }
 0x273   :  { %8162 = vmatmul.msk.f32.gmra.mxu0 %vm293_vm1, %v9655_v15  ;;  %8291 = vmatmul.msk.f32.gmra.mxu1 %vm293_vm1, %v9655_v15 }
 0x274   :  { %v3786_v41 = vadd.f32 %v3785_v56, %v3588_v22  ;;  %v3919_v57 = vadd.f32 %v3918_v29, %v3589_v45  ;;  %8547 = vmatmul.msk.f32.gmra.mxu2 %vm293_vm1, %v9910_v23  ;;  %8676 = vmatmul.msk.f32.gmra.mxu3 %vm293_vm1, %v9910_v23  ;;  %v9911_v56 = vunpack.c.h.bf16 %v10625_v55 }
 0x277   :  { %v2865_v53 = vpop.f32.mrf.mxu2  ;;  %v3266_v60 = vpop.f32.mrf.mxu3 }
 0x278   :  { %v2866_v52 = vadd.f32 %v2865_v53, %v10995_v10  ;;  %v3267_v30 = vadd.f32 %v3266_v60, %v10997_v11  ;;  %v11777_v17 = vpop.f32.mrf.mxu0  ;;  %v11779_v15 = vpop.f32.mrf.mxu1  ;;  %v10626_v53 = vld [vmem:[%s15524_s0 + $0x338] sm:$0xff]  }
 0x279   :  { %15613 = vst [vmem:[#allocation87_spill] sm:$0xff] %v11777_v17 }
 0x27a   :  { %15614 = vst [vmem:[#allocation88_spill] sm:$0xff] %v11779_v15  ;;  %v3590_v29 = vmax.f32 %v2866_v52, 0.0  ;;  %v3591_v22 = vmax.f32 %v3267_v30, 0.0  ;;  %v9659_v15 = vunpack.c.h.bf16 %v10562_v24 }
 0x27b   :  { %8163 = vmatmul.msk.f32.gmra.mxu0 %vm293_vm1, %v9658_v16  ;;  %8292 = vmatmul.msk.f32.gmra.mxu1 %vm293_vm1, %v9658_v16 }
 0x27c   :  { %v3787_v23 = vadd.f32 %v3786_v41, %v3590_v29  ;;  %v3920_v45 = vadd.f32 %v3919_v57, %v3591_v22  ;;  %8548 = vmatmul.msk.f32.gmra.mxu2 %vm293_vm1, %v9911_v56  ;;  %8677 = vmatmul.msk.f32.gmra.mxu3 %vm293_vm1, %v9911_v56  ;;  %v9914_v41 = vunpack.c.l.bf16 %v10626_v53 }
 0x27f   :  { %v2868_v60 = vpop.f32.mrf.mxu2  ;;  %v3269_v17 = vpop.f32.mrf.mxu3 }
 0x280   :  { %v2869_v55 = vadd.f32 %v2868_v60, %v10995_v10  ;;  %v3270_v52 = vadd.f32 %v3269_v17, %v10997_v11  ;;  %v11790_v30 = vpop.f32.mrf.mxu0  ;;  %v11792_v16 = vpop.f32.mrf.mxu1  ;;  %v10563_v17 = vld [vmem:[%s15524_s0 + $0x140] sm:$0xff]  }
 0x281   :  { %15615 = vst [vmem:[#allocation89_spill] sm:$0xff] %v11790_v30 }
 0x282   :  { %15616 = vst [vmem:[#allocation90_spill] sm:$0xff] %v11792_v16  ;;  %v3592_v57 = vmax.f32 %v2869_v55, 0.0  ;;  %v3593_v29 = vmax.f32 %v3270_v52, 0.0  ;;  %v9662_v16 = vunpack.c.l.bf16 %v10563_v17 }
 0x283   :  { %8164 = vmatmul.msk.f32.gmra.mxu0 %vm293_vm1, %v9659_v15  ;;  %8293 = vmatmul.msk.f32.gmra.mxu1 %vm293_vm1, %v9659_v15 }
 0x284   :  { %v3788_v56 = vadd.f32 %v3787_v23, %v3592_v57  ;;  %v3921_v22 = vadd.f32 %v3920_v45, %v3593_v29  ;;  %8549 = vmatmul.msk.f32.gmra.mxu2 %vm293_vm1, %v9914_v41  ;;  %8678 = vmatmul.msk.f32.gmra.mxu3 %vm293_vm1, %v9914_v41  ;;  %v9915_v23 = vunpack.c.h.bf16 %v10626_v53 }
 0x287   :  { %v2871_v24 = vpop.f32.mrf.mxu2  ;;  %v3272_v60 = vpop.f32.mrf.mxu3 }
 0x288   :  { %v2872_v55 = vadd.f32 %v2871_v24, %v10995_v10  ;;  %v3273_v52 = vadd.f32 %v3272_v60, %v10997_v11  ;;  %v11803_v30 = vpop.f32.mrf.mxu0  ;;  %v11805_v15 = vpop.f32.mrf.mxu1  ;;  %v10627_v24 = vld [vmem:[%s15524_s0 + $0x340] sm:$0xff]  }
 0x289   :  { %15617 = vst [vmem:[#allocation91_spill] sm:$0xff] %v11803_v30 }
 0x28a   :  { %15618 = vst [vmem:[#allocation92_spill] sm:$0xff] %v11805_v15  ;;  %v3594_v45 = vmax.f32 %v2872_v55, 0.0  ;;  %v3595_v57 = vmax.f32 %v3273_v52, 0.0  ;;  %v9663_v15 = vunpack.c.h.bf16 %v10563_v17 }
 0x28b   :  { %8165 = vmatmul.msk.f32.gmra.mxu0 %vm293_vm1, %v9662_v16  ;;  %8294 = vmatmul.msk.f32.gmra.mxu1 %vm293_vm1, %v9662_v16 }
 0x28c   :  { %v3789_v41 = vadd.f32 %v3788_v56, %v3594_v45  ;;  %v3922_v29 = vadd.f32 %v3921_v22, %v3595_v57  ;;  %8550 = vmatmul.msk.f32.gmra.mxu2 %vm293_vm1, %v9915_v23  ;;  %8679 = vmatmul.msk.f32.gmra.mxu3 %vm293_vm1, %v9915_v23  ;;  %v9918_v56 = vunpack.c.l.bf16 %v10627_v24 }
 0x28f   :  { %v2874_v60 = vpop.f32.mrf.mxu2  ;;  %v3275_v30 = vpop.f32.mrf.mxu3 }
 0x290   :  { %v2875_v53 = vadd.f32 %v2874_v60, %v10995_v10  ;;  %v3276_v55 = vadd.f32 %v3275_v30, %v10997_v11  ;;  %v11816_v52 = vpop.f32.mrf.mxu0  ;;  %v11818_v16 = vpop.f32.mrf.mxu1  ;;  %v10564_v30 = vld [vmem:[%s15524_s0 + $0x148] sm:$0xff]  }
 0x291   :  { %15619 = vst [vmem:[#allocation93_spill] sm:$0xff] %v11816_v52 }
 0x292   :  { %15620 = vst [vmem:[#allocation94_spill] sm:$0xff] %v11818_v16  ;;  %v3596_v22 = vmax.f32 %v2875_v53, 0.0  ;;  %v3597_v45 = vmax.f32 %v3276_v55, 0.0  ;;  %v9666_v16 = vunpack.c.l.bf16 %v10564_v30 }
 0x293   :  { %8166 = vmatmul.msk.f32.gmra.mxu0 %vm293_vm1, %v9663_v15  ;;  %8295 = vmatmul.msk.f32.gmra.mxu1 %vm293_vm1, %v9663_v15 }
 0x294   :  { %v3790_v23 = vadd.f32 %v3789_v41, %v3596_v22  ;;  %v3923_v57 = vadd.f32 %v3922_v29, %v3597_v45  ;;  %8551 = vmatmul.msk.f32.gmra.mxu2 %vm293_vm1, %v9918_v56  ;;  %8680 = vmatmul.msk.f32.gmra.mxu3 %vm293_vm1, %v9918_v56  ;;  %v9919_v41 = vunpack.c.h.bf16 %v10627_v24 }
 0x297   :  { %v2877_v17 = vpop.f32.mrf.mxu2  ;;  %v3278_v60 = vpop.f32.mrf.mxu3 }
 0x298   :  { %v2878_v53 = vadd.f32 %v2877_v17, %v10995_v10  ;;  %v3279_v55 = vadd.f32 %v3278_v60, %v10997_v11  ;;  %v11829_v52 = vpop.f32.mrf.mxu0  ;;  %v11831_v15 = vpop.f32.mrf.mxu1  ;;  %v10628_v17 = vld [vmem:[%s15524_s0 + $0x348] sm:$0xff]  }
 0x299   :  { %15621 = vst [vmem:[#allocation95_spill] sm:$0xff] %v11829_v52 }
 0x29a   :  { %15622 = vst [vmem:[#allocation96_spill] sm:$0xff] %v11831_v15  ;;  %v3598_v29 = vmax.f32 %v2878_v53, 0.0  ;;  %v3599_v22 = vmax.f32 %v3279_v55, 0.0  ;;  %v9667_v15 = vunpack.c.h.bf16 %v10564_v30 }
 0x29b   :  { %8167 = vmatmul.msk.f32.gmra.mxu0 %vm293_vm1, %v9666_v16  ;;  %8296 = vmatmul.msk.f32.gmra.mxu1 %vm293_vm1, %v9666_v16 }
 0x29c   :  { %v3791_v56 = vadd.f32 %v3790_v23, %v3598_v29  ;;  %v3924_v45 = vadd.f32 %v3923_v57, %v3599_v22  ;;  %8552 = vmatmul.msk.f32.gmra.mxu2 %vm293_vm1, %v9919_v41  ;;  %8681 = vmatmul.msk.f32.gmra.mxu3 %vm293_vm1, %v9919_v41  ;;  %v9922_v23 = vunpack.c.l.bf16 %v10628_v17 }
 0x29f   :  { %v2880_v60 = vpop.f32.mrf.mxu2  ;;  %v3281_v52 = vpop.f32.mrf.mxu3 }
 0x2a0   :  { %v2881_v24 = vadd.f32 %v2880_v60, %v10995_v10  ;;  %v3282_v53 = vadd.f32 %v3281_v52, %v10997_v11  ;;  %v11842_v55 = vpop.f32.mrf.mxu0  ;;  %v11844_v16 = vpop.f32.mrf.mxu1  ;;  %v10565_v52 = vld [vmem:[%s15524_s0 + $0x150] sm:$0xff]  }
 0x2a1   :  { %15623 = vst [vmem:[#allocation97_spill] sm:$0xff] %v11842_v55 }
 0x2a2   :  { %15624 = vst [vmem:[#allocation98_spill] sm:$0xff] %v11844_v16  ;;  %v3600_v57 = vmax.f32 %v2881_v24, 0.0  ;;  %v3601_v29 = vmax.f32 %v3282_v53, 0.0  ;;  %v9670_v16 = vunpack.c.l.bf16 %v10565_v52 }
 0x2a3   :  { %8168 = vmatmul.msk.f32.gmra.mxu0 %vm293_vm1, %v9667_v15  ;;  %8297 = vmatmul.msk.f32.gmra.mxu1 %vm293_vm1, %v9667_v15 }
 0x2a4   :  { %v3792_v41 = vadd.f32 %v3791_v56, %v3600_v57  ;;  %v3925_v22 = vadd.f32 %v3924_v45, %v3601_v29  ;;  %8553 = vmatmul.msk.f32.gmra.mxu2 %vm293_vm1, %v9922_v23  ;;  %8682 = vmatmul.msk.f32.gmra.mxu3 %vm293_vm1, %v9922_v23  ;;  %v9923_v56 = vunpack.c.h.bf16 %v10628_v17 }
 0x2a7   :  { %v2883_v30 = vpop.f32.mrf.mxu2  ;;  %v3284_v60 = vpop.f32.mrf.mxu3 }
 0x2a8   :  { %v2884_v24 = vadd.f32 %v2883_v30, %v10995_v10  ;;  %v3285_v53 = vadd.f32 %v3284_v60, %v10997_v11  ;;  %v11855_v55 = vpop.f32.mrf.mxu0  ;;  %v11857_v15 = vpop.f32.mrf.mxu1  ;;  %v10629_v30 = vld [vmem:[%s15524_s0 + $0x350] sm:$0xff]  }
 0x2a9   :  { %15625 = vst [vmem:[#allocation99_spill] sm:$0xff] %v11855_v55 }
 0x2aa   :  { %15626 = vst [vmem:[#allocation100_spill] sm:$0xff] %v11857_v15  ;;  %v3602_v45 = vmax.f32 %v2884_v24, 0.0  ;;  %v3603_v57 = vmax.f32 %v3285_v53, 0.0  ;;  %v9671_v15 = vunpack.c.h.bf16 %v10565_v52 }
 0x2ab   :  { %8169 = vmatmul.msk.f32.gmra.mxu0 %vm293_vm1, %v9670_v16  ;;  %8298 = vmatmul.msk.f32.gmra.mxu1 %vm293_vm1, %v9670_v16 }
 0x2ac   :  { %v3793_v23 = vadd.f32 %v3792_v41, %v3602_v45  ;;  %v3926_v29 = vadd.f32 %v3925_v22, %v3603_v57  ;;  %8554 = vmatmul.msk.f32.gmra.mxu2 %vm293_vm1, %v9923_v56  ;;  %8683 = vmatmul.msk.f32.gmra.mxu3 %vm293_vm1, %v9923_v56  ;;  %v9926_v41 = vunpack.c.l.bf16 %v10629_v30 }
 0x2af   :  { %v2886_v60 = vpop.f32.mrf.mxu2  ;;  %v3287_v55 = vpop.f32.mrf.mxu3 }
 0x2b0   :  { %v2887_v17 = vadd.f32 %v2886_v60, %v10995_v10  ;;  %v3288_v24 = vadd.f32 %v3287_v55, %v10997_v11  ;;  %v11868_v53 = vpop.f32.mrf.mxu0  ;;  %v11870_v16 = vpop.f32.mrf.mxu1  ;;  %v10566_v55 = vld [vmem:[%s15524_s0 + $0x158] sm:$0xff]  }
 0x2b1   :  { %15627 = vst [vmem:[#allocation101_spill] sm:$0xff] %v11868_v53 }
 0x2b2   :  { %15628 = vst [vmem:[#allocation102_spill] sm:$0xff] %v11870_v16  ;;  %v3604_v22 = vmax.f32 %v2887_v17, 0.0  ;;  %v3605_v45 = vmax.f32 %v3288_v24, 0.0  ;;  %v9674_v16 = vunpack.c.l.bf16 %v10566_v55 }
 0x2b3   :  { %8170 = vmatmul.msk.f32.gmra.mxu0 %vm293_vm1, %v9671_v15  ;;  %8299 = vmatmul.msk.f32.gmra.mxu1 %vm293_vm1, %v9671_v15 }
 0x2b4   :  { %v3794_v56 = vadd.f32 %v3793_v23, %v3604_v22  ;;  %v3927_v57 = vadd.f32 %v3926_v29, %v3605_v45  ;;  %8555 = vmatmul.msk.f32.gmra.mxu2 %vm293_vm1, %v9926_v41  ;;  %8684 = vmatmul.msk.f32.gmra.mxu3 %vm293_vm1, %v9926_v41  ;;  %v9927_v23 = vunpack.c.h.bf16 %v10629_v30 }
 0x2b7   :  { %v2889_v52 = vpop.f32.mrf.mxu2  ;;  %v3290_v60 = vpop.f32.mrf.mxu3 }
 0x2b8   :  { %v2890_v17 = vadd.f32 %v2889_v52, %v10995_v10  ;;  %v3291_v24 = vadd.f32 %v3290_v60, %v10997_v11  ;;  %v11881_v53 = vpop.f32.mrf.mxu0  ;;  %v11883_v15 = vpop.f32.mrf.mxu1  ;;  %v10630_v52 = vld [vmem:[%s15524_s0 + $0x358] sm:$0xff]  }
 0x2b9   :  { %15629 = vst [vmem:[#allocation103_spill] sm:$0xff] %v11881_v53 }
 0x2ba   :  { %15630 = vst [vmem:[#allocation104_spill] sm:$0xff] %v11883_v15  ;;  %v3606_v29 = vmax.f32 %v2890_v17, 0.0  ;;  %v3607_v22 = vmax.f32 %v3291_v24, 0.0  ;;  %v9675_v15 = vunpack.c.h.bf16 %v10566_v55 }
 0x2bb   :  { %8171 = vmatmul.msk.f32.gmra.mxu0 %vm293_vm1, %v9674_v16  ;;  %8300 = vmatmul.msk.f32.gmra.mxu1 %vm293_vm1, %v9674_v16 }
 0x2bc   :  { %v3795_v41 = vadd.f32 %v3794_v56, %v3606_v29  ;;  %v3928_v45 = vadd.f32 %v3927_v57, %v3607_v22  ;;  %8556 = vmatmul.msk.f32.gmra.mxu2 %vm293_vm1, %v9927_v23  ;;  %8685 = vmatmul.msk.f32.gmra.mxu3 %vm293_vm1, %v9927_v23  ;;  %v9930_v56 = vunpack.c.l.bf16 %v10630_v52 }
 0x2bf   :  { %v2892_v60 = vpop.f32.mrf.mxu2  ;;  %v3293_v53 = vpop.f32.mrf.mxu3 }
 0x2c0   :  { %v2893_v30 = vadd.f32 %v2892_v60, %v10995_v10  ;;  %v3294_v17 = vadd.f32 %v3293_v53, %v10997_v11  ;;  %v11894_v24 = vpop.f32.mrf.mxu0  ;;  %v11896_v16 = vpop.f32.mrf.mxu1  ;;  %v10567_v53 = vld [vmem:[%s15524_s0 + $0x160] sm:$0xff]  }
 0x2c1   :  { %15631 = vst [vmem:[#allocation105_spill] sm:$0xff] %v11894_v24 }
 0x2c2   :  { %15632 = vst [vmem:[#allocation106_spill] sm:$0xff] %v11896_v16  ;;  %v3608_v57 = vmax.f32 %v2893_v30, 0.0  ;;  %v3609_v29 = vmax.f32 %v3294_v17, 0.0  ;;  %v9678_v16 = vunpack.c.l.bf16 %v10567_v53 }
 0x2c3   :  { %8172 = vmatmul.msk.f32.gmra.mxu0 %vm293_vm1, %v9675_v15  ;;  %8301 = vmatmul.msk.f32.gmra.mxu1 %vm293_vm1, %v9675_v15 }
 0x2c4   :  { %v3796_v23 = vadd.f32 %v3795_v41, %v3608_v57  ;;  %v3929_v22 = vadd.f32 %v3928_v45, %v3609_v29  ;;  %8557 = vmatmul.msk.f32.gmra.mxu2 %vm293_vm1, %v9930_v56  ;;  %8686 = vmatmul.msk.f32.gmra.mxu3 %vm293_vm1, %v9930_v56  ;;  %v9931_v41 = vunpack.c.h.bf16 %v10630_v52 }
 0x2c7   :  { %v2895_v55 = vpop.f32.mrf.mxu2  ;;  %v3296_v60 = vpop.f32.mrf.mxu3 }
 0x2c8   :  { %v2896_v30 = vadd.f32 %v2895_v55, %v10995_v10  ;;  %v3297_v17 = vadd.f32 %v3296_v60, %v10997_v11  ;;  %v11907_v24 = vpop.f32.mrf.mxu0  ;;  %v11909_v15 = vpop.f32.mrf.mxu1  ;;  %v10631_v55 = vld [vmem:[%s15524_s0 + $0x360] sm:$0xff]  }
 0x2c9   :  { %15633 = vst [vmem:[#allocation107_spill] sm:$0xff] %v11907_v24 }
 0x2ca   :  { %15634 = vst [vmem:[#allocation108_spill] sm:$0xff] %v11909_v15  ;;  %v3610_v45 = vmax.f32 %v2896_v30, 0.0  ;;  %v3611_v57 = vmax.f32 %v3297_v17, 0.0  ;;  %v9679_v15 = vunpack.c.h.bf16 %v10567_v53 }
 0x2cb   :  { %8173 = vmatmul.msk.f32.gmra.mxu0 %vm293_vm1, %v9678_v16  ;;  %8302 = vmatmul.msk.f32.gmra.mxu1 %vm293_vm1, %v9678_v16 }
 0x2cc   :  { %v3797_v56 = vadd.f32 %v3796_v23, %v3610_v45  ;;  %v3930_v29 = vadd.f32 %v3929_v22, %v3611_v57  ;;  %8558 = vmatmul.msk.f32.gmra.mxu2 %vm293_vm1, %v9931_v41  ;;  %8687 = vmatmul.msk.f32.gmra.mxu3 %vm293_vm1, %v9931_v41  ;;  %v9934_v23 = vunpack.c.l.bf16 %v10631_v55 }
 0x2cf   :  { %v2898_v60 = vpop.f32.mrf.mxu2  ;;  %v3299_v24 = vpop.f32.mrf.mxu3 }
 0x2d0   :  { %v2899_v52 = vadd.f32 %v2898_v60, %v10995_v10  ;;  %v3300_v30 = vadd.f32 %v3299_v24, %v10997_v11  ;;  %v11920_v17 = vpop.f32.mrf.mxu0  ;;  %v11922_v16 = vpop.f32.mrf.mxu1  ;;  %v10568_v24 = vld [vmem:[%s15524_s0 + $0x168] sm:$0xff]  }
 0x2d1   :  { %15635 = vst [vmem:[#allocation109_spill] sm:$0xff] %v11920_v17 }
 0x2d2   :  { %15636 = vst [vmem:[#allocation110_spill] sm:$0xff] %v11922_v16  ;;  %v3612_v22 = vmax.f32 %v2899_v52, 0.0  ;;  %v3613_v45 = vmax.f32 %v3300_v30, 0.0  ;;  %v9682_v16 = vunpack.c.l.bf16 %v10568_v24 }
 0x2d3   :  { %8174 = vmatmul.msk.f32.gmra.mxu0 %vm293_vm1, %v9679_v15  ;;  %8303 = vmatmul.msk.f32.gmra.mxu1 %vm293_vm1, %v9679_v15 }
 0x2d4   :  { %v3798_v41 = vadd.f32 %v3797_v56, %v3612_v22  ;;  %v3931_v57 = vadd.f32 %v3930_v29, %v3613_v45  ;;  %8559 = vmatmul.msk.f32.gmra.mxu2 %vm293_vm1, %v9934_v23  ;;  %8688 = vmatmul.msk.f32.gmra.mxu3 %vm293_vm1, %v9934_v23  ;;  %v9935_v56 = vunpack.c.h.bf16 %v10631_v55 }
 0x2d7   :  { %v2901_v53 = vpop.f32.mrf.mxu2  ;;  %v3302_v60 = vpop.f32.mrf.mxu3 }
 0x2d8   :  { %v2902_v52 = vadd.f32 %v2901_v53, %v10995_v10  ;;  %v3303_v30 = vadd.f32 %v3302_v60, %v10997_v11  ;;  %v11933_v17 = vpop.f32.mrf.mxu0  ;;  %v11935_v15 = vpop.f32.mrf.mxu1  ;;  %v10632_v53 = vld [vmem:[%s15524_s0 + $0x368] sm:$0xff]  }
 0x2d9   :  { %15637 = vst [vmem:[#allocation111_spill] sm:$0xff] %v11933_v17 }
 0x2da   :  { %15638 = vst [vmem:[#allocation112_spill] sm:$0xff] %v11935_v15  ;;  %v3614_v29 = vmax.f32 %v2902_v52, 0.0  ;;  %v3615_v22 = vmax.f32 %v3303_v30, 0.0  ;;  %v9683_v15 = vunpack.c.h.bf16 %v10568_v24 }
 0x2db   :  { %8175 = vmatmul.msk.f32.gmra.mxu0 %vm293_vm1, %v9682_v16  ;;  %8304 = vmatmul.msk.f32.gmra.mxu1 %vm293_vm1, %v9682_v16 }
 0x2dc   :  { %v3799_v23 = vadd.f32 %v3798_v41, %v3614_v29  ;;  %v3932_v45 = vadd.f32 %v3931_v57, %v3615_v22  ;;  %8560 = vmatmul.msk.f32.gmra.mxu2 %vm293_vm1, %v9935_v56  ;;  %8689 = vmatmul.msk.f32.gmra.mxu3 %vm293_vm1, %v9935_v56  ;;  %v9938_v41 = vunpack.c.l.bf16 %v10632_v53 }
 0x2df   :  { %v2904_v60 = vpop.f32.mrf.mxu2  ;;  %v3305_v17 = vpop.f32.mrf.mxu3 }
 0x2e0   :  { %v2905_v55 = vadd.f32 %v2904_v60, %v10995_v10  ;;  %v3306_v52 = vadd.f32 %v3305_v17, %v10997_v11  ;;  %v11946_v30 = vpop.f32.mrf.mxu0  ;;  %v11948_v16 = vpop.f32.mrf.mxu1  ;;  %v10569_v17 = vld [vmem:[%s15524_s0 + $0x170] sm:$0xff]  }
 0x2e1   :  { %15639 = vst [vmem:[#allocation113_spill] sm:$0xff] %v11946_v30 }
 0x2e2   :  { %15640 = vst [vmem:[#allocation114_spill] sm:$0xff] %v11948_v16  ;;  %v3616_v57 = vmax.f32 %v2905_v55, 0.0  ;;  %v3617_v29 = vmax.f32 %v3306_v52, 0.0  ;;  %v9686_v16 = vunpack.c.l.bf16 %v10569_v17 }
 0x2e3   :  { %8176 = vmatmul.msk.f32.gmra.mxu0 %vm293_vm1, %v9683_v15  ;;  %8305 = vmatmul.msk.f32.gmra.mxu1 %vm293_vm1, %v9683_v15 }
 0x2e4   :  { %v3800_v56 = vadd.f32 %v3799_v23, %v3616_v57  ;;  %v3933_v22 = vadd.f32 %v3932_v45, %v3617_v29  ;;  %8561 = vmatmul.msk.f32.gmra.mxu2 %vm293_vm1, %v9938_v41  ;;  %8690 = vmatmul.msk.f32.gmra.mxu3 %vm293_vm1, %v9938_v41  ;;  %v9939_v23 = vunpack.c.h.bf16 %v10632_v53 }
 0x2e7   :  { %v2907_v24 = vpop.f32.mrf.mxu2  ;;  %v3308_v60 = vpop.f32.mrf.mxu3 }
 0x2e8   :  { %v2908_v55 = vadd.f32 %v2907_v24, %v10995_v10  ;;  %v3309_v52 = vadd.f32 %v3308_v60, %v10997_v11  ;;  %v11959_v30 = vpop.f32.mrf.mxu0  ;;  %v11961_v15 = vpop.f32.mrf.mxu1  ;;  %v10633_v24 = vld [vmem:[%s15524_s0 + $0x370] sm:$0xff]  }
 0x2e9   :  { %15641 = vst [vmem:[#allocation115_spill] sm:$0xff] %v11959_v30 }
 0x2ea   :  { %15642 = vst [vmem:[#allocation116_spill] sm:$0xff] %v11961_v15  ;;  %v3618_v45 = vmax.f32 %v2908_v55, 0.0  ;;  %v3619_v57 = vmax.f32 %v3309_v52, 0.0  ;;  %v9687_v15 = vunpack.c.h.bf16 %v10569_v17 }
 0x2eb   :  { %8177 = vmatmul.msk.f32.gmra.mxu0 %vm293_vm1, %v9686_v16  ;;  %8306 = vmatmul.msk.f32.gmra.mxu1 %vm293_vm1, %v9686_v16 }
 0x2ec   :  { %v3801_v41 = vadd.f32 %v3800_v56, %v3618_v45  ;;  %v3934_v29 = vadd.f32 %v3933_v22, %v3619_v57  ;;  %8562 = vmatmul.msk.f32.gmra.mxu2 %vm293_vm1, %v9939_v23  ;;  %8691 = vmatmul.msk.f32.gmra.mxu3 %vm293_vm1, %v9939_v23  ;;  %v9942_v56 = vunpack.c.l.bf16 %v10633_v24 }
 0x2ef   :  { %v2910_v60 = vpop.f32.mrf.mxu2  ;;  %v3311_v30 = vpop.f32.mrf.mxu3 }
 0x2f0   :  { %v2911_v53 = vadd.f32 %v2910_v60, %v10995_v10  ;;  %v3312_v55 = vadd.f32 %v3311_v30, %v10997_v11  ;;  %v11972_v52 = vpop.f32.mrf.mxu0  ;;  %v11974_v16 = vpop.f32.mrf.mxu1  ;;  %v10570_v30 = vld [vmem:[%s15524_s0 + $0x178] sm:$0xff]  }
 0x2f1   :  { %15643 = vst [vmem:[#allocation117_spill] sm:$0xff] %v11972_v52 }
 0x2f2   :  { %15644 = vst [vmem:[#allocation118_spill] sm:$0xff] %v11974_v16  ;;  %v3620_v22 = vmax.f32 %v2911_v53, 0.0  ;;  %v3621_v45 = vmax.f32 %v3312_v55, 0.0  ;;  %v9690_v16 = vunpack.c.l.bf16 %v10570_v30 }
 0x2f3   :  { %8178 = vmatmul.msk.f32.gmra.mxu0 %vm293_vm1, %v9687_v15  ;;  %8307 = vmatmul.msk.f32.gmra.mxu1 %vm293_vm1, %v9687_v15 }
 0x2f4   :  { %v3802_v23 = vadd.f32 %v3801_v41, %v3620_v22  ;;  %v3935_v57 = vadd.f32 %v3934_v29, %v3621_v45  ;;  %8563 = vmatmul.msk.f32.gmra.mxu2 %vm293_vm1, %v9942_v56  ;;  %8692 = vmatmul.msk.f32.gmra.mxu3 %vm293_vm1, %v9942_v56  ;;  %v9943_v41 = vunpack.c.h.bf16 %v10633_v24 }
 0x2f7   :  { %v2913_v17 = vpop.f32.mrf.mxu2  ;;  %v3314_v60 = vpop.f32.mrf.mxu3 }
 0x2f8   :  { %v2914_v53 = vadd.f32 %v2913_v17, %v10995_v10  ;;  %v3315_v55 = vadd.f32 %v3314_v60, %v10997_v11  ;;  %v11985_v52 = vpop.f32.mrf.mxu0  ;;  %v11987_v15 = vpop.f32.mrf.mxu1  ;;  %v10634_v17 = vld [vmem:[%s15524_s0 + $0x378] sm:$0xff]  }
 0x2f9   :  { %15645 = vst [vmem:[#allocation119_spill] sm:$0xff] %v11985_v52 }
 0x2fa   :  { %15646 = vst [vmem:[#allocation120_spill] sm:$0xff] %v11987_v15  ;;  %v3622_v29 = vmax.f32 %v2914_v53, 0.0  ;;  %v3623_v22 = vmax.f32 %v3315_v55, 0.0  ;;  %v9691_v15 = vunpack.c.h.bf16 %v10570_v30 }
 0x2fb   :  { %8179 = vmatmul.msk.f32.gmra.mxu0 %vm293_vm1, %v9690_v16  ;;  %8308 = vmatmul.msk.f32.gmra.mxu1 %vm293_vm1, %v9690_v16 }
 0x2fc   :  { %v3803_v56 = vadd.f32 %v3802_v23, %v3622_v29  ;;  %v3936_v45 = vadd.f32 %v3935_v57, %v3623_v22  ;;  %8564 = vmatmul.msk.f32.gmra.mxu2 %vm293_vm1, %v9943_v41  ;;  %8693 = vmatmul.msk.f32.gmra.mxu3 %vm293_vm1, %v9943_v41  ;;  %v9946_v23 = vunpack.c.l.bf16 %v10634_v17 }
 0x2ff   :  { %v2916_v60 = vpop.f32.mrf.mxu2  ;;  %v3317_v52 = vpop.f32.mrf.mxu3 }
 0x300   :  { %v2917_v24 = vadd.f32 %v2916_v60, %v10995_v10  ;;  %v3318_v53 = vadd.f32 %v3317_v52, %v10997_v11  ;;  %v11998_v55 = vpop.f32.mrf.mxu0  ;;  %v12000_v16 = vpop.f32.mrf.mxu1  ;;  %v10571_v52 = vld [vmem:[%s15524_s0 + $0x180] sm:$0xff]  }
 0x301   :  { %15647 = vst [vmem:[#allocation121_spill] sm:$0xff] %v11998_v55 }
 0x302   :  { %15648 = vst [vmem:[#allocation122_spill] sm:$0xff] %v12000_v16  ;;  %v3624_v57 = vmax.f32 %v2917_v24, 0.0  ;;  %v3625_v29 = vmax.f32 %v3318_v53, 0.0  ;;  %v9694_v16 = vunpack.c.l.bf16 %v10571_v52 }
 0x303   :  { %8180 = vmatmul.msk.f32.gmra.mxu0 %vm293_vm1, %v9691_v15  ;;  %8309 = vmatmul.msk.f32.gmra.mxu1 %vm293_vm1, %v9691_v15 }
 0x304   :  { %v3804_v41 = vadd.f32 %v3803_v56, %v3624_v57  ;;  %v3937_v22 = vadd.f32 %v3936_v45, %v3625_v29  ;;  %8565 = vmatmul.msk.f32.gmra.mxu2 %vm293_vm1, %v9946_v23  ;;  %8694 = vmatmul.msk.f32.gmra.mxu3 %vm293_vm1, %v9946_v23  ;;  %v9947_v56 = vunpack.c.h.bf16 %v10634_v17 }
 0x307   :  { %v2919_v30 = vpop.f32.mrf.mxu2  ;;  %v3320_v60 = vpop.f32.mrf.mxu3 }
 0x308   :  { %v2920_v24 = vadd.f32 %v2919_v30, %v10995_v10  ;;  %v3321_v53 = vadd.f32 %v3320_v60, %v10997_v11  ;;  %v12011_v55 = vpop.f32.mrf.mxu0  ;;  %v12013_v15 = vpop.f32.mrf.mxu1  ;;  %v10635_v30 = vld [vmem:[%s15524_s0 + $0x380] sm:$0xff]  }
 0x309   :  { %15649 = vst [vmem:[#allocation123_spill] sm:$0xff] %v12011_v55 }
 0x30a   :  { %15650 = vst [vmem:[#allocation124_spill] sm:$0xff] %v12013_v15  ;;  %v3626_v45 = vmax.f32 %v2920_v24, 0.0  ;;  %v3627_v57 = vmax.f32 %v3321_v53, 0.0  ;;  %v9695_v15 = vunpack.c.h.bf16 %v10571_v52 }
 0x30b   :  { %8181 = vmatmul.msk.f32.gmra.mxu0 %vm293_vm1, %v9694_v16  ;;  %8310 = vmatmul.msk.f32.gmra.mxu1 %vm293_vm1, %v9694_v16 }
 0x30c   :  { %v3805_v23 = vadd.f32 %v3804_v41, %v3626_v45  ;;  %v3938_v29 = vadd.f32 %v3937_v22, %v3627_v57  ;;  %8566 = vmatmul.msk.f32.gmra.mxu2 %vm293_vm1, %v9947_v56  ;;  %8695 = vmatmul.msk.f32.gmra.mxu3 %vm293_vm1, %v9947_v56  ;;  %v9950_v41 = vunpack.c.l.bf16 %v10635_v30 }
 0x30f   :  { %v2922_v60 = vpop.f32.mrf.mxu2  ;;  %v3323_v55 = vpop.f32.mrf.mxu3 }
 0x310   :  { %v2923_v17 = vadd.f32 %v2922_v60, %v10995_v10  ;;  %v3324_v24 = vadd.f32 %v3323_v55, %v10997_v11  ;;  %v12024_v53 = vpop.f32.mrf.mxu0  ;;  %v12026_v16 = vpop.f32.mrf.mxu1  ;;  %v10572_v55 = vld [vmem:[%s15524_s0 + $0x188] sm:$0xff]  }
 0x311   :  { %15651 = vst [vmem:[#allocation125_spill] sm:$0xff] %v12024_v53 }
 0x312   :  { %15652 = vst [vmem:[#allocation126_spill] sm:$0xff] %v12026_v16  ;;  %v3628_v22 = vmax.f32 %v2923_v17, 0.0  ;;  %v3629_v45 = vmax.f32 %v3324_v24, 0.0  ;;  %v9698_v16 = vunpack.c.l.bf16 %v10572_v55 }
 0x313   :  { %8182 = vmatmul.msk.f32.gmra.mxu0 %vm293_vm1, %v9695_v15  ;;  %8311 = vmatmul.msk.f32.gmra.mxu1 %vm293_vm1, %v9695_v15 }
 0x314   :  { %v3806_v56 = vadd.f32 %v3805_v23, %v3628_v22  ;;  %v3939_v57 = vadd.f32 %v3938_v29, %v3629_v45  ;;  %8567 = vmatmul.msk.f32.gmra.mxu2 %vm293_vm1, %v9950_v41  ;;  %8696 = vmatmul.msk.f32.gmra.mxu3 %vm293_vm1, %v9950_v41  ;;  %v9951_v23 = vunpack.c.h.bf16 %v10635_v30 }
 0x317   :  { %v2925_v52 = vpop.f32.mrf.mxu2  ;;  %v3326_v60 = vpop.f32.mrf.mxu3 }
 0x318   :  { %v2926_v17 = vadd.f32 %v2925_v52, %v10995_v10  ;;  %v3327_v24 = vadd.f32 %v3326_v60, %v10997_v11  ;;  %v12037_v53 = vpop.f32.mrf.mxu0  ;;  %v12039_v15 = vpop.f32.mrf.mxu1  ;;  %v10636_v52 = vld [vmem:[%s15524_s0 + $0x388] sm:$0xff]  }
 0x319   :  { %15653 = vst [vmem:[#allocation127_spill] sm:$0xff] %v12037_v53 }
 0x31a   :  { %15654 = vst [vmem:[#allocation128_spill] sm:$0xff] %v12039_v15  ;;  %v3630_v29 = vmax.f32 %v2926_v17, 0.0  ;;  %v3631_v22 = vmax.f32 %v3327_v24, 0.0  ;;  %v9699_v15 = vunpack.c.h.bf16 %v10572_v55 }
 0x31b   :  { %8183 = vmatmul.msk.f32.gmra.mxu0 %vm293_vm1, %v9698_v16  ;;  %8312 = vmatmul.msk.f32.gmra.mxu1 %vm293_vm1, %v9698_v16 }
 0x31c   :  { %v3807_v41 = vadd.f32 %v3806_v56, %v3630_v29  ;;  %v3940_v45 = vadd.f32 %v3939_v57, %v3631_v22  ;;  %8568 = vmatmul.msk.f32.gmra.mxu2 %vm293_vm1, %v9951_v23  ;;  %8697 = vmatmul.msk.f32.gmra.mxu3 %vm293_vm1, %v9951_v23  ;;  %v9954_v56 = vunpack.c.l.bf16 %v10636_v52 }
 0x31f   :  { %v2928_v60 = vpop.f32.mrf.mxu2  ;;  %v3329_v53 = vpop.f32.mrf.mxu3 }
 0x320   :  { %v2929_v30 = vadd.f32 %v2928_v60, %v10995_v10  ;;  %v3330_v17 = vadd.f32 %v3329_v53, %v10997_v11  ;;  %v12050_v24 = vpop.f32.mrf.mxu0  ;;  %v12052_v16 = vpop.f32.mrf.mxu1  ;;  %v10573_v53 = vld [vmem:[%s15524_s0 + $0x190] sm:$0xff]  }
 0x321   :  { %15655 = vst [vmem:[#allocation129_spill] sm:$0xff] %v12050_v24 }
 0x322   :  { %15656 = vst [vmem:[#allocation130_spill] sm:$0xff] %v12052_v16  ;;  %v3632_v57 = vmax.f32 %v2929_v30, 0.0  ;;  %v3633_v29 = vmax.f32 %v3330_v17, 0.0  ;;  %v9702_v16 = vunpack.c.l.bf16 %v10573_v53 }
 0x323   :  { %8184 = vmatmul.msk.f32.gmra.mxu0 %vm293_vm1, %v9699_v15  ;;  %8313 = vmatmul.msk.f32.gmra.mxu1 %vm293_vm1, %v9699_v15 }
 0x324   :  { %v3808_v23 = vadd.f32 %v3807_v41, %v3632_v57  ;;  %v3941_v22 = vadd.f32 %v3940_v45, %v3633_v29  ;;  %8569 = vmatmul.msk.f32.gmra.mxu2 %vm293_vm1, %v9954_v56  ;;  %8698 = vmatmul.msk.f32.gmra.mxu3 %vm293_vm1, %v9954_v56  ;;  %v9955_v41 = vunpack.c.h.bf16 %v10636_v52 }
 0x327   :  { %v2931_v55 = vpop.f32.mrf.mxu2  ;;  %v3332_v60 = vpop.f32.mrf.mxu3 }
 0x328   :  { %v2932_v30 = vadd.f32 %v2931_v55, %v10995_v10  ;;  %v3333_v17 = vadd.f32 %v3332_v60, %v10997_v11  ;;  %v12063_v24 = vpop.f32.mrf.mxu0  ;;  %v12065_v15 = vpop.f32.mrf.mxu1  ;;  %v10637_v55 = vld [vmem:[%s15524_s0 + $0x390] sm:$0xff]  }
 0x329   :  { %15657 = vst [vmem:[#allocation131_spill] sm:$0xff] %v12063_v24 }
 0x32a   :  { %15658 = vst [vmem:[#allocation132_spill] sm:$0xff] %v12065_v15  ;;  %v3634_v45 = vmax.f32 %v2932_v30, 0.0  ;;  %v3635_v57 = vmax.f32 %v3333_v17, 0.0  ;;  %v9703_v15 = vunpack.c.h.bf16 %v10573_v53 }
 0x32b   :  { %8185 = vmatmul.msk.f32.gmra.mxu0 %vm293_vm1, %v9702_v16  ;;  %8314 = vmatmul.msk.f32.gmra.mxu1 %vm293_vm1, %v9702_v16 }
 0x32c   :  { %v3809_v56 = vadd.f32 %v3808_v23, %v3634_v45  ;;  %v3942_v29 = vadd.f32 %v3941_v22, %v3635_v57  ;;  %8570 = vmatmul.msk.f32.gmra.mxu2 %vm293_vm1, %v9955_v41  ;;  %8699 = vmatmul.msk.f32.gmra.mxu3 %vm293_vm1, %v9955_v41  ;;  %v9958_v23 = vunpack.c.l.bf16 %v10637_v55 }
 0x32f   :  { %v2934_v60 = vpop.f32.mrf.mxu2  ;;  %v3335_v24 = vpop.f32.mrf.mxu3 }
 0x330   :  { %v2935_v52 = vadd.f32 %v2934_v60, %v10995_v10  ;;  %v3336_v30 = vadd.f32 %v3335_v24, %v10997_v11  ;;  %v12076_v17 = vpop.f32.mrf.mxu0  ;;  %v12078_v16 = vpop.f32.mrf.mxu1  ;;  %v10574_v24 = vld [vmem:[%s15524_s0 + $0x198] sm:$0xff]  }
 0x331   :  { %15659 = vst [vmem:[#allocation133_spill] sm:$0xff] %v12076_v17 }
 0x332   :  { %15660 = vst [vmem:[#allocation134_spill] sm:$0xff] %v12078_v16  ;;  %v3636_v22 = vmax.f32 %v2935_v52, 0.0  ;;  %v3637_v45 = vmax.f32 %v3336_v30, 0.0  ;;  %v9706_v16 = vunpack.c.l.bf16 %v10574_v24 }
 0x333   :  { %8186 = vmatmul.msk.f32.gmra.mxu0 %vm293_vm1, %v9703_v15  ;;  %8315 = vmatmul.msk.f32.gmra.mxu1 %vm293_vm1, %v9703_v15 }
 0x334   :  { %v3810_v41 = vadd.f32 %v3809_v56, %v3636_v22  ;;  %v3943_v57 = vadd.f32 %v3942_v29, %v3637_v45  ;;  %8571 = vmatmul.msk.f32.gmra.mxu2 %vm293_vm1, %v9958_v23  ;;  %8700 = vmatmul.msk.f32.gmra.mxu3 %vm293_vm1, %v9958_v23  ;;  %v9959_v56 = vunpack.c.h.bf16 %v10637_v55 }
 0x337   :  { %v2937_v53 = vpop.f32.mrf.mxu2  ;;  %v3338_v60 = vpop.f32.mrf.mxu3 }
 0x338   :  { %v2938_v52 = vadd.f32 %v2937_v53, %v10995_v10  ;;  %v3339_v30 = vadd.f32 %v3338_v60, %v10997_v11  ;;  %v12089_v17 = vpop.f32.mrf.mxu0  ;;  %v12091_v15 = vpop.f32.mrf.mxu1  ;;  %v10638_v53 = vld [vmem:[%s15524_s0 + $0x398] sm:$0xff]  }
 0x339   :  { %15661 = vst [vmem:[#allocation135_spill] sm:$0xff] %v12089_v17 }
 0x33a   :  { %15662 = vst [vmem:[#allocation136_spill] sm:$0xff] %v12091_v15  ;;  %v3638_v29 = vmax.f32 %v2938_v52, 0.0  ;;  %v3639_v22 = vmax.f32 %v3339_v30, 0.0  ;;  %v9707_v15 = vunpack.c.h.bf16 %v10574_v24 }
 0x33b   :  { %8187 = vmatmul.msk.f32.gmra.mxu0 %vm293_vm1, %v9706_v16  ;;  %8316 = vmatmul.msk.f32.gmra.mxu1 %vm293_vm1, %v9706_v16 }
 0x33c   :  { %v3811_v23 = vadd.f32 %v3810_v41, %v3638_v29  ;;  %v3944_v45 = vadd.f32 %v3943_v57, %v3639_v22  ;;  %8572 = vmatmul.msk.f32.gmra.mxu2 %vm293_vm1, %v9959_v56  ;;  %8701 = vmatmul.msk.f32.gmra.mxu3 %vm293_vm1, %v9959_v56  ;;  %v9962_v41 = vunpack.c.l.bf16 %v10638_v53 }
 0x33f   :  { %v2940_v60 = vpop.f32.mrf.mxu2  ;;  %v3341_v17 = vpop.f32.mrf.mxu3 }
 0x340   :  { %v2941_v55 = vadd.f32 %v2940_v60, %v10995_v10  ;;  %v3342_v52 = vadd.f32 %v3341_v17, %v10997_v11  ;;  %v12102_v30 = vpop.f32.mrf.mxu0  ;;  %v12104_v16 = vpop.f32.mrf.mxu1  ;;  %v10575_v17 = vld [vmem:[%s15524_s0 + $0x1a0] sm:$0xff]  }
 0x341   :  { %15663 = vst [vmem:[#allocation137_spill] sm:$0xff] %v12102_v30 }
 0x342   :  { %15664 = vst [vmem:[#allocation138_spill] sm:$0xff] %v12104_v16  ;;  %v3640_v57 = vmax.f32 %v2941_v55, 0.0  ;;  %v3641_v29 = vmax.f32 %v3342_v52, 0.0  ;;  %v9710_v16 = vunpack.c.l.bf16 %v10575_v17 }
 0x343   :  { %8188 = vmatmul.msk.f32.gmra.mxu0 %vm293_vm1, %v9707_v15  ;;  %8317 = vmatmul.msk.f32.gmra.mxu1 %vm293_vm1, %v9707_v15 }
 0x344   :  { %v3812_v56 = vadd.f32 %v3811_v23, %v3640_v57  ;;  %v3945_v22 = vadd.f32 %v3944_v45, %v3641_v29  ;;  %8573 = vmatmul.msk.f32.gmra.mxu2 %vm293_vm1, %v9962_v41  ;;  %8702 = vmatmul.msk.f32.gmra.mxu3 %vm293_vm1, %v9962_v41  ;;  %v9963_v23 = vunpack.c.h.bf16 %v10638_v53  ;;  %v10639_v53 = vld [vmem:[%s15524_s0 + $0x3a0] sm:$0xff]  }
 0x347   :  { %v2943_v24 = vpop.f32.mrf.mxu2  ;;  %v3344_v60 = vpop.f32.mrf.mxu3 }
 0x348   :  { %v2944_v55 = vadd.f32 %v2943_v24, %v10995_v10  ;;  %v3345_v52 = vadd.f32 %v3344_v60, %v10997_v11  ;;  %v12115_v30 = vpop.f32.mrf.mxu0  ;;  %v12117_v15 = vpop.f32.mrf.mxu1  ;;  %v701_v24 = vadd.f32 %v10966_v58, %v10995_v10  ;;  %v1102_v60 = vadd.f32 %v10968_v59, %v10997_v11 }
 0x349   :  { %15665 = vst [vmem:[#allocation139_spill] sm:$0xff] %v12115_v30 }
 0x34a   :  { %15666 = vst [vmem:[#allocation140_spill] sm:$0xff] %v12117_v15  ;;  %v3642_v45 = vmax.f32 %v2944_v55, 0.0  ;;  %v3643_v57 = vmax.f32 %v3345_v52, 0.0  ;;  %v704_v55 = vadd.f32 %v10977_v63, %v10995_v10  ;;  %v9711_v52 = vunpack.c.h.bf16 %v10575_v17 }
 0x34b   :  { %8189 = vmatmul.msk.f32.gmra.mxu0 %vm293_vm1, %v9710_v16  ;;  %8318 = vmatmul.msk.f32.gmra.mxu1 %vm293_vm1, %v9710_v16  ;;  %v1105_v16 = vadd.f32 %v10979_v0, %v10997_v11  ;;  %v1485_v15 = vmax.f32 %v701_v24, 0.0  ;;  %v1486_v30 = vmax.f32 %v1102_v60, 0.0  ;;  %v707_v0 = vadd.f32 %v10991_v7, %v10995_v10  ;;  %v12151_v24 = vld [vmem:[%s15524_s0 + $0x1a8] sm:$0xff]  }
 0x34c   :  { %v3813_v41 = vadd.f32 %v3812_v56, %v3642_v45  ;;  %v3946_v29 = vadd.f32 %v3945_v22, %v3643_v57  ;;  %8574 = vmatmul.msk.f32.gmra.mxu2 %vm293_vm1, %v9963_v23  ;;  %8703 = vmatmul.msk.f32.gmra.mxu3 %vm293_vm1, %v9963_v23  ;;  %v9966_v57 = vunpack.c.l.bf16 %v10639_v53  ;;  %v1487_v40 = vmax.f32 %v704_v55, 0.0 }
 0x34d   :  { %v1488_v31 = vmax.f32 %v1105_v16, 0.0  ;;  %v1108_v17 = vadd.f32 %v10993_v8, %v10997_v11  ;;  %v710_v7 = vadd.f32 %v11010_v20, %v10995_v10  ;;  %v1111_v55 = vadd.f32 %v11012_v21, %v10997_v11 }
 0x34e   :  { %v1742_v60 = vadd.f32 %v1487_v40, %v1485_v15  ;;  %v1489_v16 = vmax.f32 %v707_v0, 0.0  ;;  %v1114_v21 = vadd.f32 %v11025_v36, %v10997_v11 }
 0x34f   :  { %v2946_v56 = vpop.f32.mrf.mxu2  ;;  %v3347_v22 = vpop.f32.mrf.mxu3  ;;  %v1875_v8 = vadd.f32 %v1488_v31, %v1486_v30  ;;  %v9967_v31 = vunpack.c.h.bf16 %v10639_v53  ;;  %v1491_v40 = vmax.f32 %v710_v7, 0.0  ;;  %v1492_v30 = vmax.f32 %v1111_v55, 0.0 }
 0x350   :  { %v2947_v23 = vadd.f32 %v2946_v56, %v10995_v10  ;;  %v3348_v58 = vadd.f32 %v3347_v22, %v10997_v11  ;;  %v12136_v45 = vpop.f32.mrf.mxu0  ;;  %v12138_v59 = vpop.f32.mrf.mxu1  ;;  %v719_v53 = vadd.f32 %v11049_v1, %v10995_v10  ;;  %v722_v1 = vadd.f32 %v11062_v18, %v10995_v10 }
 0x351   :  { %15667 = vst [vmem:[#allocation141_spill] sm:$0xff] %v12138_v59 }
 0x352   :  { %v3644_v63 = vmax.f32 %v2947_v23, 0.0  ;;  %v3645_v54 = vmax.f32 %v3348_v58, 0.0  ;;  %v9714_v23 = vunpack.c.l.bf16 %v12151_v24 }
 0x353   :  { %8190 = vmatmul.msk.f32.gmra.mxu0 %vm293_vm1, %v9711_v52  ;;  %8319 = vmatmul.msk.f32.gmra.mxu1 %vm293_vm1, %v9711_v52 }
 0x354   :  { %v3814_v56 = vadd.f32 %v3813_v41, %v3644_v63  ;;  %v3947_v22 = vadd.f32 %v3946_v29, %v3645_v54  ;;  %8575 = vmatmul.msk.f32.gmra.mxu2 %vm293_vm1, %v9966_v57  ;;  %8704 = vmatmul.msk.f32.gmra.mxu3 %vm293_vm1, %v9966_v57  ;;  %v1490_v41 = vmax.f32 %v1108_v17, 0.0  ;;  %v713_v54 = vadd.f32 %v11023_v35, %v10995_v10 }
 0x355   :  { %v716_v35 = vadd.f32 %v11036_v48, %v10995_v10  ;;  %v1743_v17 = vadd.f32 %v1742_v60, %v1489_v16  ;;  %v1494_v60 = vmax.f32 %v1114_v21, 0.0 }
 0x356   :  { %v1876_v59 = vadd.f32 %v1875_v8, %v1490_v41  ;;  %v1120_v8 = vadd.f32 %v11051_v2, %v10997_v11  ;;  %v1123_v41 = vadd.f32 %v11064_v19, %v10997_v11  ;;  %v1497_v2 = vmax.f32 %v719_v53, 0.0 }
 0x357   :  { %v2949_v29 = vpop.f32.mrf.mxu2  ;;  %v3350_v52 = vpop.f32.mrf.mxu3  ;;  %v1744_v48 = vadd.f32 %v1743_v17, %v1491_v40  ;;  %v1495_v16 = vmax.f32 %v716_v35, 0.0  ;;  %v725_v19 = vadd.f32 %v11075_v33, %v10995_v10  ;;  %v1126_v35 = vadd.f32 %v11077_v34, %v10997_v11  ;;  %v12212_v34 = vld [vmem:[%s15524_s0 + $0x1b0] sm:$0xff]  }
 0x358   :  { %v2950_v58 = vadd.f32 %v2949_v29, %v10995_v10  ;;  %v3351_v57 = vadd.f32 %v3350_v52, %v10997_v11  ;;  %v12162_v63 = vpop.f32.mrf.mxu0  ;;  %v12164_v20 = vpop.f32.mrf.mxu1  ;;  %v1493_v29 = vmax.f32 %v713_v54, 0.0  ;;  %v1117_v52 = vadd.f32 %v11038_v49, %v10997_v11  ;;  %v12183_v49 = vld [vmem:[%s15524_s0 + $0x3a8] sm:$0xff]  }
 0x359   :  { %v1877_v55 = vadd.f32 %v1876_v59, %v1492_v30  ;;  %v9970_v18 = vunpack.c.l.bf16 %v12183_v49  ;;  %v1498_v30 = vmax.f32 %v1120_v8, 0.0  ;;  %v728_v53 = vadd.f32 %v11088_v50, %v10995_v10 }
 0x35a   :  { %v3646_v15 = vmax.f32 %v2950_v58, 0.0  ;;  %v3647_v0 = vmax.f32 %v3351_v57, 0.0  ;;  %v9715_v58 = vunpack.c.h.bf16 %v12151_v24 }
 0x35b   :  { %8191 = vmatmul.msk.f32.gmra.mxu0 %vm293_vm1, %v9714_v23  ;;  %8320 = vmatmul.msk.f32.gmra.mxu1 %vm293_vm1, %v9714_v23  ;;  %v1878_v21 = vadd.f32 %v1877_v55, %v1494_v60  ;;  %v1501_v55 = vmax.f32 %v725_v19, 0.0 }
 0x35c   :  { %v3815_v36 = vadd.f32 %v3814_v56, %v3646_v15  ;;  %v3948_v7 = vadd.f32 %v3947_v22, %v3647_v0  ;;  %8576 = vmatmul.msk.f32.gmra.mxu2 %vm293_vm1, %v9967_v31  ;;  %8705 = vmatmul.msk.f32.gmra.mxu3 %vm293_vm1, %v9967_v31  ;;  %v1745_v56 = vadd.f32 %v1744_v48, %v1493_v29  ;;  %v1496_v22 = vmax.f32 %v1117_v52, 0.0 }
 0x35d   :  { %v1499_v15 = vmax.f32 %v722_v1, 0.0  ;;  %v1500_v52 = vmax.f32 %v1123_v41, 0.0  ;;  %v1129_v48 = vadd.f32 %v11090_v51, %v10997_v11  ;;  %v731_v51 = vadd.f32 %v11101_v5, %v10995_v10 }
 0x35e   :  { %v1746_v24 = vadd.f32 %v1745_v56, %v1495_v16  ;;  %v1879_v29 = vadd.f32 %v1878_v21, %v1496_v22  ;;  %v1502_v16 = vmax.f32 %v1126_v35, 0.0  ;;  %v1503_v56 = vmax.f32 %v728_v53, 0.0 }
 0x35f   :  { %v2952_v54 = vpop.f32.mrf.mxu2  ;;  %v3353_v23 = vpop.f32.mrf.mxu3  ;;  %v1504_v22 = vmax.f32 %v1129_v48, 0.0  ;;  %v1135_v35 = vadd.f32 %v11116_v27, %v10997_v11  ;;  %v1138_v27 = vadd.f32 %v11129_v44, %v10997_v11  ;;  %v740_v53 = vadd.f32 %v11140_v62, %v10995_v10 }
 0x360   :  { %v2953_v57 = vadd.f32 %v2952_v54, %v10995_v10  ;;  %v3354_v31 = vadd.f32 %v3353_v23, %v10997_v11  ;;  %v12192_v40 = vpop.f32.mrf.mxu0  ;;  %v12194_v59 = vpop.f32.mrf.mxu1  ;;  %v1747_v33 = vadd.f32 %v1746_v24, %v1497_v2  ;;  %v1880_v50 = vadd.f32 %v1879_v29, %v1498_v30 }
 0x361   :  { %v9718_v23 = vunpack.c.l.bf16 %v12212_v34  ;;  %v1505_v30 = vmax.f32 %v731_v51, 0.0  ;;  %v9719_v51 = vunpack.c.h.bf16 %v12212_v34 }
 0x362   :  { %v3648_v0 = vmax.f32 %v2953_v57, 0.0  ;;  %v3649_v17 = vmax.f32 %v3354_v31, 0.0  ;;  %v1748_v1 = vadd.f32 %v1747_v33, %v1499_v15 }
 0x363   :  { %8192 = vmatmul.msk.f32.gmra.mxu0 %vm293_vm1, %v9715_v58  ;;  %8321 = vmatmul.msk.f32.gmra.mxu1 %vm293_vm1, %v9715_v58  ;;  %v734_v58 = vadd.f32 %v11114_v26, %v10995_v10 }
 0x364   :  { %v3816_v60 = vadd.f32 %v3815_v36, %v3648_v0  ;;  %v3949_v8 = vadd.f32 %v3948_v7, %v3649_v17  ;;  %8577 = vmatmul.msk.f32.gmra.mxu2 %vm293_vm1, %v9970_v18  ;;  %8706 = vmatmul.msk.f32.gmra.mxu3 %vm293_vm1, %v9970_v18  ;;  %v1132_v36 = vadd.f32 %v11103_v6, %v10997_v11  ;;  %v9971_v6 = vunpack.c.h.bf16 %v12183_v49 }
 0x365   :  { %v1881_v7 = vadd.f32 %v1880_v50, %v1500_v52  ;;  %v1749_v18 = vadd.f32 %v1748_v1, %v1501_v55  ;;  %v737_v0 = vadd.f32 %v11127_v43, %v10995_v10  ;;  %v1507_v29 = vmax.f32 %v734_v58, 0.0  ;;  %v12243_v43 = vld [vmem:[%s15524_s0 + $0x3b0] sm:$0xff]  }
 0x366   :  { %v1506_v19 = vmax.f32 %v1132_v36, 0.0  ;;  %v1508_v50 = vmax.f32 %v1135_v35, 0.0  ;;  %v743_v55 = vadd.f32 %v11153_v25, %v10995_v10  ;;  %v1144_v25 = vadd.f32 %v11155_v28, %v10997_v11 }
 0x367   :  { %v2955_v41 = vpop.f32.mrf.mxu2  ;;  %v3356_v54 = vpop.f32.mrf.mxu3  ;;  %v1882_v21 = vadd.f32 %v1881_v7, %v1502_v16  ;;  %v1750_v26 = vadd.f32 %v1749_v18, %v1503_v56  ;;  %v1147_v18 = vadd.f32 %v11168_v47, %v10997_v11 }
 0x368   :  { %v2956_v2 = vadd.f32 %v2955_v41, %v10995_v10  ;;  %v3357_v57 = vadd.f32 %v3356_v54, %v10997_v11  ;;  %v12223_v31 = vpop.f32.mrf.mxu0  ;;  %v12225_v5 = vpop.f32.mrf.mxu1  ;;  %v1510_v41 = vmax.f32 %v1138_v27, 0.0  ;;  %v746_v54 = vadd.f32 %v11166_v46, %v10995_v10  ;;  %v12272_v46 = vld [vmem:[%s15524_s0 + $0x1b8] sm:$0xff]  }
 0x369   :  { %v1883_v17 = vadd.f32 %v1882_v21, %v1504_v22  ;;  %v1751_v48 = vadd.f32 %v1750_v26, %v1505_v30  ;;  %v9974_v22 = vunpack.c.l.bf16 %v12243_v43  ;;  %v749_v21 = vadd.f32 %v11179_v13, %v10995_v10 }
 0x36a   :  { %v3650_v24 = vmax.f32 %v2956_v2, 0.0  ;;  %v3651_v15 = vmax.f32 %v3357_v57, 0.0  ;;  %v1514_v35 = vmax.f32 %v1144_v25, 0.0  ;;  %v752_v13 = vadd.f32 %v11192_v38, %v10995_v10 }
 0x36b   :  { %8193 = vmatmul.msk.f32.gmra.mxu0 %vm293_vm1, %v9718_v23  ;;  %8322 = vmatmul.msk.f32.gmra.mxu1 %vm293_vm1, %v9718_v23  ;;  %v1884_v33 = vadd.f32 %v1883_v17, %v1506_v19  ;;  %v1752_v62 = vadd.f32 %v1751_v48, %v1507_v29  ;;  %v1516_v17 = vmax.f32 %v1147_v18, 0.0  ;;  %v1517_v27 = vmax.f32 %v749_v21, 0.0 }
 0x36c   :  { %v3817_v49 = vadd.f32 %v3816_v60, %v3650_v24  ;;  %v3950_v52 = vadd.f32 %v3949_v8, %v3651_v15  ;;  %8578 = vmatmul.msk.f32.gmra.mxu2 %vm293_vm1, %v9971_v6  ;;  %8707 = vmatmul.msk.f32.gmra.mxu3 %vm293_vm1, %v9971_v6  ;;  %v1509_v60 = vmax.f32 %v737_v0, 0.0  ;;  %v1141_v8 = vadd.f32 %v11142_v3, %v10997_v11 }
 0x36d   :  { %v1511_v3 = vmax.f32 %v740_v53, 0.0  ;;  %v1885_v34 = vadd.f32 %v1884_v33, %v1508_v50  ;;  %v1513_v6 = vmax.f32 %v743_v55, 0.0  ;;  %v1515_v24 = vmax.f32 %v746_v54, 0.0 }
 0x36e   :  { %v1753_v2 = vadd.f32 %v1752_v62, %v1509_v60  ;;  %v1512_v57 = vmax.f32 %v1141_v8, 0.0  ;;  %v1150_v15 = vadd.f32 %v11181_v14, %v10997_v11  ;;  %v9975_v14 = vunpack.c.h.bf16 %v12243_v43 }
 0x36f   :  { %v2958_v16 = vpop.f32.mrf.mxu2  ;;  %v3359_v44 = vpop.f32.mrf.mxu3  ;;  %v1886_v19 = vadd.f32 %v1885_v34, %v1510_v41  ;;  %v1153_v8 = vadd.f32 %v11194_v39, %v10997_v11  ;;  %v755_v55 = vadd.f32 %v11205_v61, %v10995_v10  ;;  %v1159_v25 = vadd.f32 %v11220_v37, %v10997_v11 }
 0x370   :  { %v2959_v1 = vadd.f32 %v2958_v16, %v10995_v10  ;;  %v3360_v36 = vadd.f32 %v3359_v44, %v10997_v11  ;;  %v12252_v7 = vpop.f32.mrf.mxu0  ;;  %v12254_v56 = vpop.f32.mrf.mxu1  ;;  %v1754_v47 = vadd.f32 %v1753_v2, %v1511_v3  ;;  %v1518_v16 = vmax.f32 %v1150_v15, 0.0  ;;  %v15668_v15 = vld [vmem:[#allocation6_spill] sm:$0xff] }
 0x371   :  { %v1887_v26 = vadd.f32 %v1886_v19, %v1512_v57  ;;  %v1519_v44 = vmax.f32 %v752_v13, 0.0  ;;  %v1520_v61 = vmax.f32 %v1153_v8, 0.0  ;;  %v1521_v3 = vmax.f32 %v755_v55, 0.0  ;;  %v15671_v8 = vld [vmem:[#allocation9_spill] sm:$0xff] }
 0x372   :  { %v3652_v23 = vmax.f32 %v2959_v1, 0.0  ;;  %v3653_v58 = vmax.f32 %v3360_v36, 0.0  ;;  %v1755_v0 = vadd.f32 %v1754_v47, %v1513_v6  ;;  %v1156_v36 = vadd.f32 %v11207_v4, %v10997_v11  ;;  %v12303_v4 = vld [vmem:[%s15524_s0 + $0x3b8] sm:$0xff]  }
 0x373   :  { %8194 = vmatmul.msk.f32.gmra.mxu0 %vm293_vm1, %v9719_v51  ;;  %8323 = vmatmul.msk.f32.gmra.mxu1 %vm293_vm1, %v9719_v51  ;;  %v1888_v60 = vadd.f32 %v1887_v26, %v1514_v35  ;;  %v761_v34 = vadd.f32 %v11231_v9, %v10995_v10  ;;  %v1162_v2 = vadd.f32 %v11233_v12, %v10997_v11  ;;  %v9723_v18 = vunpack.c.h.bf16 %v12272_v46 }
 0x374   :  { %v3818_v28 = vadd.f32 %v3817_v49, %v3652_v23  ;;  %v3951_v30 = vadd.f32 %v3950_v52, %v3653_v58  ;;  %8579 = vmatmul.msk.f32.gmra.mxu2 %vm293_vm1, %v9974_v22  ;;  %8708 = vmatmul.msk.f32.gmra.mxu3 %vm293_vm1, %v9974_v22  ;;  %v9722_v52 = vunpack.c.l.bf16 %v12272_v46  ;;  %v1756_v38 = vadd.f32 %v1755_v0, %v1515_v24 }
 0x375   :  { %v1889_v1 = vadd.f32 %v1888_v60, %v1516_v17  ;;  %v758_v22 = vadd.f32 %v11218_v32, %v10995_v10  ;;  %v1522_v23 = vmax.f32 %v1156_v36, 0.0  ;;  %v9978_v19 = vunpack.c.l.bf16 %v12303_v4 }
 0x376   :  { %v1757_v43 = vadd.f32 %v1756_v38, %v1517_v27  ;;  %v1524_v35 = vmax.f32 %v1159_v25, 0.0  ;;  %v764_v12 = vadd.f32 %v11244_v42, %v10995_v10  ;;  %v1525_v24 = vmax.f32 %v761_v34, 0.0  ;;  %v15670_v27 = vld [vmem:[#allocation8_spill] sm:$0xff] }
 0x377   :  { %v2961_v29 = vpop.f32.mrf.mxu2  ;;  %v3362_v49 = vpop.f32.mrf.mxu3  ;;  %v1890_v32 = vadd.f32 %v1889_v1, %v1518_v16  ;;  %v1523_v58 = vmax.f32 %v758_v22, 0.0  ;;  %v1165_v46 = vadd.f32 %v15668_v15, %v10997_v11  ;;  %v770_v55 = vadd.f32 %v15671_v8, %v10995_v10  ;;  %v15673_v22 = vld [vmem:[#allocation11_spill] sm:$0xff] }
 0x378   :  { %v2962_v53 = vadd.f32 %v2961_v29, %v10995_v10  ;;  %v3363_v48 = vadd.f32 %v3362_v49, %v10997_v11  ;;  %v12281_v33 = vpop.f32.mrf.mxu0  ;;  %v12283_v50 = vpop.f32.mrf.mxu1  ;;  %v1758_v54 = vadd.f32 %v1757_v43, %v1519_v44  ;;  %v1526_v29 = vmax.f32 %v1162_v2, 0.0  ;;  %v15669_v49 = vld [vmem:[#allocation7_spill] sm:$0xff] }
 0x379   :  { %v1891_v9 = vadd.f32 %v1890_v32, %v1520_v61  ;;  %v1527_v38 = vmax.f32 %v764_v12, 0.0  ;;  %v1528_v44 = vmax.f32 %v1165_v46, 0.0  ;;  %v773_v43 = vadd.f32 %v15673_v22, %v10995_v10  ;;  %v15677_v46 = vld [vmem:[#allocation15_spill] sm:$0xff] }
 0x37a   :  { %v3654_v51 = vmax.f32 %v2962_v53, 0.0  ;;  %v3655_v62 = vmax.f32 %v3363_v48, 0.0  ;;  %v1759_v47 = vadd.f32 %v1758_v54, %v1521_v3  ;;  %v1168_v53 = vadd.f32 %v15670_v27, %v10997_v11 }
 0x37b   :  { %8195 = vmatmul.msk.f32.gmra.mxu0 %vm293_vm1, %v9722_v52  ;;  %8324 = vmatmul.msk.f32.gmra.mxu1 %vm293_vm1, %v9722_v52  ;;  %v1892_v0 = vadd.f32 %v1891_v9, %v1522_v23  ;;  %v767_v52 = vadd.f32 %v15669_v49, %v10995_v10  ;;  %v9979_v23 = vunpack.c.h.bf16 %v12303_v4  ;;  %v1531_v2 = vmax.f32 %v770_v55, 0.0 }
 0x37c   :  { %v3819_v39 = vadd.f32 %v3818_v28, %v3654_v51  ;;  %v3952_v41 = vadd.f32 %v3951_v30, %v3655_v62  ;;  %8580 = vmatmul.msk.f32.gmra.mxu2 %vm293_vm1, %v9975_v14  ;;  %8709 = vmatmul.msk.f32.gmra.mxu3 %vm293_vm1, %v9975_v14  ;;  %v1760_v17 = vadd.f32 %v1759_v47, %v1523_v58  ;;  %v12332_v14 = vld [vmem:[%s15524_s0 + $0x1c0] sm:$0xff]   ;;  %v15672_v51 = vld [vmem:[#allocation10_spill] sm:$0xff]  ;;  %v1530_v3 = vmax.f32 %v1168_v53, 0.0 }
 0x37d   :  { %v1893_v60 = vadd.f32 %v1892_v0, %v1524_v35  ;;  %v1171_v62 = vadd.f32 %v15672_v51, %v10997_v11  ;;  %v1529_v36 = vmax.f32 %v767_v52, 0.0  ;;  %v9726_v61 = vunpack.c.l.bf16 %v12332_v14  ;;  %v15678_v52 = vld [vmem:[#allocation16_spill] sm:$0xff] }
 0x37e   :  { %v1761_v16 = vadd.f32 %v1760_v17, %v1525_v24  ;;  %v1533_v12 = vmax.f32 %v773_v43, 0.0  ;;  %v15676_v24 = vld [vmem:[#allocation14_spill] sm:$0xff]  ;;  %v779_v4 = vadd.f32 %v15677_v46, %v10995_v10  ;;  %v1180_v27 = vadd.f32 %v15678_v52, %v10997_v11  ;;  %v12365_v53 = vld [vmem:[%s15524_s0 + $0x3c0] sm:$0xff]  }
 0x37f   :  { %v2964_v57 = vpop.f32.mrf.mxu2  ;;  %v3365_v6 = vpop.f32.mrf.mxu3  ;;  %v1894_v1 = vadd.f32 %v1893_v60, %v1526_v29  ;;  %v1177_v15 = vadd.f32 %v15676_v24, %v10997_v11  ;;  %v9727_v51 = vunpack.c.h.bf16 %v12332_v14  ;;  %v15684_v24 = vld [vmem:[#allocation22_spill] sm:$0xff] }
 0x380   :  { %v2965_v37 = vadd.f32 %v2964_v57, %v10995_v10  ;;  %v3366_v21 = vadd.f32 %v3365_v6, %v10997_v11  ;;  %v12312_v28 = vpop.f32.mrf.mxu0  ;;  %v12314_v30 = vpop.f32.mrf.mxu1  ;;  %v1762_v58 = vadd.f32 %v1761_v16, %v1527_v38  ;;  %v15674_v57 = vld [vmem:[#allocation12_spill] sm:$0xff]  ;;  %v15679_v38 = vld [vmem:[#allocation17_spill] sm:$0xff]  ;;  %v1537_v55 = vmax.f32 %v779_v4, 0.0 }
 0x381   :  { %v1174_v6 = vadd.f32 %v15674_v57, %v10997_v11  ;;  %v1536_v8 = vmax.f32 %v1177_v15, 0.0  ;;  %v1189_v15 = vadd.f32 %v15684_v24, %v10997_v11  ;;  %v15691_v24 = vld [vmem:[#allocation29_spill] sm:$0xff] }
 0x382   :  { %v3656_v13 = vmax.f32 %v2965_v37, 0.0  ;;  %v3657_v26 = vmax.f32 %v3366_v21, 0.0  ;;  %v1895_v21 = vadd.f32 %v1894_v1, %v1528_v44  ;;  %v1763_v35 = vadd.f32 %v1762_v58, %v1529_v36 }
 0x383   :  { %8196 = vmatmul.msk.f32.gmra.mxu0 %vm293_vm1, %v9723_v18  ;;  %8325 = vmatmul.msk.f32.gmra.mxu1 %vm293_vm1, %v9723_v18  ;;  %v15675_v18 = vld [vmem:[#allocation13_spill] sm:$0xff]  ;;  %v1534_v29 = vmax.f32 %v1174_v6, 0.0  ;;  %v15682_v6 = vld [vmem:[#allocation20_spill] sm:$0xff] }
 0x384   :  { %v3820_v42 = vadd.f32 %v3819_v39, %v3656_v13  ;;  %v3953_v48 = vadd.f32 %v3952_v41, %v3657_v26  ;;  %8581 = vmatmul.msk.f32.gmra.mxu2 %vm293_vm1, %v9978_v19  ;;  %8710 = vmatmul.msk.f32.gmra.mxu3 %vm293_vm1, %v9978_v19  ;;  %v776_v37 = vadd.f32 %v15675_v18, %v10995_v10  ;;  %v1532_v19 = vmax.f32 %v1171_v62, 0.0  ;;  %v15680_v62 = vld [vmem:[#allocation18_spill] sm:$0xff] }
 0x385   :  { %v1896_v13 = vadd.f32 %v1895_v21, %v1530_v3  ;;  %v1764_v17 = vadd.f32 %v1763_v35, %v1531_v2  ;;  %v1183_v1 = vadd.f32 %v15680_v62, %v10997_v11  ;;  %v1186_v18 = vadd.f32 %v15682_v6, %v10997_v11  ;;  %v15683_v35 = vld [vmem:[#allocation21_spill] sm:$0xff] }
 0x386   :  { %v1535_v49 = vmax.f32 %v776_v37, 0.0  ;;  %v15687_v62 = vld [vmem:[#allocation25_spill] sm:$0xff] }
 0x387   :  { %v2967_v39 = vpop.f32.mrf.mxu2  ;;  %v3368_v41 = vpop.f32.mrf.mxu3  ;;  %v1897_v60 = vadd.f32 %v1896_v13, %v1532_v19  ;;  %v1540_v21 = vmax.f32 %v1183_v1, 0.0  ;;  %v794_v1 = vadd.f32 %v15687_v62, %v10995_v10 }
 0x388   :  { %v2968_v25 = vadd.f32 %v2967_v39, %v10995_v10  ;;  %v3369_v32 = vadd.f32 %v3368_v41, %v10997_v11  ;;  %v12343_v54 = vpop.f32.mrf.mxu0  ;;  %v12345_v34 = vpop.f32.mrf.mxu1  ;;  %v9982_v41 = vunpack.c.l.bf16 %v12365_v53 }
 0x38a   :  { %v3658_v9 = vmax.f32 %v2968_v25, 0.0  ;;  %v3659_v47 = vmax.f32 %v3369_v32, 0.0  ;;  %v1538_v25 = vmax.f32 %v1180_v27, 0.0 }
 0x38b   :  { %8197 = vmatmul.msk.f32.gmra.mxu0 %vm293_vm1, %v9726_v61  ;;  %8326 = vmatmul.msk.f32.gmra.mxu1 %vm293_vm1, %v9726_v61  ;;  %v1898_v61 = vadd.f32 %v1897_v60, %v1534_v29  ;;  %v15686_v29 = vld [vmem:[#allocation24_spill] sm:$0xff] }
 0x38c   :  { %v3821_v26 = vadd.f32 %v3820_v42, %v3658_v9  ;;  %v3954_v0 = vadd.f32 %v3953_v48, %v3659_v47  ;;  %8582 = vmatmul.msk.f32.gmra.mxu2 %vm293_vm1, %v9979_v23  ;;  %8711 = vmatmul.msk.f32.gmra.mxu3 %vm293_vm1, %v9979_v23  ;;  %v782_v42 = vadd.f32 %v15679_v38, %v10995_v10  ;;  %v15681_v23 = vld [vmem:[#allocation19_spill] sm:$0xff]  ;;  %v12390_v47 = vld [vmem:[%s15524_s0 + $0x1c8] sm:$0xff]  }
 0x38d   :  { %v1765_v48 = vadd.f32 %v1764_v17, %v1533_v12  ;;  %v785_v14 = vadd.f32 %v15681_v23, %v10995_v10  ;;  %v1899_v57 = vadd.f32 %v1898_v61, %v1536_v8  ;;  %v788_v12 = vadd.f32 %v15683_v35, %v10995_v10 }
 0x38e   :  { %v1539_v32 = vmax.f32 %v782_v42, 0.0  ;;  %v9730_v60 = vunpack.c.l.bf16 %v12390_v47 }
 0x38f   :  { %v2970_v16 = vpop.f32.mrf.mxu2  ;;  %v3371_v44 = vpop.f32.mrf.mxu3  ;;  %v1766_v3 = vadd.f32 %v1765_v48, %v1535_v49  ;;  %v1900_v46 = vadd.f32 %v1899_v57, %v1538_v25  ;;  %v1541_v13 = vmax.f32 %v785_v14, 0.0  ;;  %v1192_v49 = vadd.f32 %v15686_v29, %v10997_v11  ;;  %v15689_v14 = vld [vmem:[#allocation27_spill] sm:$0xff] }
 0x390   :  { %v2971_v36 = vadd.f32 %v2970_v16, %v10995_v10  ;;  %v3372_v22 = vadd.f32 %v3371_v44, %v10997_v11  ;;  %v12374_v43 = vpop.f32.mrf.mxu0  ;;  %v12376_v39 = vpop.f32.mrf.mxu1  ;;  %v9983_v16 = vunpack.c.h.bf16 %v12365_v53  ;;  %v1543_v44 = vmax.f32 %v788_v12, 0.0  ;;  %v15690_v53 = vld [vmem:[#allocation28_spill] sm:$0xff] }
 0x391   :  { %v1767_v37 = vadd.f32 %v1766_v3, %v1537_v55  ;;  %v1901_v38 = vadd.f32 %v1900_v46, %v1540_v21  ;;  %v1546_v23 = vmax.f32 %v1192_v49, 0.0  ;;  %v1547_v21 = vmax.f32 %v794_v1, 0.0  ;;  %v12423_v12 = vld [vmem:[%s15524_s0 + $0x3c8] sm:$0xff]   ;;  %v15692_v46 = vld [vmem:[#allocation30_spill] sm:$0xff] }
 0x392   :  { %v3660_v58 = vmax.f32 %v2971_v36, 0.0  ;;  %v3661_v2 = vmax.f32 %v3372_v22, 0.0  ;;  %v15688_v36 = vld [vmem:[#allocation26_spill] sm:$0xff] }
 0x393   :  { %8198 = vmatmul.msk.f32.gmra.mxu0 %vm293_vm1, %v9727_v51  ;;  %8327 = vmatmul.msk.f32.gmra.mxu1 %vm293_vm1, %v9727_v51  ;;  %v1768_v4 = vadd.f32 %v1767_v37, %v1539_v32  ;;  %v1544_v51 = vmax.f32 %v1189_v15, 0.0  ;;  %v1195_v22 = vadd.f32 %v15688_v36, %v10997_v11  ;;  %v800_v15 = vadd.f32 %v15691_v24, %v10995_v10 }
 0x394   :  { %v3822_v19 = vadd.f32 %v3821_v26, %v3660_v58  ;;  %v3955_v9 = vadd.f32 %v3954_v0, %v3661_v2  ;;  %8583 = vmatmul.msk.f32.gmra.mxu2 %vm293_vm1, %v9982_v41  ;;  %8712 = vmatmul.msk.f32.gmra.mxu3 %vm293_vm1, %v9982_v41  ;;  %v1542_v26 = vmax.f32 %v1186_v18, 0.0  ;;  %v15685_v0 = vld [vmem:[#allocation23_spill] sm:$0xff]  ;;  %v797_v58 = vadd.f32 %v15689_v14, %v10995_v10 }
 0x395   :  { %v791_v17 = vadd.f32 %v15685_v0, %v10995_v10  ;;  %v1769_v41 = vadd.f32 %v1768_v4, %v1541_v13  ;;  %v1198_v2 = vadd.f32 %v15690_v53, %v10997_v11  ;;  %v1548_v35 = vmax.f32 %v1195_v22, 0.0  ;;  %v12452_v53 = vld [vmem:[%s15524_s0 + $0x1d0] sm:$0xff]  }
 0x396   :  { %v1902_v25 = vadd.f32 %v1901_v38, %v1542_v26  ;;  %v1549_v13 = vmax.f32 %v797_v58, 0.0  ;;  %v9986_v38 = vunpack.c.l.bf16 %v12423_v12 }
 0x397   :  { %v2973_v52 = vpop.f32.mrf.mxu2  ;;  %v3374_v27 = vpop.f32.mrf.mxu3  ;;  %v1545_v32 = vmax.f32 %v791_v17, 0.0  ;;  %v1770_v18 = vadd.f32 %v1769_v41, %v1543_v44  ;;  %v9731_v17 = vunpack.c.h.bf16 %v12390_v47  ;;  %v1550_v29 = vmax.f32 %v1198_v2, 0.0 }
 0x398   :  { %v2974_v42 = vadd.f32 %v2973_v52, %v10995_v10  ;;  %v3375_v48 = vadd.f32 %v3374_v27, %v10997_v11  ;;  %v12403_v8 = vpop.f32.mrf.mxu0  ;;  %v12405_v55 = vpop.f32.mrf.mxu1  ;;  %v1903_v37 = vadd.f32 %v1902_v25, %v1544_v51  ;;  %v15694_v51 = vld [vmem:[#allocation32_spill] sm:$0xff]  ;;  %v1551_v47 = vmax.f32 %v800_v15, 0.0  ;;  %v15696_v25 = vld [vmem:[#allocation34_spill] sm:$0xff] }
 0x399   :  { %v1204_v62 = vadd.f32 %v15694_v51, %v10997_v11  ;;  %v15698_v15 = vld [vmem:[#allocation36_spill] sm:$0xff] }
 0x39a   :  { %v3662_v61 = vmax.f32 %v2974_v42, 0.0  ;;  %v3663_v3 = vmax.f32 %v3375_v48, 0.0  ;;  %v1904_v4 = vadd.f32 %v1903_v37, %v1546_v23  ;;  %v15697_v37 = vld [vmem:[#allocation35_spill] sm:$0xff] }
 0x39b   :  { %8199 = vmatmul.msk.f32.gmra.mxu0 %vm293_vm1, %v9730_v60  ;;  %8328 = vmatmul.msk.f32.gmra.mxu1 %vm293_vm1, %v9730_v60 }
 0x39c   :  { %v3823_v57 = vadd.f32 %v3822_v19, %v3662_v61  ;;  %v3956_v6 = vadd.f32 %v3955_v9, %v3663_v3  ;;  %8584 = vmatmul.msk.f32.gmra.mxu2 %vm293_vm1, %v9983_v16  ;;  %8713 = vmatmul.msk.f32.gmra.mxu3 %vm293_vm1, %v9983_v16  ;;  %v1201_v19 = vadd.f32 %v15692_v46, %v10997_v11  ;;  %v15693_v16 = vld [vmem:[#allocation31_spill] sm:$0xff]  ;;  %v15695_v61 = vld [vmem:[#allocation33_spill] sm:$0xff] }
 0x39d   :  { %v1771_v9 = vadd.f32 %v1770_v18, %v1545_v32  ;;  %v1905_v48 = vadd.f32 %v1904_v4, %v1548_v35  ;;  %v803_v44 = vadd.f32 %v15693_v16, %v10995_v10  ;;  %v806_v3 = vadd.f32 %v15695_v61, %v10995_v10  ;;  %v15700_v16 = vld [vmem:[#allocation38_spill] sm:$0xff] }
 0x39e   :  { %v1552_v1 = vmax.f32 %v1201_v19, 0.0  ;;  %v1207_v32 = vadd.f32 %v15696_v25, %v10997_v11  ;;  %v1554_v18 = vmax.f32 %v1204_v62, 0.0  ;;  %v15699_v19 = vld [vmem:[#allocation37_spill] sm:$0xff]  ;;  %v15701_v62 = vld [vmem:[#allocation39_spill] sm:$0xff] }
 0x39f   :  { %v2976_v26 = vpop.f32.mrf.mxu2  ;;  %v3377_v0 = vpop.f32.mrf.mxu3  ;;  %v1772_v42 = vadd.f32 %v1771_v9, %v1547_v21  ;;  %v1906_v23 = vadd.f32 %v1905_v48, %v1550_v29  ;;  %v1553_v2 = vmax.f32 %v803_v44, 0.0  ;;  %v809_v21 = vadd.f32 %v15697_v37, %v10995_v10 }
 0x3a0   :  { %v2977_v49 = vadd.f32 %v2976_v26, %v10995_v10  ;;  %v3378_v52 = vadd.f32 %v3377_v0, %v10997_v11  ;;  %v12432_v27 = vpop.f32.mrf.mxu0  ;;  %v12434_v60 = vpop.f32.mrf.mxu1  ;;  %v1556_v46 = vmax.f32 %v1207_v32, 0.0  ;;  %v812_v9 = vadd.f32 %v15699_v19, %v10995_v10  ;;  %v15706_v19 = vld [vmem:[#allocation44_spill] sm:$0xff] }
 0x3a1   :  { %v1773_v41 = vadd.f32 %v1772_v42, %v1549_v13  ;;  %v1907_v24 = vadd.f32 %v1906_v23, %v1552_v1  ;;  %v9734_v26 = vunpack.c.l.bf16 %v12452_v53  ;;  %v1557_v48 = vmax.f32 %v809_v21, 0.0  ;;  %v15704_v21 = vld [vmem:[#allocation42_spill] sm:$0xff] }
 0x3a2   :  { %v3664_v36 = vmax.f32 %v2977_v49, 0.0  ;;  %v3665_v22 = vmax.f32 %v3378_v52, 0.0  ;;  %v9987_v52 = vunpack.c.h.bf16 %v12423_v12  ;;  %v1213_v44 = vadd.f32 %v15700_v16, %v10997_v11  ;;  %v15703_v12 = vld [vmem:[#allocation41_spill] sm:$0xff] }
 0x3a3   :  { %8200 = vmatmul.msk.f32.gmra.mxu0 %vm293_vm1, %v9731_v17  ;;  %8329 = vmatmul.msk.f32.gmra.mxu1 %vm293_vm1, %v9731_v17  ;;  %v1774_v35 = vadd.f32 %v1773_v41, %v1551_v47  ;;  %v1908_v42 = vadd.f32 %v1907_v24, %v1554_v18  ;;  %v815_v47 = vadd.f32 %v15701_v62, %v10995_v10  ;;  %v1559_v61 = vmax.f32 %v812_v9, 0.0  ;;  %v12485_v24 = vld [vmem:[%s15524_s0 + $0x3d0] sm:$0xff]  }
 0x3a4   :  { %v3824_v14 = vadd.f32 %v3823_v57, %v3664_v36  ;;  %v3957_v58 = vadd.f32 %v3956_v6, %v3665_v22  ;;  %8585 = vmatmul.msk.f32.gmra.mxu2 %vm293_vm1, %v9986_v38  ;;  %8714 = vmatmul.msk.f32.gmra.mxu3 %vm293_vm1, %v9986_v38  ;;  %v1210_v57 = vadd.f32 %v15698_v15, %v10997_v11  ;;  %v1555_v6 = vmax.f32 %v806_v3, 0.0  ;;  %v15702_v3 = vld [vmem:[#allocation40_spill] sm:$0xff] }
 0x3a5   :  { %v1775_v38 = vadd.f32 %v1774_v35, %v1553_v2  ;;  %v1909_v41 = vadd.f32 %v1908_v42, %v1556_v46  ;;  %v1216_v25 = vadd.f32 %v15702_v3, %v10997_v11  ;;  %v818_v32 = vadd.f32 %v15703_v12, %v10995_v10 }
 0x3a6   :  { %v1558_v51 = vmax.f32 %v1210_v57, 0.0  ;;  %v1560_v37 = vmax.f32 %v1213_v44, 0.0  ;;  %v1219_v35 = vadd.f32 %v15704_v21, %v10997_v11  ;;  %v1561_v57 = vmax.f32 %v815_v47, 0.0  ;;  %v15708_v47 = vld [vmem:[#allocation46_spill] sm:$0xff] }
 0x3a7   :  { %v2979_v4 = vpop.f32.mrf.mxu2  ;;  %v3380_v13 = vpop.f32.mrf.mxu3  ;;  %v1776_v22 = vadd.f32 %v1775_v38, %v1555_v6  ;;  %v15705_v6 = vld [vmem:[#allocation43_spill] sm:$0xff]  ;;  %v1562_v46 = vmax.f32 %v1216_v25, 0.0  ;;  %v1222_v9 = vadd.f32 %v15706_v19, %v10997_v11 }
 0x3a8   :  { %v2980_v0 = vadd.f32 %v2979_v4, %v10995_v10  ;;  %v3381_v17 = vadd.f32 %v3380_v13, %v10997_v11  ;;  %v12463_v29 = vpop.f32.mrf.mxu0  ;;  %v12465_v49 = vpop.f32.mrf.mxu1  ;;  %v1910_v15 = vadd.f32 %v1909_v41, %v1558_v51  ;;  %v1564_v44 = vmax.f32 %v1219_v35, 0.0  ;;  %v15707_v51 = vld [vmem:[#allocation45_spill] sm:$0xff]  ;;  %v15709_v25 = vld [vmem:[#allocation47_spill] sm:$0xff] }
 0x3a9   :  { %v1777_v18 = vadd.f32 %v1776_v22, %v1557_v48  ;;  %v9990_v48 = vunpack.c.l.bf16 %v12485_v24  ;;  %v824_v62 = vadd.f32 %v15707_v51, %v10995_v10  ;;  %v1566_v3 = vmax.f32 %v1222_v9, 0.0  ;;  %v15712_v9 = vld [vmem:[#allocation50_spill] sm:$0xff] }
 0x3aa   :  { %v3666_v1 = vmax.f32 %v2980_v0, 0.0  ;;  %v3667_v36 = vmax.f32 %v3381_v17, 0.0  ;;  %v1563_v0 = vmax.f32 %v818_v32, 0.0  ;;  %v1911_v16 = vadd.f32 %v1910_v15, %v1560_v37  ;;  %v15710_v32 = vld [vmem:[#allocation48_spill] sm:$0xff]  ;;  %v12514_v15 = vld [vmem:[%s15524_s0 + $0x1d8] sm:$0xff]  }
 0x3ab   :  { %8201 = vmatmul.msk.f32.gmra.mxu0 %vm293_vm1, %v9734_v26  ;;  %8330 = vmatmul.msk.f32.gmra.mxu1 %vm293_vm1, %v9734_v26  ;;  %v9735_v26 = vunpack.c.h.bf16 %v12452_v53  ;;  %v827_v12 = vadd.f32 %v15709_v25, %v10995_v10 }
 0x3ac   :  { %v3825_v23 = vadd.f32 %v3824_v14, %v3666_v1  ;;  %v3958_v2 = vadd.f32 %v3957_v58, %v3667_v36  ;;  %8586 = vmatmul.msk.f32.gmra.mxu2 %vm293_vm1, %v9987_v52  ;;  %8715 = vmatmul.msk.f32.gmra.mxu3 %vm293_vm1, %v9987_v52  ;;  %v821_v14 = vadd.f32 %v15705_v6, %v10995_v10  ;;  %v1567_v6 = vmax.f32 %v824_v62, 0.0 }
 0x3ad   :  { %v1778_v58 = vadd.f32 %v1777_v18, %v1559_v61  ;;  %v1225_v1 = vadd.f32 %v15708_v47, %v10997_v11  ;;  %v1912_v61 = vadd.f32 %v1911_v16, %v1562_v46  ;;  %v1228_v18 = vadd.f32 %v15710_v32, %v10997_v11  ;;  %v15715_v32 = vld [vmem:[#allocation53_spill] sm:$0xff] }
 0x3ae   :  { %v1565_v36 = vmax.f32 %v821_v14, 0.0  ;;  %v9991_v47 = vunpack.c.h.bf16 %v12485_v24 }
 0x3af   :  { %v2982_v4 = vpop.f32.mrf.mxu2  ;;  %v3383_v13 = vpop.f32.mrf.mxu3  ;;  %v1779_v53 = vadd.f32 %v1778_v58, %v1561_v57  ;;  %v1913_v57 = vadd.f32 %v1912_v61, %v1564_v44  ;;  %v1568_v14 = vmax.f32 %v1225_v1, 0.0  ;;  %v15711_v58 = vld [vmem:[#allocation49_spill] sm:$0xff] }
 0x3b0   :  { %v2983_v17 = vadd.f32 %v2982_v4, %v10995_v10  ;;  %v3384_v52 = vadd.f32 %v3383_v13, %v10997_v11  ;;  %v12494_v38 = vpop.f32.mrf.mxu0  ;;  %v12496_v42 = vpop.f32.mrf.mxu1  ;;  %v830_v46 = vadd.f32 %v15711_v58, %v10995_v10  ;;  %v1569_v4 = vmax.f32 %v827_v12, 0.0 }
 0x3b1   :  { %v1780_v37 = vadd.f32 %v1779_v53, %v1563_v0  ;;  %v1570_v13 = vmax.f32 %v1228_v18, 0.0  ;;  %v836_v18 = vadd.f32 %v15715_v32, %v10995_v10 }
 0x3b2   :  { %v3668_v22 = vmax.f32 %v2983_v17, 0.0  ;;  %v3669_v41 = vmax.f32 %v3384_v52, 0.0  ;;  %v9738_v17 = vunpack.c.l.bf16 %v12514_v15  ;;  %v15713_v52 = vld [vmem:[#allocation51_spill] sm:$0xff] }
 0x3b3   :  { %8202 = vmatmul.msk.f32.gmra.mxu0 %vm293_vm1, %v9735_v26  ;;  %8331 = vmatmul.msk.f32.gmra.mxu1 %vm293_vm1, %v9735_v26  ;;  %v1781_v19 = vadd.f32 %v1780_v37, %v1565_v36  ;;  %v1571_v36 = vmax.f32 %v830_v46, 0.0  ;;  %v15717_v46 = vld [vmem:[#allocation55_spill] sm:$0xff] }
 0x3b4   :  { %v3826_v21 = vadd.f32 %v3825_v23, %v3668_v22  ;;  %v3959_v35 = vadd.f32 %v3958_v2, %v3669_v41  ;;  %8587 = vmatmul.msk.f32.gmra.mxu2 %vm293_vm1, %v9990_v48  ;;  %8716 = vmatmul.msk.f32.gmra.mxu3 %vm293_vm1, %v9990_v48  ;;  %v1231_v23 = vadd.f32 %v15712_v9, %v10997_v11  ;;  %v15714_v41 = vld [vmem:[#allocation52_spill] sm:$0xff]  ;;  %v12545_v9 = vld [vmem:[%s15524_s0 + $0x3d8] sm:$0xff]  }
 0x3b5   :  { %v1914_v2 = vadd.f32 %v1913_v57, %v1566_v3  ;;  %v833_v48 = vadd.f32 %v15713_v52, %v10995_v10  ;;  %v1782_v1 = vadd.f32 %v1781_v19, %v1567_v6  ;;  %v1234_v61 = vadd.f32 %v15714_v41, %v10997_v11 }
 0x3b6   :  { %v1572_v22 = vmax.f32 %v1231_v23, 0.0  ;;  %v839_v19 = vadd.f32 %v15717_v46, %v10995_v10  ;;  %v15722_v46 = vld [vmem:[#allocation60_spill] sm:$0xff] }
 0x3b7   :  { %v2985_v26 = vpop.f32.mrf.mxu2  ;;  %v3386_v0 = vpop.f32.mrf.mxu3  ;;  %v1915_v53 = vadd.f32 %v1914_v2, %v1568_v14  ;;  %v1783_v12 = vadd.f32 %v1782_v1, %v1569_v4  ;;  %v1573_v57 = vmax.f32 %v833_v48, 0.0  ;;  %v15716_v14 = vld [vmem:[#allocation54_spill] sm:$0xff]  ;;  %v1574_v4 = vmax.f32 %v1234_v61, 0.0 }
 0x3b8   :  { %v2986_v16 = vadd.f32 %v2985_v26, %v10995_v10  ;;  %v3387_v44 = vadd.f32 %v3386_v0, %v10997_v11  ;;  %v12525_v51 = vpop.f32.mrf.mxu0  ;;  %v12527_v62 = vpop.f32.mrf.mxu1  ;;  %v1237_v58 = vadd.f32 %v15716_v14, %v10997_v11  ;;  %v15719_v26 = vld [vmem:[#allocation57_spill] sm:$0xff]  ;;  %v9739_v48 = vunpack.c.h.bf16 %v12514_v15  ;;  %v15720_v61 = vld [vmem:[#allocation58_spill] sm:$0xff] }
 0x3b9   :  { %v1916_v37 = vadd.f32 %v1915_v53, %v1570_v13  ;;  %v1784_v23 = vadd.f32 %v1783_v12, %v1571_v36  ;;  %v842_v0 = vadd.f32 %v15719_v26, %v10995_v10  ;;  %v9994_v36 = vunpack.c.l.bf16 %v12545_v9 }
 0x3ba   :  { %v3670_v3 = vmax.f32 %v2986_v16, 0.0  ;;  %v3671_v25 = vmax.f32 %v3387_v44, 0.0  ;;  %v1577_v41 = vmax.f32 %v839_v19, 0.0 }
 0x3bb   :  { %8203 = vmatmul.msk.f32.gmra.mxu0 %vm293_vm1, %v9738_v17  ;;  %8332 = vmatmul.msk.f32.gmra.mxu1 %vm293_vm1, %v9738_v17  ;;  %v1917_v2 = vadd.f32 %v1916_v37, %v1572_v22  ;;  %v1785_v16 = vadd.f32 %v1784_v23, %v1573_v57  ;;  %v1576_v22 = vmax.f32 %v1237_v58, 0.0  ;;  %v1579_v14 = vmax.f32 %v842_v0, 0.0  ;;  %v15723_v58 = vld [vmem:[#allocation61_spill] sm:$0xff] }
 0x3bc   :  { %v3827_v24 = vadd.f32 %v3826_v21, %v3670_v3  ;;  %v3960_v6 = vadd.f32 %v3959_v35, %v3671_v25  ;;  %8588 = vmatmul.msk.f32.gmra.mxu2 %vm293_vm1, %v9991_v47  ;;  %8717 = vmatmul.msk.f32.gmra.mxu3 %vm293_vm1, %v9991_v47  ;;  %v1575_v21 = vmax.f32 %v836_v18, 0.0  ;;  %v15718_v35 = vld [vmem:[#allocation56_spill] sm:$0xff]  ;;  %v1243_v3 = vadd.f32 %v15720_v61, %v10997_v11  ;;  %v15721_v25 = vld [vmem:[#allocation59_spill] sm:$0xff] }
 0x3bd   :  { %v1240_v13 = vadd.f32 %v15718_v35, %v10997_v11  ;;  %v845_v12 = vadd.f32 %v15721_v25, %v10995_v10  ;;  %v1918_v15 = vadd.f32 %v1917_v2, %v1574_v4  ;;  %v1246_v23 = vadd.f32 %v15722_v46, %v10997_v11  ;;  %v12574_v2 = vld [vmem:[%s15524_s0 + $0x1e0] sm:$0xff]  }
 0x3be   :  { %v1786_v37 = vadd.f32 %v1785_v16, %v1575_v21  ;;  %v848_v19 = vadd.f32 %v15723_v58, %v10995_v10  ;;  %v9742_v61 = vunpack.c.l.bf16 %v12574_v2 }
 0x3bf   :  { %v2988_v17 = vpop.f32.mrf.mxu2  ;;  %v3389_v52 = vpop.f32.mrf.mxu3  ;;  %v1578_v57 = vmax.f32 %v1240_v13, 0.0  ;;  %v1919_v4 = vadd.f32 %v1918_v15, %v1576_v22  ;;  %v1580_v13 = vmax.f32 %v1243_v3, 0.0  ;;  %v1581_v0 = vmax.f32 %v845_v12, 0.0 }
 0x3c0   :  { %v2989_v44 = vadd.f32 %v2988_v17, %v10995_v10  ;;  %v3390_v47 = vadd.f32 %v3389_v52, %v10997_v11  ;;  %v12554_v1 = vpop.f32.mrf.mxu0  ;;  %v12556_v53 = vpop.f32.mrf.mxu1  ;;  %v1787_v21 = vadd.f32 %v1786_v37, %v1577_v41  ;;  %v15724_v17 = vld [vmem:[#allocation62_spill] sm:$0xff]  ;;  %v1583_v25 = vmax.f32 %v848_v19, 0.0  ;;  %v15727_v37 = vld [vmem:[#allocation64_spill] sm:$0xff] }
 0x3c1   :  { %v1249_v52 = vadd.f32 %v15724_v17, %v10997_v11  ;;  %v9995_v12 = vunpack.c.h.bf16 %v12545_v9  ;;  %v15729_v17 = vld [vmem:[#allocation66_spill] sm:$0xff] }
 0x3c2   :  { %v3672_v32 = vmax.f32 %v2989_v44, 0.0  ;;  %v3673_v18 = vmax.f32 %v3390_v47, 0.0  ;;  %v1788_v16 = vadd.f32 %v1787_v21, %v1579_v14  ;;  %v1582_v44 = vmax.f32 %v1246_v23, 0.0  ;;  %v15728_v14 = vld [vmem:[#allocation65_spill] sm:$0xff] }
 0x3c3   :  { %8204 = vmatmul.msk.f32.gmra.mxu0 %vm293_vm1, %v9739_v48  ;;  %8333 = vmatmul.msk.f32.gmra.mxu1 %vm293_vm1, %v9739_v48  ;;  %v15725_v48 = vld [vmem:[#allocation63_spill] sm:$0xff]  ;;  %v854_v46 = vadd.f32 %v15728_v14, %v10995_v10  ;;  %v1584_v23 = vmax.f32 %v1249_v52, 0.0 }
 0x3c4   :  { %v3828_v35 = vadd.f32 %v3827_v24, %v3672_v32  ;;  %v3961_v26 = vadd.f32 %v3960_v6, %v3673_v18  ;;  %8589 = vmatmul.msk.f32.gmra.mxu2 %vm293_vm1, %v9994_v36  ;;  %8718 = vmatmul.msk.f32.gmra.mxu3 %vm293_vm1, %v9994_v36  ;;  %v851_v24 = vadd.f32 %v15725_v48, %v10995_v10 }
 0x3c5   :  { %v1920_v6 = vadd.f32 %v1919_v4, %v1578_v57  ;;  %v1789_v18 = vadd.f32 %v1788_v16, %v1581_v0  ;;  %v1252_v57 = vadd.f32 %v15727_v37, %v10997_v11  ;;  %v1255_v48 = vadd.f32 %v15729_v17, %v10997_v11 }
 0x3c6   :  { %v1585_v58 = vmax.f32 %v851_v24, 0.0  ;;  %v1587_v24 = vmax.f32 %v854_v46, 0.0 }
 0x3c7   :  { %v2991_v47 = vpop.f32.mrf.mxu2  ;;  %v3392_v36 = vpop.f32.mrf.mxu3  ;;  %v1921_v15 = vadd.f32 %v1920_v6, %v1580_v13  ;;  %v1790_v9 = vadd.f32 %v1789_v18, %v1583_v25  ;;  %v1586_v52 = vmax.f32 %v1252_v57, 0.0  ;;  %v15731_v6 = vld [vmem:[#allocation68_spill] sm:$0xff]  ;;  %v9743_v57 = vunpack.c.h.bf16 %v12574_v2 }
 0x3c8   :  { %v2992_v32 = vadd.f32 %v2991_v47, %v10995_v10  ;;  %v3393_v22 = vadd.f32 %v3392_v36, %v10997_v11  ;;  %v12583_v41 = vpop.f32.mrf.mxu0  ;;  %v12585_v3 = vpop.f32.mrf.mxu1  ;;  %v15730_v47 = vld [vmem:[#allocation67_spill] sm:$0xff]  ;;  %v1258_v16 = vadd.f32 %v15731_v6, %v10997_v11 }
 0x3c9   :  { %15726 = vst [vmem:[#allocation6_spill] sm:$0xff] %v12585_v3  ;;  %v1922_v21 = vadd.f32 %v1921_v15, %v1582_v44  ;;  %v857_v36 = vadd.f32 %v15730_v47, %v10995_v10  ;;  %v12605_v44 = vld [vmem:[%s15524_s0 + $0x3e0] sm:$0xff]   ;;  %v15733_v15 = vld [vmem:[#allocation70_spill] sm:$0xff] }
 0x3ca   :  { %v3674_v19 = vmax.f32 %v2992_v32, 0.0  ;;  %v3675_v4 = vmax.f32 %v3393_v22, 0.0  ;;  %v1791_v22 = vadd.f32 %v1790_v9, %v1585_v58  ;;  %v9998_v58 = vunpack.c.l.bf16 %v12605_v44  ;;  %v15737_v9 = vld [vmem:[#allocation72_spill] sm:$0xff] }
 0x3cb   :  { %8205 = vmatmul.msk.f32.gmra.mxu0 %vm293_vm1, %v9742_v61  ;;  %8334 = vmatmul.msk.f32.gmra.mxu1 %vm293_vm1, %v9742_v61  ;;  %v1923_v32 = vadd.f32 %v1922_v21, %v1584_v23  ;;  %v15732_v61 = vld [vmem:[#allocation69_spill] sm:$0xff]  ;;  %v1589_v25 = vmax.f32 %v857_v36, 0.0  ;;  %v1590_v17 = vmax.f32 %v1258_v16, 0.0  ;;  %v1264_v2 = vadd.f32 %v15737_v9, %v10997_v11 }
 0x3cc   :  { %v3829_v13 = vadd.f32 %v3828_v35, %v3674_v19  ;;  %v3962_v0 = vadd.f32 %v3961_v26, %v3675_v4  ;;  %8590 = vmatmul.msk.f32.gmra.mxu2 %vm293_vm1, %v9995_v12  ;;  %8719 = vmatmul.msk.f32.gmra.mxu3 %vm293_vm1, %v9995_v12  ;;  %v860_v35 = vadd.f32 %v15732_v61, %v10995_v10  ;;  %v1588_v26 = vmax.f32 %v1255_v48, 0.0  ;;  %v15736_v48 = vld [vmem:[#allocation71_spill] sm:$0xff] }
 0x3cd   :  { %v1261_v12 = vadd.f32 %v15733_v15, %v10997_v11  ;;  %v1924_v4 = vadd.f32 %v1923_v32, %v1586_v52  ;;  %v1792_v21 = vadd.f32 %v1791_v22, %v1587_v24  ;;  %v863_v47 = vadd.f32 %v15736_v48, %v10995_v10  ;;  %v15739_v52 = vld [vmem:[#allocation74_spill] sm:$0xff]  ;;  %v12634_v22 = vld [vmem:[%s15524_s0 + $0x1e8] sm:$0xff]  }
 0x3ce   :  { %v1591_v36 = vmax.f32 %v860_v35, 0.0  ;;  %v1267_v24 = vadd.f32 %v15739_v52, %v10997_v11  ;;  %v9746_v9 = vunpack.c.l.bf16 %v12634_v22  ;;  %v15746_v52 = vld [vmem:[#allocation79_spill] sm:$0xff] }
 0x3cf   :  { %v2994_v18 = vpop.f32.mrf.mxu2  ;;  %v3395_v37 = vpop.f32.mrf.mxu3  ;;  %v1925_v15 = vadd.f32 %v1924_v4, %v1588_v26  ;;  %v1593_v26 = vmax.f32 %v863_v47, 0.0  ;;  %v15742_v4 = vld [vmem:[#allocation77_spill] sm:$0xff] }
 0x3d0   :  { %v2995_v14 = vadd.f32 %v2994_v18, %v10995_v10  ;;  %v3396_v46 = vadd.f32 %v3395_v37, %v10997_v11  ;;  %v12614_v19 = vpop.f32.mrf.mxu0  ;;  %v12616_v23 = vpop.f32.mrf.mxu1  ;;  %v1793_v18 = vadd.f32 %v1792_v21, %v1589_v25  ;;  %v1592_v37 = vmax.f32 %v1261_v12, 0.0  ;;  %v15740_v25 = vld [vmem:[#allocation75_spill] sm:$0xff] }
 0x3d1   :  { %15734 = vst [vmem:[#allocation7_spill] sm:$0xff] %v12614_v19  ;;  %v15738_v19 = vld [vmem:[#allocation73_spill] sm:$0xff]  ;;  %v1926_v35 = vadd.f32 %v1925_v15, %v1590_v17  ;;  %v869_v12 = vadd.f32 %v15740_v25, %v10995_v10 }
 0x3d2   :  { %15735 = vst [vmem:[#allocation8_spill] sm:$0xff] %v12616_v23  ;;  %v3676_v6 = vmax.f32 %v2995_v14, 0.0  ;;  %v3677_v61 = vmax.f32 %v3396_v46, 0.0  ;;  %v866_v23 = vadd.f32 %v15738_v19, %v10995_v10  ;;  %v1594_v14 = vmax.f32 %v1264_v2, 0.0  ;;  %v15741_v46 = vld [vmem:[#allocation76_spill] sm:$0xff] }
 0x3d3   :  { %8206 = vmatmul.msk.f32.gmra.mxu0 %vm293_vm1, %v9743_v57  ;;  %8335 = vmatmul.msk.f32.gmra.mxu1 %vm293_vm1, %v9743_v57  ;;  %v1794_v57 = vadd.f32 %v1793_v18, %v1591_v36  ;;  %v9999_v2 = vunpack.c.h.bf16 %v12605_v44  ;;  %v15745_v18 = vld [vmem:[#allocation78_spill] sm:$0xff] }
 0x3d4   :  { %v3830_v16 = vadd.f32 %v3829_v13, %v3676_v6  ;;  %v3963_v32 = vadd.f32 %v3962_v0, %v3677_v61  ;;  %8591 = vmatmul.msk.f32.gmra.mxu2 %vm293_vm1, %v9998_v58  ;;  %8720 = vmatmul.msk.f32.gmra.mxu3 %vm293_vm1, %v9998_v58  ;;  %v1270_v13 = vadd.f32 %v15741_v46, %v10997_v11  ;;  %v1595_v19 = vmax.f32 %v866_v23, 0.0 }
 0x3d5   :  { %v1927_v0 = vadd.f32 %v1926_v35, %v1592_v37  ;;  %v872_v58 = vadd.f32 %v15742_v4, %v10995_v10  ;;  %v1596_v6 = vmax.f32 %v1267_v24, 0.0  ;;  %v1795_v15 = vadd.f32 %v1794_v57, %v1593_v26 }
 0x3d6   :  { %v1597_v23 = vmax.f32 %v869_v12, 0.0  ;;  %v1273_v37 = vadd.f32 %v15745_v18, %v10997_v11  ;;  %v875_v35 = vadd.f32 %v15746_v52, %v10995_v10  ;;  %v1598_v24 = vmax.f32 %v1270_v13, 0.0 }
 0x3d7   :  { %v2997_v21 = vpop.f32.mrf.mxu2  ;;  %v3398_v48 = vpop.f32.mrf.mxu3  ;;  %v1928_v25 = vadd.f32 %v1927_v0, %v1594_v14 }
 0x3d8   :  { %v2998_v17 = vadd.f32 %v2997_v21, %v10995_v10  ;;  %v3399_v47 = vadd.f32 %v3398_v48, %v10997_v11  ;;  %v12645_v61 = vpop.f32.mrf.mxu0  ;;  %v12647_v36 = vpop.f32.mrf.mxu1  ;;  %v1796_v21 = vadd.f32 %v1795_v15, %v1595_v19  ;;  %v1599_v48 = vmax.f32 %v872_v58, 0.0  ;;  %v15749_v19 = vld [vmem:[#allocation82_spill] sm:$0xff] }
 0x3d9   :  { %15743 = vst [vmem:[#allocation9_spill] sm:$0xff] %v12645_v61  ;;  %v15747_v61 = vld [vmem:[#allocation80_spill] sm:$0xff]  ;;  %v1929_v26 = vadd.f32 %v1928_v25, %v1596_v6  ;;  %v1600_v13 = vmax.f32 %v1273_v37, 0.0  ;;  %v1601_v0 = vmax.f32 %v875_v35, 0.0  ;;  %v1279_v58 = vadd.f32 %v15749_v19, %v10997_v11  ;;  %v15755_v19 = vld [vmem:[#allocation86_spill] sm:$0xff] }
 0x3da   :  { %15744 = vst [vmem:[#allocation10_spill] sm:$0xff] %v12647_v36  ;;  %v3678_v46 = vmax.f32 %v2998_v17, 0.0  ;;  %v3679_v4 = vmax.f32 %v3399_v47, 0.0  ;;  %v1276_v3 = vadd.f32 %v15747_v61, %v10997_v11  ;;  %v15748_v36 = vld [vmem:[#allocation81_spill] sm:$0xff]  ;;  %v1797_v14 = vadd.f32 %v1796_v21, %v1597_v23  ;;  %v15751_v23 = vld [vmem:[#allocation84_spill] sm:$0xff] }
 0x3db   :  { %v878_v44 = vadd.f32 %v15748_v36, %v10995_v10  ;;  %8207 = vmatmul.msk.f32.gmra.mxu0 %vm293_vm1, %v9746_v9  ;;  %8336 = vmatmul.msk.f32.gmra.mxu1 %vm293_vm1, %v9746_v9  ;;  %v12667_v17 = vld [vmem:[%s15524_s0 + $0x3e8] sm:$0xff]   ;;  %v1930_v47 = vadd.f32 %v1929_v26, %v1598_v24  ;;  %v15750_v9 = vld [vmem:[#allocation83_spill] sm:$0xff]  ;;  %v9747_v15 = vunpack.c.h.bf16 %v12634_v22  ;;  %v1282_v18 = vadd.f32 %v15751_v23, %v10997_v11 }
 0x3dc   :  { %v3831_v12 = vadd.f32 %v3830_v16, %v3678_v46  ;;  %v3964_v57 = vadd.f32 %v3963_v32, %v3679_v4  ;;  %8592 = vmatmul.msk.f32.gmra.mxu2 %vm293_vm1, %v9999_v2  ;;  %8721 = vmatmul.msk.f32.gmra.mxu3 %vm293_vm1, %v9999_v2  ;;  %v881_v16 = vadd.f32 %v15750_v9, %v10995_v10  ;;  %v1602_v6 = vmax.f32 %v1276_v3, 0.0 }
 0x3dd   :  { %v1798_v32 = vadd.f32 %v1797_v14, %v1599_v48  ;;  %v1603_v61 = vmax.f32 %v878_v44, 0.0  ;;  %v10002_v24 = vunpack.c.l.bf16 %v12667_v17  ;;  %v1931_v46 = vadd.f32 %v1930_v47, %v1600_v13  ;;  %v15754_v48 = vld [vmem:[#allocation85_spill] sm:$0xff] }
 0x3de   :  { %v1604_v4 = vmax.f32 %v1279_v58, 0.0  ;;  %v1605_v21 = vmax.f32 %v881_v16, 0.0  ;;  %v884_v22 = vadd.f32 %v15754_v48, %v10995_v10  ;;  %v1285_v9 = vadd.f32 %v15755_v19, %v10997_v11  ;;  %v15756_v58 = vld [vmem:[#allocation87_spill] sm:$0xff]  ;;  %v15757_v16 = vld [vmem:[#allocation88_spill] sm:$0xff] }
 0x3df   :  { %v3000_v36 = vpop.f32.mrf.mxu2  ;;  %v3401_v2 = vpop.f32.mrf.mxu3  ;;  %v1799_v3 = vadd.f32 %v1798_v32, %v1601_v0  ;;  %v1932_v14 = vadd.f32 %v1931_v46, %v1602_v6  ;;  %v12692_v0 = vld [vmem:[%s15524_s0 + $0x1f0] sm:$0xff]   ;;  %v887_v47 = vadd.f32 %v15756_v58, %v10995_v10  ;;  %v1288_v32 = vadd.f32 %v15757_v16, %v10997_v11  ;;  %v15763_v58 = vld [vmem:[#allocation92_spill] sm:$0xff] }
 0x3e0   :  { %v3001_v37 = vadd.f32 %v3000_v36, %v10995_v10  ;;  %v3402_v52 = vadd.f32 %v3401_v2, %v10997_v11  ;;  %v12676_v35 = vpop.f32.mrf.mxu0  ;;  %v12678_v25 = vpop.f32.mrf.mxu1  ;;  %v1606_v2 = vmax.f32 %v1282_v18, 0.0  ;;  %v1294_v16 = vadd.f32 %v15763_v58, %v10997_v11 }
 0x3e1   :  { %15752 = vst [vmem:[#allocation11_spill] sm:$0xff] %v12676_v35  ;;  %v1800_v36 = vadd.f32 %v1799_v3, %v1603_v61  ;;  %v1933_v6 = vadd.f32 %v1932_v14, %v1604_v4  ;;  %v9750_v3 = vunpack.c.l.bf16 %v12692_v0  ;;  %v1610_v14 = vmax.f32 %v1288_v32, 0.0 }
 0x3e2   :  { %15753 = vst [vmem:[#allocation12_spill] sm:$0xff] %v12678_v25  ;;  %v3680_v44 = vmax.f32 %v3001_v37, 0.0  ;;  %v3681_v26 = vmax.f32 %v3402_v52, 0.0  ;;  %v15759_v37 = vld [vmem:[#allocation90_spill] sm:$0xff] }
 0x3e3   :  { %8208 = vmatmul.msk.f32.gmra.mxu0 %vm293_vm1, %v9747_v15  ;;  %8337 = vmatmul.msk.f32.gmra.mxu1 %vm293_vm1, %v9747_v15  ;;  %v1801_v61 = vadd.f32 %v1800_v36, %v1605_v21  ;;  %v1607_v15 = vmax.f32 %v884_v22, 0.0  ;;  %v1291_v52 = vadd.f32 %v15759_v37, %v10997_v11  ;;  %v1934_v48 = vadd.f32 %v1933_v6, %v1606_v2 }
 0x3e4   :  { %v3832_v23 = vadd.f32 %v3831_v12, %v3680_v44  ;;  %v3965_v13 = vadd.f32 %v3964_v57, %v3681_v26  ;;  %8593 = vmatmul.msk.f32.gmra.mxu2 %vm293_vm1, %v10002_v24  ;;  %8722 = vmatmul.msk.f32.gmra.mxu3 %vm293_vm1, %v10002_v24  ;;  %v1608_v12 = vmax.f32 %v1285_v9, 0.0  ;;  %v15758_v57 = vld [vmem:[#allocation89_spill] sm:$0xff]  ;;  %v10003_v21 = vunpack.c.h.bf16 %v12667_v17  ;;  %v15762_v9 = vld [vmem:[#allocation91_spill] sm:$0xff]  ;;  %v15765_v17 = vld [vmem:[#allocation94_spill] sm:$0xff] }
 0x3e5   :  { %v890_v18 = vadd.f32 %v15758_v57, %v10995_v10  ;;  %v1609_v22 = vmax.f32 %v887_v47, 0.0  ;;  %v893_v36 = vadd.f32 %v15762_v9, %v10995_v10  ;;  %v1802_v57 = vadd.f32 %v1801_v61, %v1607_v15 }
 0x3e6   :  { %v1935_v37 = vadd.f32 %v1934_v48, %v1608_v12  ;;  %v1297_v47 = vadd.f32 %v15765_v17, %v10997_v11 }
 0x3e7   :  { %v3003_v24 = vpop.f32.mrf.mxu2  ;;  %v3404_v46 = vpop.f32.mrf.mxu3  ;;  %v1803_v61 = vadd.f32 %v1802_v57, %v1609_v22  ;;  %v1613_v12 = vmax.f32 %v893_v36, 0.0  ;;  %v9751_v22 = vunpack.c.h.bf16 %v12692_v0 }
 0x3e8   :  { %v3004_v44 = vadd.f32 %v3003_v24, %v10995_v10  ;;  %v3405_v26 = vadd.f32 %v3404_v46, %v10997_v11  ;;  %v12705_v19 = vpop.f32.mrf.mxu0  ;;  %v12707_v4 = vpop.f32.mrf.mxu1  ;;  %v1611_v24 = vmax.f32 %v890_v18, 0.0  ;;  %v1612_v46 = vmax.f32 %v1291_v52, 0.0  ;;  %v12725_v52 = vld [vmem:[%s15524_s0 + $0x3f0] sm:$0xff]  }
 0x3e9   :  { %15760 = vst [vmem:[#allocation13_spill] sm:$0xff] %v12705_v19  ;;  %v15764_v19 = vld [vmem:[#allocation93_spill] sm:$0xff]  ;;  %v1936_v15 = vadd.f32 %v1935_v37, %v1610_v14  ;;  %v1614_v18 = vmax.f32 %v1294_v16, 0.0  ;;  %v1616_v14 = vmax.f32 %v1297_v47, 0.0 }
 0x3ea   :  { %15761 = vst [vmem:[#allocation14_spill] sm:$0xff] %v12707_v4  ;;  %v3682_v2 = vmax.f32 %v3004_v44, 0.0  ;;  %v3683_v6 = vmax.f32 %v3405_v26, 0.0  ;;  %v896_v25 = vadd.f32 %v15764_v19, %v10995_v10  ;;  %v15767_v44 = vld [vmem:[#allocation96_spill] sm:$0xff] }
 0x3eb   :  { %8209 = vmatmul.msk.f32.gmra.mxu0 %vm293_vm1, %v9750_v3  ;;  %8338 = vmatmul.msk.f32.gmra.mxu1 %vm293_vm1, %v9750_v3  ;;  %v15766_v3 = vld [vmem:[#allocation95_spill] sm:$0xff]  ;;  %v1937_v26 = vadd.f32 %v1936_v15, %v1612_v46  ;;  %v15771_v46 = vld [vmem:[#allocation98_spill] sm:$0xff] }
 0x3ec   :  { %v3833_v32 = vadd.f32 %v3832_v23, %v3682_v2  ;;  %v3966_v9 = vadd.f32 %v3965_v13, %v3683_v6  ;;  %8594 = vmatmul.msk.f32.gmra.mxu2 %vm293_vm1, %v10003_v21  ;;  %8723 = vmatmul.msk.f32.gmra.mxu3 %vm293_vm1, %v10003_v21  ;;  %v899_v48 = vadd.f32 %v15766_v3, %v10995_v10  ;;  %v1615_v19 = vmax.f32 %v896_v25, 0.0 }
 0x3ed   :  { %v1300_v23 = vadd.f32 %v15767_v44, %v10997_v11  ;;  %v1804_v13 = vadd.f32 %v1803_v61, %v1611_v24  ;;  %v10006_v6 = vunpack.c.l.bf16 %v12725_v52  ;;  %v1938_v17 = vadd.f32 %v1937_v26, %v1614_v18  ;;  %v15770_v24 = vld [vmem:[#allocation97_spill] sm:$0xff] }
 0x3ee   :  { %v902_v25 = vadd.f32 %v15770_v24, %v10995_v10  ;;  %v1303_v61 = vadd.f32 %v15771_v46, %v10997_v11  ;;  %v1617_v0 = vmax.f32 %v899_v48, 0.0  ;;  %v12754_v48 = vld [vmem:[%s15524_s0 + $0x1f8] sm:$0xff]  }
 0x3ef   :  { %v3006_v58 = vpop.f32.mrf.mxu2  ;;  %v3407_v21 = vpop.f32.mrf.mxu3  ;;  %v1805_v37 = vadd.f32 %v1804_v13, %v1613_v12  ;;  %v1618_v47 = vmax.f32 %v1300_v23, 0.0  ;;  %v1939_v12 = vadd.f32 %v1938_v17, %v1616_v14  ;;  %v9754_v46 = vunpack.c.l.bf16 %v12754_v48 }
 0x3f0   :  { %v3007_v36 = vadd.f32 %v3006_v58, %v10995_v10  ;;  %v3408_v16 = vadd.f32 %v3407_v21, %v10997_v11  ;;  %v12734_v57 = vpop.f32.mrf.mxu0  ;;  %v12736_v2 = vpop.f32.mrf.mxu1  ;;  %v15772_v58 = vld [vmem:[#allocation99_spill] sm:$0xff]  ;;  %v1619_v23 = vmax.f32 %v902_v25, 0.0  ;;  %v1620_v26 = vmax.f32 %v1303_v61, 0.0 }
 0x3f1   :  { %15768 = vst [vmem:[#allocation15_spill] sm:$0xff] %v12734_v57  ;;  %v1806_v44 = vadd.f32 %v1805_v37, %v1615_v19  ;;  %v905_v21 = vadd.f32 %v15772_v58, %v10995_v10  ;;  %v15774_v19 = vld [vmem:[#allocation101_spill] sm:$0xff]  ;;  %v15776_v37 = vld [vmem:[#allocation103_spill] sm:$0xff]  ;;  %v15779_v58 = vld [vmem:[#allocation104_spill] sm:$0xff] }
 0x3f2   :  { %15769 = vst [vmem:[#allocation16_spill] sm:$0xff] %v12736_v2  ;;  %v3684_v15 = vmax.f32 %v3007_v36, 0.0  ;;  %v3685_v3 = vmax.f32 %v3408_v16, 0.0  ;;  %v15773_v2 = vld [vmem:[#allocation100_spill] sm:$0xff]  ;;  %v908_v36 = vadd.f32 %v15774_v19, %v10995_v10  ;;  %v15780_v19 = vld [vmem:[#allocation105_spill] sm:$0xff] }
 0x3f3   :  { %v1306_v57 = vadd.f32 %v15773_v2, %v10997_v11  ;;  %8210 = vmatmul.msk.f32.gmra.mxu0 %vm293_vm1, %v9751_v22  ;;  %8339 = vmatmul.msk.f32.gmra.mxu1 %vm293_vm1, %v9751_v22  ;;  %v1807_v16 = vadd.f32 %v1806_v44, %v1617_v0  ;;  %v1940_v2 = vadd.f32 %v1939_v12, %v1618_v47  ;;  %v15775_v22 = vld [vmem:[#allocation102_spill] sm:$0xff]  ;;  %v10007_v47 = vunpack.c.h.bf16 %v12725_v52  ;;  %v15782_v52 = vld [vmem:[#allocation107_spill] sm:$0xff] }
 0x3f4   :  { %v3834_v18 = vadd.f32 %v3833_v32, %v3684_v15  ;;  %v3967_v13 = vadd.f32 %v3966_v9, %v3685_v3  ;;  %8595 = vmatmul.msk.f32.gmra.mxu2 %vm293_vm1, %v10006_v6  ;;  %8724 = vmatmul.msk.f32.gmra.mxu3 %vm293_vm1, %v10006_v6  ;;  %v1309_v32 = vadd.f32 %v15775_v22, %v10997_v11  ;;  %v1621_v9 = vmax.f32 %v905_v21, 0.0 }
 0x3f5   :  { %v1622_v14 = vmax.f32 %v1306_v57, 0.0  ;;  %v911_v6 = vadd.f32 %v15776_v37, %v10995_v10  ;;  %v1808_v3 = vadd.f32 %v1807_v16, %v1619_v23  ;;  %v1941_v44 = vadd.f32 %v1940_v2, %v1620_v26 }
 0x3f6   :  { %v1623_v57 = vmax.f32 %v908_v36, 0.0  ;;  %v1312_v21 = vadd.f32 %v15779_v58, %v10997_v11  ;;  %v1624_v12 = vmax.f32 %v1309_v32, 0.0  ;;  %v914_v22 = vadd.f32 %v15780_v19, %v10995_v10  ;;  %v15783_v32 = vld [vmem:[#allocation108_spill] sm:$0xff] }
 0x3f7   :  { %v3009_v17 = vpop.f32.mrf.mxu2  ;;  %v3410_v24 = vpop.f32.mrf.mxu3  ;;  %v1809_v4 = vadd.f32 %v1808_v3, %v1621_v9  ;;  %v1625_v35 = vmax.f32 %v911_v6, 0.0  ;;  %v917_v23 = vadd.f32 %v15782_v52, %v10995_v10  ;;  %v1318_v9 = vadd.f32 %v15783_v32, %v10997_v11 }
 0x3f8   :  { %v3010_v25 = vadd.f32 %v3009_v17, %v10995_v10  ;;  %v3411_v61 = vadd.f32 %v3410_v24, %v10997_v11  ;;  %v12765_v15 = vpop.f32.mrf.mxu0  ;;  %v12767_v0 = vpop.f32.mrf.mxu1  ;;  %v1942_v24 = vadd.f32 %v1941_v44, %v1622_v14  ;;  %v1626_v2 = vmax.f32 %v1312_v21, 0.0  ;;  %v12787_v14 = vld [vmem:[%s15524_s0 + $0x3f8] sm:$0xff]  }
 0x3f9   :  { %15777 = vst [vmem:[#allocation17_spill] sm:$0xff] %v12765_v15  ;;  %v15781_v15 = vld [vmem:[#allocation106_spill] sm:$0xff]  ;;  %v1810_v16 = vadd.f32 %v1809_v4, %v1623_v57  ;;  %v9755_v44 = vunpack.c.h.bf16 %v12754_v48  ;;  %v1629_v57 = vmax.f32 %v917_v23, 0.0 }
 0x3fa   :  { %15778 = vst [vmem:[#allocation18_spill] sm:$0xff] %v12767_v0  ;;  %v3686_v37 = vmax.f32 %v3010_v25, 0.0  ;;  %v3687_v17 = vmax.f32 %v3411_v61, 0.0  ;;  %v1315_v0 = vadd.f32 %v15781_v15, %v10997_v11  ;;  %v1943_v6 = vadd.f32 %v1942_v24, %v1624_v12  ;;  %v15784_v25 = vld [vmem:[#allocation109_spill] sm:$0xff]  ;;  %v15785_v15 = vld [vmem:[#allocation110_spill] sm:$0xff]  ;;  %v15789_v24 = vld [vmem:[#allocation112_spill] sm:$0xff] }
 0x3fb   :  { %8211 = vmatmul.msk.f32.gmra.mxu0 %vm293_vm1, %v9754_v46  ;;  %8340 = vmatmul.msk.f32.gmra.mxu1 %vm293_vm1, %v9754_v46  ;;  %v1627_v46 = vmax.f32 %v914_v22, 0.0  ;;  %v10010_v22 = vunpack.c.l.bf16 %v12787_v14  ;;  %v1324_v52 = vadd.f32 %v15789_v24, %v10997_v11  ;;  %v15794_v24 = vld [vmem:[#allocation117_spill] sm:$0xff] }
 0x3fc   :  { %v3835_v26 = vadd.f32 %v3834_v18, %v3686_v37  ;;  %v3968_v36 = vadd.f32 %v3967_v13, %v3687_v17  ;;  %8596 = vmatmul.msk.f32.gmra.mxu2 %vm293_vm1, %v10007_v47  ;;  %8725 = vmatmul.msk.f32.gmra.mxu3 %vm293_vm1, %v10007_v47  ;;  %v920_v18 = vadd.f32 %v15784_v25, %v10995_v10  ;;  %v1628_v61 = vmax.f32 %v1315_v0, 0.0  ;;  %v15788_v37 = vld [vmem:[#allocation111_spill] sm:$0xff] }
 0x3fd   :  { %v1811_v13 = vadd.f32 %v1810_v16, %v1625_v35  ;;  %v1321_v47 = vadd.f32 %v15785_v15, %v10997_v11  ;;  %v1944_v35 = vadd.f32 %v1943_v6, %v1626_v2  ;;  %v1630_v0 = vmax.f32 %v1318_v9, 0.0 }
 0x3fe   :  { %v923_v17 = vadd.f32 %v15788_v37, %v10995_v10  ;;  %v1631_v23 = vmax.f32 %v920_v18, 0.0 }
 0x3ff   :  { %v3012_v4 = vpop.f32.mrf.mxu2  ;;  %v3413_v3 = vpop.f32.mrf.mxu3  ;;  %v1812_v48 = vadd.f32 %v1811_v13, %v1627_v46  ;;  %v1945_v25 = vadd.f32 %v1944_v35, %v1628_v61  ;;  %v1632_v15 = vmax.f32 %v1321_v47, 0.0  ;;  %v12816_v46 = vld [vmem:[%s15524_s0 + $0x400] sm:$0xff]   ;;  %v1634_v61 = vmax.f32 %v1324_v52, 0.0 }
 0x400   :  { %v3013_v58 = vadd.f32 %v3012_v4, %v10995_v10  ;;  %v3414_v21 = vadd.f32 %v3413_v3, %v10997_v11  ;;  %v12796_v19 = vpop.f32.mrf.mxu0  ;;  %v12798_v12 = vpop.f32.mrf.mxu1  ;;  %v15790_v4 = vld [vmem:[#allocation113_spill] sm:$0xff]  ;;  %v1633_v13 = vmax.f32 %v923_v17, 0.0  ;;  %v15792_v47 = vld [vmem:[#allocation115_spill] sm:$0xff]  ;;  %v10014_v37 = vunpack.c.l.bf16 %v12816_v46 }
 0x401   :  { %15786 = vst [vmem:[#allocation19_spill] sm:$0xff] %v12796_v19  ;;  %v926_v3 = vadd.f32 %v15790_v4, %v10995_v10  ;;  %v1813_v2 = vadd.f32 %v1812_v48, %v1629_v57  ;;  %v1946_v18 = vadd.f32 %v1945_v25, %v1630_v0  ;;  %v932_v48 = vadd.f32 %v15794_v24, %v10995_v10  ;;  %v15796_v4 = vld [vmem:[#allocation118_spill] sm:$0xff] }
 0x402   :  { %15787 = vst [vmem:[#allocation20_spill] sm:$0xff] %v12798_v12  ;;  %v3688_v16 = vmax.f32 %v3013_v58, 0.0  ;;  %v3689_v32 = vmax.f32 %v3414_v21, 0.0  ;;  %v15791_v12 = vld [vmem:[#allocation114_spill] sm:$0xff]  ;;  %v929_v58 = vadd.f32 %v15792_v47, %v10995_v10 }
 0x403   :  { %v1327_v19 = vadd.f32 %v15791_v12, %v10997_v11  ;;  %8212 = vmatmul.msk.f32.gmra.mxu0 %vm293_vm1, %v9755_v44  ;;  %8341 = vmatmul.msk.f32.gmra.mxu1 %vm293_vm1, %v9755_v44  ;;  %v1814_v21 = vadd.f32 %v1813_v2, %v1631_v23  ;;  %v15793_v44 = vld [vmem:[#allocation116_spill] sm:$0xff]  ;;  %v1635_v57 = vmax.f32 %v926_v3, 0.0  ;;  %v1333_v3 = vadd.f32 %v15796_v4, %v10997_v11 }
 0x404   :  { %v3836_v9 = vadd.f32 %v3835_v26, %v3688_v16  ;;  %v3969_v6 = vadd.f32 %v3968_v36, %v3689_v32  ;;  %8597 = vmatmul.msk.f32.gmra.mxu2 %vm293_vm1, %v10010_v22  ;;  %8726 = vmatmul.msk.f32.gmra.mxu3 %vm293_vm1, %v10010_v22  ;;  %v1330_v26 = vadd.f32 %v15793_v44, %v10997_v11  ;;  %v10011_v16 = vunpack.c.h.bf16 %v12787_v14  ;;  %v15797_v44 = vld [vmem:[#allocation119_spill] sm:$0xff] }
 0x405   :  { %v1947_v36 = vadd.f32 %v1946_v18, %v1632_v15  ;;  %v1636_v12 = vmax.f32 %v1327_v19, 0.0  ;;  %v1815_v32 = vadd.f32 %v1814_v21, %v1633_v13  ;;  %v1637_v19 = vmax.f32 %v929_v58, 0.0  ;;  %v15799_v21 = vld [vmem:[#allocation121_spill] sm:$0xff] }
 0x406   :  { %v1638_v15 = vmax.f32 %v1330_v26, 0.0  ;;  %v1639_v24 = vmax.f32 %v932_v48, 0.0  ;;  %v938_v26 = vadd.f32 %v15799_v21, %v10995_v10 }
 0x407   :  { %v3015_v35 = vpop.f32.mrf.mxu2  ;;  %v3416_v22 = vpop.f32.mrf.mxu3  ;;  %v1948_v25 = vadd.f32 %v1947_v36, %v1634_v61  ;;  %v1816_v47 = vadd.f32 %v1815_v32, %v1635_v57  ;;  %v15798_v61 = vld [vmem:[#allocation120_spill] sm:$0xff] }
 0x408   :  { %v3016_v0 = vadd.f32 %v3015_v35, %v10995_v10  ;;  %v3417_v17 = vadd.f32 %v3416_v22, %v10997_v11  ;;  %v12827_v52 = vpop.f32.mrf.mxu0  ;;  %v12829_v23 = vpop.f32.mrf.mxu1  ;;  %v935_v35 = vadd.f32 %v15797_v44, %v10995_v10  ;;  %v1336_v58 = vadd.f32 %v15798_v61, %v10997_v11  ;;  %v12847_v36 = vld [vmem:[%s15524_s0 + $0x600] sm:$0xff]   ;;  %v15805_v61 = vld [vmem:[#allocation125_spill] sm:$0xff] }
 0x409   :  { %15795 = vst [vmem:[#allocation21_spill] sm:$0xff] %v12829_v23  ;;  %v1949_v22 = vadd.f32 %v1948_v25, %v1636_v12  ;;  %v1817_v57 = vadd.f32 %v1816_v47, %v1637_v19  ;;  %v10015_v25 = vunpack.c.h.bf16 %v12816_v46  ;;  %v1643_v47 = vmax.f32 %v938_v26, 0.0 }
 0x40a   :  { %v3690_v2 = vmax.f32 %v3016_v0, 0.0  ;;  %v3691_v18 = vmax.f32 %v3417_v17, 0.0  ;;  %v15801_v0 = vld [vmem:[#allocation123_spill] sm:$0xff]  ;;  %v944_v21 = vadd.f32 %v15805_v61, %v10995_v10 }
 0x40b   :  { %8857 = vmatmul.msk.f32.vlgmr.msrb.gmra.mxu0 %vm293_vm1, %v10014_v37  ;;  %8986 = vmatmul.msk.f32.vlgmr.msrb.gmra.mxu1 %vm293_vm1, %v10014_v37  ;;  %v1950_v12 = vadd.f32 %v1949_v22, %v1638_v15  ;;  %v1640_v37 = vmax.f32 %v1333_v3, 0.0  ;;  %v941_v17 = vadd.f32 %v15801_v0, %v10995_v10  ;;  %v1818_v4 = vadd.f32 %v1817_v57, %v1639_v24 }
 0x40c   :  { %v3837_v14 = vadd.f32 %v3836_v9, %v3690_v2  ;;  %v3970_v13 = vadd.f32 %v3969_v6, %v3691_v18  ;;  %8598 = vmatmul.msk.f32.gmra.mxu2 %vm293_vm1, %v10011_v16  ;;  %8727 = vmatmul.msk.f32.gmra.mxu3 %vm293_vm1, %v10011_v16  ;;  %v1641_v9 = vmax.f32 %v935_v35, 0.0  ;;  %v15800_v6 = vld [vmem:[#allocation122_spill] sm:$0xff]  ;;  %v10270_v15 = vunpack.c.l.bf16 %v12847_v36  ;;  %v15804_v35 = vld [vmem:[#allocation124_spill] sm:$0xff] }
 0x40d   :  { %v1339_v48 = vadd.f32 %v15800_v6, %v10997_v11  ;;  %v1642_v3 = vmax.f32 %v1336_v58, 0.0  ;;  %v1342_v22 = vadd.f32 %v15804_v35, %v10997_v11  ;;  %v1951_v46 = vadd.f32 %v1950_v12, %v1640_v37  ;;  %v15807_v58 = vld [vmem:[#allocation127_spill] sm:$0xff]  ;;  %v12876_v12 = vld [vmem:[%s15524_s0 + $0x408] sm:$0xff]  }
 0x40e   :  { %v1819_v6 = vadd.f32 %v1818_v4, %v1641_v9  ;;  %v947_v26 = vadd.f32 %v15807_v58, %v10995_v10 }
 0x40f   :  { %v3018_v16 = vpop.f32.mrf.mxu2  ;;  %v3419_v32 = vpop.f32.mrf.mxu3  ;;  %v1644_v0 = vmax.f32 %v1339_v48, 0.0  ;;  %v1952_v37 = vadd.f32 %v1951_v46, %v1642_v3  ;;  %v1646_v48 = vmax.f32 %v1342_v22, 0.0 }
 0x410   :  { %v3019_v2 = vadd.f32 %v3018_v16, %v10995_v10  ;;  %v3420_v18 = vadd.f32 %v3419_v32, %v10997_v11  ;;  %v12856_v44 = vpop.f32.mrf.mxu0  ;;  %v12858_v19 = vpop.f32.mrf.mxu1  ;;  %v1645_v16 = vmax.f32 %v941_v17, 0.0  ;;  %v15806_v32 = vld [vmem:[#allocation126_spill] sm:$0xff]  ;;  %v1820_v9 = vadd.f32 %v1819_v6, %v1643_v47 }
 0x411   :  { %15802 = vst [vmem:[#allocation22_spill] sm:$0xff] %v12856_v44  ;;  %v1345_v44 = vadd.f32 %v15806_v32, %v10997_v11  ;;  %v1647_v17 = vmax.f32 %v944_v21, 0.0  ;;  %v1649_v32 = vmax.f32 %v947_v26, 0.0  ;;  %v10271_v21 = vunpack.c.h.bf16 %v12847_v36 }
 0x412   :  { %15803 = vst [vmem:[#allocation23_spill] sm:$0xff] %v12858_v19  ;;  %v3692_v24 = vmax.f32 %v3019_v2, 0.0  ;;  %v3693_v57 = vmax.f32 %v3420_v18, 0.0  ;;  %v15809_v2 = vld [vmem:[#allocation129_spill] sm:$0xff]  ;;  %v1821_v18 = vadd.f32 %v1820_v9, %v1645_v16  ;;  %v15813_v16 = vld [vmem:[#allocation131_spill] sm:$0xff] }
 0x413   :  { %8858 = vmatmul.msk.f32.gmra.mxu0 %vm293_vm1, %v10015_v25  ;;  %8987 = vmatmul.msk.f32.gmra.mxu1 %vm293_vm1, %v10015_v25  ;;  %v15808_v25 = vld [vmem:[#allocation128_spill] sm:$0xff]  ;;  %v1648_v61 = vmax.f32 %v1345_v44, 0.0 }
 0x414   :  { %v3838_v35 = vadd.f32 %v3837_v14, %v3692_v24  ;;  %v3971_v19 = vadd.f32 %v3970_v13, %v3693_v57  ;;  %9243 = vmatmul.msk.f32.vlgmr.msrb.gmra.mxu2 %vm293_vm1, %v10270_v15  ;;  %9372 = vmatmul.msk.f32.vlgmr.msrb.gmra.mxu3 %vm293_vm1, %v10270_v15  ;;  %v1348_v4 = vadd.f32 %v15808_v25, %v10997_v11  ;;  %v10018_v57 = vunpack.c.l.bf16 %v12876_v12 }
 0x415   :  { %v950_v14 = vadd.f32 %v15809_v2, %v10995_v10  ;;  %v1953_v13 = vadd.f32 %v1952_v37, %v1644_v0  ;;  %v1822_v6 = vadd.f32 %v1821_v18, %v1647_v17  ;;  %v15812_v0 = vld [vmem:[#allocation130_spill] sm:$0xff]  ;;  %v953_v37 = vadd.f32 %v15813_v16, %v10995_v10 }
 0x416   :  { %v1351_v44 = vadd.f32 %v15812_v0, %v10997_v11  ;;  %v1650_v9 = vmax.f32 %v1348_v4, 0.0  ;;  %v10019_v0 = vunpack.c.h.bf16 %v12876_v12 }
 0x417   :  { %v3021_v24 = vpop.f32.mrf.mxu2  ;;  %v3422_v15 = vpop.f32.mrf.mxu3  ;;  %v1954_v46 = vadd.f32 %v1953_v13, %v1646_v48  ;;  %v1651_v26 = vmax.f32 %v950_v14, 0.0  ;;  %v1823_v36 = vadd.f32 %v1822_v6, %v1649_v32  ;;  %v1653_v14 = vmax.f32 %v953_v37, 0.0  ;;  %v15816_v13 = vld [vmem:[#allocation134_spill] sm:$0xff] }
 0x418   :  { %v3022_v58 = vadd.f32 %v3021_v24, %v10995_v10  ;;  %v3423_v3 = vadd.f32 %v3422_v15, %v10997_v11  ;;  %v12885_v47 = vpop.f32.mrf.mxu0  ;;  %v12887_v22 = vpop.f32.mrf.mxu1  ;;  %v15814_v15 = vld [vmem:[#allocation132_spill] sm:$0xff]  ;;  %v1652_v4 = vmax.f32 %v1351_v44, 0.0  ;;  %v1357_v18 = vadd.f32 %v15816_v13, %v10997_v11 }
 0x419   :  { %15810 = vst [vmem:[#allocation24_spill] sm:$0xff] %v12885_v47  ;;  %v1955_v24 = vadd.f32 %v1954_v46, %v1648_v61  ;;  %v1354_v47 = vadd.f32 %v15814_v15, %v10997_v11  ;;  %v12907_v61 = vld [vmem:[%s15524_s0 + $0x608] sm:$0xff]  }
 0x41a   :  { %15811 = vst [vmem:[#allocation25_spill] sm:$0xff] %v12887_v22  ;;  %v3694_v25 = vmax.f32 %v3022_v58, 0.0  ;;  %v3695_v2 = vmax.f32 %v3423_v3, 0.0  ;;  %v15815_v22 = vld [vmem:[#allocation133_spill] sm:$0xff]  ;;  %v1824_v3 = vadd.f32 %v1823_v36, %v1651_v26  ;;  %v10274_v26 = vunpack.c.l.bf16 %v12907_v61  ;;  %v15822_v36 = vld [vmem:[#allocation138_spill] sm:$0xff] }
 0x41b   :  { %v956_v23 = vadd.f32 %v15815_v22, %v10995_v10  ;;  %8859 = vmatmul.msk.f32.gmra.mxu0 %vm293_vm1, %v10018_v57  ;;  %8988 = vmatmul.msk.f32.gmra.mxu1 %vm293_vm1, %v10018_v57  ;;  %v1956_v58 = vadd.f32 %v1955_v24, %v1650_v9  ;;  %v15817_v57 = vld [vmem:[#allocation135_spill] sm:$0xff]  ;;  %v15818_v22 = vld [vmem:[#allocation136_spill] sm:$0xff]  ;;  %v1363_v12 = vadd.f32 %v15822_v36, %v10997_v11  ;;  %v10275_v36 = vunpack.c.h.bf16 %v12907_v61 }
 0x41c   :  { %v3839_v48 = vadd.f32 %v3838_v35, %v3694_v25  ;;  %v3972_v17 = vadd.f32 %v3971_v19, %v3695_v2  ;;  %9244 = vmatmul.msk.f32.gmra.mxu2 %vm293_vm1, %v10271_v21  ;;  %9373 = vmatmul.msk.f32.gmra.mxu3 %vm293_vm1, %v10271_v21  ;;  %v959_v35 = vadd.f32 %v15817_v57, %v10995_v10  ;;  %v1654_v19 = vmax.f32 %v1354_v47, 0.0  ;;  %v15821_v2 = vld [vmem:[#allocation137_spill] sm:$0xff] }
 0x41d   :  { %v1655_v32 = vmax.f32 %v956_v23, 0.0  ;;  %v1360_v21 = vadd.f32 %v15818_v22, %v10997_v11  ;;  %v1957_v25 = vadd.f32 %v1956_v58, %v1652_v4  ;;  %v1825_v47 = vadd.f32 %v1824_v3, %v1653_v14  ;;  %v15824_v4 = vld [vmem:[#allocation140_spill] sm:$0xff]  ;;  %v12936_v3 = vld [vmem:[%s15524_s0 + $0x410] sm:$0xff]  }
 0x41e   :  { %v1656_v23 = vmax.f32 %v1357_v18, 0.0  ;;  %v962_v24 = vadd.f32 %v15821_v2, %v10995_v10  ;;  %v1657_v15 = vmax.f32 %v959_v35, 0.0  ;;  %v1366_v14 = vadd.f32 %v15824_v4, %v10997_v11 }
 0x41f   :  { %v3024_v46 = vpop.f32.mrf.mxu2  ;;  %v3425_v6 = vpop.f32.mrf.mxu3  ;;  %v1958_v22 = vadd.f32 %v1957_v25, %v1654_v19  ;;  %v977_v61 = vadd.f32 %v12223_v31, %v10995_v10  ;;  %v12969_v31 = vld [vmem:[%s15524_s0 + $0x610] sm:$0xff]  }
 0x420   :  { %v3025_v44 = vadd.f32 %v3024_v46, %v10995_v10  ;;  %v3426_v16 = vadd.f32 %v3425_v6, %v10997_v11  ;;  %v12916_v37 = vpop.f32.mrf.mxu0  ;;  %v12918_v9 = vpop.f32.mrf.mxu1  ;;  %v1826_v46 = vadd.f32 %v1825_v47, %v1655_v32  ;;  %v1658_v6 = vmax.f32 %v1360_v21, 0.0 }
 0x421   :  { %15819 = vst [vmem:[#allocation26_spill] sm:$0xff] %v12916_v37  ;;  %v15823_v37 = vld [vmem:[#allocation139_spill] sm:$0xff]  ;;  %v1959_v35 = vadd.f32 %v1958_v22, %v1656_v23  ;;  %v1659_v19 = vmax.f32 %v962_v24, 0.0  ;;  %v968_v32 = vadd.f32 %v12136_v45, %v10995_v10  ;;  %v10022_v47 = vunpack.c.l.bf16 %v12936_v3 }
 0x422   :  { %15820 = vst [vmem:[#allocation27_spill] sm:$0xff] %v12918_v9  ;;  %v3696_v13 = vmax.f32 %v3025_v44, 0.0  ;;  %v3697_v57 = vmax.f32 %v3426_v16, 0.0  ;;  %v965_v9 = vadd.f32 %v15823_v37, %v10995_v10  ;;  %v1827_v21 = vadd.f32 %v1826_v46, %v1657_v15  ;;  %v15825_v44 = vld [vmem:[#allocation141_spill] sm:$0xff] }
 0x423   :  { %8860 = vmatmul.msk.f32.gmra.mxu0 %vm293_vm1, %v10019_v0  ;;  %8989 = vmatmul.msk.f32.gmra.mxu1 %vm293_vm1, %v10019_v0  ;;  %v1660_v0 = vmax.f32 %v1363_v12, 0.0  ;;  %v971_v37 = vadd.f32 %v12162_v63, %v10995_v10  ;;  %v1662_v2 = vmax.f32 %v1366_v14, 0.0  ;;  %v1372_v63 = vadd.f32 %v12164_v20, %v10997_v11 }
 0x424   :  { %v3840_v18 = vadd.f32 %v3839_v48, %v3696_v13  ;;  %v3973_v58 = vadd.f32 %v3972_v17, %v3697_v57  ;;  %9245 = vmatmul.msk.f32.gmra.mxu2 %vm293_vm1, %v10274_v26  ;;  %9374 = vmatmul.msk.f32.gmra.mxu3 %vm293_vm1, %v10274_v26  ;;  %v1369_v48 = vadd.f32 %v15825_v44, %v10997_v11  ;;  %v1661_v16 = vmax.f32 %v965_v9, 0.0 }
 0x425   :  { %v1960_v17 = vadd.f32 %v1959_v35, %v1658_v6  ;;  %v1828_v12 = vadd.f32 %v1827_v21, %v1659_v19  ;;  %v1663_v9 = vmax.f32 %v968_v32, 0.0  ;;  %v974_v13 = vadd.f32 %v12192_v40, %v10995_v10 }
 0x426   :  { %v1664_v22 = vmax.f32 %v1369_v48, 0.0  ;;  %v1665_v14 = vmax.f32 %v971_v37, 0.0  ;;  %v1375_v35 = vadd.f32 %v12194_v59, %v10997_v11  ;;  %v1666_v21 = vmax.f32 %v1372_v63, 0.0 }
 0x427   :  { %v3027_v26 = vpop.f32.mrf.mxu2  ;;  %v3428_v25 = vpop.f32.mrf.mxu3  ;;  %v1961_v57 = vadd.f32 %v1960_v17, %v1660_v0  ;;  %v1829_v4 = vadd.f32 %v1828_v12, %v1661_v16  ;;  %v1667_v0 = vmax.f32 %v974_v13, 0.0  ;;  %v1378_v59 = vadd.f32 %v12225_v5, %v10997_v11 }
 0x428   :  { %v3028_v23 = vadd.f32 %v3027_v26, %v10995_v10  ;;  %v3429_v24 = vadd.f32 %v3428_v25, %v10997_v11  ;;  %v12947_v45 = vpop.f32.mrf.mxu0  ;;  %v12949_v15 = vpop.f32.mrf.mxu1  ;;  %v1668_v48 = vmax.f32 %v1375_v35, 0.0  ;;  %v1669_v17 = vmax.f32 %v977_v61, 0.0 }
 0x429   :  { %v1962_v20 = vadd.f32 %v1961_v57, %v1662_v2  ;;  %v1830_v40 = vadd.f32 %v1829_v4, %v1663_v9  ;;  %v10023_v26 = vunpack.c.h.bf16 %v12936_v3  ;;  %v1381_v25 = vadd.f32 %v12254_v56, %v10997_v11 }
 0x42a   :  { %v3698_v46 = vmax.f32 %v3028_v23, 0.0  ;;  %v3699_v6 = vmax.f32 %v3429_v24, 0.0  ;;  %v1670_v12 = vmax.f32 %v1378_v59, 0.0  ;;  %v983_v9 = vadd.f32 %v12281_v33, %v10995_v10  ;;  %v12996_v33 = vld [vmem:[%s15524_s0 + $0x418] sm:$0xff]  }
 0x42b   :  { %8861 = vmatmul.msk.f32.gmra.mxu0 %vm293_vm1, %v10022_v47  ;;  %8990 = vmatmul.msk.f32.gmra.mxu1 %vm293_vm1, %v10022_v47  ;;  %v1963_v44 = vadd.f32 %v1962_v20, %v1664_v22  ;;  %v1384_v56 = vadd.f32 %v12283_v50, %v10997_v11  ;;  %v986_v22 = vadd.f32 %v12312_v28, %v10995_v10 }
 0x42c   :  { %v3841_v19 = vadd.f32 %v3840_v18, %v3698_v46  ;;  %v3974_v32 = vadd.f32 %v3973_v58, %v3699_v6  ;;  %9246 = vmatmul.msk.f32.gmra.mxu2 %vm293_vm1, %v10275_v36  ;;  %9375 = vmatmul.msk.f32.gmra.mxu3 %vm293_vm1, %v10275_v36  ;;  %v980_v18 = vadd.f32 %v12252_v7, %v10995_v10  ;;  %v10278_v7 = vunpack.c.l.bf16 %v12969_v31 }
 0x42d   :  { %v1831_v58 = vadd.f32 %v1830_v40, %v1665_v14  ;;  %v1964_v24 = vadd.f32 %v1963_v44, %v1666_v21  ;;  %v1672_v6 = vmax.f32 %v1381_v25, 0.0  ;;  %v1673_v50 = vmax.f32 %v983_v9, 0.0 }
 0x42e   :  { %v1671_v3 = vmax.f32 %v980_v18, 0.0  ;;  %v1387_v28 = vadd.f32 %v12314_v30, %v10997_v11  ;;  %v989_v35 = vadd.f32 %v12343_v54, %v10995_v10  ;;  %v1390_v40 = vadd.f32 %v12345_v34, %v10997_v11 }
 0x42f   :  { %v3030_v16 = vpop.f32.mrf.mxu2  ;;  %v3431_v37 = vpop.f32.mrf.mxu3  ;;  %v1832_v36 = vadd.f32 %v1831_v58, %v1667_v0  ;;  %v1965_v57 = vadd.f32 %v1964_v24, %v1668_v48  ;;  %v992_v21 = vadd.f32 %v12374_v43, %v10995_v10  ;;  %v10026_v44 = vunpack.c.l.bf16 %v12996_v33 }
 0x430   :  { %v3031_v5 = vadd.f32 %v3030_v16, %v10995_v10  ;;  %v3432_v47 = vadd.f32 %v3431_v37, %v10997_v11  ;;  %v12978_v2 = vpop.f32.mrf.mxu0  ;;  %v12980_v23 = vpop.f32.mrf.mxu1  ;;  %v1676_v34 = vmax.f32 %v1387_v28, 0.0  ;;  %v1677_v37 = vmax.f32 %v989_v35, 0.0 }
 0x431   :  { %v1833_v46 = vadd.f32 %v1832_v36, %v1669_v17  ;;  %v1966_v61 = vadd.f32 %v1965_v57, %v1670_v12  ;;  %v10279_v17 = vunpack.c.h.bf16 %v12969_v31  ;;  %v1393_v43 = vadd.f32 %v12376_v39, %v10997_v11 }
 0x432   :  { %v3700_v63 = vmax.f32 %v3031_v5, 0.0  ;;  %v3701_v13 = vmax.f32 %v3432_v47, 0.0  ;;  %v995_v25 = vadd.f32 %v12403_v8, %v10995_v10  ;;  %v1678_v24 = vmax.f32 %v1390_v40, 0.0 }
 0x433   :  { %8862 = vmatmul.msk.f32.gmra.mxu0 %vm293_vm1, %v10023_v26  ;;  %8991 = vmatmul.msk.f32.gmra.mxu1 %vm293_vm1, %v10023_v26  ;;  %v1834_v20 = vadd.f32 %v1833_v46, %v1671_v3  ;;  %v1967_v18 = vadd.f32 %v1966_v61, %v1672_v6  ;;  %v1679_v36 = vmax.f32 %v992_v21, 0.0  ;;  %v1396_v12 = vadd.f32 %v12405_v55, %v10997_v11  ;;  %v10718_v55 = vld [vmem:[%s15524_s0 + $0x618] sm:$0xff]  }
 0x434   :  { %v3842_v4 = vadd.f32 %v3841_v19, %v3700_v63  ;;  %v3975_v14 = vadd.f32 %v3974_v32, %v3701_v13  ;;  %9247 = vmatmul.msk.f32.gmra.mxu2 %vm293_vm1, %v10278_v7  ;;  %9376 = vmatmul.msk.f32.gmra.mxu3 %vm293_vm1, %v10278_v7  ;;  %v1674_v19 = vmax.f32 %v1384_v56, 0.0  ;;  %v1675_v32 = vmax.f32 %v986_v22, 0.0 }
 0x435   :  { %v1835_v16 = vadd.f32 %v1834_v20, %v1673_v50  ;;  %v998_v31 = vadd.f32 %v12432_v27, %v10995_v10  ;;  %v1680_v56 = vmax.f32 %v1393_v43, 0.0  ;;  %v1681_v63 = vmax.f32 %v995_v25, 0.0 }
 0x436   :  { %v1968_v26 = vadd.f32 %v1967_v18, %v1674_v19  ;;  %v1399_v13 = vadd.f32 %v12434_v60, %v10997_v11  ;;  %v1001_v27 = vadd.f32 %v12463_v29, %v10995_v10  ;;  %v1402_v28 = vadd.f32 %v12465_v49, %v10997_v11 }
 0x437   :  { %v3033_v0 = vpop.f32.mrf.mxu2  ;;  %v3434_v59 = vpop.f32.mrf.mxu3  ;;  %v1836_v7 = vadd.f32 %v1835_v16, %v1675_v32  ;;  %v1683_v50 = vmax.f32 %v998_v31, 0.0  ;;  %v10282_v60 = vunpack.c.l.bf16 %v10718_v55  ;;  %v1004_v29 = vadd.f32 %v12494_v38, %v10995_v10  ;;  %v10655_v38 = vld [vmem:[%s15524_s0 + $0x420] sm:$0xff]  }
 0x438   :  { %v3034_v30 = vadd.f32 %v3033_v0, %v10995_v10  ;;  %v3435_v58 = vadd.f32 %v3434_v59, %v10997_v11  ;;  %v13009_v54 = vpop.f32.mrf.mxu0  ;;  %v13011_v48 = vpop.f32.mrf.mxu1  ;;  %v1969_v8 = vadd.f32 %v1968_v26, %v1676_v34  ;;  %v1684_v32 = vmax.f32 %v1399_v13, 0.0  ;;  %v15829_v13 = vld [vmem:[#allocation9_spill] sm:$0xff] }
 0x439   :  { %v1837_v3 = vadd.f32 %v1836_v7, %v1677_v37  ;;  %v1685_v40 = vmax.f32 %v1001_v27, 0.0  ;;  %v1007_v21 = vadd.f32 %v12525_v51, %v10995_v10  ;;  %v1686_v59 = vmax.f32 %v1402_v28, 0.0  ;;  %v15830_v28 = vld [vmem:[#allocation10_spill] sm:$0xff] }
 0x43a   :  { %v3702_v5 = vmax.f32 %v3034_v30, 0.0  ;;  %v3703_v47 = vmax.f32 %v3435_v58, 0.0  ;;  %v1970_v57 = vadd.f32 %v1969_v8, %v1678_v24  ;;  %v1010_v51 = vadd.f32 %v12554_v1, %v10995_v10 }
 0x43b   :  { %8863 = vmatmul.msk.f32.gmra.mxu0 %vm293_vm1, %v10026_v44  ;;  %8992 = vmatmul.msk.f32.gmra.mxu1 %vm293_vm1, %v10026_v44  ;;  %v1838_v22 = vadd.f32 %v1837_v3, %v1679_v36  ;;  %v1687_v44 = vmax.f32 %v1004_v29, 0.0  ;;  %v1411_v16 = vadd.f32 %v12556_v53, %v10997_v11  ;;  %v1013_v34 = vadd.f32 %v12583_v41, %v10995_v10  ;;  %v15826_v36 = vld [vmem:[#allocation6_spill] sm:$0xff] }
 0x43c   :  { %v13024_v39 = vadd.f32 %v3842_v4, %v3702_v5  ;;  %v13026_v9 = vadd.f32 %v3975_v14, %v3703_v47  ;;  %9248 = vmatmul.msk.f32.gmra.mxu2 %vm293_vm1, %v10279_v17  ;;  %9377 = vmatmul.msk.f32.gmra.mxu3 %vm293_vm1, %v10279_v17  ;;  %v10027_v4 = vunpack.c.h.bf16 %v12996_v33  ;;  %v1682_v14 = vmax.f32 %v1396_v12, 0.0  ;;  %v15827_v12 = vld [vmem:[#allocation7_spill] sm:$0xff] }
 0x43d   :  { %v1971_v20 = vadd.f32 %v1970_v57, %v1680_v56  ;;  %v1839_v19 = vadd.f32 %v1838_v22, %v1681_v63  ;;  %v1405_v33 = vadd.f32 %v12496_v42, %v10997_v11  ;;  %v1408_v42 = vadd.f32 %v12527_v62, %v10997_v11  ;;  %v15828_v63 = vld [vmem:[#allocation8_spill] sm:$0xff] }
 0x43e   :  { %v1689_v17 = vmax.f32 %v1007_v21, 0.0  ;;  %v10030_v26 = vunpack.c.l.bf16 %v10655_v38  ;;  %v10283_v1 = vunpack.c.h.bf16 %v10718_v55  ;;  %v1691_v24 = vmax.f32 %v1010_v51, 0.0 }
 0x43f   :  { %v13037_v46 = vpop.f32.mrf.mxu2  ;;  %v13039_v6 = vpop.f32.mrf.mxu3  ;;  %v1972_v49 = vadd.f32 %v1971_v20, %v1682_v14  ;;  %v1840_v0 = vadd.f32 %v1839_v19, %v1683_v50  ;;  %v1688_v58 = vmax.f32 %v1405_v33, 0.0  ;;  %v1690_v7 = vmax.f32 %v1408_v42, 0.0  ;;  %v10719_v14 = vld [vmem:[%s15524_s0 + $0x620] sm:$0xff]  }
 0x440   :  { %v13044_v35 = vpop.f32.mrf.mxu0  ;;  %v13046_v61 = vpop.f32.mrf.mxu1  ;;  %v1414_v53 = vadd.f32 %v15826_v36, %v10997_v11  ;;  %v1016_v41 = vadd.f32 %v15827_v12, %v10995_v10  ;;  %v1692_v3 = vmax.f32 %v1411_v16, 0.0  ;;  %v1693_v56 = vmax.f32 %v1013_v34, 0.0  ;;  %v15831_v20 = vld [vmem:[#allocation11_spill] sm:$0xff] }
 0x441   :  { %v1973_v18 = vadd.f32 %v1972_v49, %v1684_v32  ;;  %v1841_v30 = vadd.f32 %v1840_v0, %v1685_v40  ;;  %v1417_v55 = vadd.f32 %v15828_v63, %v10997_v11  ;;  %v1019_v27 = vadd.f32 %v15829_v13, %v10995_v10 }
 0x442   :  { %v1695_v50 = vmax.f32 %v1016_v41, 0.0  ;;  %v1022_v29 = vadd.f32 %v15831_v20, %v10995_v10  ;;  %v10031_v21 = vunpack.c.h.bf16 %v10655_v38  ;;  %v15836_v41 = vld [vmem:[#allocation16_spill] sm:$0xff] }
 0x443   :  { %8864 = vmatmul.msk.f32.gmra.mxu0 %vm293_vm1, %v10027_v4  ;;  %8993 = vmatmul.msk.f32.gmra.mxu1 %vm293_vm1, %v10027_v4  ;;  %v1974_v25 = vadd.f32 %v1973_v18, %v1686_v59  ;;  %v1842_v47 = vadd.f32 %v1841_v30, %v1687_v44  ;;  %v1694_v4 = vmax.f32 %v1414_v53, 0.0  ;;  %v1696_v49 = vmax.f32 %v1417_v55, 0.0  ;;  %v15832_v59 = vld [vmem:[#allocation12_spill] sm:$0xff] }
 0x444   :  { %9249 = vmatmul.msk.f32.gmra.mxu2 %vm293_vm1, %v10282_v60  ;;  %9378 = vmatmul.msk.f32.gmra.mxu3 %vm293_vm1, %v10282_v60  ;;  %v1420_v60 = vadd.f32 %v15830_v28, %v10997_v11  ;;  %v1697_v0 = vmax.f32 %v1019_v27, 0.0  ;;  %v1423_v44 = vadd.f32 %v15832_v59, %v10997_v11  ;;  %v10286_v18 = vunpack.c.l.bf16 %v10719_v14  ;;  %v10656_v53 = vld [vmem:[%s15524_s0 + $0x428] sm:$0xff]   ;;  %v15838_v27 = vld [vmem:[#allocation18_spill] sm:$0xff] }
 0x445   :  { %v1975_v31 = vadd.f32 %v1974_v25, %v1688_v58  ;;  %v1843_v8 = vadd.f32 %v1842_v47, %v1689_v17  ;;  %v15833_v58 = vld [vmem:[#allocation13_spill] sm:$0xff]  ;;  %v15834_v25 = vld [vmem:[#allocation14_spill] sm:$0xff]  ;;  %v15840_v59 = vld [vmem:[#allocation20_spill] sm:$0xff] }
 0x446   :  { %v1025_v17 = vadd.f32 %v15833_v58, %v10995_v10  ;;  %v1698_v34 = vmax.f32 %v1420_v60, 0.0  ;;  %v1426_v38 = vadd.f32 %v15834_v25, %v10997_v11  ;;  %v1700_v36 = vmax.f32 %v1423_v44, 0.0 }
 0x447   :  { %v13069_v37 = vpop.f32.mrf.mxu2  ;;  %v13071_v43 = vpop.f32.mrf.mxu3  ;;  %v1976_v57 = vadd.f32 %v1975_v31, %v1690_v7  ;;  %v1844_v22 = vadd.f32 %v1843_v8, %v1691_v24  ;;  %v1429_v31 = vadd.f32 %v15836_v41, %v10997_v11  ;;  %v15837_v8 = vld [vmem:[#allocation17_spill] sm:$0xff]  ;;  %v10034_v60 = vunpack.c.l.bf16 %v10656_v53 }
 0x448   :  { %v13073_v62 = vpop.f32.mrf.mxu0  ;;  %v13075_v5 = vpop.f32.mrf.mxu1  ;;  %v1701_v12 = vmax.f32 %v1025_v17, 0.0  ;;  %v1702_v55 = vmax.f32 %v1426_v38, 0.0  ;;  %v1435_v44 = vadd.f32 %v15840_v59, %v10997_v11 }
 0x449   :  { %v1977_v19 = vadd.f32 %v1976_v57, %v1692_v3  ;;  %v1845_v32 = vadd.f32 %v1844_v22, %v1693_v56  ;;  %v1031_v3 = vadd.f32 %v15837_v8, %v10995_v10  ;;  %v1432_v57 = vadd.f32 %v15838_v27, %v10997_v11  ;;  %v15839_v22 = vld [vmem:[#allocation19_spill] sm:$0xff]  ;;  %v15845_v27 = vld [vmem:[#allocation25_spill] sm:$0xff] }
 0x44b   :  { %8865 = vmatmul.msk.f32.gmra.mxu0 %vm293_vm1, %v10030_v26  ;;  %8994 = vmatmul.msk.f32.gmra.mxu1 %vm293_vm1, %v10030_v26  ;;  %v1978_v30 = vadd.f32 %v1977_v19, %v1694_v4  ;;  %v1846_v16 = vadd.f32 %v1845_v32, %v1695_v50  ;;  %v1699_v26 = vmax.f32 %v1022_v29, 0.0  ;;  %v1034_v4 = vadd.f32 %v15839_v22, %v10995_v10  ;;  %v15846_v22 = vld [vmem:[#allocation26_spill] sm:$0xff] }
 0x44c   :  { %9250 = vmatmul.msk.f32.gmra.mxu2 %vm293_vm1, %v10283_v1  ;;  %9379 = vmatmul.msk.f32.gmra.mxu3 %vm293_vm1, %v10283_v1  ;;  %v15835_v1 = vld [vmem:[#allocation15_spill] sm:$0xff]  ;;  %v10287_v32 = vunpack.c.h.bf16 %v10719_v14  ;;  %v1706_v17 = vmax.f32 %v1432_v57, 0.0  ;;  %v15842_v14 = vld [vmem:[#allocation22_spill] sm:$0xff]  ;;  %v1444_v57 = vadd.f32 %v15845_v27, %v10997_v11 }
 0x44d   :  { %v1028_v47 = vadd.f32 %v15835_v1, %v10995_v10  ;;  %v1979_v7 = vadd.f32 %v1978_v30, %v1696_v49  ;;  %v1847_v24 = vadd.f32 %v1846_v16, %v1697_v0  ;;  %v1704_v49 = vmax.f32 %v1429_v31, 0.0 }
 0x44e   :  { %v1705_v0 = vmax.f32 %v1031_v3, 0.0  ;;  %v1037_v30 = vadd.f32 %v12827_v52, %v10995_v10  ;;  %v1707_v16 = vmax.f32 %v1034_v4, 0.0  ;;  %v1040_v25 = vadd.f32 %v15842_v14, %v10995_v10 }
 0x44f   :  { %v13096_v40 = vpop.f32.mrf.mxu2  ;;  %v13098_v33 = vpop.f32.mrf.mxu3  ;;  %v1980_v56 = vadd.f32 %v1979_v7, %v1698_v34  ;;  %v1848_v63 = vadd.f32 %v1847_v24, %v1699_v26  ;;  %v1703_v13 = vmax.f32 %v1028_v47, 0.0  ;;  %v15841_v34 = vld [vmem:[#allocation21_spill] sm:$0xff]  ;;  %v1708_v52 = vmax.f32 %v1435_v44, 0.0  ;;  %v15843_v47 = vld [vmem:[#allocation23_spill] sm:$0xff] }
 0x450   :  { %v13102_v42 = vpop.f32.mrf.mxu0  ;;  %v13104_v51 = vpop.f32.mrf.mxu1  ;;  %v1438_v26 = vadd.f32 %v15841_v34, %v10997_v11  ;;  %v1441_v7 = vadd.f32 %v15843_v47, %v10997_v11  ;;  %v10720_v24 = vld [vmem:[%s15524_s0 + $0x628] sm:$0xff]   ;;  %v1046_v4 = vadd.f32 %v15846_v22, %v10995_v10  ;;  %v15847_v44 = vld [vmem:[#allocation27_spill] sm:$0xff]  ;;  %v1450_v34 = vadd.f32 %v12949_v15, %v10997_v11 }
 0x451   :  { %v1981_v20 = vadd.f32 %v1980_v56, %v1700_v36  ;;  %v1709_v36 = vmax.f32 %v1037_v30, 0.0  ;;  %v1052_v14 = vadd.f32 %v12978_v2, %v10995_v10  ;;  %v10291_v2 = vunpack.c.h.bf16 %v10720_v24 }
 0x452   :  { %v1710_v3 = vmax.f32 %v1438_v26, 0.0  ;;  %v13179_v26 = vld [vmem:[%s15524_s0 + $0x430] sm:$0xff]   ;;  %v3037_v22 = vadd.f32 %v13037_v46, %v10995_v10 }
 0x453   :  { %8866 = vmatmul.msk.f32.gmra.mxu0 %vm293_vm1, %v10031_v21  ;;  %8995 = vmatmul.msk.f32.gmra.mxu1 %vm293_vm1, %v10031_v21  ;;  %v1849_v21 = vadd.f32 %v1848_v63, %v1701_v12  ;;  %v15844_v12 = vld [vmem:[#allocation24_spill] sm:$0xff] }
 0x454   :  { %9251 = vmatmul.msk.f32.gmra.mxu2 %vm293_vm1, %v10286_v18  ;;  %9380 = vmatmul.msk.f32.gmra.mxu3 %vm293_vm1, %v10286_v18  ;;  %v1982_v18 = vadd.f32 %v1981_v20, %v1702_v55  ;;  %v1043_v41 = vadd.f32 %v15844_v12, %v10995_v10  ;;  %v10035_v55 = vunpack.c.h.bf16 %v10656_v53  ;;  %v1049_v53 = vadd.f32 %v12947_v45, %v10995_v10 }
 0x455   :  { %v1850_v58 = vadd.f32 %v1849_v21, %v1703_v13  ;;  %v1711_v13 = vmax.f32 %v1040_v25, 0.0 }
 0x456   :  { %v1983_v38 = vadd.f32 %v1982_v18, %v1704_v49  ;;  %v1712_v49 = vmax.f32 %v1441_v7, 0.0  ;;  %v1713_v59 = vmax.f32 %v1043_v41, 0.0  ;;  %v1447_v18 = vadd.f32 %v15847_v44, %v10997_v11 }
 0x457   :  { %v13127_v50 = vpop.f32.mrf.mxu2  ;;  %v13129_v28 = vpop.f32.mrf.mxu3  ;;  %v1851_v1 = vadd.f32 %v1850_v58, %v1705_v0  ;;  %v10038_v7 = vunpack.c.l.bf16 %v13179_v26  ;;  %v1718_v41 = vmax.f32 %v1450_v34, 0.0 }
 0x458   :  { %v13131_v29 = vpop.f32.mrf.mxu0  ;;  %v13133_v19 = vpop.f32.mrf.mxu1  ;;  %v1984_v31 = vadd.f32 %v1983_v38, %v1706_v17  ;;  %v1714_v17 = vmax.f32 %v1444_v57, 0.0  ;;  %v1716_v38 = vmax.f32 %v1447_v18, 0.0 }
 0x459   :  { %v1852_v8 = vadd.f32 %v1851_v1, %v1707_v16  ;;  %v1715_v16 = vmax.f32 %v1046_v4, 0.0  ;;  %v1717_v1 = vmax.f32 %v1049_v53, 0.0  ;;  %v3438_v4 = vadd.f32 %v13039_v6, %v10997_v11  ;;  %v13213_v6 = vld [vmem:[%s15524_s0 + $0x630] sm:$0xff]  }
 0x45a   :  { %v1985_v21 = vadd.f32 %v1984_v31, %v1708_v52  ;;  %v1453_v52 = vadd.f32 %v12980_v23, %v10997_v11  ;;  %v1456_v23 = vadd.f32 %v13011_v48, %v10997_v11  ;;  %v1459_v48 = vadd.f32 %v13046_v61, %v10997_v11 }
 0x45b   :  { %8867 = vmatmul.msk.f32.gmra.mxu0 %vm293_vm1, %v10034_v60  ;;  %8996 = vmatmul.msk.f32.gmra.mxu1 %vm293_vm1, %v10034_v60  ;;  %v1853_v0 = vadd.f32 %v1852_v8, %v1709_v36  ;;  %v3704_v61 = vmax.f32 %v3037_v22, 0.0 }
 0x45c   :  { %9252 = vmatmul.msk.f32.gmra.mxu2 %vm293_vm1, %v10287_v32  ;;  %9381 = vmatmul.msk.f32.gmra.mxu3 %vm293_vm1, %v10287_v32  ;;  %v10290_v32 = vunpack.c.l.bf16 %v10720_v24  ;;  %v1986_v30 = vadd.f32 %v1985_v21, %v1710_v3  ;;  %v1719_v3 = vmax.f32 %v1052_v14, 0.0  ;;  %v1720_v57 = vmax.f32 %v1453_v52, 0.0 }
 0x45d   :  { %v1854_v58 = vadd.f32 %v1853_v0, %v1711_v13  ;;  %v1722_v21 = vmax.f32 %v1456_v23, 0.0  ;;  %v1462_v0 = vadd.f32 %v13075_v5, %v10997_v11 }
 0x45e   :  { %v1987_v45 = vadd.f32 %v1986_v30, %v1712_v49  ;;  %v1061_v49 = vadd.f32 %v13073_v62, %v10995_v10  ;;  %v10039_v30 = vunpack.c.h.bf16 %v13179_v26  ;;  %v1465_v62 = vadd.f32 %v13104_v51, %v10997_v11 }
 0x45f   :  { %v13154_v56 = vpop.f32.mrf.mxu2  ;;  %v13156_v63 = vpop.f32.mrf.mxu3  ;;  %v1855_v25 = vadd.f32 %v1854_v58, %v1713_v59  ;;  %v3705_v59 = vmax.f32 %v3438_v4, 0.0  ;;  %v10810_v58 = vmov 0.0   ;;  %v3441_v26 = vadd.f32 %v13071_v43, %v10997_v11 }
 0x460   :  { %v13162_v60 = vpop.f32.mrf.mxu0  ;;  %v13164_v20 = vpop.f32.mrf.mxu1  ;;  %v1988_v36 = vadd.f32 %v1987_v45, %v1714_v17  ;;  %25 = vst [vmem:[#allocation2] sm:$0xff] %v10810_v58  ;;  %v1724_v17 = vmax.f32 %v1459_v48, 0.0  ;;  %v10294_v45 = vunpack.c.l.bf16 %v13213_v6  ;;  %v1726_v52 = vmax.f32 %v1462_v0, 0.0 }
 0x461   :  { %v1856_v12 = vadd.f32 %v1855_v25, %v1715_v16  ;;  %v1064_v16 = vadd.f32 %v13102_v42, %v10995_v10  ;;  %v1067_v42 = vadd.f32 %v13131_v29, %v10995_v10  ;;  %v1468_v51 = vadd.f32 %v13133_v19, %v10997_v11 }
 0x462   :  { %v1989_v13 = vadd.f32 %v1988_v36, %v1716_v38  ;;  %v3040_v38 = vadd.f32 %v13069_v37, %v10995_v10  ;;  %v3977_v36 = vadd.f32 %v13026_v9, %v3705_v59  ;;  %v3043_v43 = vadd.f32 %v13096_v40, %v10995_v10 }
 0x463   :  { %8868 = vmatmul.msk.f32.gmra.mxu0 %vm293_vm1, %v10035_v55  ;;  %8997 = vmatmul.msk.f32.gmra.mxu1 %vm293_vm1, %v10035_v55  ;;  %v1055_v55 = vadd.f32 %v13009_v54, %v10995_v10  ;;  %v1857_v27 = vadd.f32 %v1856_v12, %v1717_v1  ;;  %v1725_v1 = vmax.f32 %v1061_v49, 0.0  ;;  %v3707_v29 = vmax.f32 %v3441_v26, 0.0 }
 0x464   :  { %9253 = vmatmul.msk.f32.gmra.mxu2 %vm293_vm1, %v10290_v32  ;;  %9382 = vmatmul.msk.f32.gmra.mxu3 %vm293_vm1, %v10290_v32  ;;  %v1058_v32 = vadd.f32 %v13044_v35, %v10995_v10  ;;  %v1990_v54 = vadd.f32 %v1989_v13, %v1718_v41  ;;  %v1727_v41 = vmax.f32 %v1064_v16, 0.0  ;;  %v3706_v9 = vmax.f32 %v3040_v38, 0.0 }
 0x465   :  { %v1858_v24 = vadd.f32 %v1857_v27, %v1719_v3  ;;  %v1721_v46 = vmax.f32 %v1055_v55, 0.0  ;;  %v1070_v19 = vadd.f32 %v13162_v60, %v10995_v10  ;;  %v1471_v3 = vadd.f32 %v13164_v20, %v10997_v11 }
 0x466   :  { %v1991_v35 = vadd.f32 %v1990_v54, %v1720_v57  ;;  %v1723_v44 = vmax.f32 %v1058_v32, 0.0  ;;  %v1729_v23 = vmax.f32 %v1067_v42, 0.0  ;;  %v1730_v13 = vmax.f32 %v1468_v51, 0.0 }
 0x467   :  { %v13185_v15 = vpop.f32.mrf.mxu2  ;;  %v13187_v47 = vpop.f32.mrf.mxu3  ;;  %v1859_v14 = vadd.f32 %v1858_v24, %v1721_v46  ;;  %v3444_v27 = vadd.f32 %v13098_v33, %v10997_v11  ;;  %v3708_v20 = vmax.f32 %v3043_v43, 0.0  ;;  %v1731_v33 = vmax.f32 %v1070_v19, 0.0 }
 0x468   :  { %v13190_v31 = vpop.f32.mrf.mxu0  ;;  %v13192_v8 = vpop.f32.mrf.mxu1  ;;  %v1992_v25 = vadd.f32 %v1991_v35, %v1722_v21  ;;  %v10295_v21 = vunpack.c.h.bf16 %v13213_v6  ;;  %v1732_v35 = vmax.f32 %v1471_v3, 0.0  ;;  %v3046_v0 = vadd.f32 %v13127_v50, %v10995_v10 }
 0x469   :  { %v1860_v12 = vadd.f32 %v1859_v14, %v1723_v44  ;;  %v1073_v57 = vadd.f32 %v13190_v31, %v10995_v10  ;;  %v1474_v22 = vadd.f32 %v13192_v8, %v10997_v11  ;;  %v3978_v6 = vadd.f32 %v3977_v36, %v3707_v29 }
 0x46a   :  { %v1993_v37 = vadd.f32 %v1992_v25, %v1724_v17  ;;  %v13281_v25 = vld [vmem:[%s15524_s0 + $0x638] sm:$0xff]   ;;  %v3710_v38 = vmax.f32 %v3046_v0, 0.0  ;;  %v3049_v26 = vadd.f32 %v13154_v56, %v10995_v10  ;;  %v3052_v43 = vadd.f32 %v13185_v15, %v10995_v10 }
 0x46b   :  { %8869 = vmatmul.msk.f32.gmra.mxu0 %vm293_vm1, %v10038_v7  ;;  %8998 = vmatmul.msk.f32.gmra.mxu1 %vm293_vm1, %v10038_v7  ;;  %v3844_v7 = vadd.f32 %v13024_v39, %v3704_v61  ;;  %v13248_v39 = vld [vmem:[%s15524_s0 + $0x438] sm:$0xff]   ;;  %v1861_v40 = vadd.f32 %v1860_v12, %v1725_v1  ;;  %v1733_v44 = vmax.f32 %v1073_v57, 0.0 }
 0x46c   :  { %9254 = vmatmul.msk.f32.gmra.mxu2 %vm293_vm1, %v10291_v2  ;;  %9383 = vmatmul.msk.f32.gmra.mxu3 %vm293_vm1, %v10291_v2  ;;  %v1728_v2 = vmax.f32 %v1465_v62, 0.0  ;;  %v1994_v55 = vadd.f32 %v1993_v37, %v1726_v52  ;;  %v10042_v60 = vunpack.c.l.bf16 %v13248_v39  ;;  %v3709_v62 = vmax.f32 %v3444_v27, 0.0 }
 0x46d   :  { %v1862_v54 = vadd.f32 %v1861_v40, %v1727_v41  ;;  %v3845_v8 = vadd.f32 %v3844_v7, %v3706_v9  ;;  %v10043_v1 = vunpack.c.h.bf16 %v13248_v39  ;;  %v3453_v41 = vadd.f32 %v13187_v47, %v10997_v11 }
 0x46e   :  { %v1995_v48 = vadd.f32 %v1994_v55, %v1728_v2  ;;  %v10298_v9 = vunpack.c.l.bf16 %v13281_v25  ;;  %v3979_v3 = vadd.f32 %v3978_v6, %v3709_v62  ;;  %v3712_v55 = vmax.f32 %v3049_v26, 0.0 }
 0x46f   :  { %v13219_v18 = vpop.f32.mrf.mxu2  ;;  %v13221_v53 = vpop.f32.mrf.mxu3  ;;  %v1863_v61 = vadd.f32 %v1862_v54, %v1729_v23  ;;  %v3846_v16 = vadd.f32 %v3845_v8, %v3708_v20  ;;  %v13306_v20 = vld [vmem:[%s15524_s0 + $0x440] sm:$0xff]   ;;  %v3714_v54 = vmax.f32 %v3052_v43, 0.0 }
 0x470   :  { %v1075_v34 = vpop.f32.mrf.mxu0  ;;  %v1476_v5 = vpop.f32.mrf.mxu1  ;;  %v1996_v59 = vadd.f32 %v1995_v48, %v1730_v13  ;;  %v3715_v48 = vmax.f32 %v3453_v41, 0.0  ;;  %v10046_v0 = vunpack.c.l.bf16 %v13306_v20 }
 0x471   :  { %v1076_v31 = vadd.f32 %v1075_v34, %v10995_v10  ;;  %v1477_v49 = vadd.f32 %v1476_v5, %v10997_v11  ;;  %v3447_v34 = vadd.f32 %v13129_v28, %v10997_v11  ;;  %v1864_v50 = vadd.f32 %v1863_v61, %v1731_v33 }
 0x472   :  { %v1997_v5 = vadd.f32 %v1996_v59, %v1732_v35  ;;  %v3450_v28 = vadd.f32 %v13156_v63, %v10997_v11  ;;  %v3847_v40 = vadd.f32 %v3846_v16, %v3710_v38  ;;  %v10299_v61 = vunpack.c.h.bf16 %v13281_v25 }
 0x473   :  { %8870 = vmatmul.msk.f32.gmra.mxu0 %vm293_vm1, %v10039_v30  ;;  %8999 = vmatmul.msk.f32.gmra.mxu1 %vm293_vm1, %v10039_v30  ;;  %v1734_v30 = vmax.f32 %v1474_v22, 0.0  ;;  %v1736_v14 = vmax.f32 %v1477_v49, 0.0  ;;  %v1865_v52 = vadd.f32 %v1864_v50, %v1733_v44  ;;  %v3711_v37 = vmax.f32 %v3447_v34, 0.0 }
 0x474   :  { %9255 = vmatmul.msk.f32.gmra.mxu2 %vm293_vm1, %v10294_v45  ;;  %9384 = vmatmul.msk.f32.gmra.mxu3 %vm293_vm1, %v10294_v45  ;;  %v1735_v45 = vmax.f32 %v1076_v31, 0.0  ;;  %v3713_v23 = vmax.f32 %v3450_v28, 0.0  ;;  %v3055_v22 = vadd.f32 %v13219_v18, %v10995_v10 }
 0x475   :  { %v1998_v42 = vadd.f32 %v1997_v5, %v1734_v30  ;;  %v3980_v47 = vadd.f32 %v3979_v3, %v3711_v37 }
 0x476   :  { %v1866_v63 = vadd.f32 %v1865_v52, %v1735_v45  ;;  %v3716_v59 = vmax.f32 %v3055_v22, 0.0  ;;  %v10723_v52 = vld [vmem:[%s15524_s0 + $0x640] sm:$0xff]  }
 0x477   :  { %v13260_v4 = vpop.f32.mrf.mxu2  ;;  %v13262_v32 = vpop.f32.mrf.mxu3  ;;  %v1999_v29 = vadd.f32 %v1998_v42, %v1736_v14  ;;  %v3981_v33 = vadd.f32 %v3980_v47, %v3713_v23 }
 0x478   :  { %v1078_v24 = vpop.f32.mrf.mxu0  ;;  %v1479_v46 = vpop.f32.mrf.mxu1  ;;  %v3058_v18 = vadd.f32 %v13260_v4, %v10995_v10 }
 0x479   :  { %v1079_v58 = vadd.f32 %v1078_v24, %v10995_v10  ;;  %v1480_v17 = vadd.f32 %v1479_v46, %v10997_v11 }
 0x47a   :  { %v3718_v34 = vmax.f32 %v3058_v18, 0.0 }
 0x47b   :  { %8871 = vmatmul.msk.f32.gmra.mxu0 %vm293_vm1, %v10042_v60  ;;  %9000 = vmatmul.msk.f32.gmra.mxu1 %vm293_vm1, %v10042_v60  ;;  %v1737_v51 = vmax.f32 %v1079_v58, 0.0  ;;  %v1738_v7 = vmax.f32 %v1480_v17, 0.0  ;;  %v3456_v60 = vadd.f32 %v13221_v53, %v10997_v11  ;;  %v3459_v53 = vadd.f32 %v13262_v32, %v10997_v11 }
 0x47c   :  { %9256 = vmatmul.msk.f32.gmra.mxu2 %vm293_vm1, %v10295_v21  ;;  %9385 = vmatmul.msk.f32.gmra.mxu3 %vm293_vm1, %v10295_v21  ;;  %v3848_v21 = vadd.f32 %v3847_v40, %v3712_v55  ;;  %v3982_v32 = vadd.f32 %v3981_v33, %v3715_v48 }
 0x47d   :  { %v1867_v13 = vadd.f32 %v1866_v63, %v1737_v51  ;;  %v2000_v27 = vadd.f32 %v1999_v29, %v1738_v7  ;;  %v3717_v44 = vmax.f32 %v3456_v60, 0.0  ;;  %v3719_v50 = vmax.f32 %v3459_v53, 0.0  ;;  %v1741_v60 = vld [vmem:[#allocation2] ss:$4 sm:$0x3] }
 0x47e   :  { %v3849_v6 = vadd.f32 %v3848_v21, %v3714_v54  ;;  %v10302_v63 = vunpack.c.l.bf16 %v10723_v52  ;;  %v15848_v21 = vmov 0 }
 0x47f   :  { %v3060_v36 = vpop.f32.mrf.mxu2  ;;  %v3461_v12 = vpop.f32.mrf.mxu3  ;;  %v3983_v26 = vadd.f32 %v3982_v32, %v3717_v44  ;;  %v10303_v44 = vunpack.c.h.bf16 %v10723_v52 }
 0x480   :  { %v1081_v2 = vpop.f32.mrf.mxu0  ;;  %v1482_v56 = vpop.f32.mrf.mxu1  ;;  %v3061_v30 = vadd.f32 %v3060_v36, %v10995_v10  ;;  %v3462_v58 = vadd.f32 %v3461_v12, %v10997_v11  ;;  %v3850_v38 = vadd.f32 %v3849_v6, %v3716_v59 }
 0x481   :  { %v1082_v39 = vadd.f32 %v1081_v2, %v10995_v10  ;;  %v1483_v19 = vadd.f32 %v1482_v56, %v10997_v11  ;;  %v3984_v36 = vadd.f32 %v3983_v26, %v3719_v50 }
 0x482   :  { %v3720_v28 = vmax.f32 %v3061_v30, 0.0  ;;  %v3851_v7 = vadd.f32 %v3850_v38, %v3718_v34  ;;  %v10724_v34 = vld [vmem:[%s15524_s0 + $0x648] sm:$0xff]  }
 0x483   :  { %v1739_v15 = vmax.f32 %v1082_v39, 0.0  ;;  %v1740_v57 = vmax.f32 %v1483_v19, 0.0  ;;  %8872 = vmatmul.msk.f32.gmra.mxu0 %vm293_vm1, %v10043_v1  ;;  %9001 = vmatmul.msk.f32.gmra.mxu1 %vm293_vm1, %v10043_v1  ;;  %v3721_v1 = vmax.f32 %v3462_v58, 0.0 }
 0x484   :  { %9257 = vmatmul.msk.f32.gmra.mxu2 %vm293_vm1, %v10298_v9  ;;  %9386 = vmatmul.msk.f32.gmra.mxu3 %vm293_vm1, %v10298_v9  ;;  %v10047_v9 = vunpack.c.h.bf16 %v13306_v20  ;;  %v3852_v29 = vadd.f32 %v3851_v7, %v3720_v28 }
 0x485   :  { %v1868_v24 = vadd.f32 %v1867_v13, %v1739_v15  ;;  %v2001_v46 = vadd.f32 %v2000_v27, %v1740_v57  ;;  %v3985_v39 = vadd.f32 %v3984_v36, %v3721_v1  ;;  %v2015_v13 = vlaneseq }
 0x487   :  { %v1869_v35 = vrot.slane %v1868_v24, 4  ;;  %v2002_v31 = vrot.slane %v2001_v46, 4  ;;  %v3063_v49 = vpop.f32.mrf.mxu2  ;;  %v3464_v8 = vpop.f32.mrf.mxu3  ;;  %vm13344_vm3 = vcmp.lt.s32.totalorder %v2015_v13, 256 }
 0x488   :  { %v13316_v17 = vpop.f32.mrf.mxu0  ;;  %v13318_v4 = vpop.f32.mrf.mxu1  ;;  %v3064_v5 = vadd.f32 %v3063_v49, %v10995_v10  ;;  %v3465_v45 = vadd.f32 %v3464_v8, %v10997_v11  ;;  %v15849_v21 = vsel %vm13344_vm3, 4294967295, %v15848_v21 }
 0x489   :  { %v1870_v16 = vadd.f32 %v1869_v35, %v1868_v24  ;;  %v2003_v62 = vadd.f32 %v2002_v31, %v2001_v46  ;;  %v10660_v24 = vld [vmem:[%s15524_s0 + $0x448] sm:$0xff]   ;;  %15850 = vst [vmem:[#allocation28_spill] sm:$0xff] %v15849_v21 }
 0x48a   :  { %v3722_v12 = vmax.f32 %v3064_v5, 0.0  ;;  %v3723_v37 = vmax.f32 %v3465_v45, 0.0  ;;  %v10050_v49 = vunpack.c.l.bf16 %v10660_v24 }
 0x48b   :  { %v1871_v14 = vrot.slane %v1870_v16, 2  ;;  %v2004_v25 = vrot.slane %v2003_v62, 2  ;;  %8873 = vmatmul.msk.f32.gmra.mxu0 %vm293_vm1, %v10046_v0  ;;  %9002 = vmatmul.msk.f32.gmra.mxu1 %vm293_vm1, %v10046_v0 }
 0x48c   :  { %9258 = vmatmul.msk.f32.gmra.mxu2 %vm293_vm1, %v10299_v61  ;;  %9387 = vmatmul.msk.f32.gmra.mxu3 %vm293_vm1, %v10299_v61  ;;  %v3853_v27 = vadd.f32 %v3852_v29, %v3722_v12  ;;  %v3986_v15 = vadd.f32 %v3985_v39, %v3723_v37  ;;  %v3727_v12 = vld [vmem:[#allocation2 + $0x1] ss:$4 sm:$0x3] }
 0x48d   :  { %v1872_v42 = vadd.f32 %v1871_v14, %v1870_v16  ;;  %v2005_v51 = vadd.f32 %v2004_v25, %v2003_v62  ;;  %v10051_v25 = vunpack.c.h.bf16 %v10660_v24  ;;  %v7999_v24 = vld [vmem:[%s15527_s3 + $0xf8] sm:$0xff] }
 0x48e   :  { %8030 = vmatpush.msra.mxu1 %v7999_v24 }
 0x48f   :  { %v1873_v43 = vrot.slane %v1872_v42, 1  ;;  %v2006_v41 = vrot.slane %v2005_v51, 1  ;;  %v3066_v2 = vpop.f32.mrf.mxu2  ;;  %v3467_v56 = vpop.f32.mrf.mxu3 }
 0x490   :  { %v3067_v19 = vadd.f32 %v3066_v2, %v10995_v10  ;;  %v3468_v3 = vadd.f32 %v3467_v56, %v10997_v11  ;;  %v13332_v40 = vpop.f32.mrf.mxu0  ;;  %v13334_v55 = vpop.f32.mrf.mxu1 }
 0x491   :  { %v2007_v23 = vadd.f32 %v2006_v41, %v2005_v51  ;;  %v1874_v22 = vadd.f32 %v1873_v43, %v1872_v42  ;;  %v10306_v42 = vunpack.c.l.bf16 %v10724_v34 }
 0x492   :  { %v3724_v57 = vmax.f32 %v3067_v19, 0.0  ;;  %v3725_v47 = vmax.f32 %v3468_v3, 0.0 }
 0x493   :  { %v2010_v20 = vrot.slane %v2007_v23, 7  ;;  %8874 = vmatmul.msk.f32.gmra.mxu0 %vm293_vm1, %v10047_v9  ;;  %9003 = vmatmul.msk.f32.gmra.mxu1 %vm293_vm1, %v10047_v9 }
 0x494   :  { %v3854_v54 = vadd.f32 %v3853_v27, %v3724_v57  ;;  %v3987_v48 = vadd.f32 %v3986_v15, %v3725_v47  ;;  %9259 = vmatmul.msk.f32.gmra.mxu2 %vm293_vm1, %v10302_v63  ;;  %9388 = vmatmul.msk.f32.gmra.mxu3 %vm293_vm1, %v10302_v63  ;;  %v10661_v63 = vld [vmem:[%s15524_s0 + $0x450] sm:$0xff]   ;;  %v10307_v57 = vunpack.c.h.bf16 %v10724_v34 }
 0x495   :  { %v2012_v46 = vsel %vm2011_vm2, %v1874_v22, %v2010_v20  ;;  %v10054_v3 = vunpack.c.l.bf16 %v10661_v63 }
 0x496   :  { %v2014_v33 = vadd.f32 %v2012_v46, %v1741_v60  ;;  %v3855_v18 = vrot.slane %v3854_v54, 4  ;;  %v3988_v53 = vrot.slane %v3987_v48, 4 }
 0x497   :  { %v6647_v35 = vpop.f32.mrf.mxu2  ;;  %v7048_v31 = vpop.f32.mrf.mxu3 }
 0x498   :  { %2019 = vst.msk [vmem:[#allocation2] ss:$4 sm:$0x3] %vm13344_vm3, %v2014_v33  ;;  %v3856_v8 = vadd.f32 %v3855_v18, %v3854_v54  ;;  %v3989_v0 = vadd.f32 %v3988_v53, %v3987_v48  ;;  %v13350_v61 = vpop.f32.mrf.mxu0  ;;  %v13352_v59 = vpop.f32.mrf.mxu1  ;;  %v6648_v16 = vadd.f32 %v6647_v35, %v10995_v10  ;;  %v7049_v62 = vadd.f32 %v7048_v31, %v10997_v11  ;;  %v7983_v54 = vld [vmem:[%s15527_s3 + $0x78] sm:$0xff]  ;;  %v10725_v48 = vld [vmem:[%s15524_s0 + $0x650] sm:$0xff]  }
 0x499   :  { %8010 = vmatpush.msra.mxu0 %v7983_v54  ;;  %v10055_v18 = vunpack.c.h.bf16 %v10661_v63 }
 0x49a   :  { %v3857_v30 = vrot.slane %v3856_v8, 2  ;;  %v3990_v58 = vrot.slane %v3989_v0, 2  ;;  %v7432_v51 = vmax.f32 %v6648_v16, 0.0  ;;  %v7433_v7 = vmax.f32 %v7049_v62, 0.0 }
 0x49b   :  { %8875 = vmatmul.msk.f32.gmra.mxu0 %vm293_vm1, %v10050_v49  ;;  %9004 = vmatmul.msk.f32.gmra.mxu1 %vm293_vm1, %v10050_v49 }
 0x49c   :  { %v3858_v6 = vadd.f32 %v3857_v30, %v3856_v8  ;;  %v3991_v32 = vadd.f32 %v3990_v58, %v3989_v0  ;;  %9260 = vmatmul.msk.f32.gmra.mxu2 %vm293_vm1, %v10303_v44  ;;  %9389 = vmatmul.msk.f32.gmra.mxu3 %vm293_vm1, %v10303_v44  ;;  %v10310_v8 = vunpack.c.l.bf16 %v10725_v48 }
 0x49e   :  { %v3859_v50 = vrot.slane %v3858_v6, 1  ;;  %v3992_v5 = vrot.slane %v3991_v32, 1 }
 0x49f   :  { %v6650_v45 = vpop.f32.mrf.mxu2  ;;  %v7051_v14 = vpop.f32.mrf.mxu3 }
 0x4a0   :  { %v3993_v38 = vadd.f32 %v3992_v5, %v3991_v32  ;;  %v6651_v26 = vadd.f32 %v6650_v45, %v10995_v10  ;;  %v7052_v28 = vadd.f32 %v7051_v14, %v10997_v11  ;;  %v13365_v1 = vpop.f32.mrf.mxu0  ;;  %v13367_v52 = vpop.f32.mrf.mxu1  ;;  %v3860_v36 = vadd.f32 %v3859_v50, %v3858_v6  ;;  %v10662_v6 = vld [vmem:[%s15524_s0 + $0x458] sm:$0xff]  }
 0x4a1   :  { %v10058_v62 = vunpack.c.l.bf16 %v10662_v6  ;;  %v10311_v14 = vunpack.c.h.bf16 %v10725_v48 }
 0x4a2   :  { %v3996_v37 = vrot.slane %v3993_v38, 7  ;;  %v7434_v43 = vmax.f32 %v6651_v26, 0.0  ;;  %v7435_v41 = vmax.f32 %v7052_v28, 0.0 }
 0x4a3   :  { %8876 = vmatmul.msk.f32.gmra.mxu0 %vm293_vm1, %v10051_v25  ;;  %9005 = vmatmul.msk.f32.gmra.mxu1 %vm293_vm1, %v10051_v25 }
 0x4a4   :  { %v3997_v2 = vsel %vm2011_vm2, %v3860_v36, %v3996_v37  ;;  %v7690_v56 = vadd.f32 %v7434_v43, %v7432_v51  ;;  %v7823_v9 = vadd.f32 %v7435_v41, %v7433_v7  ;;  %9261 = vmatmul.msk.f32.gmra.mxu2 %vm293_vm1, %v10306_v42  ;;  %9390 = vmatmul.msk.f32.gmra.mxu3 %vm293_vm1, %v10306_v42  ;;  %v10726_v42 = vld [vmem:[%s15524_s0 + $0x658] sm:$0xff]   ;;  %v10059_v36 = vunpack.c.h.bf16 %v10662_v6 }
 0x4a5   :  { %v3999_v29 = vadd.f32 %v3997_v2, %v3727_v12  ;;  %v10314_v2 = vunpack.c.l.bf16 %v10726_v42 }
 0x4a7   :  { %4000 = vst.msk [vmem:[#allocation2 + $0x1] ss:$4 sm:$0x3] %vm13344_vm3, %v3999_v29  ;;  %v6653_v39 = vpop.f32.mrf.mxu2  ;;  %v7054_v19 = vpop.f32.mrf.mxu3 }
 0x4a8   :  { %v6654_v23 = vadd.f32 %v6653_v39, %v10995_v10  ;;  %v7055_v13 = vadd.f32 %v7054_v19, %v10997_v11  ;;  %v13381_v27 = vpop.f32.mrf.mxu0  ;;  %v13383_v15 = vpop.f32.mrf.mxu1  ;;  %v10663_v39 = vld [vmem:[%s15524_s0 + $0x460] sm:$0xff]  }
 0x4aa   :  { %v7436_v47 = vmax.f32 %v6654_v23, 0.0  ;;  %v7437_v22 = vmax.f32 %v7055_v13, 0.0  ;;  %v10062_v23 = vunpack.c.l.bf16 %v10663_v39 }
 0x4ab   :  { %8877 = vmatmul.msk.f32.gmra.mxu0 %vm293_vm1, %v10054_v3  ;;  %9006 = vmatmul.msk.f32.gmra.mxu1 %vm293_vm1, %v10054_v3 }
 0x4ac   :  { %v7691_v60 = vadd.f32 %v7690_v56, %v7436_v47  ;;  %v7824_v20 = vadd.f32 %v7823_v9, %v7437_v22  ;;  %9262 = vmatmul.msk.f32.gmra.mxu2 %vm293_vm1, %v10307_v57  ;;  %9391 = vmatmul.msk.f32.gmra.mxu3 %vm293_vm1, %v10307_v57 }
 0x4af   :  { %v6656_v46 = vpop.f32.mrf.mxu2  ;;  %v7057_v33 = vpop.f32.mrf.mxu3 }
 0x4b0   :  { %v6657_v53 = vadd.f32 %v6656_v46, %v10995_v10  ;;  %v7058_v35 = vadd.f32 %v7057_v33, %v10997_v11  ;;  %v13400_v31 = vpop.f32.mrf.mxu0  ;;  %v13402_v49 = vpop.f32.mrf.mxu1  ;;  %v10727_v46 = vld [vmem:[%s15524_s0 + $0x660] sm:$0xff]  }
 0x4b2   :  { %v7438_v0 = vmax.f32 %v6657_v53, 0.0  ;;  %v7439_v44 = vmax.f32 %v7058_v35, 0.0  ;;  %v10063_v53 = vunpack.c.h.bf16 %v10663_v39 }
 0x4b3   :  { %8878 = vmatmul.msk.f32.gmra.mxu0 %vm293_vm1, %v10055_v18  ;;  %9007 = vmatmul.msk.f32.gmra.mxu1 %vm293_vm1, %v10055_v18 }
 0x4b4   :  { %v7692_v30 = vadd.f32 %v7691_v60, %v7438_v0  ;;  %v7825_v58 = vadd.f32 %v7824_v20, %v7439_v44  ;;  %9263 = vmatmul.msk.f32.gmra.mxu2 %vm293_vm1, %v10310_v8  ;;  %9392 = vmatmul.msk.f32.gmra.mxu3 %vm293_vm1, %v10310_v8  ;;  %v10315_v60 = vunpack.c.h.bf16 %v10726_v42  ;;  %v10319_v42 = vunpack.c.h.bf16 %v10727_v46 }
 0x4b7   :  { %v6659_v32 = vpop.f32.mrf.mxu2  ;;  %v7060_v16 = vpop.f32.mrf.mxu3 }
 0x4b8   :  { %v6660_v34 = vadd.f32 %v6659_v32, %v10995_v10  ;;  %v7061_v50 = vadd.f32 %v7060_v16, %v10997_v11  ;;  %v13413_v5 = vpop.f32.mrf.mxu0  ;;  %v13415_v45 = vpop.f32.mrf.mxu1 }
 0x4ba   :  { %v7440_v25 = vmax.f32 %v6660_v34, 0.0  ;;  %v7441_v38 = vmax.f32 %v7061_v50, 0.0 }
 0x4bb   :  { %8879 = vmatmul.msk.f32.gmra.mxu0 %vm293_vm1, %v10058_v62  ;;  %9008 = vmatmul.msk.f32.gmra.mxu1 %vm293_vm1, %v10058_v62  ;;  %v10664_v62 = vld [vmem:[%s15524_s0 + $0x468] sm:$0xff]  }
 0x4bc   :  { %v7693_v26 = vadd.f32 %v7692_v30, %v7440_v25  ;;  %v7826_v28 = vadd.f32 %v7825_v58, %v7441_v38  ;;  %9264 = vmatmul.msk.f32.gmra.mxu2 %vm293_vm1, %v10311_v14  ;;  %9393 = vmatmul.msk.f32.gmra.mxu3 %vm293_vm1, %v10311_v14  ;;  %v10318_v30 = vunpack.c.l.bf16 %v10727_v46  ;;  %v10066_v14 = vunpack.c.l.bf16 %v10664_v62 }
 0x4bf   :  { %v6662_v51 = vpop.f32.mrf.mxu2  ;;  %v7063_v7 = vpop.f32.mrf.mxu3 }
 0x4c0   :  { %v6663_v12 = vadd.f32 %v6662_v51, %v10995_v10  ;;  %v7064_v37 = vadd.f32 %v7063_v7, %v10997_v11  ;;  %v13426_v43 = vpop.f32.mrf.mxu0  ;;  %v13428_v41 = vpop.f32.mrf.mxu1 }
 0x4c2   :  { %v7442_v56 = vmax.f32 %v6663_v12, 0.0  ;;  %v7443_v9 = vmax.f32 %v7064_v37, 0.0  ;;  %v10728_v37 = vld [vmem:[%s15524_s0 + $0x668] sm:$0xff]  }
 0x4c3   :  { %8880 = vmatmul.msk.f32.gmra.mxu0 %vm293_vm1, %v10059_v36  ;;  %9009 = vmatmul.msk.f32.gmra.mxu1 %vm293_vm1, %v10059_v36 }
 0x4c4   :  { %v7694_v63 = vadd.f32 %v7693_v26, %v7442_v56  ;;  %v7827_v29 = vadd.f32 %v7826_v28, %v7443_v9  ;;  %9265 = vmatmul.msk.f32.gmra.mxu2 %vm293_vm1, %v10314_v2  ;;  %9394 = vmatmul.msk.f32.gmra.mxu3 %vm293_vm1, %v10314_v2  ;;  %v10067_v9 = vunpack.c.h.bf16 %v10664_v62  ;;  %v7998_v62 = vld [vmem:[%s15527_s3 + $0xf0] sm:$0xff] }
 0x4c5   :  { %8031 = vmatpush.msra.mxu1 %v7998_v62 }
 0x4c7   :  { %v6665_v19 = vpop.f32.mrf.mxu2  ;;  %v7066_v3 = vpop.f32.mrf.mxu3 }
 0x4c8   :  { %v6666_v13 = vadd.f32 %v6665_v19, %v10995_v10  ;;  %v7067_v57 = vadd.f32 %v7066_v3, %v10997_v11  ;;  %v13439_v47 = vpop.f32.mrf.mxu0  ;;  %v13441_v22 = vpop.f32.mrf.mxu1  ;;  %v10322_v3 = vunpack.c.l.bf16 %v10728_v37 }
 0x4ca   :  { %v7444_v20 = vmax.f32 %v6666_v13, 0.0  ;;  %v7445_v54 = vmax.f32 %v7067_v57, 0.0 }
 0x4cb   :  { %8881 = vmatmul.msk.f32.gmra.mxu0 %vm293_vm1, %v10062_v23  ;;  %9010 = vmatmul.msk.f32.gmra.mxu1 %vm293_vm1, %v10062_v23 }
 0x4cc   :  { %v7695_v48 = vadd.f32 %v7694_v63, %v7444_v20  ;;  %v7828_v24 = vadd.f32 %v7827_v29, %v7445_v54  ;;  %9266 = vmatmul.msk.f32.gmra.mxu2 %vm293_vm1, %v10315_v60  ;;  %9395 = vmatmul.msk.f32.gmra.mxu3 %vm293_vm1, %v10315_v60  ;;  %v10665_v20 = vld [vmem:[%s15524_s0 + $0x470] sm:$0xff]  }
 0x4cf   :  { %v6668_v33 = vpop.f32.mrf.mxu2  ;;  %v7069_v18 = vpop.f32.mrf.mxu3 }
 0x4d0   :  { %v6669_v35 = vadd.f32 %v6668_v33, %v10995_v10  ;;  %v7070_v8 = vadd.f32 %v7069_v18, %v10997_v11  ;;  %v13452_v0 = vpop.f32.mrf.mxu0  ;;  %v13454_v44 = vpop.f32.mrf.mxu1 }
 0x4d2   :  { %v7446_v58 = vmax.f32 %v6669_v35, 0.0  ;;  %v7447_v6 = vmax.f32 %v7070_v8, 0.0  ;;  %v10323_v35 = vunpack.c.h.bf16 %v10728_v37 }
 0x4d3   :  { %8882 = vmatmul.msk.f32.gmra.mxu0 %vm293_vm1, %v10063_v53  ;;  %9011 = vmatmul.msk.f32.gmra.mxu1 %vm293_vm1, %v10063_v53 }
 0x4d4   :  { %v7696_v32 = vadd.f32 %v7695_v48, %v7446_v58  ;;  %v7829_v16 = vadd.f32 %v7828_v24, %v7447_v6  ;;  %9267 = vmatmul.msk.f32.gmra.mxu2 %vm293_vm1, %v10318_v30  ;;  %9396 = vmatmul.msk.f32.gmra.mxu3 %vm293_vm1, %v10318_v30  ;;  %v10070_v24 = vunpack.c.l.bf16 %v10665_v20 }
 0x4d7   :  { %v6671_v34 = vpop.f32.mrf.mxu2  ;;  %v7072_v50 = vpop.f32.mrf.mxu3 }
 0x4d8   :  { %v6672_v25 = vadd.f32 %v6671_v34, %v10995_v10  ;;  %v7073_v38 = vadd.f32 %v7072_v50, %v10997_v11  ;;  %v13465_v26 = vpop.f32.mrf.mxu0  ;;  %v13467_v28 = vpop.f32.mrf.mxu1 }
 0x4da   :  { %v7448_v51 = vmax.f32 %v6672_v25, 0.0  ;;  %v7449_v7 = vmax.f32 %v7073_v38, 0.0 }
 0x4db   :  { %8883 = vmatmul.msk.f32.gmra.mxu0 %vm293_vm1, %v10066_v14  ;;  %9012 = vmatmul.msk.f32.gmra.mxu1 %vm293_vm1, %v10066_v14  ;;  %v10071_v14 = vunpack.c.h.bf16 %v10665_v20 }
 0x4dc   :  { %v7697_v36 = vadd.f32 %v7696_v32, %v7448_v51  ;;  %v7830_v12 = vadd.f32 %v7829_v16, %v7449_v7  ;;  %9268 = vmatmul.msk.f32.gmra.mxu2 %vm293_vm1, %v10319_v42  ;;  %9397 = vmatmul.msk.f32.gmra.mxu3 %vm293_vm1, %v10319_v42  ;;  %v7982_v32 = vld [vmem:[%s15527_s3 + $0x70] sm:$0xff] }
 0x4dd   :  { %v10729_v16 = vld [vmem:[%s15524_s0 + $0x670] sm:$0xff]   ;;  %8011 = vmatpush.msra.mxu0 %v7982_v32 }
 0x4de   :  { %v10326_v7 = vunpack.c.l.bf16 %v10729_v16 }
 0x4df   :  { %v6674_v2 = vpop.f32.mrf.mxu2  ;;  %v7075_v56 = vpop.f32.mrf.mxu3 }
 0x4e0   :  { %v6675_v63 = vadd.f32 %v6674_v2, %v10995_v10  ;;  %v7076_v29 = vadd.f32 %v7075_v56, %v10997_v11  ;;  %v13478_v39 = vpop.f32.mrf.mxu0  ;;  %v13480_v19 = vpop.f32.mrf.mxu1  ;;  %v10666_v56 = vld [vmem:[%s15524_s0 + $0x478] sm:$0xff]  }
 0x4e2   :  { %v7450_v23 = vmax.f32 %v6675_v63, 0.0  ;;  %v7451_v13 = vmax.f32 %v7076_v29, 0.0  ;;  %v10074_v29 = vunpack.c.l.bf16 %v10666_v56 }
 0x4e3   :  { %8884 = vmatmul.msk.f32.gmra.mxu0 %vm293_vm1, %v10067_v9  ;;  %9013 = vmatmul.msk.f32.gmra.mxu1 %vm293_vm1, %v10067_v9 }
 0x4e4   :  { %v7698_v57 = vadd.f32 %v7697_v36, %v7450_v23  ;;  %v7831_v60 = vadd.f32 %v7830_v12, %v7451_v13  ;;  %9269 = vmatmul.msk.f32.gmra.mxu2 %vm293_vm1, %v10322_v3  ;;  %9398 = vmatmul.msk.f32.gmra.mxu3 %vm293_vm1, %v10322_v3 }
 0x4e7   :  { %v6677_v54 = vpop.f32.mrf.mxu2  ;;  %v7078_v48 = vpop.f32.mrf.mxu3 }
 0x4e8   :  { %v6678_v46 = vadd.f32 %v6677_v54, %v10995_v10  ;;  %v7079_v33 = vadd.f32 %v7078_v48, %v10997_v11  ;;  %v13491_v18 = vpop.f32.mrf.mxu0  ;;  %v13493_v53 = vpop.f32.mrf.mxu1 }
 0x4ea   :  { %v7452_v8 = vmax.f32 %v6678_v46, 0.0  ;;  %v7453_v30 = vmax.f32 %v7079_v33, 0.0  ;;  %v10730_v46 = vld [vmem:[%s15524_s0 + $0x678] sm:$0xff]  }
 0x4eb   :  { %8885 = vmatmul.msk.f32.gmra.mxu0 %vm293_vm1, %v10070_v24  ;;  %9014 = vmatmul.msk.f32.gmra.mxu1 %vm293_vm1, %v10070_v24 }
 0x4ec   :  { %v7699_v58 = vadd.f32 %v7698_v57, %v7452_v8  ;;  %v7832_v6 = vadd.f32 %v7831_v60, %v7453_v30  ;;  %9270 = vmatmul.msk.f32.gmra.mxu2 %vm293_vm1, %v10323_v35  ;;  %9399 = vmatmul.msk.f32.gmra.mxu3 %vm293_vm1, %v10323_v35  ;;  %v10327_v60 = vunpack.c.h.bf16 %v10729_v16  ;;  %v10075_v8 = vunpack.c.h.bf16 %v10666_v56 }
 0x4ed   :  { %v10330_v16 = vunpack.c.l.bf16 %v10730_v46 }
 0x4ef   :  { %v6680_v34 = vpop.f32.mrf.mxu2  ;;  %v7081_v50 = vpop.f32.mrf.mxu3 }
 0x4f0   :  { %v6681_v25 = vadd.f32 %v6680_v34, %v10995_v10  ;;  %v7082_v38 = vadd.f32 %v7081_v50, %v10997_v11  ;;  %v13510_v42 = vpop.f32.mrf.mxu0  ;;  %v13512_v51 = vpop.f32.mrf.mxu1 }
 0x4f2   :  { %v7454_v36 = vmax.f32 %v6681_v25, 0.0  ;;  %v7455_v12 = vmax.f32 %v7082_v38, 0.0  ;;  %v10667_v25 = vld [vmem:[%s15524_s0 + $0x480] sm:$0xff]  }
 0x4f3   :  { %8886 = vmatmul.msk.f32.gmra.mxu0 %vm293_vm1, %v10071_v14  ;;  %9015 = vmatmul.msk.f32.gmra.mxu1 %vm293_vm1, %v10071_v14 }
 0x4f4   :  { %v7700_v37 = vadd.f32 %v7699_v58, %v7454_v36  ;;  %v7833_v2 = vadd.f32 %v7832_v6, %v7455_v12  ;;  %9271 = vmatmul.msk.f32.gmra.mxu2 %vm293_vm1, %v10326_v7  ;;  %9400 = vmatmul.msk.f32.gmra.mxu3 %vm293_vm1, %v10326_v7  ;;  %v10078_v36 = vunpack.c.l.bf16 %v10667_v25 }
 0x4f7   :  { %v6683_v9 = vpop.f32.mrf.mxu2  ;;  %v7084_v63 = vpop.f32.mrf.mxu3 }
 0x4f8   :  { %v6684_v3 = vadd.f32 %v6683_v9, %v10995_v10  ;;  %v7085_v23 = vadd.f32 %v7084_v63, %v10997_v11  ;;  %v13523_v13 = vpop.f32.mrf.mxu0  ;;  %v13525_v57 = vpop.f32.mrf.mxu1  ;;  %v10331_v9 = vunpack.c.h.bf16 %v10730_v46 }
 0x4fa   :  { %v7456_v20 = vmax.f32 %v6684_v3, 0.0  ;;  %v7457_v54 = vmax.f32 %v7085_v23, 0.0 }
 0x4fb   :  { %8887 = vmatmul.msk.f32.gmra.mxu0 %vm293_vm1, %v10074_v29  ;;  %9016 = vmatmul.msk.f32.gmra.mxu1 %vm293_vm1, %v10074_v29 }
 0x4fc   :  { %v7701_v48 = vadd.f32 %v7700_v37, %v7456_v20  ;;  %v7834_v24 = vadd.f32 %v7833_v2, %v7457_v54  ;;  %9272 = vmatmul.msk.f32.gmra.mxu2 %vm293_vm1, %v10327_v60  ;;  %9401 = vmatmul.msk.f32.gmra.mxu3 %vm293_vm1, %v10327_v60  ;;  %v10731_v60 = vld [vmem:[%s15524_s0 + $0x680] sm:$0xff]  }
 0x4ff   :  { %v6686_v33 = vpop.f32.mrf.mxu2  ;;  %v7087_v35 = vpop.f32.mrf.mxu3 }
 0x500   :  { %v6687_v30 = vadd.f32 %v6686_v33, %v10995_v10  ;;  %v7088_v58 = vadd.f32 %v7087_v35, %v10997_v11  ;;  %v13536_v6 = vpop.f32.mrf.mxu0  ;;  %v13538_v32 = vpop.f32.mrf.mxu1 }
 0x502   :  { %v7458_v62 = vmax.f32 %v6687_v30, 0.0  ;;  %v7459_v34 = vmax.f32 %v7088_v58, 0.0 }
 0x503   :  { %8888 = vmatmul.msk.f32.gmra.mxu0 %vm293_vm1, %v10075_v8  ;;  %9017 = vmatmul.msk.f32.gmra.mxu1 %vm293_vm1, %v10075_v8  ;;  %v10334_v8 = vunpack.c.l.bf16 %v10731_v60 }
 0x504   :  { %v7702_v50 = vadd.f32 %v7701_v48, %v7458_v62  ;;  %v7835_v14 = vadd.f32 %v7834_v24, %v7459_v34  ;;  %9273 = vmatmul.msk.f32.gmra.mxu2 %vm293_vm1, %v10330_v16  ;;  %9402 = vmatmul.msk.f32.gmra.mxu3 %vm293_vm1, %v10330_v16  ;;  %v10079_v48 = vunpack.c.h.bf16 %v10667_v25  ;;  %v10668_v34 = vld [vmem:[%s15524_s0 + $0x488] sm:$0xff]  }
 0x505   :  { %v10082_v25 = vunpack.c.l.bf16 %v10668_v34 }
 0x507   :  { %v6689_v38 = vpop.f32.mrf.mxu2  ;;  %v7090_v7 = vpop.f32.mrf.mxu3 }
 0x508   :  { %v6690_v12 = vadd.f32 %v6689_v38, %v10995_v10  ;;  %v7091_v37 = vadd.f32 %v7090_v7, %v10997_v11  ;;  %v13549_v2 = vpop.f32.mrf.mxu0  ;;  %v13551_v56 = vpop.f32.mrf.mxu1 }
 0x50a   :  { %v7460_v63 = vmax.f32 %v6690_v12, 0.0  ;;  %v7461_v29 = vmax.f32 %v7091_v37, 0.0  ;;  %v10335_v37 = vunpack.c.h.bf16 %v10731_v60 }
 0x50b   :  { %8889 = vmatmul.msk.f32.gmra.mxu0 %vm293_vm1, %v10078_v36  ;;  %9018 = vmatmul.msk.f32.gmra.mxu1 %vm293_vm1, %v10078_v36 }
 0x50c   :  { %v7703_v3 = vadd.f32 %v7702_v50, %v7460_v63  ;;  %v7836_v23 = vadd.f32 %v7835_v14, %v7461_v29  ;;  %9274 = vmatmul.msk.f32.gmra.mxu2 %vm293_vm1, %v10331_v9  ;;  %9403 = vmatmul.msk.f32.gmra.mxu3 %vm293_vm1, %v10331_v9 }
 0x50f   :  { %v6692_v20 = vpop.f32.mrf.mxu2  ;;  %v7093_v54 = vpop.f32.mrf.mxu3 }
 0x510   :  { %v6693_v24 = vadd.f32 %v6692_v20, %v10995_v10  ;;  %v7094_v46 = vadd.f32 %v7093_v54, %v10997_v11  ;;  %v13562_v33 = vpop.f32.mrf.mxu0  ;;  %v13564_v35 = vpop.f32.mrf.mxu1 }
 0x512   :  { %v7462_v30 = vmax.f32 %v6693_v24, 0.0  ;;  %v7463_v58 = vmax.f32 %v7094_v46, 0.0 }
 0x513   :  { %8890 = vmatmul.msk.f32.gmra.mxu0 %vm293_vm1, %v10079_v48  ;;  %9019 = vmatmul.msk.f32.gmra.mxu1 %vm293_vm1, %v10079_v48  ;;  %v10083_v48 = vunpack.c.h.bf16 %v10668_v34  ;;  %v10669_v34 = vld [vmem:[%s15524_s0 + $0x490] sm:$0xff]  }
 0x514   :  { %v7704_v16 = vadd.f32 %v7703_v3, %v7462_v30  ;;  %v7837_v62 = vadd.f32 %v7836_v23, %v7463_v58  ;;  %9275 = vmatmul.msk.f32.gmra.mxu2 %vm293_vm1, %v10334_v8  ;;  %9404 = vmatmul.msk.f32.gmra.mxu3 %vm293_vm1, %v10334_v8  ;;  %v10732_v23 = vld [vmem:[%s15524_s0 + $0x688] sm:$0xff]  }
 0x515   :  { %v10338_v30 = vunpack.c.l.bf16 %v10732_v23 }
 0x517   :  { %v6695_v50 = vpop.f32.mrf.mxu2  ;;  %v7096_v14 = vpop.f32.mrf.mxu3 }
 0x518   :  { %v6696_v38 = vadd.f32 %v6695_v50, %v10995_v10  ;;  %v7097_v7 = vadd.f32 %v7096_v14, %v10997_v11  ;;  %v13575_v36 = vpop.f32.mrf.mxu0  ;;  %v13577_v12 = vpop.f32.mrf.mxu1 }
 0x51a   :  { %v7464_v9 = vmax.f32 %v6696_v38, 0.0  ;;  %v7465_v63 = vmax.f32 %v7097_v7, 0.0  ;;  %v10086_v38 = vunpack.c.l.bf16 %v10669_v34 }
 0x51b   :  { %8891 = vmatmul.msk.f32.gmra.mxu0 %vm293_vm1, %v10082_v25  ;;  %9020 = vmatmul.msk.f32.gmra.mxu1 %vm293_vm1, %v10082_v25 }
 0x51c   :  { %v7705_v29 = vadd.f32 %v7704_v16, %v7464_v9  ;;  %v7838_v3 = vadd.f32 %v7837_v62, %v7465_v63  ;;  %9276 = vmatmul.msk.f32.gmra.mxu2 %vm293_vm1, %v10335_v37  ;;  %9405 = vmatmul.msk.f32.gmra.mxu3 %vm293_vm1, %v10335_v37 }
 0x51f   :  { %v6698_v20 = vpop.f32.mrf.mxu2  ;;  %v7099_v54 = vpop.f32.mrf.mxu3 }
 0x520   :  { %v6699_v60 = vadd.f32 %v6698_v20, %v10995_v10  ;;  %v7100_v24 = vadd.f32 %v7099_v54, %v10997_v11  ;;  %v13588_v46 = vpop.f32.mrf.mxu0  ;;  %v13590_v8 = vpop.f32.mrf.mxu1 }
 0x522   :  { %v7466_v58 = vmax.f32 %v6699_v60, 0.0  ;;  %v7467_v16 = vmax.f32 %v7100_v24, 0.0  ;;  %v7981_v60 = vld [vmem:[%s15527_s3 + $0x68] sm:$0xff] }
 0x523   :  { %8892 = vmatmul.msk.f32.gmra.mxu0 %vm293_vm1, %v10083_v48  ;;  %9021 = vmatmul.msk.f32.gmra.mxu1 %vm293_vm1, %v10083_v48  ;;  %v7997_v24 = vld [vmem:[%s15527_s3 + $0xe8] sm:$0xff] }
 0x524   :  { %v7706_v62 = vadd.f32 %v7705_v29, %v7466_v58  ;;  %v7839_v50 = vadd.f32 %v7838_v3, %v7467_v16  ;;  %9277 = vmatmul.msk.f32.gmra.mxu2 %vm293_vm1, %v10338_v30  ;;  %9406 = vmatmul.msk.f32.gmra.mxu3 %vm293_vm1, %v10338_v30  ;;  %v10339_v29 = vunpack.c.h.bf16 %v10732_v23  ;;  %v10733_v23 = vld [vmem:[%s15524_s0 + $0x690] sm:$0xff]   ;;  %v10087_v16 = vunpack.c.h.bf16 %v10669_v34  ;;  %v10670_v34 = vld [vmem:[%s15524_s0 + $0x498] sm:$0xff]  }
 0x525   :  { %8012 = vmatpush.msra.mxu0 %v7981_v60  ;;  %8032 = vmatpush.msra.mxu1 %v7997_v24  ;;  %v10090_v24 = vunpack.c.l.bf16 %v10670_v34  ;;  %v10091_v21 = vunpack.c.h.bf16 %v10670_v34  ;;  %v10671_v34 = vld [vmem:[%s15524_s0 + $0x4a0] sm:$0xff]  }
 0x527   :  { %v6701_v14 = vpop.f32.mrf.mxu2  ;;  %v7102_v25 = vpop.f32.mrf.mxu3 }
 0x528   :  { %v6702_v7 = vadd.f32 %v6701_v14, %v10995_v10  ;;  %v7103_v37 = vadd.f32 %v7102_v25, %v10997_v11  ;;  %v13601_v9 = vpop.f32.mrf.mxu0  ;;  %v13603_v63 = vpop.f32.mrf.mxu1 }
 0x52a   :  { %v7468_v3 = vmax.f32 %v6702_v7, 0.0  ;;  %v7469_v20 = vmax.f32 %v7103_v37, 0.0 }
 0x52b   :  { %8893 = vmatmul.msk.f32.gmra.mxu0 %vm293_vm1, %v10086_v38  ;;  %9022 = vmatmul.msk.f32.gmra.mxu1 %vm293_vm1, %v10086_v38  ;;  %v10342_v38 = vunpack.c.l.bf16 %v10733_v23 }
 0x52c   :  { %v7707_v54 = vadd.f32 %v7706_v62, %v7468_v3  ;;  %v7840_v48 = vadd.f32 %v7839_v50, %v7469_v20  ;;  %9278 = vmatmul.msk.f32.gmra.mxu2 %vm293_vm1, %v10339_v29  ;;  %9407 = vmatmul.msk.f32.gmra.mxu3 %vm293_vm1, %v10339_v29 }
 0x52f   :  { %v6704_v30 = vpop.f32.mrf.mxu2  ;;  %v7105_v58 = vpop.f32.mrf.mxu3 }
 0x530   :  { %v6705_v62 = vadd.f32 %v6704_v30, %v10995_v10  ;;  %v7106_v50 = vadd.f32 %v7105_v58, %v10997_v11  ;;  %v13620_v14 = vpop.f32.mrf.mxu0  ;;  %v13622_v25 = vpop.f32.mrf.mxu1 }
 0x531   :  { %15851 = vst [vmem:[#allocation29_spill] sm:$0xff] %v13620_v14  ;;  %v5074_v14 = vadd.f32 %v13352_v59, %v10997_v11  ;;  %v14372_v59 = vld [vmem:[%s15524_s0 + $0x768] sm:$0xff]  }
 0x532   :  { %15852 = vst [vmem:[#allocation30_spill] sm:$0xff] %v13622_v25  ;;  %v7470_v7 = vmax.f32 %v6705_v62, 0.0  ;;  %v7471_v37 = vmax.f32 %v7106_v50, 0.0 }
 0x533   :  { %8894 = vmatmul.msk.f32.gmra.mxu0 %vm293_vm1, %v10087_v16  ;;  %9023 = vmatmul.msk.f32.gmra.mxu1 %vm293_vm1, %v10087_v16 }
 0x534   :  { %v7708_v29 = vadd.f32 %v7707_v54, %v7470_v7  ;;  %v7841_v3 = vadd.f32 %v7840_v48, %v7471_v37  ;;  %9279 = vmatmul.msk.f32.gmra.mxu2 %vm293_vm1, %v10342_v38  ;;  %9408 = vmatmul.msk.f32.gmra.mxu3 %vm293_vm1, %v10342_v38  ;;  %v10343_v54 = vunpack.c.h.bf16 %v10733_v23  ;;  %v10734_v37 = vld [vmem:[%s15524_s0 + $0x698] sm:$0xff]  }
 0x537   :  { %v6707_v20 = vpop.f32.mrf.mxu2  ;;  %v7108_v60 = vpop.f32.mrf.mxu3 }
 0x538   :  { %v6708_v30 = vadd.f32 %v6707_v20, %v10995_v10  ;;  %v7109_v58 = vadd.f32 %v7108_v60, %v10997_v11  ;;  %v13633_v62 = vpop.f32.mrf.mxu0  ;;  %v13635_v16 = vpop.f32.mrf.mxu1 }
 0x539   :  { %15853 = vst [vmem:[#allocation31_spill] sm:$0xff] %v13633_v62 }
 0x53a   :  { %15854 = vst [vmem:[#allocation32_spill] sm:$0xff] %v13635_v16  ;;  %v7472_v48 = vmax.f32 %v6708_v30, 0.0  ;;  %v7473_v50 = vmax.f32 %v7109_v58, 0.0 }
 0x53b   :  { %8895 = vmatmul.msk.f32.gmra.mxu0 %vm293_vm1, %v10090_v24  ;;  %9024 = vmatmul.msk.f32.gmra.mxu1 %vm293_vm1, %v10090_v24 }
 0x53c   :  { %v7709_v38 = vadd.f32 %v7708_v29, %v7472_v48  ;;  %v7842_v7 = vadd.f32 %v7841_v3, %v7473_v50  ;;  %9280 = vmatmul.msk.f32.gmra.mxu2 %vm293_vm1, %v10343_v54  ;;  %9409 = vmatmul.msk.f32.gmra.mxu3 %vm293_vm1, %v10343_v54  ;;  %v10346_v29 = vunpack.c.l.bf16 %v10734_v37 }
 0x53f   :  { %v6710_v20 = vpop.f32.mrf.mxu2  ;;  %v7111_v60 = vpop.f32.mrf.mxu3 }
 0x540   :  { %v6711_v23 = vadd.f32 %v6710_v20, %v10995_v10  ;;  %v7112_v30 = vadd.f32 %v7111_v60, %v10997_v11  ;;  %v13646_v58 = vpop.f32.mrf.mxu0  ;;  %v13648_v24 = vpop.f32.mrf.mxu1 }
 0x541   :  { %15855 = vst [vmem:[#allocation33_spill] sm:$0xff] %v13646_v58 }
 0x542   :  { %15856 = vst [vmem:[#allocation34_spill] sm:$0xff] %v13648_v24  ;;  %v7474_v3 = vmax.f32 %v6711_v23, 0.0  ;;  %v7475_v48 = vmax.f32 %v7112_v30, 0.0  ;;  %v10094_v24 = vunpack.c.l.bf16 %v10671_v34 }
 0x543   :  { %8896 = vmatmul.msk.f32.gmra.mxu0 %vm293_vm1, %v10091_v21  ;;  %9025 = vmatmul.msk.f32.gmra.mxu1 %vm293_vm1, %v10091_v21 }
 0x544   :  { %v7710_v54 = vadd.f32 %v7709_v38, %v7474_v3  ;;  %v7843_v50 = vadd.f32 %v7842_v7, %v7475_v48  ;;  %9281 = vmatmul.msk.f32.gmra.mxu2 %vm293_vm1, %v10346_v29  ;;  %9410 = vmatmul.msk.f32.gmra.mxu3 %vm293_vm1, %v10346_v29  ;;  %v10347_v38 = vunpack.c.h.bf16 %v10734_v37 }
 0x547   :  { %v6713_v20 = vpop.f32.mrf.mxu2  ;;  %v7114_v60 = vpop.f32.mrf.mxu3 }
 0x548   :  { %v6714_v23 = vadd.f32 %v6713_v20, %v10995_v10  ;;  %v7115_v30 = vadd.f32 %v7114_v60, %v10997_v11  ;;  %v13659_v58 = vpop.f32.mrf.mxu0  ;;  %v13661_v21 = vpop.f32.mrf.mxu1  ;;  %v10735_v20 = vld [vmem:[%s15524_s0 + $0x6a0] sm:$0xff]  }
 0x549   :  { %15857 = vst [vmem:[#allocation35_spill] sm:$0xff] %v13659_v58 }
 0x54a   :  { %15858 = vst [vmem:[#allocation36_spill] sm:$0xff] %v13661_v21  ;;  %v7476_v7 = vmax.f32 %v6714_v23, 0.0  ;;  %v7477_v3 = vmax.f32 %v7115_v30, 0.0  ;;  %v10095_v21 = vunpack.c.h.bf16 %v10671_v34 }
 0x54b   :  { %8897 = vmatmul.msk.f32.gmra.mxu0 %vm293_vm1, %v10094_v24  ;;  %9026 = vmatmul.msk.f32.gmra.mxu1 %vm293_vm1, %v10094_v24 }
 0x54c   :  { %v7711_v29 = vadd.f32 %v7710_v54, %v7476_v7  ;;  %v7844_v48 = vadd.f32 %v7843_v50, %v7477_v3  ;;  %9282 = vmatmul.msk.f32.gmra.mxu2 %vm293_vm1, %v10347_v38  ;;  %9411 = vmatmul.msk.f32.gmra.mxu3 %vm293_vm1, %v10347_v38  ;;  %v10350_v54 = vunpack.c.l.bf16 %v10735_v20 }
 0x54f   :  { %v6716_v60 = vpop.f32.mrf.mxu2  ;;  %v7117_v58 = vpop.f32.mrf.mxu3 }
 0x550   :  { %v6717_v37 = vadd.f32 %v6716_v60, %v10995_v10  ;;  %v7118_v23 = vadd.f32 %v7117_v58, %v10997_v11  ;;  %v13672_v30 = vpop.f32.mrf.mxu0  ;;  %v13674_v24 = vpop.f32.mrf.mxu1  ;;  %v10672_v58 = vld [vmem:[%s15524_s0 + $0x4a8] sm:$0xff]  }
 0x551   :  { %15859 = vst [vmem:[#allocation37_spill] sm:$0xff] %v13672_v30 }
 0x552   :  { %15860 = vst [vmem:[#allocation38_spill] sm:$0xff] %v13674_v24  ;;  %v7478_v50 = vmax.f32 %v6717_v37, 0.0  ;;  %v7479_v7 = vmax.f32 %v7118_v23, 0.0  ;;  %v10098_v24 = vunpack.c.l.bf16 %v10672_v58 }
 0x553   :  { %8898 = vmatmul.msk.f32.gmra.mxu0 %vm293_vm1, %v10095_v21  ;;  %9027 = vmatmul.msk.f32.gmra.mxu1 %vm293_vm1, %v10095_v21 }
 0x554   :  { %v7712_v38 = vadd.f32 %v7711_v29, %v7478_v50  ;;  %v7845_v3 = vadd.f32 %v7844_v48, %v7479_v7  ;;  %9283 = vmatmul.msk.f32.gmra.mxu2 %vm293_vm1, %v10350_v54  ;;  %9412 = vmatmul.msk.f32.gmra.mxu3 %vm293_vm1, %v10350_v54  ;;  %v10351_v29 = vunpack.c.h.bf16 %v10735_v20 }
 0x557   :  { %v6719_v34 = vpop.f32.mrf.mxu2  ;;  %v7120_v60 = vpop.f32.mrf.mxu3 }
 0x558   :  { %v6720_v37 = vadd.f32 %v6719_v34, %v10995_v10  ;;  %v7121_v23 = vadd.f32 %v7120_v60, %v10997_v11  ;;  %v13685_v30 = vpop.f32.mrf.mxu0  ;;  %v13687_v21 = vpop.f32.mrf.mxu1  ;;  %v10736_v34 = vld [vmem:[%s15524_s0 + $0x6a8] sm:$0xff]  }
 0x559   :  { %15861 = vst [vmem:[#allocation39_spill] sm:$0xff] %v13685_v30 }
 0x55a   :  { %15862 = vst [vmem:[#allocation40_spill] sm:$0xff] %v13687_v21  ;;  %v7480_v48 = vmax.f32 %v6720_v37, 0.0  ;;  %v7481_v50 = vmax.f32 %v7121_v23, 0.0  ;;  %v10099_v21 = vunpack.c.h.bf16 %v10672_v58 }
 0x55b   :  { %8899 = vmatmul.msk.f32.gmra.mxu0 %vm293_vm1, %v10098_v24  ;;  %9028 = vmatmul.msk.f32.gmra.mxu1 %vm293_vm1, %v10098_v24 }
 0x55c   :  { %v7713_v54 = vadd.f32 %v7712_v38, %v7480_v48  ;;  %v7846_v7 = vadd.f32 %v7845_v3, %v7481_v50  ;;  %9284 = vmatmul.msk.f32.gmra.mxu2 %vm293_vm1, %v10351_v29  ;;  %9413 = vmatmul.msk.f32.gmra.mxu3 %vm293_vm1, %v10351_v29  ;;  %v10354_v38 = vunpack.c.l.bf16 %v10736_v34 }
 0x55f   :  { %v6722_v60 = vpop.f32.mrf.mxu2  ;;  %v7123_v30 = vpop.f32.mrf.mxu3 }
 0x560   :  { %v6723_v20 = vadd.f32 %v6722_v60, %v10995_v10  ;;  %v7124_v37 = vadd.f32 %v7123_v30, %v10997_v11  ;;  %v13698_v23 = vpop.f32.mrf.mxu0  ;;  %v13700_v24 = vpop.f32.mrf.mxu1  ;;  %v10673_v30 = vld [vmem:[%s15524_s0 + $0x4b0] sm:$0xff]  }
 0x561   :  { %15863 = vst [vmem:[#allocation41_spill] sm:$0xff] %v13698_v23 }
 0x562   :  { %15864 = vst [vmem:[#allocation42_spill] sm:$0xff] %v13700_v24  ;;  %v7482_v3 = vmax.f32 %v6723_v20, 0.0  ;;  %v7483_v48 = vmax.f32 %v7124_v37, 0.0  ;;  %v10102_v24 = vunpack.c.l.bf16 %v10673_v30 }
 0x563   :  { %8900 = vmatmul.msk.f32.gmra.mxu0 %vm293_vm1, %v10099_v21  ;;  %9029 = vmatmul.msk.f32.gmra.mxu1 %vm293_vm1, %v10099_v21 }
 0x564   :  { %v7714_v29 = vadd.f32 %v7713_v54, %v7482_v3  ;;  %v7847_v50 = vadd.f32 %v7846_v7, %v7483_v48  ;;  %9285 = vmatmul.msk.f32.gmra.mxu2 %vm293_vm1, %v10354_v38  ;;  %9414 = vmatmul.msk.f32.gmra.mxu3 %vm293_vm1, %v10354_v38  ;;  %v10355_v54 = vunpack.c.h.bf16 %v10736_v34  ;;  %v10737_v34 = vld [vmem:[%s15524_s0 + $0x6b0] sm:$0xff]  }
 0x567   :  { %v6725_v58 = vpop.f32.mrf.mxu2  ;;  %v7126_v60 = vpop.f32.mrf.mxu3 }
 0x568   :  { %v6726_v20 = vadd.f32 %v6725_v58, %v10995_v10  ;;  %v7127_v37 = vadd.f32 %v7126_v60, %v10997_v11  ;;  %v13711_v23 = vpop.f32.mrf.mxu0  ;;  %v13713_v21 = vpop.f32.mrf.mxu1  ;;  %v7980_v58 = vld [vmem:[%s15527_s3 + $0x60] sm:$0xff] }
 0x569   :  { %15865 = vst [vmem:[#allocation43_spill] sm:$0xff] %v13711_v23  ;;  %8013 = vmatpush.msra.mxu0 %v7980_v58  ;;  %v7996_v60 = vld [vmem:[%s15527_s3 + $0xe0] sm:$0xff] }
 0x56a   :  { %15866 = vst [vmem:[#allocation44_spill] sm:$0xff] %v13713_v21  ;;  %v7484_v7 = vmax.f32 %v6726_v20, 0.0  ;;  %v7485_v3 = vmax.f32 %v7127_v37, 0.0  ;;  %8033 = vmatpush.msra.mxu1 %v7996_v60 }
 0x56b   :  { %8901 = vmatmul.msk.f32.gmra.mxu0 %vm293_vm1, %v10102_v24  ;;  %9030 = vmatmul.msk.f32.gmra.mxu1 %vm293_vm1, %v10102_v24 }
 0x56c   :  { %v7715_v38 = vadd.f32 %v7714_v29, %v7484_v7  ;;  %v7848_v48 = vadd.f32 %v7847_v50, %v7485_v3  ;;  %9286 = vmatmul.msk.f32.gmra.mxu2 %vm293_vm1, %v10355_v54  ;;  %9415 = vmatmul.msk.f32.gmra.mxu3 %vm293_vm1, %v10355_v54  ;;  %v10103_v50 = vunpack.c.h.bf16 %v10673_v30  ;;  %v10358_v3 = vunpack.c.l.bf16 %v10737_v34  ;;  %v10674_v30 = vld [vmem:[%s15524_s0 + $0x4b8] sm:$0xff]  }
 0x56f   :  { %v6728_v24 = vpop.f32.mrf.mxu2  ;;  %v7129_v29 = vpop.f32.mrf.mxu3 }
 0x570   :  { %v6729_v20 = vadd.f32 %v6728_v24, %v10995_v10  ;;  %v7130_v37 = vadd.f32 %v7129_v29, %v10997_v11  ;;  %v13730_v54 = vpop.f32.mrf.mxu0  ;;  %v13732_v7 = vpop.f32.mrf.mxu1 }
 0x571   :  { %15867 = vst [vmem:[#allocation45_spill] sm:$0xff] %v13730_v54 }
 0x572   :  { %15868 = vst [vmem:[#allocation46_spill] sm:$0xff] %v13732_v7  ;;  %v7486_v21 = vmax.f32 %v6729_v20, 0.0  ;;  %v7487_v23 = vmax.f32 %v7130_v37, 0.0  ;;  %v10106_v7 = vunpack.c.l.bf16 %v10674_v30 }
 0x573   :  { %8902 = vmatmul.msk.f32.gmra.mxu0 %vm293_vm1, %v10103_v50  ;;  %9031 = vmatmul.msk.f32.gmra.mxu1 %vm293_vm1, %v10103_v50 }
 0x574   :  { %v7716_v58 = vadd.f32 %v7715_v38, %v7486_v21  ;;  %v7849_v60 = vadd.f32 %v7848_v48, %v7487_v23  ;;  %9287 = vmatmul.msk.f32.gmra.mxu2 %vm293_vm1, %v10358_v3  ;;  %9416 = vmatmul.msk.f32.gmra.mxu3 %vm293_vm1, %v10358_v3  ;;  %v10359_v23 = vunpack.c.h.bf16 %v10737_v34 }
 0x577   :  { %v6731_v24 = vpop.f32.mrf.mxu2  ;;  %v7132_v29 = vpop.f32.mrf.mxu3 }
 0x578   :  { %v6732_v20 = vadd.f32 %v6731_v24, %v10995_v10  ;;  %v7133_v37 = vadd.f32 %v7132_v29, %v10997_v11  ;;  %v13743_v54 = vpop.f32.mrf.mxu0  ;;  %v13745_v50 = vpop.f32.mrf.mxu1  ;;  %v10738_v24 = vld [vmem:[%s15524_s0 + $0x6b8] sm:$0xff]  }
 0x579   :  { %15869 = vst [vmem:[#allocation47_spill] sm:$0xff] %v13743_v54 }
 0x57a   :  { %15870 = vst [vmem:[#allocation48_spill] sm:$0xff] %v13745_v50  ;;  %v7488_v21 = vmax.f32 %v6732_v20, 0.0  ;;  %v7489_v38 = vmax.f32 %v7133_v37, 0.0  ;;  %v10107_v50 = vunpack.c.h.bf16 %v10674_v30 }
 0x57b   :  { %8903 = vmatmul.msk.f32.gmra.mxu0 %vm293_vm1, %v10106_v7  ;;  %9032 = vmatmul.msk.f32.gmra.mxu1 %vm293_vm1, %v10106_v7 }
 0x57c   :  { %v7717_v48 = vadd.f32 %v7716_v58, %v7488_v21  ;;  %v7850_v3 = vadd.f32 %v7849_v60, %v7489_v38  ;;  %9288 = vmatmul.msk.f32.gmra.mxu2 %vm293_vm1, %v10359_v23  ;;  %9417 = vmatmul.msk.f32.gmra.mxu3 %vm293_vm1, %v10359_v23  ;;  %v10362_v58 = vunpack.c.l.bf16 %v10738_v24 }
 0x57f   :  { %v6734_v29 = vpop.f32.mrf.mxu2  ;;  %v7135_v54 = vpop.f32.mrf.mxu3 }
 0x580   :  { %v6735_v34 = vadd.f32 %v6734_v29, %v10995_v10  ;;  %v7136_v20 = vadd.f32 %v7135_v54, %v10997_v11  ;;  %v13756_v37 = vpop.f32.mrf.mxu0  ;;  %v13758_v7 = vpop.f32.mrf.mxu1  ;;  %v10675_v54 = vld [vmem:[%s15524_s0 + $0x4c0] sm:$0xff]  }
 0x581   :  { %15871 = vst [vmem:[#allocation49_spill] sm:$0xff] %v13756_v37 }
 0x582   :  { %15872 = vst [vmem:[#allocation50_spill] sm:$0xff] %v13758_v7  ;;  %v7490_v60 = vmax.f32 %v6735_v34, 0.0  ;;  %v7491_v21 = vmax.f32 %v7136_v20, 0.0  ;;  %v10110_v7 = vunpack.c.l.bf16 %v10675_v54 }
 0x583   :  { %8904 = vmatmul.msk.f32.gmra.mxu0 %vm293_vm1, %v10107_v50  ;;  %9033 = vmatmul.msk.f32.gmra.mxu1 %vm293_vm1, %v10107_v50 }
 0x584   :  { %v7718_v23 = vadd.f32 %v7717_v48, %v7490_v60  ;;  %v7851_v38 = vadd.f32 %v7850_v3, %v7491_v21  ;;  %9289 = vmatmul.msk.f32.gmra.mxu2 %vm293_vm1, %v10362_v58  ;;  %9418 = vmatmul.msk.f32.gmra.mxu3 %vm293_vm1, %v10362_v58  ;;  %v10363_v48 = vunpack.c.h.bf16 %v10738_v24 }
 0x587   :  { %v6737_v30 = vpop.f32.mrf.mxu2  ;;  %v7138_v29 = vpop.f32.mrf.mxu3 }
 0x588   :  { %v6738_v34 = vadd.f32 %v6737_v30, %v10995_v10  ;;  %v7139_v20 = vadd.f32 %v7138_v29, %v10997_v11  ;;  %v13769_v37 = vpop.f32.mrf.mxu0  ;;  %v13771_v50 = vpop.f32.mrf.mxu1  ;;  %v10739_v30 = vld [vmem:[%s15524_s0 + $0x6c0] sm:$0xff]  }
 0x589   :  { %15873 = vst [vmem:[#allocation51_spill] sm:$0xff] %v13769_v37 }
 0x58a   :  { %15874 = vst [vmem:[#allocation52_spill] sm:$0xff] %v13771_v50  ;;  %v7492_v3 = vmax.f32 %v6738_v34, 0.0  ;;  %v7493_v60 = vmax.f32 %v7139_v20, 0.0  ;;  %v10111_v50 = vunpack.c.h.bf16 %v10675_v54 }
 0x58b   :  { %8905 = vmatmul.msk.f32.gmra.mxu0 %vm293_vm1, %v10110_v7  ;;  %9034 = vmatmul.msk.f32.gmra.mxu1 %vm293_vm1, %v10110_v7 }
 0x58c   :  { %v7719_v58 = vadd.f32 %v7718_v23, %v7492_v3  ;;  %v7852_v21 = vadd.f32 %v7851_v38, %v7493_v60  ;;  %9290 = vmatmul.msk.f32.gmra.mxu2 %vm293_vm1, %v10363_v48  ;;  %9419 = vmatmul.msk.f32.gmra.mxu3 %vm293_vm1, %v10363_v48  ;;  %v10366_v23 = vunpack.c.l.bf16 %v10739_v30 }
 0x58f   :  { %v6740_v29 = vpop.f32.mrf.mxu2  ;;  %v7141_v37 = vpop.f32.mrf.mxu3 }
 0x590   :  { %v6741_v24 = vadd.f32 %v6740_v29, %v10995_v10  ;;  %v7142_v34 = vadd.f32 %v7141_v37, %v10997_v11  ;;  %v13782_v20 = vpop.f32.mrf.mxu0  ;;  %v13784_v7 = vpop.f32.mrf.mxu1  ;;  %v10676_v37 = vld [vmem:[%s15524_s0 + $0x4c8] sm:$0xff]  }
 0x591   :  { %15875 = vst [vmem:[#allocation53_spill] sm:$0xff] %v13782_v20 }
 0x592   :  { %15876 = vst [vmem:[#allocation54_spill] sm:$0xff] %v13784_v7  ;;  %v7494_v38 = vmax.f32 %v6741_v24, 0.0  ;;  %v7495_v3 = vmax.f32 %v7142_v34, 0.0  ;;  %v10114_v7 = vunpack.c.l.bf16 %v10676_v37 }
 0x593   :  { %8906 = vmatmul.msk.f32.gmra.mxu0 %vm293_vm1, %v10111_v50  ;;  %9035 = vmatmul.msk.f32.gmra.mxu1 %vm293_vm1, %v10111_v50 }
 0x594   :  { %v7720_v48 = vadd.f32 %v7719_v58, %v7494_v38  ;;  %v7853_v60 = vadd.f32 %v7852_v21, %v7495_v3  ;;  %9291 = vmatmul.msk.f32.gmra.mxu2 %vm293_vm1, %v10366_v23  ;;  %9420 = vmatmul.msk.f32.gmra.mxu3 %vm293_vm1, %v10366_v23  ;;  %v10367_v58 = vunpack.c.h.bf16 %v10739_v30 }
 0x597   :  { %v6743_v54 = vpop.f32.mrf.mxu2  ;;  %v7144_v29 = vpop.f32.mrf.mxu3 }
 0x598   :  { %v6744_v24 = vadd.f32 %v6743_v54, %v10995_v10  ;;  %v7145_v34 = vadd.f32 %v7144_v29, %v10997_v11  ;;  %v13795_v20 = vpop.f32.mrf.mxu0  ;;  %v13797_v50 = vpop.f32.mrf.mxu1  ;;  %v10740_v54 = vld [vmem:[%s15524_s0 + $0x6c8] sm:$0xff]  }
 0x599   :  { %15877 = vst [vmem:[#allocation55_spill] sm:$0xff] %v13795_v20 }
 0x59a   :  { %15878 = vst [vmem:[#allocation56_spill] sm:$0xff] %v13797_v50  ;;  %v7496_v21 = vmax.f32 %v6744_v24, 0.0  ;;  %v7497_v38 = vmax.f32 %v7145_v34, 0.0  ;;  %v10115_v50 = vunpack.c.h.bf16 %v10676_v37 }
 0x59b   :  { %8907 = vmatmul.msk.f32.gmra.mxu0 %vm293_vm1, %v10114_v7  ;;  %9036 = vmatmul.msk.f32.gmra.mxu1 %vm293_vm1, %v10114_v7 }
 0x59c   :  { %v7721_v23 = vadd.f32 %v7720_v48, %v7496_v21  ;;  %v7854_v3 = vadd.f32 %v7853_v60, %v7497_v38  ;;  %9292 = vmatmul.msk.f32.gmra.mxu2 %vm293_vm1, %v10367_v58  ;;  %9421 = vmatmul.msk.f32.gmra.mxu3 %vm293_vm1, %v10367_v58  ;;  %v10370_v48 = vunpack.c.l.bf16 %v10740_v54 }
 0x59f   :  { %v6746_v29 = vpop.f32.mrf.mxu2  ;;  %v7147_v20 = vpop.f32.mrf.mxu3 }
 0x5a0   :  { %v6747_v30 = vadd.f32 %v6746_v29, %v10995_v10  ;;  %v7148_v24 = vadd.f32 %v7147_v20, %v10997_v11  ;;  %v13808_v34 = vpop.f32.mrf.mxu0  ;;  %v13810_v7 = vpop.f32.mrf.mxu1  ;;  %v10677_v20 = vld [vmem:[%s15524_s0 + $0x4d0] sm:$0xff]  }
 0x5a1   :  { %15879 = vst [vmem:[#allocation57_spill] sm:$0xff] %v13808_v34 }
 0x5a2   :  { %15880 = vst [vmem:[#allocation58_spill] sm:$0xff] %v13810_v7  ;;  %v7498_v60 = vmax.f32 %v6747_v30, 0.0  ;;  %v7499_v21 = vmax.f32 %v7148_v24, 0.0  ;;  %v10118_v7 = vunpack.c.l.bf16 %v10677_v20 }
 0x5a3   :  { %8908 = vmatmul.msk.f32.gmra.mxu0 %vm293_vm1, %v10115_v50  ;;  %9037 = vmatmul.msk.f32.gmra.mxu1 %vm293_vm1, %v10115_v50 }
 0x5a4   :  { %v7722_v58 = vadd.f32 %v7721_v23, %v7498_v60  ;;  %v7855_v38 = vadd.f32 %v7854_v3, %v7499_v21  ;;  %9293 = vmatmul.msk.f32.gmra.mxu2 %vm293_vm1, %v10370_v48  ;;  %9422 = vmatmul.msk.f32.gmra.mxu3 %vm293_vm1, %v10370_v48  ;;  %v10371_v23 = vunpack.c.h.bf16 %v10740_v54  ;;  %v10741_v54 = vld [vmem:[%s15524_s0 + $0x6d0] sm:$0xff]  }
 0x5a7   :  { %v6749_v37 = vpop.f32.mrf.mxu2  ;;  %v7150_v29 = vpop.f32.mrf.mxu3 }
 0x5a8   :  { %v6750_v30 = vadd.f32 %v6749_v37, %v10995_v10  ;;  %v7151_v24 = vadd.f32 %v7150_v29, %v10997_v11  ;;  %v13821_v34 = vpop.f32.mrf.mxu0  ;;  %v13823_v50 = vpop.f32.mrf.mxu1  ;;  %v7979_v37 = vld [vmem:[%s15527_s3 + $0x58] sm:$0xff] }
 0x5a9   :  { %15881 = vst [vmem:[#allocation59_spill] sm:$0xff] %v13821_v34  ;;  %8014 = vmatpush.msra.mxu0 %v7979_v37  ;;  %v7995_v29 = vld [vmem:[%s15527_s3 + $0xd8] sm:$0xff] }
 0x5aa   :  { %15882 = vst [vmem:[#allocation60_spill] sm:$0xff] %v13823_v50  ;;  %v7500_v3 = vmax.f32 %v6750_v30, 0.0  ;;  %v7501_v60 = vmax.f32 %v7151_v24, 0.0  ;;  %8034 = vmatpush.msra.mxu1 %v7995_v29 }
 0x5ab   :  { %8909 = vmatmul.msk.f32.gmra.mxu0 %vm293_vm1, %v10118_v7  ;;  %9038 = vmatmul.msk.f32.gmra.mxu1 %vm293_vm1, %v10118_v7 }
 0x5ac   :  { %v7723_v48 = vadd.f32 %v7722_v58, %v7500_v3  ;;  %v7856_v21 = vadd.f32 %v7855_v38, %v7501_v60  ;;  %9294 = vmatmul.msk.f32.gmra.mxu2 %vm293_vm1, %v10371_v23  ;;  %9423 = vmatmul.msk.f32.gmra.mxu3 %vm293_vm1, %v10371_v23  ;;  %v10119_v38 = vunpack.c.h.bf16 %v10677_v20  ;;  %v10374_v60 = vunpack.c.l.bf16 %v10741_v54  ;;  %v10678_v20 = vld [vmem:[%s15524_s0 + $0x4d8] sm:$0xff]  }
 0x5af   :  { %v6752_v7 = vpop.f32.mrf.mxu2  ;;  %v7153_v58 = vpop.f32.mrf.mxu3 }
 0x5b0   :  { %v6753_v30 = vadd.f32 %v6752_v7, %v10995_v10  ;;  %v7154_v24 = vadd.f32 %v7153_v58, %v10997_v11  ;;  %v13840_v23 = vpop.f32.mrf.mxu0  ;;  %v13842_v3 = vpop.f32.mrf.mxu1 }
 0x5b1   :  { %15883 = vst [vmem:[#allocation61_spill] sm:$0xff] %v13840_v23 }
 0x5b2   :  { %15884 = vst [vmem:[#allocation62_spill] sm:$0xff] %v13842_v3  ;;  %v7502_v50 = vmax.f32 %v6753_v30, 0.0  ;;  %v7503_v34 = vmax.f32 %v7154_v24, 0.0  ;;  %v10122_v3 = vunpack.c.l.bf16 %v10678_v20 }
 0x5b3   :  { %8910 = vmatmul.msk.f32.gmra.mxu0 %vm293_vm1, %v10119_v38  ;;  %9039 = vmatmul.msk.f32.gmra.mxu1 %vm293_vm1, %v10119_v38 }
 0x5b4   :  { %v7724_v37 = vadd.f32 %v7723_v48, %v7502_v50  ;;  %v7857_v29 = vadd.f32 %v7856_v21, %v7503_v34  ;;  %9295 = vmatmul.msk.f32.gmra.mxu2 %vm293_vm1, %v10374_v60  ;;  %9424 = vmatmul.msk.f32.gmra.mxu3 %vm293_vm1, %v10374_v60  ;;  %v10375_v34 = vunpack.c.h.bf16 %v10741_v54 }
 0x5b7   :  { %v6755_v7 = vpop.f32.mrf.mxu2  ;;  %v7156_v58 = vpop.f32.mrf.mxu3 }
 0x5b8   :  { %v6756_v30 = vadd.f32 %v6755_v7, %v10995_v10  ;;  %v7157_v24 = vadd.f32 %v7156_v58, %v10997_v11  ;;  %v13853_v23 = vpop.f32.mrf.mxu0  ;;  %v13855_v38 = vpop.f32.mrf.mxu1  ;;  %v10742_v7 = vld [vmem:[%s15524_s0 + $0x6d8] sm:$0xff]  }
 0x5b9   :  { %15885 = vst [vmem:[#allocation63_spill] sm:$0xff] %v13853_v23 }
 0x5ba   :  { %15886 = vst [vmem:[#allocation64_spill] sm:$0xff] %v13855_v38  ;;  %v7504_v50 = vmax.f32 %v6756_v30, 0.0  ;;  %v7505_v48 = vmax.f32 %v7157_v24, 0.0  ;;  %v10123_v38 = vunpack.c.h.bf16 %v10678_v20 }
 0x5bb   :  { %8911 = vmatmul.msk.f32.gmra.mxu0 %vm293_vm1, %v10122_v3  ;;  %9040 = vmatmul.msk.f32.gmra.mxu1 %vm293_vm1, %v10122_v3 }
 0x5bc   :  { %v7725_v21 = vadd.f32 %v7724_v37, %v7504_v50  ;;  %v7858_v60 = vadd.f32 %v7857_v29, %v7505_v48  ;;  %9296 = vmatmul.msk.f32.gmra.mxu2 %vm293_vm1, %v10375_v34  ;;  %9425 = vmatmul.msk.f32.gmra.mxu3 %vm293_vm1, %v10375_v34  ;;  %v10378_v37 = vunpack.c.l.bf16 %v10742_v7 }
 0x5bf   :  { %v6758_v58 = vpop.f32.mrf.mxu2  ;;  %v7159_v23 = vpop.f32.mrf.mxu3 }
 0x5c0   :  { %v6759_v54 = vadd.f32 %v6758_v58, %v10995_v10  ;;  %v7160_v30 = vadd.f32 %v7159_v23, %v10997_v11  ;;  %v13866_v24 = vpop.f32.mrf.mxu0  ;;  %v13868_v3 = vpop.f32.mrf.mxu1  ;;  %v10679_v23 = vld [vmem:[%s15524_s0 + $0x4e0] sm:$0xff]  }
 0x5c1   :  { %15887 = vst [vmem:[#allocation65_spill] sm:$0xff] %v13866_v24 }
 0x5c2   :  { %15888 = vst [vmem:[#allocation66_spill] sm:$0xff] %v13868_v3  ;;  %v7506_v29 = vmax.f32 %v6759_v54, 0.0  ;;  %v7507_v50 = vmax.f32 %v7160_v30, 0.0  ;;  %v10126_v3 = vunpack.c.l.bf16 %v10679_v23 }
 0x5c3   :  { %8912 = vmatmul.msk.f32.gmra.mxu0 %vm293_vm1, %v10123_v38  ;;  %9041 = vmatmul.msk.f32.gmra.mxu1 %vm293_vm1, %v10123_v38 }
 0x5c4   :  { %v7726_v34 = vadd.f32 %v7725_v21, %v7506_v29  ;;  %v7859_v48 = vadd.f32 %v7858_v60, %v7507_v50  ;;  %9297 = vmatmul.msk.f32.gmra.mxu2 %vm293_vm1, %v10378_v37  ;;  %9426 = vmatmul.msk.f32.gmra.mxu3 %vm293_vm1, %v10378_v37  ;;  %v10379_v21 = vunpack.c.h.bf16 %v10742_v7 }
 0x5c7   :  { %v6761_v20 = vpop.f32.mrf.mxu2  ;;  %v7162_v58 = vpop.f32.mrf.mxu3 }
 0x5c8   :  { %v6762_v54 = vadd.f32 %v6761_v20, %v10995_v10  ;;  %v7163_v30 = vadd.f32 %v7162_v58, %v10997_v11  ;;  %v13879_v24 = vpop.f32.mrf.mxu0  ;;  %v13881_v38 = vpop.f32.mrf.mxu1  ;;  %v10743_v20 = vld [vmem:[%s15524_s0 + $0x6e0] sm:$0xff]  }
 0x5c9   :  { %15889 = vst [vmem:[#allocation67_spill] sm:$0xff] %v13879_v24 }
 0x5ca   :  { %15890 = vst [vmem:[#allocation68_spill] sm:$0xff] %v13881_v38  ;;  %v7508_v60 = vmax.f32 %v6762_v54, 0.0  ;;  %v7509_v29 = vmax.f32 %v7163_v30, 0.0  ;;  %v10127_v38 = vunpack.c.h.bf16 %v10679_v23 }
 0x5cb   :  { %8913 = vmatmul.msk.f32.gmra.mxu0 %vm293_vm1, %v10126_v3  ;;  %9042 = vmatmul.msk.f32.gmra.mxu1 %vm293_vm1, %v10126_v3 }
 0x5cc   :  { %v7727_v37 = vadd.f32 %v7726_v34, %v7508_v60  ;;  %v7860_v50 = vadd.f32 %v7859_v48, %v7509_v29  ;;  %9298 = vmatmul.msk.f32.gmra.mxu2 %vm293_vm1, %v10379_v21  ;;  %9427 = vmatmul.msk.f32.gmra.mxu3 %vm293_vm1, %v10379_v21  ;;  %v10382_v34 = vunpack.c.l.bf16 %v10743_v20 }
 0x5cf   :  { %v6764_v58 = vpop.f32.mrf.mxu2  ;;  %v7165_v24 = vpop.f32.mrf.mxu3 }
 0x5d0   :  { %v6765_v7 = vadd.f32 %v6764_v58, %v10995_v10  ;;  %v7166_v54 = vadd.f32 %v7165_v24, %v10997_v11  ;;  %v13892_v30 = vpop.f32.mrf.mxu0  ;;  %v13894_v3 = vpop.f32.mrf.mxu1  ;;  %v10680_v24 = vld [vmem:[%s15524_s0 + $0x4e8] sm:$0xff]  }
 0x5d1   :  { %15891 = vst [vmem:[#allocation69_spill] sm:$0xff] %v13892_v30 }
 0x5d2   :  { %15892 = vst [vmem:[#allocation70_spill] sm:$0xff] %v13894_v3  ;;  %v7510_v48 = vmax.f32 %v6765_v7, 0.0  ;;  %v7511_v60 = vmax.f32 %v7166_v54, 0.0  ;;  %v10130_v3 = vunpack.c.l.bf16 %v10680_v24 }
 0x5d3   :  { %8914 = vmatmul.msk.f32.gmra.mxu0 %vm293_vm1, %v10127_v38  ;;  %9043 = vmatmul.msk.f32.gmra.mxu1 %vm293_vm1, %v10127_v38 }
 0x5d4   :  { %v7728_v21 = vadd.f32 %v7727_v37, %v7510_v48  ;;  %v7861_v29 = vadd.f32 %v7860_v50, %v7511_v60  ;;  %9299 = vmatmul.msk.f32.gmra.mxu2 %vm293_vm1, %v10382_v34  ;;  %9428 = vmatmul.msk.f32.gmra.mxu3 %vm293_vm1, %v10382_v34  ;;  %v10383_v37 = vunpack.c.h.bf16 %v10743_v20 }
 0x5d7   :  { %v6767_v23 = vpop.f32.mrf.mxu2  ;;  %v7168_v58 = vpop.f32.mrf.mxu3 }
 0x5d8   :  { %v6768_v7 = vadd.f32 %v6767_v23, %v10995_v10  ;;  %v7169_v54 = vadd.f32 %v7168_v58, %v10997_v11  ;;  %v13905_v30 = vpop.f32.mrf.mxu0  ;;  %v13907_v38 = vpop.f32.mrf.mxu1  ;;  %v10744_v23 = vld [vmem:[%s15524_s0 + $0x6e8] sm:$0xff]  }
 0x5d9   :  { %15893 = vst [vmem:[#allocation71_spill] sm:$0xff] %v13905_v30 }
 0x5da   :  { %15894 = vst [vmem:[#allocation72_spill] sm:$0xff] %v13907_v38  ;;  %v7512_v50 = vmax.f32 %v6768_v7, 0.0  ;;  %v7513_v48 = vmax.f32 %v7169_v54, 0.0  ;;  %v10131_v38 = vunpack.c.h.bf16 %v10680_v24 }
 0x5db   :  { %8915 = vmatmul.msk.f32.gmra.mxu0 %vm293_vm1, %v10130_v3  ;;  %9044 = vmatmul.msk.f32.gmra.mxu1 %vm293_vm1, %v10130_v3 }
 0x5dc   :  { %v7729_v34 = vadd.f32 %v7728_v21, %v7512_v50  ;;  %v7862_v60 = vadd.f32 %v7861_v29, %v7513_v48  ;;  %9300 = vmatmul.msk.f32.gmra.mxu2 %vm293_vm1, %v10383_v37  ;;  %9429 = vmatmul.msk.f32.gmra.mxu3 %vm293_vm1, %v10383_v37  ;;  %v10386_v21 = vunpack.c.l.bf16 %v10744_v23 }
 0x5df   :  { %v6770_v58 = vpop.f32.mrf.mxu2  ;;  %v7171_v30 = vpop.f32.mrf.mxu3 }
 0x5e0   :  { %v6771_v20 = vadd.f32 %v6770_v58, %v10995_v10  ;;  %v7172_v7 = vadd.f32 %v7171_v30, %v10997_v11  ;;  %v13918_v54 = vpop.f32.mrf.mxu0  ;;  %v13920_v3 = vpop.f32.mrf.mxu1  ;;  %v10681_v30 = vld [vmem:[%s15524_s0 + $0x4f0] sm:$0xff]  }
 0x5e1   :  { %15895 = vst [vmem:[#allocation73_spill] sm:$0xff] %v13918_v54 }
 0x5e2   :  { %15896 = vst [vmem:[#allocation74_spill] sm:$0xff] %v13920_v3  ;;  %v7514_v29 = vmax.f32 %v6771_v20, 0.0  ;;  %v7515_v50 = vmax.f32 %v7172_v7, 0.0  ;;  %v10134_v3 = vunpack.c.l.bf16 %v10681_v30 }
 0x5e3   :  { %8916 = vmatmul.msk.f32.gmra.mxu0 %vm293_vm1, %v10131_v38  ;;  %9045 = vmatmul.msk.f32.gmra.mxu1 %vm293_vm1, %v10131_v38 }
 0x5e4   :  { %v7730_v37 = vadd.f32 %v7729_v34, %v7514_v29  ;;  %v7863_v48 = vadd.f32 %v7862_v60, %v7515_v50  ;;  %9301 = vmatmul.msk.f32.gmra.mxu2 %vm293_vm1, %v10386_v21  ;;  %9430 = vmatmul.msk.f32.gmra.mxu3 %vm293_vm1, %v10386_v21  ;;  %v10387_v34 = vunpack.c.h.bf16 %v10744_v23  ;;  %v10745_v23 = vld [vmem:[%s15524_s0 + $0x6f0] sm:$0xff]  }
 0x5e7   :  { %v6773_v24 = vpop.f32.mrf.mxu2  ;;  %v7174_v58 = vpop.f32.mrf.mxu3 }
 0x5e8   :  { %v6774_v20 = vadd.f32 %v6773_v24, %v10995_v10  ;;  %v7175_v7 = vadd.f32 %v7174_v58, %v10997_v11  ;;  %v13931_v54 = vpop.f32.mrf.mxu0  ;;  %v13933_v38 = vpop.f32.mrf.mxu1  ;;  %v7978_v24 = vld [vmem:[%s15527_s3 + $0x50] sm:$0xff] }
 0x5e9   :  { %15897 = vst [vmem:[#allocation75_spill] sm:$0xff] %v13931_v54  ;;  %8015 = vmatpush.msra.mxu0 %v7978_v24  ;;  %v7994_v58 = vld [vmem:[%s15527_s3 + $0xd0] sm:$0xff] }
 0x5ea   :  { %15898 = vst [vmem:[#allocation76_spill] sm:$0xff] %v13933_v38  ;;  %v7516_v60 = vmax.f32 %v6774_v20, 0.0  ;;  %v7517_v29 = vmax.f32 %v7175_v7, 0.0  ;;  %8035 = vmatpush.msra.mxu1 %v7994_v58 }
 0x5eb   :  { %8917 = vmatmul.msk.f32.gmra.mxu0 %vm293_vm1, %v10134_v3  ;;  %9046 = vmatmul.msk.f32.gmra.mxu1 %vm293_vm1, %v10134_v3 }
 0x5ec   :  { %v7731_v21 = vadd.f32 %v7730_v37, %v7516_v60  ;;  %v7864_v50 = vadd.f32 %v7863_v48, %v7517_v29  ;;  %9302 = vmatmul.msk.f32.gmra.mxu2 %vm293_vm1, %v10387_v34  ;;  %9431 = vmatmul.msk.f32.gmra.mxu3 %vm293_vm1, %v10387_v34  ;;  %v10135_v48 = vunpack.c.h.bf16 %v10681_v30  ;;  %v10390_v29 = vunpack.c.l.bf16 %v10745_v23  ;;  %v10682_v30 = vld [vmem:[%s15524_s0 + $0x4f8] sm:$0xff]  }
 0x5ef   :  { %v6776_v3 = vpop.f32.mrf.mxu2  ;;  %v7177_v37 = vpop.f32.mrf.mxu3 }
 0x5f0   :  { %v6777_v20 = vadd.f32 %v6776_v3, %v10995_v10  ;;  %v7178_v7 = vadd.f32 %v7177_v37, %v10997_v11  ;;  %v13950_v34 = vpop.f32.mrf.mxu0  ;;  %v13952_v60 = vpop.f32.mrf.mxu1 }
 0x5f1   :  { %15899 = vst [vmem:[#allocation77_spill] sm:$0xff] %v13950_v34 }
 0x5f2   :  { %15900 = vst [vmem:[#allocation78_spill] sm:$0xff] %v13952_v60  ;;  %v7518_v38 = vmax.f32 %v6777_v20, 0.0  ;;  %v7519_v54 = vmax.f32 %v7178_v7, 0.0  ;;  %v10138_v60 = vunpack.c.l.bf16 %v10682_v30 }
 0x5f3   :  { %8918 = vmatmul.msk.f32.gmra.mxu0 %vm293_vm1, %v10135_v48  ;;  %9047 = vmatmul.msk.f32.gmra.mxu1 %vm293_vm1, %v10135_v48 }
 0x5f4   :  { %v7732_v24 = vadd.f32 %v7731_v21, %v7518_v38  ;;  %v7865_v58 = vadd.f32 %v7864_v50, %v7519_v54  ;;  %9303 = vmatmul.msk.f32.gmra.mxu2 %vm293_vm1, %v10390_v29  ;;  %9432 = vmatmul.msk.f32.gmra.mxu3 %vm293_vm1, %v10390_v29  ;;  %v10391_v54 = vunpack.c.h.bf16 %v10745_v23 }
 0x5f7   :  { %v6779_v3 = vpop.f32.mrf.mxu2  ;;  %v7180_v37 = vpop.f32.mrf.mxu3 }
 0x5f8   :  { %v6780_v20 = vadd.f32 %v6779_v3, %v10995_v10  ;;  %v7181_v7 = vadd.f32 %v7180_v37, %v10997_v11  ;;  %v13963_v34 = vpop.f32.mrf.mxu0  ;;  %v13965_v48 = vpop.f32.mrf.mxu1  ;;  %v10746_v3 = vld [vmem:[%s15524_s0 + $0x6f8] sm:$0xff]  }
 0x5f9   :  { %15901 = vst [vmem:[#allocation79_spill] sm:$0xff] %v13963_v34 }
 0x5fa   :  { %15902 = vst [vmem:[#allocation80_spill] sm:$0xff] %v13965_v48  ;;  %v7520_v38 = vmax.f32 %v6780_v20, 0.0  ;;  %v7521_v21 = vmax.f32 %v7181_v7, 0.0  ;;  %v10139_v48 = vunpack.c.h.bf16 %v10682_v30 }
 0x5fb   :  { %8919 = vmatmul.msk.f32.gmra.mxu0 %vm293_vm1, %v10138_v60  ;;  %9048 = vmatmul.msk.f32.gmra.mxu1 %vm293_vm1, %v10138_v60 }
 0x5fc   :  { %v7733_v50 = vadd.f32 %v7732_v24, %v7520_v38  ;;  %v7866_v29 = vadd.f32 %v7865_v58, %v7521_v21  ;;  %9304 = vmatmul.msk.f32.gmra.mxu2 %vm293_vm1, %v10391_v54  ;;  %9433 = vmatmul.msk.f32.gmra.mxu3 %vm293_vm1, %v10391_v54  ;;  %v10394_v24 = vunpack.c.l.bf16 %v10746_v3 }
 0x5ff   :  { %v6782_v37 = vpop.f32.mrf.mxu2  ;;  %v7183_v34 = vpop.f32.mrf.mxu3 }
 0x600   :  { %v6783_v23 = vadd.f32 %v6782_v37, %v10995_v10  ;;  %v7184_v20 = vadd.f32 %v7183_v34, %v10997_v11  ;;  %v13976_v7 = vpop.f32.mrf.mxu0  ;;  %v13978_v60 = vpop.f32.mrf.mxu1  ;;  %v10683_v34 = vld [vmem:[%s15524_s0 + $0x500] sm:$0xff]  }
 0x601   :  { %15903 = vst [vmem:[#allocation81_spill] sm:$0xff] %v13976_v7 }
 0x602   :  { %15904 = vst [vmem:[#allocation82_spill] sm:$0xff] %v13978_v60  ;;  %v7522_v58 = vmax.f32 %v6783_v23, 0.0  ;;  %v7523_v38 = vmax.f32 %v7184_v20, 0.0  ;;  %v10142_v60 = vunpack.c.l.bf16 %v10683_v34 }
 0x603   :  { %8920 = vmatmul.msk.f32.gmra.mxu0 %vm293_vm1, %v10139_v48  ;;  %9049 = vmatmul.msk.f32.gmra.mxu1 %vm293_vm1, %v10139_v48 }
 0x604   :  { %v7734_v54 = vadd.f32 %v7733_v50, %v7522_v58  ;;  %v7867_v21 = vadd.f32 %v7866_v29, %v7523_v38  ;;  %9305 = vmatmul.msk.f32.gmra.mxu2 %vm293_vm1, %v10394_v24  ;;  %9434 = vmatmul.msk.f32.gmra.mxu3 %vm293_vm1, %v10394_v24  ;;  %v10395_v50 = vunpack.c.h.bf16 %v10746_v3 }
 0x607   :  { %v6785_v30 = vpop.f32.mrf.mxu2  ;;  %v7186_v37 = vpop.f32.mrf.mxu3 }
 0x608   :  { %v6786_v23 = vadd.f32 %v6785_v30, %v10995_v10  ;;  %v7187_v20 = vadd.f32 %v7186_v37, %v10997_v11  ;;  %v13989_v7 = vpop.f32.mrf.mxu0  ;;  %v13991_v48 = vpop.f32.mrf.mxu1  ;;  %v10747_v30 = vld [vmem:[%s15524_s0 + $0x700] sm:$0xff]  }
 0x609   :  { %15905 = vst [vmem:[#allocation83_spill] sm:$0xff] %v13989_v7 }
 0x60a   :  { %15906 = vst [vmem:[#allocation84_spill] sm:$0xff] %v13991_v48  ;;  %v7524_v29 = vmax.f32 %v6786_v23, 0.0  ;;  %v7525_v58 = vmax.f32 %v7187_v20, 0.0  ;;  %v10143_v48 = vunpack.c.h.bf16 %v10683_v34 }
 0x60b   :  { %8921 = vmatmul.msk.f32.gmra.mxu0 %vm293_vm1, %v10142_v60  ;;  %9050 = vmatmul.msk.f32.gmra.mxu1 %vm293_vm1, %v10142_v60 }
 0x60c   :  { %v7735_v24 = vadd.f32 %v7734_v54, %v7524_v29  ;;  %v7868_v38 = vadd.f32 %v7867_v21, %v7525_v58  ;;  %9306 = vmatmul.msk.f32.gmra.mxu2 %vm293_vm1, %v10395_v50  ;;  %9435 = vmatmul.msk.f32.gmra.mxu3 %vm293_vm1, %v10395_v50  ;;  %v10398_v54 = vunpack.c.l.bf16 %v10747_v30 }
 0x60f   :  { %v6788_v37 = vpop.f32.mrf.mxu2  ;;  %v7189_v7 = vpop.f32.mrf.mxu3 }
 0x610   :  { %v6789_v3 = vadd.f32 %v6788_v37, %v10995_v10  ;;  %v7190_v23 = vadd.f32 %v7189_v7, %v10997_v11  ;;  %v14002_v20 = vpop.f32.mrf.mxu0  ;;  %v14004_v60 = vpop.f32.mrf.mxu1  ;;  %v10684_v7 = vld [vmem:[%s15524_s0 + $0x508] sm:$0xff]  }
 0x611   :  { %15907 = vst [vmem:[#allocation85_spill] sm:$0xff] %v14002_v20 }
 0x612   :  { %15908 = vst [vmem:[#allocation86_spill] sm:$0xff] %v14004_v60  ;;  %v7526_v21 = vmax.f32 %v6789_v3, 0.0  ;;  %v7527_v29 = vmax.f32 %v7190_v23, 0.0  ;;  %v10146_v60 = vunpack.c.l.bf16 %v10684_v7 }
 0x613   :  { %8922 = vmatmul.msk.f32.gmra.mxu0 %vm293_vm1, %v10143_v48  ;;  %9051 = vmatmul.msk.f32.gmra.mxu1 %vm293_vm1, %v10143_v48 }
 0x614   :  { %v7736_v50 = vadd.f32 %v7735_v24, %v7526_v21  ;;  %v7869_v58 = vadd.f32 %v7868_v38, %v7527_v29  ;;  %9307 = vmatmul.msk.f32.gmra.mxu2 %vm293_vm1, %v10398_v54  ;;  %9436 = vmatmul.msk.f32.gmra.mxu3 %vm293_vm1, %v10398_v54  ;;  %v10399_v24 = vunpack.c.h.bf16 %v10747_v30 }
 0x617   :  { %v6791_v34 = vpop.f32.mrf.mxu2  ;;  %v7192_v37 = vpop.f32.mrf.mxu3 }
 0x618   :  { %v6792_v3 = vadd.f32 %v6791_v34, %v10995_v10  ;;  %v7193_v23 = vadd.f32 %v7192_v37, %v10997_v11  ;;  %v14015_v20 = vpop.f32.mrf.mxu0  ;;  %v14017_v48 = vpop.f32.mrf.mxu1  ;;  %v10748_v34 = vld [vmem:[%s15524_s0 + $0x708] sm:$0xff]  }
 0x619   :  { %15909 = vst [vmem:[#allocation87_spill] sm:$0xff] %v14015_v20 }
 0x61a   :  { %15910 = vst [vmem:[#allocation88_spill] sm:$0xff] %v14017_v48  ;;  %v7528_v38 = vmax.f32 %v6792_v3, 0.0  ;;  %v7529_v21 = vmax.f32 %v7193_v23, 0.0  ;;  %v10147_v48 = vunpack.c.h.bf16 %v10684_v7 }
 0x61b   :  { %8923 = vmatmul.msk.f32.gmra.mxu0 %vm293_vm1, %v10146_v60  ;;  %9052 = vmatmul.msk.f32.gmra.mxu1 %vm293_vm1, %v10146_v60 }
 0x61c   :  { %v7737_v54 = vadd.f32 %v7736_v50, %v7528_v38  ;;  %v7870_v29 = vadd.f32 %v7869_v58, %v7529_v21  ;;  %9308 = vmatmul.msk.f32.gmra.mxu2 %vm293_vm1, %v10399_v24  ;;  %9437 = vmatmul.msk.f32.gmra.mxu3 %vm293_vm1, %v10399_v24  ;;  %v10402_v50 = vunpack.c.l.bf16 %v10748_v34 }
 0x61f   :  { %v6794_v37 = vpop.f32.mrf.mxu2  ;;  %v7195_v20 = vpop.f32.mrf.mxu3 }
 0x620   :  { %v6795_v30 = vadd.f32 %v6794_v37, %v10995_v10  ;;  %v7196_v3 = vadd.f32 %v7195_v20, %v10997_v11  ;;  %v14028_v23 = vpop.f32.mrf.mxu0  ;;  %v14030_v60 = vpop.f32.mrf.mxu1  ;;  %v10685_v20 = vld [vmem:[%s15524_s0 + $0x510] sm:$0xff]  }
 0x621   :  { %15911 = vst [vmem:[#allocation89_spill] sm:$0xff] %v14028_v23 }
 0x622   :  { %15912 = vst [vmem:[#allocation90_spill] sm:$0xff] %v14030_v60  ;;  %v7530_v58 = vmax.f32 %v6795_v30, 0.0  ;;  %v7531_v38 = vmax.f32 %v7196_v3, 0.0  ;;  %v10150_v60 = vunpack.c.l.bf16 %v10685_v20 }
 0x623   :  { %8924 = vmatmul.msk.f32.gmra.mxu0 %vm293_vm1, %v10147_v48  ;;  %9053 = vmatmul.msk.f32.gmra.mxu1 %vm293_vm1, %v10147_v48 }
 0x624   :  { %v7738_v24 = vadd.f32 %v7737_v54, %v7530_v58  ;;  %v7871_v21 = vadd.f32 %v7870_v29, %v7531_v38  ;;  %9309 = vmatmul.msk.f32.gmra.mxu2 %vm293_vm1, %v10402_v50  ;;  %9438 = vmatmul.msk.f32.gmra.mxu3 %vm293_vm1, %v10402_v50  ;;  %v10403_v54 = vunpack.c.h.bf16 %v10748_v34  ;;  %v10749_v34 = vld [vmem:[%s15524_s0 + $0x710] sm:$0xff]  }
 0x627   :  { %v6797_v7 = vpop.f32.mrf.mxu2  ;;  %v7198_v37 = vpop.f32.mrf.mxu3 }
 0x628   :  { %v6798_v30 = vadd.f32 %v6797_v7, %v10995_v10  ;;  %v7199_v3 = vadd.f32 %v7198_v37, %v10997_v11  ;;  %v14041_v23 = vpop.f32.mrf.mxu0  ;;  %v14043_v48 = vpop.f32.mrf.mxu1  ;;  %v7977_v7 = vld [vmem:[%s15527_s3 + $0x48] sm:$0xff] }
 0x629   :  { %15913 = vst [vmem:[#allocation91_spill] sm:$0xff] %v14041_v23  ;;  %8016 = vmatpush.msra.mxu0 %v7977_v7  ;;  %v7993_v37 = vld [vmem:[%s15527_s3 + $0xc8] sm:$0xff] }
 0x62a   :  { %15914 = vst [vmem:[#allocation92_spill] sm:$0xff] %v14043_v48  ;;  %v7532_v29 = vmax.f32 %v6798_v30, 0.0  ;;  %v7533_v58 = vmax.f32 %v7199_v3, 0.0  ;;  %8036 = vmatpush.msra.mxu1 %v7993_v37 }
 0x62b   :  { %8925 = vmatmul.msk.f32.gmra.mxu0 %vm293_vm1, %v10150_v60  ;;  %9054 = vmatmul.msk.f32.gmra.mxu1 %vm293_vm1, %v10150_v60 }
 0x62c   :  { %v7739_v50 = vadd.f32 %v7738_v24, %v7532_v29  ;;  %v7872_v38 = vadd.f32 %v7871_v21, %v7533_v58  ;;  %9310 = vmatmul.msk.f32.gmra.mxu2 %vm293_vm1, %v10403_v54  ;;  %9439 = vmatmul.msk.f32.gmra.mxu3 %vm293_vm1, %v10403_v54  ;;  %v10151_v21 = vunpack.c.h.bf16 %v10685_v20  ;;  %v10406_v58 = vunpack.c.l.bf16 %v10749_v34  ;;  %v10686_v20 = vld [vmem:[%s15524_s0 + $0x518] sm:$0xff]  }
 0x62f   :  { %v6800_v60 = vpop.f32.mrf.mxu2  ;;  %v7201_v24 = vpop.f32.mrf.mxu3 }
 0x630   :  { %v6801_v30 = vadd.f32 %v6800_v60, %v10995_v10  ;;  %v7202_v3 = vadd.f32 %v7201_v24, %v10997_v11  ;;  %v14060_v54 = vpop.f32.mrf.mxu0  ;;  %v14062_v29 = vpop.f32.mrf.mxu1 }
 0x631   :  { %15915 = vst [vmem:[#allocation93_spill] sm:$0xff] %v14060_v54 }
 0x632   :  { %15916 = vst [vmem:[#allocation94_spill] sm:$0xff] %v14062_v29  ;;  %v7534_v48 = vmax.f32 %v6801_v30, 0.0  ;;  %v7535_v23 = vmax.f32 %v7202_v3, 0.0  ;;  %v10154_v29 = vunpack.c.l.bf16 %v10686_v20 }
 0x633   :  { %8926 = vmatmul.msk.f32.gmra.mxu0 %vm293_vm1, %v10151_v21  ;;  %9055 = vmatmul.msk.f32.gmra.mxu1 %vm293_vm1, %v10151_v21 }
 0x634   :  { %v7740_v7 = vadd.f32 %v7739_v50, %v7534_v48  ;;  %v7873_v37 = vadd.f32 %v7872_v38, %v7535_v23  ;;  %9311 = vmatmul.msk.f32.gmra.mxu2 %vm293_vm1, %v10406_v58  ;;  %9440 = vmatmul.msk.f32.gmra.mxu3 %vm293_vm1, %v10406_v58  ;;  %v10407_v23 = vunpack.c.h.bf16 %v10749_v34 }
 0x637   :  { %v6803_v60 = vpop.f32.mrf.mxu2  ;;  %v7204_v24 = vpop.f32.mrf.mxu3 }
 0x638   :  { %v6804_v30 = vadd.f32 %v6803_v60, %v10995_v10  ;;  %v7205_v3 = vadd.f32 %v7204_v24, %v10997_v11  ;;  %v14073_v54 = vpop.f32.mrf.mxu0  ;;  %v14075_v21 = vpop.f32.mrf.mxu1  ;;  %v10750_v60 = vld [vmem:[%s15524_s0 + $0x718] sm:$0xff]  }
 0x639   :  { %15917 = vst [vmem:[#allocation95_spill] sm:$0xff] %v14073_v54 }
 0x63a   :  { %15918 = vst [vmem:[#allocation96_spill] sm:$0xff] %v14075_v21  ;;  %v7536_v48 = vmax.f32 %v6804_v30, 0.0  ;;  %v7537_v50 = vmax.f32 %v7205_v3, 0.0  ;;  %v10155_v21 = vunpack.c.h.bf16 %v10686_v20 }
 0x63b   :  { %8927 = vmatmul.msk.f32.gmra.mxu0 %vm293_vm1, %v10154_v29  ;;  %9056 = vmatmul.msk.f32.gmra.mxu1 %vm293_vm1, %v10154_v29 }
 0x63c   :  { %v7741_v38 = vadd.f32 %v7740_v7, %v7536_v48  ;;  %v7874_v58 = vadd.f32 %v7873_v37, %v7537_v50  ;;  %9312 = vmatmul.msk.f32.gmra.mxu2 %vm293_vm1, %v10407_v23  ;;  %9441 = vmatmul.msk.f32.gmra.mxu3 %vm293_vm1, %v10407_v23  ;;  %v10410_v7 = vunpack.c.l.bf16 %v10750_v60 }
 0x63f   :  { %v6806_v24 = vpop.f32.mrf.mxu2  ;;  %v7207_v54 = vpop.f32.mrf.mxu3 }
 0x640   :  { %v6807_v34 = vadd.f32 %v6806_v24, %v10995_v10  ;;  %v7208_v30 = vadd.f32 %v7207_v54, %v10997_v11  ;;  %v14086_v3 = vpop.f32.mrf.mxu0  ;;  %v14088_v29 = vpop.f32.mrf.mxu1  ;;  %v10687_v54 = vld [vmem:[%s15524_s0 + $0x520] sm:$0xff]  }
 0x641   :  { %15919 = vst [vmem:[#allocation97_spill] sm:$0xff] %v14086_v3 }
 0x642   :  { %15920 = vst [vmem:[#allocation98_spill] sm:$0xff] %v14088_v29  ;;  %v7538_v37 = vmax.f32 %v6807_v34, 0.0  ;;  %v7539_v48 = vmax.f32 %v7208_v30, 0.0  ;;  %v10158_v29 = vunpack.c.l.bf16 %v10687_v54 }
 0x643   :  { %8928 = vmatmul.msk.f32.gmra.mxu0 %vm293_vm1, %v10155_v21  ;;  %9057 = vmatmul.msk.f32.gmra.mxu1 %vm293_vm1, %v10155_v21 }
 0x644   :  { %v7742_v23 = vadd.f32 %v7741_v38, %v7538_v37  ;;  %v7875_v50 = vadd.f32 %v7874_v58, %v7539_v48  ;;  %9313 = vmatmul.msk.f32.gmra.mxu2 %vm293_vm1, %v10410_v7  ;;  %9442 = vmatmul.msk.f32.gmra.mxu3 %vm293_vm1, %v10410_v7  ;;  %v10411_v38 = vunpack.c.h.bf16 %v10750_v60 }
 0x647   :  { %v6809_v20 = vpop.f32.mrf.mxu2  ;;  %v7210_v24 = vpop.f32.mrf.mxu3 }
 0x648   :  { %v6810_v34 = vadd.f32 %v6809_v20, %v10995_v10  ;;  %v7211_v30 = vadd.f32 %v7210_v24, %v10997_v11  ;;  %v14099_v3 = vpop.f32.mrf.mxu0  ;;  %v14101_v21 = vpop.f32.mrf.mxu1  ;;  %v10751_v20 = vld [vmem:[%s15524_s0 + $0x720] sm:$0xff]  }
 0x649   :  { %15921 = vst [vmem:[#allocation99_spill] sm:$0xff] %v14099_v3 }
 0x64a   :  { %15922 = vst [vmem:[#allocation100_spill] sm:$0xff] %v14101_v21  ;;  %v7540_v58 = vmax.f32 %v6810_v34, 0.0  ;;  %v7541_v37 = vmax.f32 %v7211_v30, 0.0  ;;  %v10159_v21 = vunpack.c.h.bf16 %v10687_v54 }
 0x64b   :  { %8929 = vmatmul.msk.f32.gmra.mxu0 %vm293_vm1, %v10158_v29  ;;  %9058 = vmatmul.msk.f32.gmra.mxu1 %vm293_vm1, %v10158_v29 }
 0x64c   :  { %v7743_v7 = vadd.f32 %v7742_v23, %v7540_v58  ;;  %v7876_v48 = vadd.f32 %v7875_v50, %v7541_v37  ;;  %9314 = vmatmul.msk.f32.gmra.mxu2 %vm293_vm1, %v10411_v38  ;;  %9443 = vmatmul.msk.f32.gmra.mxu3 %vm293_vm1, %v10411_v38  ;;  %v10414_v23 = vunpack.c.l.bf16 %v10751_v20 }
 0x64f   :  { %v6812_v24 = vpop.f32.mrf.mxu2  ;;  %v7213_v3 = vpop.f32.mrf.mxu3 }
 0x650   :  { %v6813_v60 = vadd.f32 %v6812_v24, %v10995_v10  ;;  %v7214_v34 = vadd.f32 %v7213_v3, %v10997_v11  ;;  %v14112_v30 = vpop.f32.mrf.mxu0  ;;  %v14114_v29 = vpop.f32.mrf.mxu1  ;;  %v10688_v3 = vld [vmem:[%s15524_s0 + $0x528] sm:$0xff]  }
 0x651   :  { %15923 = vst [vmem:[#allocation101_spill] sm:$0xff] %v14112_v30 }
 0x652   :  { %15924 = vst [vmem:[#allocation102_spill] sm:$0xff] %v14114_v29  ;;  %v7542_v50 = vmax.f32 %v6813_v60, 0.0  ;;  %v7543_v58 = vmax.f32 %v7214_v34, 0.0  ;;  %v10162_v29 = vunpack.c.l.bf16 %v10688_v3 }
 0x653   :  { %8930 = vmatmul.msk.f32.gmra.mxu0 %vm293_vm1, %v10159_v21  ;;  %9059 = vmatmul.msk.f32.gmra.mxu1 %vm293_vm1, %v10159_v21 }
 0x654   :  { %v7744_v38 = vadd.f32 %v7743_v7, %v7542_v50  ;;  %v7877_v37 = vadd.f32 %v7876_v48, %v7543_v58  ;;  %9315 = vmatmul.msk.f32.gmra.mxu2 %vm293_vm1, %v10414_v23  ;;  %9444 = vmatmul.msk.f32.gmra.mxu3 %vm293_vm1, %v10414_v23  ;;  %v10415_v7 = vunpack.c.h.bf16 %v10751_v20 }
 0x657   :  { %v6815_v54 = vpop.f32.mrf.mxu2  ;;  %v7216_v24 = vpop.f32.mrf.mxu3 }
 0x658   :  { %v6816_v60 = vadd.f32 %v6815_v54, %v10995_v10  ;;  %v7217_v34 = vadd.f32 %v7216_v24, %v10997_v11  ;;  %v14125_v30 = vpop.f32.mrf.mxu0  ;;  %v14127_v21 = vpop.f32.mrf.mxu1  ;;  %v10752_v54 = vld [vmem:[%s15524_s0 + $0x728] sm:$0xff]  }
 0x659   :  { %15925 = vst [vmem:[#allocation103_spill] sm:$0xff] %v14125_v30 }
 0x65a   :  { %15926 = vst [vmem:[#allocation104_spill] sm:$0xff] %v14127_v21  ;;  %v7544_v48 = vmax.f32 %v6816_v60, 0.0  ;;  %v7545_v50 = vmax.f32 %v7217_v34, 0.0  ;;  %v10163_v21 = vunpack.c.h.bf16 %v10688_v3 }
 0x65b   :  { %8931 = vmatmul.msk.f32.gmra.mxu0 %vm293_vm1, %v10162_v29  ;;  %9060 = vmatmul.msk.f32.gmra.mxu1 %vm293_vm1, %v10162_v29 }
 0x65c   :  { %v7745_v23 = vadd.f32 %v7744_v38, %v7544_v48  ;;  %v7878_v58 = vadd.f32 %v7877_v37, %v7545_v50  ;;  %9316 = vmatmul.msk.f32.gmra.mxu2 %vm293_vm1, %v10415_v7  ;;  %9445 = vmatmul.msk.f32.gmra.mxu3 %vm293_vm1, %v10415_v7  ;;  %v10418_v38 = vunpack.c.l.bf16 %v10752_v54 }
 0x65f   :  { %v6818_v24 = vpop.f32.mrf.mxu2  ;;  %v7219_v30 = vpop.f32.mrf.mxu3 }
 0x660   :  { %v6819_v20 = vadd.f32 %v6818_v24, %v10995_v10  ;;  %v7220_v60 = vadd.f32 %v7219_v30, %v10997_v11  ;;  %v14138_v34 = vpop.f32.mrf.mxu0  ;;  %v14140_v29 = vpop.f32.mrf.mxu1  ;;  %v10689_v30 = vld [vmem:[%s15524_s0 + $0x530] sm:$0xff]  }
 0x661   :  { %15927 = vst [vmem:[#allocation105_spill] sm:$0xff] %v14138_v34 }
 0x662   :  { %15928 = vst [vmem:[#allocation106_spill] sm:$0xff] %v14140_v29  ;;  %v7546_v37 = vmax.f32 %v6819_v20, 0.0  ;;  %v7547_v48 = vmax.f32 %v7220_v60, 0.0  ;;  %v10166_v29 = vunpack.c.l.bf16 %v10689_v30 }
 0x663   :  { %8932 = vmatmul.msk.f32.gmra.mxu0 %vm293_vm1, %v10163_v21  ;;  %9061 = vmatmul.msk.f32.gmra.mxu1 %vm293_vm1, %v10163_v21 }
 0x664   :  { %v7746_v7 = vadd.f32 %v7745_v23, %v7546_v37  ;;  %v7879_v50 = vadd.f32 %v7878_v58, %v7547_v48  ;;  %9317 = vmatmul.msk.f32.gmra.mxu2 %vm293_vm1, %v10418_v38  ;;  %9446 = vmatmul.msk.f32.gmra.mxu3 %vm293_vm1, %v10418_v38  ;;  %v10419_v23 = vunpack.c.h.bf16 %v10752_v54  ;;  %v10753_v54 = vld [vmem:[%s15524_s0 + $0x730] sm:$0xff]  }
 0x667   :  { %v6821_v3 = vpop.f32.mrf.mxu2  ;;  %v7222_v24 = vpop.f32.mrf.mxu3 }
 0x668   :  { %v6822_v20 = vadd.f32 %v6821_v3, %v10995_v10  ;;  %v7223_v60 = vadd.f32 %v7222_v24, %v10997_v11  ;;  %v14151_v34 = vpop.f32.mrf.mxu0  ;;  %v14153_v21 = vpop.f32.mrf.mxu1  ;;  %v7976_v3 = vld [vmem:[%s15527_s3 + $0x40] sm:$0xff] }
 0x669   :  { %15929 = vst [vmem:[#allocation107_spill] sm:$0xff] %v14151_v34  ;;  %8017 = vmatpush.msra.mxu0 %v7976_v3  ;;  %v7992_v24 = vld [vmem:[%s15527_s3 + $0xc0] sm:$0xff] }
 0x66a   :  { %15930 = vst [vmem:[#allocation108_spill] sm:$0xff] %v14153_v21  ;;  %v7548_v58 = vmax.f32 %v6822_v20, 0.0  ;;  %v7549_v37 = vmax.f32 %v7223_v60, 0.0  ;;  %8037 = vmatpush.msra.mxu1 %v7992_v24 }
 0x66b   :  { %8933 = vmatmul.msk.f32.gmra.mxu0 %vm293_vm1, %v10166_v29  ;;  %9062 = vmatmul.msk.f32.gmra.mxu1 %vm293_vm1, %v10166_v29 }
 0x66c   :  { %v7747_v38 = vadd.f32 %v7746_v7, %v7548_v58  ;;  %v7880_v48 = vadd.f32 %v7879_v50, %v7549_v37  ;;  %9318 = vmatmul.msk.f32.gmra.mxu2 %vm293_vm1, %v10419_v23  ;;  %9447 = vmatmul.msk.f32.gmra.mxu3 %vm293_vm1, %v10419_v23  ;;  %v10167_v50 = vunpack.c.h.bf16 %v10689_v30  ;;  %v10422_v37 = vunpack.c.l.bf16 %v10753_v54  ;;  %v10690_v30 = vld [vmem:[%s15524_s0 + $0x538] sm:$0xff]  }
 0x66f   :  { %v6824_v29 = vpop.f32.mrf.mxu2  ;;  %v7225_v7 = vpop.f32.mrf.mxu3 }
 0x670   :  { %v6825_v20 = vadd.f32 %v6824_v29, %v10995_v10  ;;  %v7226_v60 = vadd.f32 %v7225_v7, %v10997_v11  ;;  %v14170_v23 = vpop.f32.mrf.mxu0  ;;  %v14172_v58 = vpop.f32.mrf.mxu1 }
 0x671   :  { %15931 = vst [vmem:[#allocation109_spill] sm:$0xff] %v14170_v23 }
 0x672   :  { %15932 = vst [vmem:[#allocation110_spill] sm:$0xff] %v14172_v58  ;;  %v7550_v21 = vmax.f32 %v6825_v20, 0.0  ;;  %v7551_v34 = vmax.f32 %v7226_v60, 0.0  ;;  %v10170_v58 = vunpack.c.l.bf16 %v10690_v30 }
 0x673   :  { %8934 = vmatmul.msk.f32.gmra.mxu0 %vm293_vm1, %v10167_v50  ;;  %9063 = vmatmul.msk.f32.gmra.mxu1 %vm293_vm1, %v10167_v50 }
 0x674   :  { %v7748_v3 = vadd.f32 %v7747_v38, %v7550_v21  ;;  %v7881_v24 = vadd.f32 %v7880_v48, %v7551_v34  ;;  %9319 = vmatmul.msk.f32.gmra.mxu2 %vm293_vm1, %v10422_v37  ;;  %9448 = vmatmul.msk.f32.gmra.mxu3 %vm293_vm1, %v10422_v37  ;;  %v10423_v34 = vunpack.c.h.bf16 %v10753_v54 }
 0x677   :  { %v6827_v29 = vpop.f32.mrf.mxu2  ;;  %v7228_v7 = vpop.f32.mrf.mxu3 }
 0x678   :  { %v6828_v20 = vadd.f32 %v6827_v29, %v10995_v10  ;;  %v7229_v60 = vadd.f32 %v7228_v7, %v10997_v11  ;;  %v14183_v23 = vpop.f32.mrf.mxu0  ;;  %v14185_v50 = vpop.f32.mrf.mxu1  ;;  %v10754_v29 = vld [vmem:[%s15524_s0 + $0x738] sm:$0xff]  }
 0x679   :  { %15933 = vst [vmem:[#allocation111_spill] sm:$0xff] %v14183_v23 }
 0x67a   :  { %15934 = vst [vmem:[#allocation112_spill] sm:$0xff] %v14185_v50  ;;  %v7552_v21 = vmax.f32 %v6828_v20, 0.0  ;;  %v7553_v38 = vmax.f32 %v7229_v60, 0.0  ;;  %v10171_v50 = vunpack.c.h.bf16 %v10690_v30 }
 0x67b   :  { %8935 = vmatmul.msk.f32.gmra.mxu0 %vm293_vm1, %v10170_v58  ;;  %9064 = vmatmul.msk.f32.gmra.mxu1 %vm293_vm1, %v10170_v58 }
 0x67c   :  { %v7749_v48 = vadd.f32 %v7748_v3, %v7552_v21  ;;  %v7882_v37 = vadd.f32 %v7881_v24, %v7553_v38  ;;  %9320 = vmatmul.msk.f32.gmra.mxu2 %vm293_vm1, %v10423_v34  ;;  %9449 = vmatmul.msk.f32.gmra.mxu3 %vm293_vm1, %v10423_v34  ;;  %v10426_v3 = vunpack.c.l.bf16 %v10754_v29 }
 0x67f   :  { %v6830_v7 = vpop.f32.mrf.mxu2  ;;  %v7231_v23 = vpop.f32.mrf.mxu3 }
 0x680   :  { %v6831_v54 = vadd.f32 %v6830_v7, %v10995_v10  ;;  %v7232_v20 = vadd.f32 %v7231_v23, %v10997_v11  ;;  %v14196_v60 = vpop.f32.mrf.mxu0  ;;  %v14198_v58 = vpop.f32.mrf.mxu1  ;;  %v10691_v23 = vld [vmem:[%s15524_s0 + $0x540] sm:$0xff]  }
 0x681   :  { %15935 = vst [vmem:[#allocation113_spill] sm:$0xff] %v14196_v60 }
 0x682   :  { %15936 = vst [vmem:[#allocation114_spill] sm:$0xff] %v14198_v58  ;;  %v7554_v24 = vmax.f32 %v6831_v54, 0.0  ;;  %v7555_v21 = vmax.f32 %v7232_v20, 0.0  ;;  %v10174_v58 = vunpack.c.l.bf16 %v10691_v23 }
 0x683   :  { %8936 = vmatmul.msk.f32.gmra.mxu0 %vm293_vm1, %v10171_v50  ;;  %9065 = vmatmul.msk.f32.gmra.mxu1 %vm293_vm1, %v10171_v50 }
 0x684   :  { %v7750_v34 = vadd.f32 %v7749_v48, %v7554_v24  ;;  %v7883_v38 = vadd.f32 %v7882_v37, %v7555_v21  ;;  %9321 = vmatmul.msk.f32.gmra.mxu2 %vm293_vm1, %v10426_v3  ;;  %9450 = vmatmul.msk.f32.gmra.mxu3 %vm293_vm1, %v10426_v3  ;;  %v10427_v48 = vunpack.c.h.bf16 %v10754_v29 }
 0x687   :  { %v6833_v30 = vpop.f32.mrf.mxu2  ;;  %v7234_v7 = vpop.f32.mrf.mxu3 }
 0x688   :  { %v6834_v54 = vadd.f32 %v6833_v30, %v10995_v10  ;;  %v7235_v20 = vadd.f32 %v7234_v7, %v10997_v11  ;;  %v14209_v60 = vpop.f32.mrf.mxu0  ;;  %v14211_v50 = vpop.f32.mrf.mxu1  ;;  %v10755_v30 = vld [vmem:[%s15524_s0 + $0x740] sm:$0xff]  }
 0x689   :  { %15937 = vst [vmem:[#allocation115_spill] sm:$0xff] %v14209_v60 }
 0x68a   :  { %15938 = vst [vmem:[#allocation116_spill] sm:$0xff] %v14211_v50  ;;  %v7556_v37 = vmax.f32 %v6834_v54, 0.0  ;;  %v7557_v24 = vmax.f32 %v7235_v20, 0.0  ;;  %v10175_v50 = vunpack.c.h.bf16 %v10691_v23 }
 0x68b   :  { %8937 = vmatmul.msk.f32.gmra.mxu0 %vm293_vm1, %v10174_v58  ;;  %9066 = vmatmul.msk.f32.gmra.mxu1 %vm293_vm1, %v10174_v58 }
 0x68c   :  { %v7751_v3 = vadd.f32 %v7750_v34, %v7556_v37  ;;  %v7884_v21 = vadd.f32 %v7883_v38, %v7557_v24  ;;  %9322 = vmatmul.msk.f32.gmra.mxu2 %vm293_vm1, %v10427_v48  ;;  %9451 = vmatmul.msk.f32.gmra.mxu3 %vm293_vm1, %v10427_v48  ;;  %v10430_v34 = vunpack.c.l.bf16 %v10755_v30 }
 0x68f   :  { %v6836_v7 = vpop.f32.mrf.mxu2  ;;  %v7237_v60 = vpop.f32.mrf.mxu3 }
 0x690   :  { %v6837_v29 = vadd.f32 %v6836_v7, %v10995_v10  ;;  %v7238_v54 = vadd.f32 %v7237_v60, %v10997_v11  ;;  %v14222_v20 = vpop.f32.mrf.mxu0  ;;  %v14224_v58 = vpop.f32.mrf.mxu1  ;;  %v10692_v60 = vld [vmem:[%s15524_s0 + $0x548] sm:$0xff]  }
 0x691   :  { %15939 = vst [vmem:[#allocation117_spill] sm:$0xff] %v14222_v20 }
 0x692   :  { %15940 = vst [vmem:[#allocation118_spill] sm:$0xff] %v14224_v58  ;;  %v7558_v38 = vmax.f32 %v6837_v29, 0.0  ;;  %v7559_v37 = vmax.f32 %v7238_v54, 0.0  ;;  %v10178_v58 = vunpack.c.l.bf16 %v10692_v60 }
 0x693   :  { %8938 = vmatmul.msk.f32.gmra.mxu0 %vm293_vm1, %v10175_v50  ;;  %9067 = vmatmul.msk.f32.gmra.mxu1 %vm293_vm1, %v10175_v50 }
 0x694   :  { %v7752_v48 = vadd.f32 %v7751_v3, %v7558_v38  ;;  %v7885_v24 = vadd.f32 %v7884_v21, %v7559_v37  ;;  %9323 = vmatmul.msk.f32.gmra.mxu2 %vm293_vm1, %v10430_v34  ;;  %9452 = vmatmul.msk.f32.gmra.mxu3 %vm293_vm1, %v10430_v34  ;;  %v10431_v3 = vunpack.c.h.bf16 %v10755_v30 }
 0x697   :  { %v6839_v23 = vpop.f32.mrf.mxu2  ;;  %v7240_v7 = vpop.f32.mrf.mxu3 }
 0x698   :  { %v6840_v29 = vadd.f32 %v6839_v23, %v10995_v10  ;;  %v7241_v54 = vadd.f32 %v7240_v7, %v10997_v11  ;;  %v14235_v20 = vpop.f32.mrf.mxu0  ;;  %v14237_v50 = vpop.f32.mrf.mxu1  ;;  %v10756_v23 = vld [vmem:[%s15524_s0 + $0x748] sm:$0xff]  }
 0x699   :  { %15941 = vst [vmem:[#allocation119_spill] sm:$0xff] %v14235_v20 }
 0x69a   :  { %15942 = vst [vmem:[#allocation120_spill] sm:$0xff] %v14237_v50  ;;  %v7560_v21 = vmax.f32 %v6840_v29, 0.0  ;;  %v7561_v38 = vmax.f32 %v7241_v54, 0.0  ;;  %v10179_v50 = vunpack.c.h.bf16 %v10692_v60 }
 0x69b   :  { %8939 = vmatmul.msk.f32.gmra.mxu0 %vm293_vm1, %v10178_v58  ;;  %9068 = vmatmul.msk.f32.gmra.mxu1 %vm293_vm1, %v10178_v58 }
 0x69c   :  { %v7753_v34 = vadd.f32 %v7752_v48, %v7560_v21  ;;  %v7886_v37 = vadd.f32 %v7885_v24, %v7561_v38  ;;  %9324 = vmatmul.msk.f32.gmra.mxu2 %vm293_vm1, %v10431_v3  ;;  %9453 = vmatmul.msk.f32.gmra.mxu3 %vm293_vm1, %v10431_v3  ;;  %v10434_v48 = vunpack.c.l.bf16 %v10756_v23 }
 0x69f   :  { %v6842_v7 = vpop.f32.mrf.mxu2  ;;  %v7243_v20 = vpop.f32.mrf.mxu3 }
 0x6a0   :  { %v6843_v30 = vadd.f32 %v6842_v7, %v10995_v10  ;;  %v7244_v29 = vadd.f32 %v7243_v20, %v10997_v11  ;;  %v14248_v54 = vpop.f32.mrf.mxu0  ;;  %v14250_v58 = vpop.f32.mrf.mxu1  ;;  %v10693_v20 = vld [vmem:[%s15524_s0 + $0x550] sm:$0xff]  }
 0x6a1   :  { %15943 = vst [vmem:[#allocation121_spill] sm:$0xff] %v14248_v54 }
 0x6a2   :  { %15944 = vst [vmem:[#allocation122_spill] sm:$0xff] %v14250_v58  ;;  %v7562_v24 = vmax.f32 %v6843_v30, 0.0  ;;  %v7563_v21 = vmax.f32 %v7244_v29, 0.0  ;;  %v10182_v58 = vunpack.c.l.bf16 %v10693_v20 }
 0x6a3   :  { %8940 = vmatmul.msk.f32.gmra.mxu0 %vm293_vm1, %v10179_v50  ;;  %9069 = vmatmul.msk.f32.gmra.mxu1 %vm293_vm1, %v10179_v50 }
 0x6a4   :  { %v7754_v3 = vadd.f32 %v7753_v34, %v7562_v24  ;;  %v7887_v38 = vadd.f32 %v7886_v37, %v7563_v21  ;;  %9325 = vmatmul.msk.f32.gmra.mxu2 %vm293_vm1, %v10434_v48  ;;  %9454 = vmatmul.msk.f32.gmra.mxu3 %vm293_vm1, %v10434_v48  ;;  %v10435_v34 = vunpack.c.h.bf16 %v10756_v23  ;;  %v10757_v23 = vld [vmem:[%s15524_s0 + $0x750] sm:$0xff]  }
 0x6a7   :  { %v6845_v60 = vpop.f32.mrf.mxu2  ;;  %v7246_v7 = vpop.f32.mrf.mxu3 }
 0x6a8   :  { %v6846_v30 = vadd.f32 %v6845_v60, %v10995_v10  ;;  %v7247_v29 = vadd.f32 %v7246_v7, %v10997_v11  ;;  %v14261_v54 = vpop.f32.mrf.mxu0  ;;  %v14263_v50 = vpop.f32.mrf.mxu1  ;;  %v7975_v60 = vld [vmem:[%s15527_s3 + $0x38] sm:$0xff] }
 0x6a9   :  { %15945 = vst [vmem:[#allocation123_spill] sm:$0xff] %v14261_v54  ;;  %8018 = vmatpush.msra.mxu0 %v7975_v60  ;;  %v7991_v7 = vld [vmem:[%s15527_s3 + $0xb8] sm:$0xff] }
 0x6aa   :  { %15946 = vst [vmem:[#allocation124_spill] sm:$0xff] %v14263_v50  ;;  %v7564_v37 = vmax.f32 %v6846_v30, 0.0  ;;  %v7565_v24 = vmax.f32 %v7247_v29, 0.0  ;;  %8038 = vmatpush.msra.mxu1 %v7991_v7 }
 0x6ab   :  { %8941 = vmatmul.msk.f32.gmra.mxu0 %vm293_vm1, %v10182_v58  ;;  %9070 = vmatmul.msk.f32.gmra.mxu1 %vm293_vm1, %v10182_v58 }
 0x6ac   :  { %v7755_v48 = vadd.f32 %v7754_v3, %v7564_v37  ;;  %v7888_v21 = vadd.f32 %v7887_v38, %v7565_v24  ;;  %9326 = vmatmul.msk.f32.gmra.mxu2 %vm293_vm1, %v10435_v34  ;;  %9455 = vmatmul.msk.f32.gmra.mxu3 %vm293_vm1, %v10435_v34  ;;  %v10183_v38 = vunpack.c.h.bf16 %v10693_v20  ;;  %v10438_v24 = vunpack.c.l.bf16 %v10757_v23  ;;  %v10694_v20 = vld [vmem:[%s15524_s0 + $0x558] sm:$0xff]  }
 0x6af   :  { %v6848_v58 = vpop.f32.mrf.mxu2  ;;  %v7249_v3 = vpop.f32.mrf.mxu3 }
 0x6b0   :  { %v6849_v30 = vadd.f32 %v6848_v58, %v10995_v10  ;;  %v7250_v29 = vadd.f32 %v7249_v3, %v10997_v11  ;;  %v14280_v34 = vpop.f32.mrf.mxu0  ;;  %v14282_v37 = vpop.f32.mrf.mxu1 }
 0x6b1   :  { %15947 = vst [vmem:[#allocation125_spill] sm:$0xff] %v14280_v34 }
 0x6b2   :  { %15948 = vst [vmem:[#allocation126_spill] sm:$0xff] %v14282_v37  ;;  %v7566_v50 = vmax.f32 %v6849_v30, 0.0  ;;  %v7567_v54 = vmax.f32 %v7250_v29, 0.0  ;;  %v10186_v37 = vunpack.c.l.bf16 %v10694_v20 }
 0x6b3   :  { %8942 = vmatmul.msk.f32.gmra.mxu0 %vm293_vm1, %v10183_v38  ;;  %9071 = vmatmul.msk.f32.gmra.mxu1 %vm293_vm1, %v10183_v38 }
 0x6b4   :  { %v7756_v60 = vadd.f32 %v7755_v48, %v7566_v50  ;;  %v7889_v7 = vadd.f32 %v7888_v21, %v7567_v54  ;;  %9327 = vmatmul.msk.f32.gmra.mxu2 %vm293_vm1, %v10438_v24  ;;  %9456 = vmatmul.msk.f32.gmra.mxu3 %vm293_vm1, %v10438_v24  ;;  %v10439_v54 = vunpack.c.h.bf16 %v10757_v23 }
 0x6b7   :  { %v6851_v58 = vpop.f32.mrf.mxu2  ;;  %v7252_v3 = vpop.f32.mrf.mxu3 }
 0x6b8   :  { %v6852_v30 = vadd.f32 %v6851_v58, %v10995_v10  ;;  %v7253_v29 = vadd.f32 %v7252_v3, %v10997_v11  ;;  %v14293_v34 = vpop.f32.mrf.mxu0  ;;  %v14295_v38 = vpop.f32.mrf.mxu1  ;;  %v10758_v58 = vld [vmem:[%s15524_s0 + $0x758] sm:$0xff]  }
 0x6b9   :  { %15949 = vst [vmem:[#allocation127_spill] sm:$0xff] %v14293_v34 }
 0x6ba   :  { %15950 = vst [vmem:[#allocation128_spill] sm:$0xff] %v14295_v38  ;;  %v7568_v50 = vmax.f32 %v6852_v30, 0.0  ;;  %v7569_v48 = vmax.f32 %v7253_v29, 0.0  ;;  %v10187_v38 = vunpack.c.h.bf16 %v10694_v20 }
 0x6bb   :  { %8943 = vmatmul.msk.f32.gmra.mxu0 %vm293_vm1, %v10186_v37  ;;  %9072 = vmatmul.msk.f32.gmra.mxu1 %vm293_vm1, %v10186_v37 }
 0x6bc   :  { %v7757_v21 = vadd.f32 %v7756_v60, %v7568_v50  ;;  %v7890_v24 = vadd.f32 %v7889_v7, %v7569_v48  ;;  %9328 = vmatmul.msk.f32.gmra.mxu2 %vm293_vm1, %v10439_v54  ;;  %9457 = vmatmul.msk.f32.gmra.mxu3 %vm293_vm1, %v10439_v54  ;;  %v10442_v60 = vunpack.c.l.bf16 %v10758_v58 }
 0x6bf   :  { %v6854_v3 = vpop.f32.mrf.mxu2  ;;  %v7255_v34 = vpop.f32.mrf.mxu3 }
 0x6c0   :  { %v6855_v23 = vadd.f32 %v6854_v3, %v10995_v10  ;;  %v7256_v30 = vadd.f32 %v7255_v34, %v10997_v11  ;;  %v14306_v29 = vpop.f32.mrf.mxu0  ;;  %v14308_v37 = vpop.f32.mrf.mxu1  ;;  %v10695_v34 = vld [vmem:[%s15524_s0 + $0x560] sm:$0xff]  }
 0x6c1   :  { %15951 = vst [vmem:[#allocation129_spill] sm:$0xff] %v14306_v29 }
 0x6c2   :  { %15952 = vst [vmem:[#allocation130_spill] sm:$0xff] %v14308_v37  ;;  %v7570_v7 = vmax.f32 %v6855_v23, 0.0  ;;  %v7571_v50 = vmax.f32 %v7256_v30, 0.0  ;;  %v10190_v37 = vunpack.c.l.bf16 %v10695_v34 }
 0x6c3   :  { %8944 = vmatmul.msk.f32.gmra.mxu0 %vm293_vm1, %v10187_v38  ;;  %9073 = vmatmul.msk.f32.gmra.mxu1 %vm293_vm1, %v10187_v38 }
 0x6c4   :  { %v7758_v54 = vadd.f32 %v7757_v21, %v7570_v7  ;;  %v7891_v48 = vadd.f32 %v7890_v24, %v7571_v50  ;;  %9329 = vmatmul.msk.f32.gmra.mxu2 %vm293_vm1, %v10442_v60  ;;  %9458 = vmatmul.msk.f32.gmra.mxu3 %vm293_vm1, %v10442_v60  ;;  %v10443_v21 = vunpack.c.h.bf16 %v10758_v58 }
 0x6c7   :  { %v6857_v20 = vpop.f32.mrf.mxu2  ;;  %v7258_v3 = vpop.f32.mrf.mxu3 }
 0x6c8   :  { %v6858_v23 = vadd.f32 %v6857_v20, %v10995_v10  ;;  %v7259_v30 = vadd.f32 %v7258_v3, %v10997_v11  ;;  %v14319_v29 = vpop.f32.mrf.mxu0  ;;  %v14321_v38 = vpop.f32.mrf.mxu1  ;;  %v10759_v20 = vld [vmem:[%s15524_s0 + $0x760] sm:$0xff]  }
 0x6c9   :  { %15953 = vst [vmem:[#allocation131_spill] sm:$0xff] %v14319_v29 }
 0x6ca   :  { %15954 = vst [vmem:[#allocation132_spill] sm:$0xff] %v14321_v38  ;;  %v7572_v24 = vmax.f32 %v6858_v23, 0.0  ;;  %v7573_v7 = vmax.f32 %v7259_v30, 0.0  ;;  %v10191_v38 = vunpack.c.h.bf16 %v10695_v34  ;;  %v4667_v34 = vadd.f32 %v13316_v17, %v10995_v10 }
 0x6cb   :  { %8945 = vmatmul.msk.f32.gmra.mxu0 %vm293_vm1, %v10190_v37  ;;  %9074 = vmatmul.msk.f32.gmra.mxu1 %vm293_vm1, %v10190_v37  ;;  %v10447_v17 = vunpack.c.h.bf16 %v10759_v20 }
 0x6cc   :  { %v7759_v60 = vadd.f32 %v7758_v54, %v7572_v24  ;;  %v7892_v50 = vadd.f32 %v7891_v48, %v7573_v7  ;;  %9330 = vmatmul.msk.f32.gmra.mxu2 %vm293_vm1, %v10443_v21  ;;  %9459 = vmatmul.msk.f32.gmra.mxu3 %vm293_vm1, %v10443_v21  ;;  %v10446_v54 = vunpack.c.l.bf16 %v10759_v20 }
 0x6cf   :  { %v6860_v3 = vpop.f32.mrf.mxu2  ;;  %v7261_v29 = vpop.f32.mrf.mxu3 }
 0x6d0   :  { %v6861_v58 = vadd.f32 %v6860_v3, %v10995_v10  ;;  %v7262_v23 = vadd.f32 %v7261_v29, %v10997_v11  ;;  %v14332_v30 = vpop.f32.mrf.mxu0  ;;  %v14334_v37 = vpop.f32.mrf.mxu1  ;;  %v10696_v29 = vld [vmem:[%s15524_s0 + $0x568] sm:$0xff]   ;;  %v4670_v3 = vadd.f32 %v13332_v40, %v10995_v10 }
 0x6d1   :  { %15955 = vst [vmem:[#allocation133_spill] sm:$0xff] %v14332_v30  ;;  %v5451_v30 = vmax.f32 %v4667_v34, 0.0 }
 0x6d2   :  { %15956 = vst [vmem:[#allocation134_spill] sm:$0xff] %v14334_v37  ;;  %v7574_v48 = vmax.f32 %v6861_v58, 0.0  ;;  %v7575_v24 = vmax.f32 %v7262_v23, 0.0  ;;  %v5068_v58 = vadd.f32 %v13318_v4, %v10997_v11  ;;  %v10194_v23 = vunpack.c.l.bf16 %v10696_v29 }
 0x6d3   :  { %8946 = vmatmul.msk.f32.gmra.mxu0 %vm293_vm1, %v10191_v38  ;;  %9075 = vmatmul.msk.f32.gmra.mxu1 %vm293_vm1, %v10191_v38  ;;  %v5071_v38 = vadd.f32 %v13334_v55, %v10997_v11  ;;  %v5453_v40 = vmax.f32 %v4670_v3, 0.0  ;;  %v4673_v4 = vadd.f32 %v13350_v61, %v10995_v10  ;;  %v5077_v61 = vadd.f32 %v13367_v52, %v10997_v11 }
 0x6d4   :  { %v7760_v21 = vadd.f32 %v7759_v60, %v7574_v48  ;;  %v7893_v7 = vadd.f32 %v7892_v50, %v7575_v24  ;;  %9331 = vmatmul.msk.f32.gmra.mxu2 %vm293_vm1, %v10446_v54  ;;  %9460 = vmatmul.msk.f32.gmra.mxu3 %vm293_vm1, %v10446_v54  ;;  %v5452_v55 = vmax.f32 %v5068_v58, 0.0 }
 0x6d5   :  { %v5454_v25 = vmax.f32 %v5071_v38, 0.0  ;;  %v5709_v3 = vadd.f32 %v5453_v40, %v5451_v30  ;;  %v5455_v58 = vmax.f32 %v4673_v4, 0.0  ;;  %v4679_v38 = vadd.f32 %v13381_v27, %v10995_v10 }
 0x6d6   :  { %v5458_v27 = vmax.f32 %v5077_v61, 0.0 }
 0x6d7   :  { %v6863_v60 = vpop.f32.mrf.mxu2  ;;  %v7264_v50 = vpop.f32.mrf.mxu3 }
 0x6d8   :  { %v6864_v54 = vadd.f32 %v6863_v60, %v10995_v10  ;;  %v7265_v48 = vadd.f32 %v7264_v50, %v10997_v11  ;;  %v14353_v24 = vpop.f32.mrf.mxu0  ;;  %v14355_v37 = vpop.f32.mrf.mxu1  ;;  %v4676_v60 = vadd.f32 %v13365_v1, %v10995_v10  ;;  %v5842_v1 = vadd.f32 %v5454_v25, %v5452_v55 }
 0x6d9   :  { %v10195_v50 = vunpack.c.h.bf16 %v10696_v29  ;;  %v5710_v25 = vadd.f32 %v5709_v3, %v5455_v58  ;;  %v5459_v29 = vmax.f32 %v4679_v38, 0.0 }
 0x6da   :  { %v7576_v16 = vmax.f32 %v6864_v54, 0.0  ;;  %v7577_v62 = vmax.f32 %v7265_v48, 0.0 }
 0x6db   :  { %8947 = vmatmul.msk.f32.gmra.mxu0 %vm293_vm1, %v10194_v23  ;;  %9076 = vmatmul.msk.f32.gmra.mxu1 %vm293_vm1, %v10194_v23  ;;  %v5457_v23 = vmax.f32 %v4676_v60, 0.0 }
 0x6dc   :  { %v7761_v20 = vadd.f32 %v7760_v21, %v7576_v16  ;;  %v7894_v34 = vadd.f32 %v7893_v7, %v7577_v62  ;;  %9332 = vmatmul.msk.f32.gmra.mxu2 %vm293_vm1, %v10447_v17  ;;  %9461 = vmatmul.msk.f32.gmra.mxu3 %vm293_vm1, %v10447_v17  ;;  %v5456_v16 = vmax.f32 %v5074_v14, 0.0  ;;  %v5080_v62 = vadd.f32 %v13383_v15, %v10997_v11 }
 0x6dd   :  { %v10450_v17 = vunpack.c.l.bf16 %v14372_v59  ;;  %v4682_v14 = vadd.f32 %v13400_v31, %v10995_v10  ;;  %v5083_v15 = vadd.f32 %v13402_v49, %v10997_v11  ;;  %v5711_v31 = vadd.f32 %v5710_v25, %v5457_v23  ;;  %v14400_v49 = vld [vmem:[%s15524_s0 + $0x570] sm:$0xff]  }
 0x6de   :  { %v5843_v55 = vadd.f32 %v5842_v1, %v5456_v16  ;;  %v5460_v60 = vmax.f32 %v5080_v62, 0.0  ;;  %v10198_v23 = vunpack.c.l.bf16 %v14400_v49 }
 0x6df   :  { %v6866_v21 = vpop.f32.mrf.mxu2  ;;  %v7267_v7 = vpop.f32.mrf.mxu3  ;;  %v5461_v3 = vmax.f32 %v4682_v14, 0.0  ;;  %v5462_v58 = vmax.f32 %v5083_v15, 0.0  ;;  %v5712_v38 = vadd.f32 %v5711_v31, %v5459_v29 }
 0x6e0   :  { %v6867_v52 = vadd.f32 %v6866_v21, %v10995_v10  ;;  %v7268_v54 = vadd.f32 %v7267_v7, %v10997_v11  ;;  %v14380_v48 = vpop.f32.mrf.mxu0  ;;  %v14382_v30 = vpop.f32.mrf.mxu1  ;;  %v4685_v21 = vadd.f32 %v13413_v5, %v10995_v10  ;;  %v5086_v7 = vadd.f32 %v13415_v45, %v10997_v11 }
 0x6e1   :  { %15957 = vst [vmem:[#allocation135_spill] sm:$0xff] %v14382_v30  ;;  %v5844_v5 = vadd.f32 %v5843_v55, %v5458_v27  ;;  %v4688_v45 = vadd.f32 %v13426_v43, %v10995_v10  ;;  %v5713_v14 = vadd.f32 %v5712_v38, %v5461_v3  ;;  %v14434_v3 = vld [vmem:[%s15524_s0 + $0x770] sm:$0xff]  }
 0x6e2   :  { %v7578_v40 = vmax.f32 %v6867_v52, 0.0  ;;  %v7579_v4 = vmax.f32 %v7268_v54, 0.0  ;;  %v5463_v1 = vmax.f32 %v4685_v21, 0.0  ;;  %v5464_v16 = vmax.f32 %v5086_v7, 0.0 }
 0x6e3   :  { %8948 = vmatmul.msk.f32.gmra.mxu0 %vm293_vm1, %v10195_v50  ;;  %9077 = vmatmul.msk.f32.gmra.mxu1 %vm293_vm1, %v10195_v50  ;;  %v4691_v52 = vadd.f32 %v13439_v47, %v10995_v10  ;;  %v5465_v25 = vmax.f32 %v4688_v45, 0.0 }
 0x6e4   :  { %v7762_v61 = vadd.f32 %v7761_v20, %v7578_v40  ;;  %v7895_v30 = vadd.f32 %v7894_v34, %v7579_v4  ;;  %9333 = vmatmul.msk.f32.gmra.mxu2 %vm293_vm1, %v10450_v17  ;;  %9462 = vmatmul.msk.f32.gmra.mxu3 %vm293_vm1, %v10450_v17  ;;  %v5089_v20 = vadd.f32 %v13428_v41, %v10997_v11  ;;  %v10451_v41 = vunpack.c.h.bf16 %v14372_v59 }
 0x6e5   :  { %v5845_v34 = vadd.f32 %v5844_v5, %v5460_v60  ;;  %v5092_v40 = vadd.f32 %v13441_v22, %v10997_v11  ;;  %v5714_v47 = vadd.f32 %v5713_v14, %v5463_v1  ;;  %v4694_v60 = vadd.f32 %v13452_v0, %v10995_v10  ;;  %v7974_v22 = vld [vmem:[%s15527_s3 + $0x30] sm:$0xff] }
 0x6e6   :  { %v5466_v29 = vmax.f32 %v5089_v20, 0.0  ;;  %v5467_v7 = vmax.f32 %v4691_v52, 0.0  ;;  %v5095_v5 = vadd.f32 %v13454_v44, %v10997_v11  ;;  %v4697_v0 = vadd.f32 %v13465_v26, %v10995_v10  ;;  %8019 = vmatpush.msra.mxu0 %v7974_v22 }
 0x6e7   :  { %v6869_v62 = vpop.f32.mrf.mxu2  ;;  %v7270_v50 = vpop.f32.mrf.mxu3  ;;  %v5846_v15 = vadd.f32 %v5845_v34, %v5462_v58  ;;  %v5468_v45 = vmax.f32 %v5092_v40, 0.0  ;;  %v5469_v38 = vmax.f32 %v4694_v60, 0.0  ;;  %v5098_v44 = vadd.f32 %v13467_v28, %v10997_v11 }
 0x6e8   :  { %v6870_v54 = vadd.f32 %v6869_v62, %v10995_v10  ;;  %v7271_v17 = vadd.f32 %v7270_v50, %v10997_v11  ;;  %v14411_v27 = vpop.f32.mrf.mxu0  ;;  %v14413_v43 = vpop.f32.mrf.mxu1  ;;  %v4700_v26 = vadd.f32 %v13478_v39, %v10995_v10  ;;  %v10199_v1 = vunpack.c.h.bf16 %v14400_v49 }
 0x6e9   :  { %v5847_v21 = vadd.f32 %v5846_v15, %v5464_v16  ;;  %v5471_v28 = vmax.f32 %v4697_v0, 0.0  ;;  %v5101_v39 = vadd.f32 %v13480_v19, %v10997_v11  ;;  %v5107_v22 = vadd.f32 %v13512_v51, %v10997_v11 }
 0x6ea   :  { %v7580_v4 = vmax.f32 %v6870_v54, 0.0  ;;  %v7581_v55 = vmax.f32 %v7271_v17, 0.0  ;;  %v10454_v54 = vunpack.c.l.bf16 %v14434_v3  ;;  %v5470_v17 = vmax.f32 %v5095_v5, 0.0 }
 0x6eb   :  { %8949 = vmatmul.msk.f32.gmra.mxu0 %vm293_vm1, %v10198_v23  ;;  %9078 = vmatmul.msk.f32.gmra.mxu1 %vm293_vm1, %v10198_v23  ;;  %v5848_v58 = vadd.f32 %v5847_v21, %v5466_v29  ;;  %v5472_v29 = vmax.f32 %v5098_v44, 0.0  ;;  %v5473_v40 = vmax.f32 %v4700_v26, 0.0  ;;  %v5474_v21 = vmax.f32 %v5101_v39, 0.0 }
 0x6ec   :  { %v7763_v59 = vadd.f32 %v7762_v61, %v7580_v4  ;;  %v7896_v31 = vadd.f32 %v7895_v30, %v7581_v55  ;;  %9334 = vmatmul.msk.f32.gmra.mxu2 %vm293_vm1, %v10451_v41  ;;  %9463 = vmatmul.msk.f32.gmra.mxu3 %vm293_vm1, %v10451_v41  ;;  %v7990_v30 = vld [vmem:[%s15527_s3 + $0xb0] sm:$0xff]  ;;  %v5715_v61 = vadd.f32 %v5714_v47, %v5465_v25  ;;  %v10455_v51 = vunpack.c.h.bf16 %v14434_v3 }
 0x6ed   :  { %8039 = vmatpush.msra.mxu1 %v7990_v30  ;;  %v4703_v41 = vadd.f32 %v13491_v18, %v10995_v10  ;;  %v5849_v49 = vadd.f32 %v5848_v58, %v5468_v45  ;;  %v5104_v4 = vadd.f32 %v13493_v53, %v10997_v11  ;;  %v4706_v55 = vadd.f32 %v13510_v42, %v10995_v10  ;;  %v14466_v18 = vld [vmem:[%s15524_s0 + $0x578] sm:$0xff]  }
 0x6ee   :  { %v5716_v16 = vadd.f32 %v5715_v61, %v5467_v7  ;;  %v4709_v42 = vadd.f32 %v13523_v13, %v10995_v10  ;;  %v10202_v61 = vunpack.c.l.bf16 %v14466_v18  ;;  %v4715_v39 = vadd.f32 %v13549_v2, %v10995_v10 }
 0x6ef   :  { %v6872_v20 = vpop.f32.mrf.mxu2  ;;  %v7273_v34 = vpop.f32.mrf.mxu3  ;;  %v5850_v60 = vadd.f32 %v5849_v49, %v5470_v17  ;;  %v5475_v7 = vmax.f32 %v4703_v41, 0.0  ;;  %v5476_v5 = vmax.f32 %v5104_v4, 0.0  ;;  %v5477_v58 = vmax.f32 %v4706_v55, 0.0 }
 0x6f0   :  { %v6873_v62 = vadd.f32 %v6872_v20, %v10995_v10  ;;  %v7274_v50 = vadd.f32 %v7273_v34, %v10997_v11  ;;  %v14446_v23 = vpop.f32.mrf.mxu0  ;;  %v14448_v52 = vpop.f32.mrf.mxu1  ;;  %v5717_v25 = vadd.f32 %v5716_v16, %v5469_v38  ;;  %v5110_v34 = vadd.f32 %v13525_v57, %v10997_v11 }
 0x6f1   :  { %v5478_v16 = vmax.f32 %v5107_v22, 0.0  ;;  %v5119_v4 = vadd.f32 %v13564_v35, %v10997_v11  ;;  %v4721_v35 = vadd.f32 %v13575_v36, %v10995_v10 }
 0x6f2   :  { %v7582_v14 = vmax.f32 %v6873_v62, 0.0  ;;  %v7583_v15 = vmax.f32 %v7274_v50, 0.0  ;;  %v5718_v53 = vadd.f32 %v5717_v25, %v5471_v28  ;;  %v5479_v62 = vmax.f32 %v4709_v42, 0.0 }
 0x6f3   :  { %8950 = vmatmul.msk.f32.gmra.mxu0 %vm293_vm1, %v10199_v1  ;;  %9079 = vmatmul.msk.f32.gmra.mxu1 %vm293_vm1, %v10199_v1  ;;  %v4712_v1 = vadd.f32 %v13536_v6, %v10995_v10  ;;  %v5113_v28 = vadd.f32 %v13538_v32, %v10997_v11  ;;  %v5480_v6 = vmax.f32 %v5110_v34, 0.0  ;;  %v14497_v32 = vld [vmem:[%s15524_s0 + $0x778] sm:$0xff]   ;;  %v4718_v25 = vadd.f32 %v13562_v33, %v10995_v10 }
 0x6f4   :  { %v7764_v19 = vadd.f32 %v7763_v59, %v7582_v14  ;;  %v7897_v47 = vadd.f32 %v7896_v31, %v7583_v15  ;;  %9335 = vmatmul.msk.f32.gmra.mxu2 %vm293_vm1, %v10454_v54  ;;  %9464 = vmatmul.msk.f32.gmra.mxu3 %vm293_vm1, %v10454_v54  ;;  %v5851_v59 = vadd.f32 %v5850_v60, %v5472_v29 }
 0x6f5   :  { %v5719_v31 = vadd.f32 %v5718_v53, %v5473_v40  ;;  %v5481_v49 = vmax.f32 %v4712_v1, 0.0  ;;  %v5116_v14 = vadd.f32 %v13551_v56, %v10997_v11  ;;  %v5482_v29 = vmax.f32 %v5113_v28, 0.0 }
 0x6f6   :  { %v5852_v20 = vadd.f32 %v5851_v59, %v5474_v21  ;;  %v5483_v40 = vmax.f32 %v4715_v39, 0.0  ;;  %v5485_v59 = vmax.f32 %v4718_v25, 0.0 }
 0x6f7   :  { %v6875_v0 = vpop.f32.mrf.mxu2  ;;  %v7276_v30 = vpop.f32.mrf.mxu3  ;;  %v5720_v13 = vadd.f32 %v5719_v31, %v5475_v7  ;;  %v10458_v7 = vunpack.c.l.bf16 %v14497_v32  ;;  %v5484_v42 = vmax.f32 %v5116_v14, 0.0  ;;  %v15959_v14 = vld [vmem:[#allocation30_spill] sm:$0xff] }
 0x6f8   :  { %v6876_v45 = vadd.f32 %v6875_v0, %v10995_v10  ;;  %v7277_v38 = vadd.f32 %v7276_v30, %v10997_v11  ;;  %v14475_v44 = vpop.f32.mrf.mxu0  ;;  %v14477_v26 = vpop.f32.mrf.mxu1  ;;  %v5853_v17 = vadd.f32 %v5852_v20, %v5476_v5  ;;  %v4727_v20 = vadd.f32 %v13601_v9, %v10995_v10 }
 0x6f9   :  { %v5721_v3 = vadd.f32 %v5720_v13, %v5477_v58  ;;  %v4724_v58 = vadd.f32 %v13588_v46, %v10995_v10  ;;  %v5487_v46 = vmax.f32 %v4721_v35, 0.0 }
 0x6fa   :  { %v7584_v50 = vmax.f32 %v6876_v45, 0.0  ;;  %v7585_v54 = vmax.f32 %v7277_v38, 0.0  ;;  %v5854_v2 = vadd.f32 %v5853_v17, %v5478_v16  ;;  %v5125_v45 = vadd.f32 %v13590_v8, %v10997_v11 }
 0x6fb   :  { %8951 = vmatmul.msk.f32.gmra.mxu0 %vm293_vm1, %v10202_v61  ;;  %9080 = vmatmul.msk.f32.gmra.mxu1 %vm293_vm1, %v10202_v61  ;;  %v5722_v15 = vadd.f32 %v5721_v3, %v5479_v62  ;;  %v5486_v61 = vmax.f32 %v5119_v4, 0.0  ;;  %v5128_v8 = vadd.f32 %v13603_v63, %v10997_v11  ;;  %v5489_v16 = vmax.f32 %v4724_v58, 0.0  ;;  %v15958_v62 = vld [vmem:[#allocation29_spill] sm:$0xff] }
 0x6fc   :  { %v7765_v57 = vadd.f32 %v7764_v19, %v7584_v50  ;;  %v7898_v41 = vadd.f32 %v7897_v47, %v7585_v54  ;;  %9336 = vmatmul.msk.f32.gmra.mxu2 %vm293_vm1, %v10455_v51  ;;  %9465 = vmatmul.msk.f32.gmra.mxu3 %vm293_vm1, %v10455_v51  ;;  %v10203_v47 = vunpack.c.h.bf16 %v14466_v18  ;;  %v5855_v33 = vadd.f32 %v5854_v2, %v5480_v6 }
 0x6fd   :  { %v5723_v22 = vadd.f32 %v5722_v15, %v5481_v49  ;;  %v5122_v18 = vadd.f32 %v13577_v12, %v10997_v11  ;;  %v14526_v12 = vld [vmem:[%s15524_s0 + $0x580] sm:$0xff]   ;;  %v4730_v50 = vadd.f32 %v15958_v62, %v10995_v10  ;;  %v5490_v39 = vmax.f32 %v5125_v45, 0.0 }
 0x6fe   :  { %v5856_v0 = vadd.f32 %v5855_v33, %v5482_v29  ;;  %v10206_v28 = vunpack.c.l.bf16 %v14526_v12  ;;  %v10459_v63 = vunpack.c.h.bf16 %v14497_v32  ;;  %v5491_v49 = vmax.f32 %v4727_v20, 0.0  ;;  %v15960_v15 = vld [vmem:[#allocation31_spill] sm:$0xff] }
 0x6ff   :  { %v6878_v55 = vpop.f32.mrf.mxu2  ;;  %v7279_v19 = vpop.f32.mrf.mxu3  ;;  %v5724_v30 = vadd.f32 %v5723_v22, %v5483_v40  ;;  %v5488_v34 = vmax.f32 %v5122_v18, 0.0  ;;  %v5131_v2 = vadd.f32 %v15959_v14, %v10997_v11  ;;  %v4733_v25 = vadd.f32 %v15960_v15, %v10995_v10 }
 0x700   :  { %v6879_v56 = vadd.f32 %v6878_v55, %v10995_v10  ;;  %v7280_v60 = vadd.f32 %v7279_v19, %v10997_v11  ;;  %v14506_v53 = vpop.f32.mrf.mxu0  ;;  %v14508_v21 = vpop.f32.mrf.mxu1  ;;  %v5857_v51 = vadd.f32 %v5856_v0, %v5484_v42  ;;  %v5492_v40 = vmax.f32 %v5128_v8, 0.0  ;;  %v14559_v0 = vld [vmem:[%s15524_s0 + $0x780] sm:$0xff]  }
 0x701   :  { %v5725_v13 = vadd.f32 %v5724_v30, %v5485_v59  ;;  %v5494_v59 = vmax.f32 %v5131_v2, 0.0  ;;  %v5495_v18 = vmax.f32 %v4733_v25, 0.0  ;;  %v10207_v20 = vunpack.c.h.bf16 %v14526_v12 }
 0x702   :  { %v7586_v31 = vmax.f32 %v6879_v56, 0.0  ;;  %v7587_v5 = vmax.f32 %v7280_v60, 0.0  ;;  %v5858_v1 = vadd.f32 %v5857_v51, %v5486_v61  ;;  %v15961_v56 = vld [vmem:[#allocation32_spill] sm:$0xff]  ;;  %v15964_v61 = vld [vmem:[#allocation35_spill] sm:$0xff] }
 0x703   :  { %8952 = vmatmul.msk.f32.gmra.mxu0 %vm293_vm1, %v10203_v47  ;;  %9081 = vmatmul.msk.f32.gmra.mxu1 %vm293_vm1, %v10203_v47  ;;  %v5726_v6 = vadd.f32 %v5725_v13, %v5487_v46  ;;  %v5493_v47 = vmax.f32 %v4730_v50, 0.0  ;;  %v5134_v60 = vadd.f32 %v15961_v56, %v10997_v11  ;;  %v4739_v58 = vadd.f32 %v15964_v61, %v10995_v10  ;;  %v15965_v13 = vld [vmem:[#allocation36_spill] sm:$0xff] }
 0x704   :  { %v7766_v36 = vadd.f32 %v7765_v57, %v7586_v31  ;;  %v7899_v38 = vadd.f32 %v7898_v41, %v7587_v5  ;;  %9337 = vmatmul.msk.f32.gmra.mxu2 %vm293_vm1, %v10458_v7  ;;  %9466 = vmatmul.msk.f32.gmra.mxu3 %vm293_vm1, %v10458_v7  ;;  %v5859_v29 = vadd.f32 %v5858_v1, %v5488_v34  ;;  %v15962_v7 = vld [vmem:[#allocation33_spill] sm:$0xff]  ;;  %v15963_v31 = vld [vmem:[#allocation34_spill] sm:$0xff]  ;;  %v10462_v50 = vunpack.c.l.bf16 %v14559_v0 }
 0x705   :  { %v5727_v19 = vadd.f32 %v5726_v6, %v5489_v16  ;;  %v4736_v32 = vadd.f32 %v15962_v7, %v10995_v10  ;;  %v5137_v5 = vadd.f32 %v15963_v31, %v10997_v11  ;;  %v5140_v34 = vadd.f32 %v15965_v13, %v10997_v11  ;;  %v15973_v13 = vld [vmem:[#allocation44_spill] sm:$0xff] }
 0x706   :  { %v5860_v33 = vadd.f32 %v5859_v29, %v5490_v39  ;;  %v5499_v39 = vmax.f32 %v4739_v58, 0.0 }
 0x707   :  { %v6881_v54 = vpop.f32.mrf.mxu2  ;;  %v7282_v17 = vpop.f32.mrf.mxu3  ;;  %v5728_v35 = vadd.f32 %v5727_v19, %v5491_v49  ;;  %v15967_v49 = vld [vmem:[#allocation38_spill] sm:$0xff]  ;;  %v5500_v15 = vmax.f32 %v5140_v34, 0.0  ;;  %v15969_v19 = vld [vmem:[#allocation40_spill] sm:$0xff]  ;;  %v5152_v34 = vadd.f32 %v15973_v13, %v10997_v11 }
 0x708   :  { %v6882_v3 = vadd.f32 %v6881_v54, %v10995_v10  ;;  %v7283_v57 = vadd.f32 %v7282_v17, %v10997_v11  ;;  %v14537_v9 = vpop.f32.mrf.mxu0  ;;  %v14539_v41 = vpop.f32.mrf.mxu1  ;;  %v5861_v30 = vadd.f32 %v5860_v33, %v5492_v40  ;;  %v5143_v14 = vadd.f32 %v15967_v49, %v10997_v11  ;;  %v14584_v40 = vld [vmem:[%s15524_s0 + $0x588] sm:$0xff]  }
 0x709   :  { %v5729_v45 = vadd.f32 %v5728_v35, %v5493_v47  ;;  %v5146_v47 = vadd.f32 %v15969_v19, %v10997_v11  ;;  %v15970_v33 = vld [vmem:[#allocation41_spill] sm:$0xff]  ;;  %v10210_v31 = vunpack.c.l.bf16 %v14584_v40  ;;  %v15977_v19 = vld [vmem:[#allocation48_spill] sm:$0xff] }
 0x70a   :  { %v7588_v4 = vmax.f32 %v6882_v3, 0.0  ;;  %v7589_v55 = vmax.f32 %v7283_v57, 0.0  ;;  %v5862_v54 = vadd.f32 %v5861_v30, %v5494_v59  ;;  %v15966_v3 = vld [vmem:[#allocation37_spill] sm:$0xff] }
 0x70b   :  { %8953 = vmatmul.msk.f32.gmra.mxu0 %vm293_vm1, %v10206_v28  ;;  %9082 = vmatmul.msk.f32.gmra.mxu1 %vm293_vm1, %v10206_v28  ;;  %v5730_v17 = vadd.f32 %v5729_v45, %v5495_v18  ;;  %v5498_v28 = vmax.f32 %v5137_v5, 0.0  ;;  %v4742_v12 = vadd.f32 %v15966_v3, %v10995_v10 }
 0x70c   :  { %v7767_v22 = vadd.f32 %v7766_v36, %v7588_v4  ;;  %v7900_v42 = vadd.f32 %v7899_v38, %v7589_v55  ;;  %9338 = vmatmul.msk.f32.gmra.mxu2 %vm293_vm1, %v10459_v63  ;;  %9467 = vmatmul.msk.f32.gmra.mxu3 %vm293_vm1, %v10459_v63  ;;  %v5496_v36 = vmax.f32 %v5134_v60, 0.0  ;;  %v5497_v38 = vmax.f32 %v4736_v32, 0.0  ;;  %v15968_v4 = vld [vmem:[#allocation39_spill] sm:$0xff] }
 0x70d   :  { %v4745_v55 = vadd.f32 %v15968_v4, %v10995_v10  ;;  %v5501_v7 = vmax.f32 %v4742_v12, 0.0  ;;  %v5502_v32 = vmax.f32 %v5143_v14, 0.0  ;;  %v15976_v4 = vld [vmem:[#allocation47_spill] sm:$0xff] }
 0x70e   :  { %v5863_v6 = vadd.f32 %v5862_v54, %v5496_v36  ;;  %v5731_v2 = vadd.f32 %v5730_v17, %v5497_v38  ;;  %v10463_v36 = vunpack.c.h.bf16 %v14559_v0  ;;  %v15975_v0 = vld [vmem:[#allocation46_spill] sm:$0xff] }
 0x70f   :  { %v6884_v51 = vpop.f32.mrf.mxu2  ;;  %v7285_v46 = vpop.f32.mrf.mxu3  ;;  %v5503_v38 = vmax.f32 %v4745_v55, 0.0  ;;  %v5155_v12 = vadd.f32 %v15975_v0, %v10997_v11  ;;  %v4757_v55 = vadd.f32 %v15976_v4, %v10995_v10 }
 0x710   :  { %v6885_v8 = vadd.f32 %v6884_v51, %v10995_v10  ;;  %v7286_v1 = vadd.f32 %v7285_v46, %v10997_v11  ;;  %v14568_v16 = vpop.f32.mrf.mxu0  ;;  %v14570_v62 = vpop.f32.mrf.mxu1  ;;  %v5864_v56 = vadd.f32 %v5863_v6, %v5498_v28  ;;  %v5732_v60 = vadd.f32 %v5731_v2, %v5499_v39  ;;  %v15972_v46 = vld [vmem:[#allocation43_spill] sm:$0xff]  ;;  %v15974_v39 = vld [vmem:[#allocation45_spill] sm:$0xff] }
 0x711   :  { %v5504_v51 = vmax.f32 %v5146_v47, 0.0  ;;  %v4754_v3 = vadd.f32 %v15974_v39, %v10995_v10  ;;  %v5508_v2 = vmax.f32 %v5152_v34, 0.0  ;;  %v15980_v34 = vld [vmem:[#allocation51_spill] sm:$0xff]  ;;  %v14646_v39 = vld [vmem:[%s15524_s0 + $0x590] sm:$0xff]  }
 0x712   :  { %v7590_v57 = vmax.f32 %v6885_v8, 0.0  ;;  %v7591_v63 = vmax.f32 %v7286_v1, 0.0  ;;  %v5865_v5 = vadd.f32 %v5864_v56, %v5500_v15  ;;  %v5733_v8 = vadd.f32 %v5732_v60, %v5501_v7  ;;  %v14617_v15 = vld [vmem:[%s15524_s0 + $0x788] sm:$0xff]  }
 0x713   :  { %8954 = vmatmul.msk.f32.gmra.mxu0 %vm293_vm1, %v10207_v20  ;;  %9083 = vmatmul.msk.f32.gmra.mxu1 %vm293_vm1, %v10207_v20  ;;  %v4751_v20 = vadd.f32 %v15972_v46, %v10995_v10  ;;  %v5509_v56 = vmax.f32 %v4754_v3, 0.0 }
 0x714   :  { %v7768_v25 = vadd.f32 %v7767_v22, %v7590_v57  ;;  %v7901_v29 = vadd.f32 %v7900_v42, %v7591_v63  ;;  %9339 = vmatmul.msk.f32.gmra.mxu2 %vm293_vm1, %v10462_v50  ;;  %9468 = vmatmul.msk.f32.gmra.mxu3 %vm293_vm1, %v10462_v50  ;;  %v4748_v22 = vadd.f32 %v15970_v33, %v10995_v10  ;;  %v15971_v42 = vld [vmem:[#allocation42_spill] sm:$0xff]  ;;  %v5510_v33 = vmax.f32 %v5155_v12, 0.0  ;;  %v15982_v12 = vld [vmem:[#allocation53_spill] sm:$0xff] }
 0x715   :  { %v5149_v35 = vadd.f32 %v15971_v42, %v10997_v11  ;;  %v5866_v54 = vadd.f32 %v5865_v5, %v5502_v32  ;;  %v5734_v6 = vadd.f32 %v5733_v8, %v5503_v38  ;;  %v5507_v14 = vmax.f32 %v4751_v20, 0.0 }
 0x716   :  { %v5505_v17 = vmax.f32 %v4748_v22, 0.0  ;;  %v10211_v32 = vunpack.c.h.bf16 %v14584_v40  ;;  %v5511_v40 = vmax.f32 %v4757_v55, 0.0  ;;  %v4763_v8 = vadd.f32 %v15980_v34, %v10995_v10  ;;  %v15984_v55 = vld [vmem:[#allocation55_spill] sm:$0xff] }
 0x717   :  { %v6887_v59 = vpop.f32.mrf.mxu2  ;;  %v7288_v18 = vpop.f32.mrf.mxu3  ;;  %v5506_v28 = vmax.f32 %v5149_v35, 0.0  ;;  %v5867_v49 = vadd.f32 %v5866_v54, %v5504_v51 }
 0x718   :  { %v6888_v30 = vadd.f32 %v6887_v59, %v10995_v10  ;;  %v7289_v61 = vadd.f32 %v7288_v18, %v10997_v11  ;;  %v14597_v58 = vpop.f32.mrf.mxu0  ;;  %v14599_v45 = vpop.f32.mrf.mxu1  ;;  %v10466_v18 = vunpack.c.l.bf16 %v14617_v15 }
 0x719   :  { %v5868_v47 = vadd.f32 %v5867_v49, %v5506_v28 }
 0x71a   :  { %v7592_v1 = vmax.f32 %v6888_v30, 0.0  ;;  %v7593_v50 = vmax.f32 %v7289_v61, 0.0  ;;  %v15978_v30 = vld [vmem:[#allocation49_spill] sm:$0xff] }
 0x71b   :  { %8955 = vmatmul.msk.f32.gmra.mxu0 %vm293_vm1, %v10210_v31  ;;  %9084 = vmatmul.msk.f32.gmra.mxu1 %vm293_vm1, %v10210_v31  ;;  %v5869_v5 = vadd.f32 %v5868_v47, %v5508_v2  ;;  %v4760_v61 = vadd.f32 %v15978_v30, %v10995_v10  ;;  %v15983_v2 = vld [vmem:[#allocation54_spill] sm:$0xff]  ;;  %v10214_v47 = vunpack.c.l.bf16 %v14646_v39 }
 0x71c   :  { %v7769_v57 = vadd.f32 %v7768_v25, %v7592_v1  ;;  %v7902_v63 = vadd.f32 %v7901_v29, %v7593_v50  ;;  %9340 = vmatmul.msk.f32.gmra.mxu2 %vm293_vm1, %v10463_v36  ;;  %9469 = vmatmul.msk.f32.gmra.mxu3 %vm293_vm1, %v10463_v36  ;;  %v5158_v25 = vadd.f32 %v15977_v19, %v10997_v11  ;;  %v15979_v36 = vld [vmem:[#allocation50_spill] sm:$0xff]  ;;  %v15981_v1 = vld [vmem:[#allocation52_spill] sm:$0xff] }
 0x71d   :  { %v5735_v29 = vadd.f32 %v5734_v6, %v5505_v17  ;;  %v5161_v38 = vadd.f32 %v15979_v36, %v10997_v11  ;;  %v5164_v50 = vadd.f32 %v15981_v1, %v10997_v11  ;;  %v5870_v54 = vadd.f32 %v5869_v5, %v5510_v33 }
 0x71e   :  { %v5512_v51 = vmax.f32 %v5158_v25, 0.0  ;;  %v5513_v3 = vmax.f32 %v4760_v61, 0.0  ;;  %v4766_v6 = vadd.f32 %v15982_v12, %v10995_v10  ;;  %v4769_v19 = vadd.f32 %v15984_v55, %v10995_v10  ;;  %v15986_v61 = vld [vmem:[#allocation57_spill] sm:$0xff]  ;;  %v15989_v12 = vld [vmem:[#allocation60_spill] sm:$0xff]  ;;  %v15991_v55 = vld [vmem:[#allocation62_spill] sm:$0xff] }
 0x71f   :  { %v6890_v60 = vpop.f32.mrf.mxu2  ;;  %v7291_v7 = vpop.f32.mrf.mxu3  ;;  %v5736_v31 = vadd.f32 %v5735_v29, %v5507_v14  ;;  %v5514_v0 = vmax.f32 %v5161_v38, 0.0  ;;  %v5516_v4 = vmax.f32 %v5164_v50, 0.0  ;;  %v10467_v33 = vunpack.c.h.bf16 %v14617_v15  ;;  %v15988_v15 = vld [vmem:[#allocation59_spill] sm:$0xff] }
 0x720   :  { %v6891_v22 = vadd.f32 %v6890_v60, %v10995_v10  ;;  %v7292_v42 = vadd.f32 %v7291_v7, %v10997_v11  ;;  %v14626_v35 = vpop.f32.mrf.mxu0  ;;  %v14628_v59 = vpop.f32.mrf.mxu1  ;;  %v5871_v14 = vadd.f32 %v5870_v54, %v5512_v51  ;;  %v4772_v36 = vadd.f32 %v15986_v61, %v10995_v10  ;;  %v7973_v54 = vld [vmem:[%s15527_s3 + $0x28] sm:$0xff] }
 0x721   :  { %v5737_v13 = vadd.f32 %v5736_v31, %v5509_v56  ;;  %v15985_v31 = vld [vmem:[#allocation56_spill] sm:$0xff]  ;;  %8020 = vmatpush.msra.mxu0 %v7973_v54 }
 0x722   :  { %v7594_v46 = vmax.f32 %v6891_v22, 0.0  ;;  %v7595_v20 = vmax.f32 %v7292_v42, 0.0  ;;  %v5872_v42 = vadd.f32 %v5871_v14, %v5514_v0  ;;  %v5170_v5 = vadd.f32 %v15985_v31, %v10997_v11 }
 0x723   :  { %8956 = vmatmul.msk.f32.gmra.mxu0 %vm293_vm1, %v10211_v32  ;;  %9085 = vmatmul.msk.f32.gmra.mxu1 %vm293_vm1, %v10211_v32  ;;  %v5738_v49 = vadd.f32 %v5737_v13, %v5511_v40  ;;  %v15987_v13 = vld [vmem:[#allocation58_spill] sm:$0xff]  ;;  %v5521_v14 = vmax.f32 %v4772_v36, 0.0  ;;  %v15993_v36 = vld [vmem:[#allocation64_spill] sm:$0xff] }
 0x724   :  { %v7770_v17 = vadd.f32 %v7769_v57, %v7594_v46  ;;  %v7903_v28 = vadd.f32 %v7902_v63, %v7595_v20  ;;  %9341 = vmatmul.msk.f32.gmra.mxu2 %vm293_vm1, %v10466_v18  ;;  %9470 = vmatmul.msk.f32.gmra.mxu3 %vm293_vm1, %v10466_v18  ;;  %v5167_v57 = vadd.f32 %v15983_v2, %v10997_v11  ;;  %v5515_v63 = vmax.f32 %v4763_v8, 0.0  ;;  %v15990_v2 = vld [vmem:[#allocation61_spill] sm:$0xff] }
 0x725   :  { %v5739_v22 = vadd.f32 %v5738_v49, %v5513_v3  ;;  %v5517_v18 = vmax.f32 %v4766_v6, 0.0  ;;  %v5873_v46 = vadd.f32 %v5872_v42, %v5516_v4  ;;  %v5519_v20 = vmax.f32 %v4769_v19, 0.0  ;;  %v14682_v49 = vld [vmem:[%s15524_s0 + $0x790] sm:$0xff]  }
 0x726   :  { %v5518_v30 = vmax.f32 %v5167_v57, 0.0  ;;  %v5173_v34 = vadd.f32 %v15987_v13, %v10997_v11  ;;  %v4775_v8 = vadd.f32 %v15988_v15, %v10995_v10  ;;  %v5520_v0 = vmax.f32 %v5170_v5, 0.0 }
 0x727   :  { %v6893_v25 = vpop.f32.mrf.mxu2  ;;  %v7294_v29 = vpop.f32.mrf.mxu3  ;;  %v5740_v51 = vadd.f32 %v5739_v22, %v5515_v63  ;;  %v5176_v6 = vadd.f32 %v15989_v12, %v10997_v11  ;;  %v4778_v57 = vadd.f32 %v15990_v2, %v10995_v10  ;;  %v5179_v19 = vadd.f32 %v15991_v55, %v10997_v11  ;;  %v15996_v2 = vld [vmem:[#allocation67_spill] sm:$0xff] }
 0x728   :  { %v6894_v56 = vadd.f32 %v6893_v25, %v10995_v10  ;;  %v7295_v60 = vadd.f32 %v7294_v29, %v10997_v11  ;;  %v14657_v7 = vpop.f32.mrf.mxu0  ;;  %v14659_v32 = vpop.f32.mrf.mxu1  ;;  %v5522_v4 = vmax.f32 %v5173_v34, 0.0  ;;  %v15994_v34 = vld [vmem:[#allocation65_spill] sm:$0xff] }
 0x729   :  { %v5741_v3 = vadd.f32 %v5740_v51, %v5517_v18  ;;  %v10470_v18 = vunpack.c.l.bf16 %v14682_v49  ;;  %v5524_v5 = vmax.f32 %v5176_v6, 0.0  ;;  %v5526_v13 = vmax.f32 %v5179_v19, 0.0  ;;  %v14714_v6 = vld [vmem:[%s15524_s0 + $0x598] sm:$0xff]  }
 0x72a   :  { %v7596_v38 = vmax.f32 %v6894_v56, 0.0  ;;  %v7597_v40 = vmax.f32 %v7295_v60, 0.0  ;;  %v5523_v56 = vmax.f32 %v4775_v8, 0.0  ;;  %v4784_v15 = vadd.f32 %v15994_v34, %v10995_v10  ;;  %v15995_v8 = vld [vmem:[#allocation66_spill] sm:$0xff]  ;;  %v16000_v34 = vld [vmem:[#allocation71_spill] sm:$0xff] }
 0x72b   :  { %8957 = vmatmul.msk.f32.gmra.mxu0 %vm293_vm1, %v10214_v47  ;;  %9086 = vmatmul.msk.f32.gmra.mxu1 %vm293_vm1, %v10214_v47  ;;  %v5742_v63 = vadd.f32 %v5741_v3, %v5519_v20  ;;  %v10215_v47 = vunpack.c.h.bf16 %v14646_v39  ;;  %v5185_v54 = vadd.f32 %v15995_v8, %v10997_v11 }
 0x72c   :  { %v7771_v1 = vadd.f32 %v7770_v17, %v7596_v38  ;;  %v7904_v50 = vadd.f32 %v7903_v28, %v7597_v40  ;;  %9342 = vmatmul.msk.f32.gmra.mxu2 %vm293_vm1, %v10467_v33  ;;  %9471 = vmatmul.msk.f32.gmra.mxu3 %vm293_vm1, %v10467_v33  ;;  %v7989_v17 = vld [vmem:[%s15527_s3 + $0xa8] sm:$0xff]  ;;  %v5874_v28 = vadd.f32 %v5873_v46, %v5518_v30  ;;  %v15992_v30 = vld [vmem:[#allocation63_spill] sm:$0xff]  ;;  %v5525_v40 = vmax.f32 %v4778_v57, 0.0 }
 0x72d   :  { %8040 = vmatpush.msra.mxu1 %v7989_v17  ;;  %v4781_v61 = vadd.f32 %v15992_v30, %v10995_v10  ;;  %v5182_v38 = vadd.f32 %v15993_v36, %v10997_v11  ;;  %v5743_v39 = vadd.f32 %v5742_v63, %v5521_v14  ;;  %v4787_v57 = vadd.f32 %v15996_v2, %v10995_v10 }
 0x72e   :  { %v5875_v31 = vadd.f32 %v5874_v28, %v5520_v0  ;;  %v5529_v55 = vmax.f32 %v4784_v15, 0.0  ;;  %v5530_v19 = vmax.f32 %v5185_v54, 0.0  ;;  %v10471_v30 = vunpack.c.h.bf16 %v14682_v49 }
 0x72f   :  { %v6896_v25 = vpop.f32.mrf.mxu2  ;;  %v7297_v29 = vpop.f32.mrf.mxu3  ;;  %v5744_v3 = vadd.f32 %v5743_v39, %v5523_v56  ;;  %v5527_v28 = vmax.f32 %v4781_v61, 0.0  ;;  %v5528_v14 = vmax.f32 %v5182_v38, 0.0  ;;  %v15998_v56 = vld [vmem:[#allocation69_spill] sm:$0xff]  ;;  %v5531_v38 = vmax.f32 %v4787_v57, 0.0  ;;  %v14745_v57 = vld [vmem:[%s15524_s0 + $0x798] sm:$0xff]  }
 0x730   :  { %v6897_v60 = vadd.f32 %v6896_v25, %v10995_v10  ;;  %v7298_v33 = vadd.f32 %v7297_v29, %v10997_v11  ;;  %v14694_v22 = vpop.f32.mrf.mxu0  ;;  %v14696_v42 = vpop.f32.mrf.mxu1  ;;  %v5876_v20 = vadd.f32 %v5875_v31, %v5522_v4  ;;  %v15997_v4 = vld [vmem:[#allocation68_spill] sm:$0xff]  ;;  %v4793_v15 = vadd.f32 %v16000_v34, %v10995_v10 }
 0x731   :  { %v5745_v63 = vadd.f32 %v5744_v3, %v5525_v40  ;;  %v15999_v40 = vld [vmem:[#allocation70_spill] sm:$0xff] }
 0x732   :  { %v7598_v51 = vmax.f32 %v6897_v60, 0.0  ;;  %v7599_v46 = vmax.f32 %v7298_v33, 0.0  ;;  %v5877_v17 = vadd.f32 %v5876_v20, %v5524_v5  ;;  %v4790_v60 = vadd.f32 %v15998_v56, %v10995_v10 }
 0x733   :  { %8958 = vmatmul.msk.f32.gmra.mxu0 %vm293_vm1, %v10215_v47  ;;  %9087 = vmatmul.msk.f32.gmra.mxu1 %vm293_vm1, %v10215_v47  ;;  %v10218_v47 = vunpack.c.l.bf16 %v14714_v6  ;;  %v5746_v61 = vadd.f32 %v5745_v63, %v5527_v28 }
 0x734   :  { %v7772_v0 = vadd.f32 %v7771_v1, %v7598_v51  ;;  %v7905_v12 = vadd.f32 %v7904_v50, %v7599_v46  ;;  %9343 = vmatmul.msk.f32.gmra.mxu2 %vm293_vm1, %v10470_v18  ;;  %9472 = vmatmul.msk.f32.gmra.mxu3 %vm293_vm1, %v10470_v18  ;;  %v5188_v1 = vadd.f32 %v15997_v4, %v10997_v11  ;;  %v5533_v54 = vmax.f32 %v4790_v60, 0.0 }
 0x735   :  { %v5878_v50 = vadd.f32 %v5877_v17, %v5526_v13  ;;  %v5191_v51 = vadd.f32 %v15999_v40, %v10997_v11  ;;  %v5747_v13 = vadd.f32 %v5746_v61, %v5529_v55  ;;  %v16001_v17 = vld [vmem:[#allocation72_spill] sm:$0xff]  ;;  %v16004_v55 = vld [vmem:[#allocation75_spill] sm:$0xff]  ;;  %v10474_v61 = vunpack.c.l.bf16 %v14745_v57 }
 0x736   :  { %v5532_v39 = vmax.f32 %v5188_v1, 0.0  ;;  %v5194_v28 = vadd.f32 %v16001_v17, %v10997_v11 }
 0x737   :  { %v6899_v25 = vpop.f32.mrf.mxu2  ;;  %v7300_v29 = vpop.f32.mrf.mxu3  ;;  %v5879_v36 = vadd.f32 %v5878_v50, %v5528_v14  ;;  %v16002_v14 = vld [vmem:[#allocation73_spill] sm:$0xff]  ;;  %v5748_v63 = vadd.f32 %v5747_v13, %v5531_v38  ;;  %v5534_v1 = vmax.f32 %v5191_v51, 0.0 }
 0x738   :  { %v6900_v33 = vadd.f32 %v6899_v25, %v10995_v10  ;;  %v7301_v18 = vadd.f32 %v7300_v29, %v10997_v11  ;;  %v14725_v31 = vpop.f32.mrf.mxu0  ;;  %v14727_v5 = vpop.f32.mrf.mxu1  ;;  %v4796_v2 = vadd.f32 %v16002_v14, %v10995_v10  ;;  %v16006_v51 = vld [vmem:[#allocation77_spill] sm:$0xff] }
 0x739   :  { %v5880_v8 = vadd.f32 %v5879_v36, %v5530_v19  ;;  %v4799_v19 = vadd.f32 %v16004_v55, %v10995_v10  ;;  %v5749_v56 = vadd.f32 %v5748_v63, %v5533_v54  ;;  %v5536_v36 = vmax.f32 %v5194_v28, 0.0  ;;  %v16007_v54 = vld [vmem:[#allocation78_spill] sm:$0xff]  ;;  %v16008_v28 = vld [vmem:[#allocation79_spill] sm:$0xff]  ;;  %v16009_v55 = vld [vmem:[#allocation80_spill] sm:$0xff] }
 0x73a   :  { %v7600_v46 = vmax.f32 %v6900_v33, 0.0  ;;  %v7601_v20 = vmax.f32 %v7301_v18, 0.0  ;;  %v5537_v38 = vmax.f32 %v4796_v2, 0.0  ;;  %v5203_v17 = vadd.f32 %v16007_v54, %v10997_v11 }
 0x73b   :  { %8959 = vmatmul.msk.f32.gmra.mxu0 %vm293_vm1, %v10218_v47  ;;  %9088 = vmatmul.msk.f32.gmra.mxu1 %vm293_vm1, %v10218_v47  ;;  %v5881_v4 = vadd.f32 %v5880_v8, %v5532_v39  ;;  %v10219_v47 = vunpack.c.h.bf16 %v14714_v6  ;;  %v16005_v39 = vld [vmem:[#allocation76_spill] sm:$0xff]  ;;  %v5539_v8 = vmax.f32 %v4799_v19, 0.0  ;;  %v4805_v14 = vadd.f32 %v16008_v28, %v10995_v10 }
 0x73c   :  { %v7773_v49 = vadd.f32 %v7772_v0, %v7600_v46  ;;  %v7906_v3 = vadd.f32 %v7905_v12, %v7601_v20  ;;  %9344 = vmatmul.msk.f32.gmra.mxu2 %vm293_vm1, %v10471_v30  ;;  %9473 = vmatmul.msk.f32.gmra.mxu3 %vm293_vm1, %v10471_v30  ;;  %v5535_v0 = vmax.f32 %v4793_v15, 0.0  ;;  %v16003_v12 = vld [vmem:[#allocation74_spill] sm:$0xff]  ;;  %v5200_v40 = vadd.f32 %v16005_v39, %v10997_v11 }
 0x73d   :  { %v5197_v50 = vadd.f32 %v16003_v12, %v10997_v11  ;;  %v4802_v46 = vadd.f32 %v16006_v51, %v10995_v10  ;;  %v5882_v6 = vadd.f32 %v5881_v4, %v5534_v1  ;;  %v14774_v4 = vld [vmem:[%s15524_s0 + $0x5a0] sm:$0xff]   ;;  %v5206_v19 = vadd.f32 %v16009_v55, %v10997_v11  ;;  %v16014_v55 = vld [vmem:[#allocation85_spill] sm:$0xff] }
 0x73e   :  { %v5750_v34 = vadd.f32 %v5749_v56, %v5535_v0  ;;  %v5540_v12 = vmax.f32 %v5200_v40, 0.0  ;;  %v10475_v51 = vunpack.c.h.bf16 %v14745_v57 }
 0x73f   :  { %v6902_v25 = vpop.f32.mrf.mxu2  ;;  %v7303_v29 = vpop.f32.mrf.mxu3  ;;  %v5538_v15 = vmax.f32 %v5197_v50, 0.0  ;;  %v5883_v1 = vadd.f32 %v5882_v6, %v5536_v36  ;;  %v5541_v50 = vmax.f32 %v4802_v46, 0.0 }
 0x740   :  { %v6903_v60 = vadd.f32 %v6902_v25, %v10995_v10  ;;  %v7304_v33 = vadd.f32 %v7303_v29, %v10997_v11  ;;  %v14754_v18 = vpop.f32.mrf.mxu0  ;;  %v14756_v30 = vpop.f32.mrf.mxu1  ;;  %v5751_v0 = vadd.f32 %v5750_v34, %v5537_v38  ;;  %v16010_v25 = vld [vmem:[#allocation81_spill] sm:$0xff]  ;;  %v16012_v34 = vld [vmem:[#allocation83_spill] sm:$0xff] }
 0x742   :  { %v7602_v20 = vmax.f32 %v6903_v60, 0.0  ;;  %v7603_v13 = vmax.f32 %v7304_v33, 0.0  ;;  %v5752_v29 = vadd.f32 %v5751_v0, %v5539_v8  ;;  %v10222_v33 = vunpack.c.l.bf16 %v14774_v4 }
 0x743   :  { %8960 = vmatmul.msk.f32.gmra.mxu0 %vm293_vm1, %v10219_v47  ;;  %9089 = vmatmul.msk.f32.gmra.mxu1 %vm293_vm1, %v10219_v47  ;;  %v5542_v47 = vmax.f32 %v5203_v17, 0.0  ;;  %v5544_v8 = vmax.f32 %v5206_v19, 0.0 }
 0x744   :  { %v7774_v2 = vadd.f32 %v7773_v49, %v7602_v20  ;;  %v7907_v63 = vadd.f32 %v7906_v3, %v7603_v13  ;;  %9345 = vmatmul.msk.f32.gmra.mxu2 %vm293_vm1, %v10474_v61  ;;  %9474 = vmatmul.msk.f32.gmra.mxu3 %vm293_vm1, %v10474_v61  ;;  %v4808_v49 = vadd.f32 %v16010_v25, %v10995_v10  ;;  %v5543_v61 = vmax.f32 %v4805_v14, 0.0  ;;  %v16011_v20 = vld [vmem:[#allocation82_spill] sm:$0xff] }
 0x745   :  { %v5884_v3 = vadd.f32 %v5883_v1, %v5538_v15  ;;  %v5753_v6 = vadd.f32 %v5752_v29, %v5541_v50  ;;  %v5209_v13 = vadd.f32 %v16011_v20, %v10997_v11  ;;  %v4811_v15 = vadd.f32 %v16012_v34, %v10995_v10  ;;  %v16013_v1 = vld [vmem:[#allocation84_spill] sm:$0xff] }
 0x746   :  { %v5545_v54 = vmax.f32 %v4808_v49, 0.0  ;;  %v5212_v0 = vadd.f32 %v16013_v1, %v10997_v11  ;;  %v4814_v25 = vadd.f32 %v16014_v55, %v10995_v10  ;;  %v16020_v55 = vld [vmem:[#allocation90_spill] sm:$0xff] }
 0x747   :  { %v6905_v56 = vpop.f32.mrf.mxu2  ;;  %v7306_v60 = vpop.f32.mrf.mxu3  ;;  %v5885_v46 = vadd.f32 %v5884_v3, %v5540_v12  ;;  %v5754_v57 = vadd.f32 %v5753_v6, %v5543_v61  ;;  %v5546_v19 = vmax.f32 %v5209_v13, 0.0  ;;  %v5547_v49 = vmax.f32 %v4811_v15, 0.0  ;;  %v16015_v3 = vld [vmem:[#allocation86_spill] sm:$0xff] }
 0x748   :  { %v6906_v39 = vadd.f32 %v6905_v56, %v10995_v10  ;;  %v7307_v36 = vadd.f32 %v7306_v60, %v10997_v11  ;;  %v14783_v38 = vpop.f32.mrf.mxu0  ;;  %v14785_v40 = vpop.f32.mrf.mxu1  ;;  %v5215_v29 = vadd.f32 %v16015_v3, %v10997_v11  ;;  %v5549_v61 = vmax.f32 %v4814_v25, 0.0 }
 0x749   :  { %v5886_v14 = vadd.f32 %v5885_v46, %v5542_v47  ;;  %v14805_v47 = vld [vmem:[%s15524_s0 + $0x7a0] sm:$0xff]   ;;  %v5755_v60 = vadd.f32 %v5754_v57, %v5545_v54  ;;  %v10223_v6 = vunpack.c.h.bf16 %v14774_v4  ;;  %v5221_v4 = vadd.f32 %v16020_v55, %v10997_v11 }
 0x74a   :  { %v7604_v17 = vmax.f32 %v6906_v39, 0.0  ;;  %v7605_v28 = vmax.f32 %v7307_v36, 0.0  ;;  %v16017_v39 = vld [vmem:[#allocation88_spill] sm:$0xff] }
 0x74b   :  { %8961 = vmatmul.msk.f32.gmra.mxu0 %vm293_vm1, %v10222_v33  ;;  %9090 = vmatmul.msk.f32.gmra.mxu1 %vm293_vm1, %v10222_v33  ;;  %v5887_v56 = vadd.f32 %v5886_v14, %v5544_v8  ;;  %v16016_v33 = vld [vmem:[#allocation87_spill] sm:$0xff]  ;;  %v5218_v36 = vadd.f32 %v16017_v39, %v10997_v11  ;;  %v10478_v8 = vunpack.c.l.bf16 %v14805_v47  ;;  %v16019_v14 = vld [vmem:[#allocation89_spill] sm:$0xff] }
 0x74c   :  { %v7775_v12 = vadd.f32 %v7774_v2, %v7604_v17  ;;  %v7908_v50 = vadd.f32 %v7907_v63, %v7605_v28  ;;  %9346 = vmatmul.msk.f32.gmra.mxu2 %vm293_vm1, %v10475_v51  ;;  %9475 = vmatmul.msk.f32.gmra.mxu3 %vm293_vm1, %v10475_v51  ;;  %v4817_v2 = vadd.f32 %v16016_v33, %v10995_v10  ;;  %v5548_v63 = vmax.f32 %v5212_v0, 0.0 }
 0x74d   :  { %v5888_v54 = vadd.f32 %v5887_v56, %v5546_v19  ;;  %v5756_v17 = vadd.f32 %v5755_v60, %v5547_v49  ;;  %v5550_v28 = vmax.f32 %v5215_v29, 0.0  ;;  %v4820_v1 = vadd.f32 %v16019_v14, %v10995_v10  ;;  %v16022_v19 = vld [vmem:[#allocation92_spill] sm:$0xff] }
 0x74e   :  { %v5551_v0 = vmax.f32 %v4817_v2, 0.0  ;;  %v5552_v39 = vmax.f32 %v5218_v36, 0.0  ;;  %v5224_v49 = vadd.f32 %v16022_v19, %v10997_v11  ;;  %v14834_v60 = vld [vmem:[%s15524_s0 + $0x5a8] sm:$0xff]  }
 0x74f   :  { %v6908_v51 = vpop.f32.mrf.mxu2  ;;  %v7309_v46 = vpop.f32.mrf.mxu3  ;;  %v5889_v3 = vadd.f32 %v5888_v54, %v5548_v63  ;;  %v5757_v33 = vadd.f32 %v5756_v17, %v5549_v61  ;;  %v5553_v63 = vmax.f32 %v4820_v1, 0.0  ;;  %v16023_v61 = vld [vmem:[#allocation93_spill] sm:$0xff]  ;;  %v16025_v17 = vld [vmem:[#allocation95_spill] sm:$0xff] }
 0x750   :  { %v6909_v20 = vadd.f32 %v6908_v51, %v10995_v10  ;;  %v7310_v13 = vadd.f32 %v7309_v46, %v10997_v11  ;;  %v14814_v34 = vpop.f32.mrf.mxu0  ;;  %v14816_v15 = vpop.f32.mrf.mxu1  ;;  %v16021_v51 = vld [vmem:[#allocation91_spill] sm:$0xff]  ;;  %v4826_v36 = vadd.f32 %v16023_v61, %v10995_v10  ;;  %v16029_v19 = vld [vmem:[#allocation97_spill] sm:$0xff] }
 0x751   :  { %16018 = vst [vmem:[#allocation136_spill] sm:$0xff] %v14816_v15  ;;  %v4823_v46 = vadd.f32 %v16021_v51, %v10995_v10  ;;  %v5890_v2 = vadd.f32 %v5889_v3, %v5550_v28  ;;  %v16028_v51 = vld [vmem:[#allocation96_spill] sm:$0xff] }
 0x752   :  { %v7606_v25 = vmax.f32 %v6909_v20, 0.0  ;;  %v7607_v57 = vmax.f32 %v7310_v13, 0.0  ;;  %v5554_v20 = vmax.f32 %v5221_v4, 0.0  ;;  %v16024_v13 = vld [vmem:[#allocation94_spill] sm:$0xff]  ;;  %v10479_v4 = vunpack.c.h.bf16 %v14805_v47 }
 0x753   :  { %8962 = vmatmul.msk.f32.gmra.mxu0 %vm293_vm1, %v10223_v6  ;;  %9091 = vmatmul.msk.f32.gmra.mxu1 %vm293_vm1, %v10223_v6  ;;  %v5758_v6 = vadd.f32 %v5757_v33, %v5551_v0  ;;  %v5555_v54 = vmax.f32 %v4823_v46, 0.0  ;;  %v5230_v46 = vadd.f32 %v16028_v51, %v10997_v11 }
 0x754   :  { %v7776_v29 = vadd.f32 %v7775_v12, %v7606_v25  ;;  %v7909_v56 = vadd.f32 %v7908_v50, %v7607_v57  ;;  %9347 = vmatmul.msk.f32.gmra.mxu2 %vm293_vm1, %v10478_v8  ;;  %9476 = vmatmul.msk.f32.gmra.mxu3 %vm293_vm1, %v10478_v8  ;;  %v5227_v12 = vadd.f32 %v16024_v13, %v10997_v11  ;;  %v10226_v25 = vunpack.c.l.bf16 %v14834_v60 }
 0x755   :  { %v5891_v50 = vadd.f32 %v5890_v2, %v5552_v39  ;;  %v4829_v8 = vadd.f32 %v16025_v17, %v10995_v10  ;;  %v5556_v57 = vmax.f32 %v5224_v49, 0.0  ;;  %v5759_v33 = vadd.f32 %v5758_v6, %v5553_v63 }
 0x756   :  { %v5557_v39 = vmax.f32 %v4826_v36, 0.0  ;;  %v4832_v2 = vadd.f32 %v16029_v19, %v10995_v10  ;;  %v5558_v49 = vmax.f32 %v5227_v12, 0.0  ;;  %v5560_v12 = vmax.f32 %v5230_v46, 0.0 }
 0x757   :  { %v6911_v14 = vpop.f32.mrf.mxu2  ;;  %v7312_v55 = vpop.f32.mrf.mxu3  ;;  %v5892_v61 = vadd.f32 %v5891_v50, %v5554_v20 }
 0x758   :  { %v6912_v28 = vadd.f32 %v6911_v14, %v10995_v10  ;;  %v7313_v1 = vadd.f32 %v7312_v55, %v10997_v11  ;;  %v14845_v3 = vpop.f32.mrf.mxu0  ;;  %v14847_v0 = vpop.f32.mrf.mxu1  ;;  %v5760_v14 = vadd.f32 %v5759_v33, %v5555_v54  ;;  %v5559_v55 = vmax.f32 %v4829_v8, 0.0  ;;  %v16032_v54 = vld [vmem:[#allocation100_spill] sm:$0xff] }
 0x759   :  { %16026 = vst [vmem:[#allocation137_spill] sm:$0xff] %v14845_v3  ;;  %v16030_v3 = vld [vmem:[#allocation98_spill] sm:$0xff]  ;;  %v5893_v63 = vadd.f32 %v5892_v61, %v5556_v57  ;;  %v5561_v50 = vmax.f32 %v4832_v2, 0.0  ;;  %v5236_v8 = vadd.f32 %v16032_v54, %v10997_v11  ;;  %v10227_v33 = vunpack.c.h.bf16 %v14834_v60  ;;  %v16038_v54 = vld [vmem:[#allocation104_spill] sm:$0xff] }
 0x75a   :  { %16027 = vst [vmem:[#allocation138_spill] sm:$0xff] %v14847_v0  ;;  %v7608_v13 = vmax.f32 %v6912_v28, 0.0  ;;  %v7609_v17 = vmax.f32 %v7313_v1, 0.0  ;;  %v5233_v15 = vadd.f32 %v16030_v3, %v10997_v11  ;;  %v16031_v0 = vld [vmem:[#allocation99_spill] sm:$0xff]  ;;  %v5761_v20 = vadd.f32 %v5760_v14, %v5557_v39  ;;  %v14867_v28 = vld [vmem:[%s15524_s0 + $0x7a8] sm:$0xff]   ;;  %v16034_v39 = vld [vmem:[#allocation102_spill] sm:$0xff] }
 0x75b   :  { %v4835_v47 = vadd.f32 %v16031_v0, %v10995_v10  ;;  %8963 = vmatmul.msk.f32.gmra.mxu0 %vm293_vm1, %v10226_v25  ;;  %9092 = vmatmul.msk.f32.gmra.mxu1 %vm293_vm1, %v10226_v25  ;;  %v5894_v1 = vadd.f32 %v5893_v63, %v5558_v49  ;;  %v16033_v25 = vld [vmem:[#allocation101_spill] sm:$0xff]  ;;  %v5239_v51 = vadd.f32 %v16034_v39, %v10997_v11  ;;  %v10482_v49 = vunpack.c.l.bf16 %v14867_v28 }
 0x75c   :  { %v7777_v36 = vadd.f32 %v7776_v29, %v7608_v13  ;;  %v7910_v6 = vadd.f32 %v7909_v56, %v7609_v17  ;;  %9348 = vmatmul.msk.f32.gmra.mxu2 %vm293_vm1, %v10479_v4  ;;  %9477 = vmatmul.msk.f32.gmra.mxu3 %vm293_vm1, %v10479_v4  ;;  %v4838_v29 = vadd.f32 %v16033_v25, %v10995_v10  ;;  %v5562_v57 = vmax.f32 %v5233_v15, 0.0 }
 0x75d   :  { %v5762_v56 = vadd.f32 %v5761_v20, %v5559_v55  ;;  %v5563_v3 = vmax.f32 %v4835_v47, 0.0  ;;  %v5895_v13 = vadd.f32 %v5894_v1, %v5560_v12  ;;  %v5564_v17 = vmax.f32 %v5236_v8, 0.0  ;;  %v16037_v55 = vld [vmem:[#allocation103_spill] sm:$0xff]  ;;  %v16039_v8 = vld [vmem:[#allocation105_spill] sm:$0xff] }
 0x75e   :  { %v5565_v14 = vmax.f32 %v4838_v29, 0.0  ;;  %v4841_v60 = vadd.f32 %v16037_v55, %v10995_v10  ;;  %v5242_v25 = vadd.f32 %v16038_v54, %v10997_v11  ;;  %v4844_v1 = vadd.f32 %v16039_v8, %v10995_v10  ;;  %v16040_v29 = vld [vmem:[#allocation106_spill] sm:$0xff] }
 0x75f   :  { %v6914_v0 = vpop.f32.mrf.mxu2  ;;  %v7315_v4 = vpop.f32.mrf.mxu3  ;;  %v5763_v15 = vadd.f32 %v5762_v56, %v5561_v50  ;;  %v5896_v20 = vadd.f32 %v5895_v13, %v5562_v57  ;;  %v14892_v50 = vld [vmem:[%s15524_s0 + $0x5b0] sm:$0xff]   ;;  %v5245_v56 = vadd.f32 %v16040_v29, %v10997_v11 }
 0x760   :  { %v6915_v46 = vadd.f32 %v6914_v0, %v10995_v10  ;;  %v7316_v19 = vadd.f32 %v7315_v4, %v10997_v11  ;;  %v14876_v2 = vpop.f32.mrf.mxu0  ;;  %v14878_v61 = vpop.f32.mrf.mxu1  ;;  %v5566_v4 = vmax.f32 %v5239_v51, 0.0  ;;  %v16046_v8 = vld [vmem:[#allocation110_spill] sm:$0xff] }
 0x761   :  { %16035 = vst [vmem:[#allocation139_spill] sm:$0xff] %v14876_v2  ;;  %v5764_v0 = vadd.f32 %v5763_v15, %v5563_v3  ;;  %v5897_v57 = vadd.f32 %v5896_v20, %v5564_v17  ;;  %v10230_v15 = vunpack.c.l.bf16 %v14892_v50  ;;  %v5570_v20 = vmax.f32 %v5245_v56, 0.0 }
 0x762   :  { %16036 = vst [vmem:[#allocation140_spill] sm:$0xff] %v14878_v61  ;;  %v7610_v47 = vmax.f32 %v6915_v46, 0.0  ;;  %v7611_v63 = vmax.f32 %v7316_v19, 0.0  ;;  %v16042_v46 = vld [vmem:[#allocation108_spill] sm:$0xff]  ;;  %v5251_v29 = vadd.f32 %v16046_v8, %v10997_v11  ;;  %v10231_v8 = vunpack.c.h.bf16 %v14892_v50 }
 0x763   :  { %8964 = vmatmul.msk.f32.gmra.mxu0 %vm293_vm1, %v10227_v33  ;;  %9093 = vmatmul.msk.f32.gmra.mxu1 %vm293_vm1, %v10227_v33  ;;  %v5765_v3 = vadd.f32 %v5764_v0, %v5565_v14  ;;  %v5567_v33 = vmax.f32 %v4841_v60, 0.0  ;;  %v5248_v19 = vadd.f32 %v16042_v46, %v10997_v11  ;;  %v5898_v55 = vadd.f32 %v5897_v57, %v5566_v4 }
 0x764   :  { %v7778_v39 = vadd.f32 %v7777_v36, %v7610_v47  ;;  %v7911_v12 = vadd.f32 %v7910_v6, %v7611_v63  ;;  %9349 = vmatmul.msk.f32.gmra.mxu2 %vm293_vm1, %v10482_v49  ;;  %9478 = vmatmul.msk.f32.gmra.mxu3 %vm293_vm1, %v10482_v49  ;;  %v5568_v36 = vmax.f32 %v5242_v25, 0.0  ;;  %v16041_v6 = vld [vmem:[#allocation107_spill] sm:$0xff]  ;;  %v10483_v14 = vunpack.c.h.bf16 %v14867_v28  ;;  %v16045_v25 = vld [vmem:[#allocation109_spill] sm:$0xff]  ;;  %v16048_v28 = vld [vmem:[#allocation112_spill] sm:$0xff] }
 0x765   :  { %v4847_v51 = vadd.f32 %v16041_v6, %v10995_v10  ;;  %v5569_v60 = vmax.f32 %v4844_v1, 0.0  ;;  %v4850_v0 = vadd.f32 %v16045_v25, %v10995_v10  ;;  %v5766_v6 = vadd.f32 %v5765_v3, %v5567_v33  ;;  %v7972_v3 = vld [vmem:[%s15527_s3 + $0x20] sm:$0xff] }
 0x766   :  { %v5899_v46 = vadd.f32 %v5898_v55, %v5568_v36  ;;  %v5254_v1 = vadd.f32 %v16048_v28, %v10997_v11  ;;  %8021 = vmatpush.msra.mxu0 %v7972_v3 }
 0x767   :  { %v6917_v49 = vpop.f32.mrf.mxu2  ;;  %v7318_v13 = vpop.f32.mrf.mxu3  ;;  %v5767_v33 = vadd.f32 %v5766_v6, %v5569_v60 }
 0x768   :  { %v6918_v47 = vadd.f32 %v6917_v49, %v10995_v10  ;;  %v7319_v63 = vadd.f32 %v7318_v13, %v10997_v11  ;;  %v14905_v54 = vpop.f32.mrf.mxu0  ;;  %v14907_v17 = vpop.f32.mrf.mxu1  ;;  %v5571_v49 = vmax.f32 %v4847_v51, 0.0  ;;  %v5572_v13 = vmax.f32 %v5248_v19, 0.0 }
 0x769   :  { %16043 = vst [vmem:[#allocation141_spill] sm:$0xff] %v14905_v54  ;;  %v16047_v54 = vld [vmem:[#allocation111_spill] sm:$0xff]  ;;  %v5900_v36 = vadd.f32 %v5899_v46, %v5570_v20  ;;  %v5573_v51 = vmax.f32 %v4850_v0, 0.0  ;;  %v5574_v19 = vmax.f32 %v5251_v29, 0.0  ;;  %v5576_v29 = vmax.f32 %v5254_v1, 0.0 }
 0x76a   :  { %16044 = vst [vmem:[#allocation6_spill] sm:$0xff] %v14907_v17  ;;  %v7612_v4 = vmax.f32 %v6918_v47, 0.0  ;;  %v7613_v57 = vmax.f32 %v7319_v63, 0.0  ;;  %v4853_v61 = vadd.f32 %v16047_v54, %v10995_v10  ;;  %v16050_v47 = vld [vmem:[#allocation114_spill] sm:$0xff]  ;;  %v5768_v54 = vadd.f32 %v5767_v33, %v5571_v49  ;;  %v16053_v49 = vld [vmem:[#allocation115_spill] sm:$0xff] }
 0x76b   :  { %8965 = vmatmul.msk.f32.gmra.mxu0 %vm293_vm1, %v10230_v15  ;;  %9094 = vmatmul.msk.f32.gmra.mxu1 %vm293_vm1, %v10230_v15  ;;  %v14928_v15 = vld [vmem:[%s15524_s0 + $0x7b0] sm:$0xff]   ;;  %v5257_v63 = vadd.f32 %v16050_v47, %v10997_v11 }
 0x76c   :  { %v7779_v56 = vadd.f32 %v7778_v39, %v7612_v4  ;;  %v7912_v25 = vadd.f32 %v7911_v12, %v7613_v57  ;;  %9350 = vmatmul.msk.f32.gmra.mxu2 %vm293_vm1, %v10483_v14  ;;  %9479 = vmatmul.msk.f32.gmra.mxu3 %vm293_vm1, %v10483_v14  ;;  %v7988_v39 = vld [vmem:[%s15527_s3 + $0xa0] sm:$0xff]  ;;  %v16049_v12 = vld [vmem:[#allocation113_spill] sm:$0xff]  ;;  %v5901_v14 = vadd.f32 %v5900_v36, %v5572_v13  ;;  %v5575_v60 = vmax.f32 %v4853_v61, 0.0 }
 0x76d   :  { %v4856_v55 = vadd.f32 %v16049_v12, %v10995_v10  ;;  %8041 = vmatpush.msra.mxu1 %v7988_v39  ;;  %v10486_v28 = vunpack.c.l.bf16 %v14928_v15  ;;  %v5769_v3 = vadd.f32 %v5768_v54, %v5573_v51  ;;  %v4859_v61 = vadd.f32 %v16053_v49, %v10995_v10  ;;  %v16054_v13 = vld [vmem:[#allocation116_spill] sm:$0xff] }
 0x76e   :  { %v5902_v39 = vadd.f32 %v5901_v14, %v5574_v19  ;;  %v5260_v33 = vadd.f32 %v16054_v13, %v10997_v11  ;;  %v5578_v1 = vmax.f32 %v5257_v63, 0.0 }
 0x76f   :  { %v6920_v20 = vpop.f32.mrf.mxu2  ;;  %v7321_v0 = vpop.f32.mrf.mxu3  ;;  %v5577_v50 = vmax.f32 %v4856_v55, 0.0  ;;  %v5770_v47 = vadd.f32 %v5769_v3, %v5575_v60  ;;  %v14960_v55 = vld [vmem:[%s15524_s0 + $0x5b8] sm:$0xff]   ;;  %v5579_v63 = vmax.f32 %v4859_v61, 0.0  ;;  %v16059_v3 = vld [vmem:[#allocation121_spill] sm:$0xff] }
 0x770   :  { %v6921_v6 = vadd.f32 %v6920_v20, %v10995_v10  ;;  %v7322_v4 = vadd.f32 %v7321_v0, %v10997_v11  ;;  %v14940_v57 = vpop.f32.mrf.mxu0  ;;  %v14942_v46 = vpop.f32.mrf.mxu1  ;;  %v16055_v20 = vld [vmem:[#allocation117_spill] sm:$0xff]  ;;  %v5903_v51 = vadd.f32 %v5902_v39, %v5576_v29  ;;  %v5580_v14 = vmax.f32 %v5260_v33, 0.0  ;;  %v16057_v60 = vld [vmem:[#allocation119_spill] sm:$0xff] }
 0x771   :  { %16051 = vst [vmem:[#allocation7_spill] sm:$0xff] %v14940_v57  ;;  %v4862_v0 = vadd.f32 %v16055_v20, %v10995_v10  ;;  %v10234_v13 = vunpack.c.l.bf16 %v14960_v55  ;;  %v16062_v20 = vld [vmem:[#allocation122_spill] sm:$0xff] }
 0x772   :  { %16052 = vst [vmem:[#allocation8_spill] sm:$0xff] %v14942_v46  ;;  %v7614_v36 = vmax.f32 %v6921_v6, 0.0  ;;  %v7615_v12 = vmax.f32 %v7322_v4, 0.0  ;;  %v16056_v46 = vld [vmem:[#allocation118_spill] sm:$0xff]  ;;  %v4865_v6 = vadd.f32 %v16057_v60, %v10995_v10  ;;  %v5771_v4 = vadd.f32 %v5770_v47, %v5577_v50  ;;  %v16063_v60 = vld [vmem:[#allocation123_spill] sm:$0xff] }
 0x773   :  { %v5263_v57 = vadd.f32 %v16056_v46, %v10997_v11  ;;  %8966 = vmatmul.msk.f32.gmra.mxu0 %vm293_vm1, %v10231_v8  ;;  %9095 = vmatmul.msk.f32.gmra.mxu1 %vm293_vm1, %v10231_v8  ;;  %v5904_v46 = vadd.f32 %v5903_v51, %v5578_v1  ;;  %v16058_v8 = vld [vmem:[#allocation120_spill] sm:$0xff]  ;;  %v10487_v1 = vunpack.c.h.bf16 %v14928_v15  ;;  %v16065_v15 = vld [vmem:[#allocation125_spill] sm:$0xff] }
 0x774   :  { %v7780_v19 = vadd.f32 %v7779_v56, %v7614_v36  ;;  %v7913_v54 = vadd.f32 %v7912_v25, %v7615_v12  ;;  %9351 = vmatmul.msk.f32.gmra.mxu2 %vm293_vm1, %v10486_v28  ;;  %9480 = vmatmul.msk.f32.gmra.mxu3 %vm293_vm1, %v10486_v28  ;;  %v5266_v56 = vadd.f32 %v16058_v8, %v10997_v11  ;;  %v5581_v25 = vmax.f32 %v4862_v0, 0.0 }
 0x775   :  { %v5582_v29 = vmax.f32 %v5263_v57, 0.0  ;;  %v4868_v28 = vadd.f32 %v16059_v3, %v10995_v10  ;;  %v5772_v12 = vadd.f32 %v5771_v4, %v5579_v63  ;;  %v5905_v47 = vadd.f32 %v5904_v46, %v5580_v14 }
 0x776   :  { %v5583_v57 = vmax.f32 %v4865_v6, 0.0  ;;  %v5269_v0 = vadd.f32 %v16062_v20, %v10997_v11  ;;  %v5584_v51 = vmax.f32 %v5266_v56, 0.0  ;;  %v4871_v8 = vadd.f32 %v16063_v60, %v10995_v10  ;;  %v16066_v56 = vld [vmem:[#allocation126_spill] sm:$0xff] }
 0x777   :  { %v6923_v39 = vpop.f32.mrf.mxu2  ;;  %v7324_v49 = vpop.f32.mrf.mxu3  ;;  %v5773_v17 = vadd.f32 %v5772_v12, %v5581_v25  ;;  %v5585_v2 = vmax.f32 %v4868_v28, 0.0  ;;  %v4874_v63 = vadd.f32 %v16065_v15, %v10995_v10  ;;  %v5275_v25 = vadd.f32 %v16066_v56, %v10997_v11 }
 0x778   :  { %v6924_v61 = vadd.f32 %v6923_v39, %v10995_v10  ;;  %v7325_v33 = vadd.f32 %v7324_v49, %v10997_v11  ;;  %v14971_v36 = vpop.f32.mrf.mxu0  ;;  %v14973_v50 = vpop.f32.mrf.mxu1  ;;  %v5906_v49 = vadd.f32 %v5905_v47, %v5582_v29  ;;  %v5586_v46 = vmax.f32 %v5269_v0, 0.0  ;;  %v14993_v29 = vld [vmem:[%s15524_s0 + $0x7b8] sm:$0xff]  }
 0x779   :  { %16060 = vst [vmem:[#allocation9_spill] sm:$0xff] %v14971_v36  ;;  %v16064_v36 = vld [vmem:[#allocation124_spill] sm:$0xff]  ;;  %v5774_v4 = vadd.f32 %v5773_v17, %v5583_v57  ;;  %v10235_v47 = vunpack.c.h.bf16 %v14960_v55  ;;  %v5589_v57 = vmax.f32 %v4874_v63, 0.0 }
 0x77a   :  { %16061 = vst [vmem:[#allocation10_spill] sm:$0xff] %v14973_v50  ;;  %v7616_v3 = vmax.f32 %v6924_v61, 0.0  ;;  %v7617_v39 = vmax.f32 %v7325_v33, 0.0  ;;  %v5272_v50 = vadd.f32 %v16064_v36, %v10997_v11  ;;  %v5907_v28 = vadd.f32 %v5906_v49, %v5584_v51  ;;  %v16067_v61 = vld [vmem:[#allocation127_spill] sm:$0xff]  ;;  %v16068_v36 = vld [vmem:[#allocation128_spill] sm:$0xff]  ;;  %v16072_v49 = vld [vmem:[#allocation130_spill] sm:$0xff] }
 0x77b   :  { %8967 = vmatmul.msk.f32.gmra.mxu0 %vm293_vm1, %v10234_v13  ;;  %9096 = vmatmul.msk.f32.gmra.mxu1 %vm293_vm1, %v10234_v13  ;;  %v5587_v13 = vmax.f32 %v4871_v8, 0.0  ;;  %v10490_v8 = vunpack.c.l.bf16 %v14993_v29  ;;  %v5281_v15 = vadd.f32 %v16072_v49, %v10997_v11  ;;  %v4889_v49 = vadd.f32 %v14353_v24, %v10995_v10 }
 0x77c   :  { %v7781_v14 = vadd.f32 %v7780_v19, %v7616_v3  ;;  %v7914_v6 = vadd.f32 %v7913_v54, %v7617_v39  ;;  %9352 = vmatmul.msk.f32.gmra.mxu2 %vm293_vm1, %v10487_v1  ;;  %9481 = vmatmul.msk.f32.gmra.mxu3 %vm293_vm1, %v10487_v1  ;;  %v4877_v19 = vadd.f32 %v16067_v61, %v10995_v10  ;;  %v5588_v33 = vmax.f32 %v5272_v50, 0.0  ;;  %v16071_v3 = vld [vmem:[#allocation129_spill] sm:$0xff] }
 0x77d   :  { %v5775_v54 = vadd.f32 %v5774_v4, %v5585_v2  ;;  %v5278_v1 = vadd.f32 %v16068_v36, %v10997_v11  ;;  %v5908_v2 = vadd.f32 %v5907_v28, %v5586_v46  ;;  %v5590_v50 = vmax.f32 %v5275_v25, 0.0 }
 0x77e   :  { %v4880_v39 = vadd.f32 %v16071_v3, %v10995_v10  ;;  %v5591_v63 = vmax.f32 %v4877_v19, 0.0 }
 0x77f   :  { %v6926_v17 = vpop.f32.mrf.mxu2  ;;  %v7327_v12 = vpop.f32.mrf.mxu3  ;;  %v5776_v55 = vadd.f32 %v5775_v54, %v5587_v13  ;;  %v5909_v61 = vadd.f32 %v5908_v2, %v5588_v33  ;;  %v5592_v36 = vmax.f32 %v5278_v1, 0.0  ;;  %v15022_v13 = vld [vmem:[%s15524_s0 + $0x5c0] sm:$0xff]   ;;  %v5594_v33 = vmax.f32 %v5281_v15, 0.0  ;;  %v16075_v1 = vld [vmem:[#allocation133_spill] sm:$0xff] }
 0x780   :  { %v6927_v20 = vadd.f32 %v6926_v17, %v10995_v10  ;;  %v7328_v0 = vadd.f32 %v7327_v12, %v10997_v11  ;;  %v15002_v60 = vpop.f32.mrf.mxu0  ;;  %v15004_v51 = vpop.f32.mrf.mxu1  ;;  %v16073_v17 = vld [vmem:[#allocation131_spill] sm:$0xff]  ;;  %v5593_v54 = vmax.f32 %v4880_v39, 0.0  ;;  %v10238_v3 = vunpack.c.l.bf16 %v15022_v13 }
 0x781   :  { %16069 = vst [vmem:[#allocation11_spill] sm:$0xff] %v15002_v60  ;;  %v4883_v12 = vadd.f32 %v16073_v17, %v10995_v10  ;;  %v5777_v46 = vadd.f32 %v5776_v55, %v5589_v57  ;;  %v5910_v19 = vadd.f32 %v5909_v61, %v5590_v50 }
 0x782   :  { %16070 = vst [vmem:[#allocation12_spill] sm:$0xff] %v15004_v51  ;;  %v7618_v4 = vmax.f32 %v6927_v20, 0.0  ;;  %v7619_v56 = vmax.f32 %v7328_v0, 0.0  ;;  %v16074_v51 = vld [vmem:[#allocation132_spill] sm:$0xff]  ;;  %v4886_v20 = vadd.f32 %v16075_v1, %v10995_v10  ;;  %v5599_v1 = vmax.f32 %v4889_v49, 0.0 }
 0x783   :  { %v5284_v60 = vadd.f32 %v16074_v51, %v10997_v11  ;;  %8968 = vmatmul.msk.f32.gmra.mxu0 %vm293_vm1, %v10235_v47  ;;  %9097 = vmatmul.msk.f32.gmra.mxu1 %vm293_vm1, %v10235_v47  ;;  %v5778_v0 = vadd.f32 %v5777_v46, %v5591_v63  ;;  %v16076_v47 = vld [vmem:[#allocation134_spill] sm:$0xff]  ;;  %v5595_v57 = vmax.f32 %v4883_v12, 0.0  ;;  %v10491_v63 = vunpack.c.h.bf16 %v14993_v29 }
 0x784   :  { %v7782_v25 = vadd.f32 %v7781_v14, %v7618_v4  ;;  %v7915_v28 = vadd.f32 %v7914_v6, %v7619_v56  ;;  %9353 = vmatmul.msk.f32.gmra.mxu2 %vm293_vm1, %v10490_v8  ;;  %9482 = vmatmul.msk.f32.gmra.mxu3 %vm293_vm1, %v10490_v8  ;;  %v5287_v14 = vadd.f32 %v16076_v47, %v10997_v11 }
 0x785   :  { %v5911_v6 = vadd.f32 %v5910_v19, %v5592_v36  ;;  %v5596_v51 = vmax.f32 %v5284_v60, 0.0  ;;  %v5779_v4 = vadd.f32 %v5778_v0, %v5593_v54  ;;  %v5597_v60 = vmax.f32 %v4886_v20, 0.0 }
 0x786   :  { %v5598_v61 = vmax.f32 %v5287_v14, 0.0  ;;  %v5290_v36 = vadd.f32 %v14355_v37, %v10997_v11  ;;  %v4892_v46 = vadd.f32 %v14380_v48, %v10995_v10  ;;  %v16077_v37 = vld [vmem:[#allocation135_spill] sm:$0xff]  ;;  %v4895_v20 = vadd.f32 %v14411_v27, %v10995_v10 }
 0x787   :  { %v6929_v2 = vpop.f32.mrf.mxu2  ;;  %v7330_v8 = vpop.f32.mrf.mxu3  ;;  %v5912_v56 = vadd.f32 %v5911_v6, %v5594_v33  ;;  %v5780_v24 = vadd.f32 %v5779_v4, %v5595_v57  ;;  %v5293_v33 = vadd.f32 %v16077_v37, %v10997_v11  ;;  %v15053_v48 = vld [vmem:[%s15524_s0 + $0x7c0] sm:$0xff]   ;;  %v4898_v6 = vadd.f32 %v14446_v23, %v10995_v10 }
 0x788   :  { %v6930_v50 = vadd.f32 %v6929_v2, %v10995_v10  ;;  %v7331_v39 = vadd.f32 %v7330_v8, %v10997_v11  ;;  %v15033_v15 = vpop.f32.mrf.mxu0  ;;  %v15035_v55 = vpop.f32.mrf.mxu1  ;;  %v5600_v14 = vmax.f32 %v5290_v36, 0.0  ;;  %v10239_v2 = vunpack.c.h.bf16 %v15022_v13 }
 0x789   :  { %v5913_v19 = vadd.f32 %v5912_v56, %v5596_v51  ;;  %v5781_v0 = vadd.f32 %v5780_v24, %v5597_v60  ;;  %v5299_v23 = vadd.f32 %v14448_v52, %v10997_v11  ;;  %v4901_v4 = vadd.f32 %v14475_v44, %v10995_v10  ;;  %v15082_v44 = vld [vmem:[%s15524_s0 + $0x5c8] sm:$0xff]  }
 0x78a   :  { %v7620_v17 = vmax.f32 %v6930_v50, 0.0  ;;  %v7621_v12 = vmax.f32 %v7331_v39, 0.0  ;;  %v10494_v39 = vunpack.c.l.bf16 %v15053_v48  ;;  %v4904_v24 = vadd.f32 %v14506_v53, %v10995_v10 }
 0x78b   :  { %8969 = vmatmul.msk.f32.gmra.mxu0 %vm293_vm1, %v10238_v3  ;;  %9098 = vmatmul.msk.f32.gmra.mxu1 %vm293_vm1, %v10238_v3  ;;  %v5914_v47 = vadd.f32 %v5913_v19, %v5598_v61  ;;  %v5782_v27 = vadd.f32 %v5781_v0, %v5599_v1  ;;  %v5606_v1 = vmax.f32 %v5299_v23, 0.0  ;;  %v5607_v37 = vmax.f32 %v4901_v4, 0.0 }
 0x78c   :  { %v7783_v29 = vadd.f32 %v7782_v25, %v7620_v17  ;;  %v7916_v54 = vadd.f32 %v7915_v28, %v7621_v12  ;;  %9354 = vmatmul.msk.f32.gmra.mxu2 %vm293_vm1, %v10491_v63  ;;  %9483 = vmatmul.msk.f32.gmra.mxu3 %vm293_vm1, %v10491_v63  ;;  %v5601_v25 = vmax.f32 %v4892_v46, 0.0  ;;  %v5296_v28 = vadd.f32 %v14413_v43, %v10997_v11 }
 0x78d   :  { %v5602_v63 = vmax.f32 %v5293_v33, 0.0  ;;  %v5603_v43 = vmax.f32 %v4895_v20, 0.0  ;;  %v5915_v13 = vadd.f32 %v5914_v47, %v5600_v14  ;;  %v5605_v17 = vmax.f32 %v4898_v6, 0.0 }
 0x78e   :  { %v5783_v61 = vadd.f32 %v5782_v27, %v5601_v25  ;;  %v5604_v36 = vmax.f32 %v5296_v28, 0.0  ;;  %v5302_v12 = vadd.f32 %v14477_v26, %v10997_v11  ;;  %v5305_v33 = vadd.f32 %v14508_v21, %v10997_v11 }
 0x78f   :  { %v6932_v57 = vpop.f32.mrf.mxu2  ;;  %v7333_v51 = vpop.f32.mrf.mxu3  ;;  %v5916_v19 = vadd.f32 %v5915_v13, %v5602_v63  ;;  %v4907_v53 = vadd.f32 %v14537_v9, %v10995_v10  ;;  %v10242_v14 = vunpack.c.l.bf16 %v15082_v44  ;;  %v5609_v25 = vmax.f32 %v4904_v24, 0.0 }
 0x790   :  { %v6933_v8 = vadd.f32 %v6932_v57, %v10995_v10  ;;  %v7334_v3 = vadd.f32 %v7333_v51, %v10997_v11  ;;  %v15062_v49 = vpop.f32.mrf.mxu0  ;;  %v15064_v50 = vpop.f32.mrf.mxu1  ;;  %v5784_v26 = vadd.f32 %v5783_v61, %v5603_v43  ;;  %v5608_v20 = vmax.f32 %v5302_v12, 0.0 }
 0x791   :  { %v10495_v21 = vunpack.c.h.bf16 %v15053_v48  ;;  %v5308_v27 = vadd.f32 %v14539_v41, %v10997_v11  ;;  %v5311_v4 = vadd.f32 %v14570_v62, %v10997_v11  ;;  %v4913_v13 = vadd.f32 %v14597_v58, %v10995_v10  ;;  %v15113_v62 = vld [vmem:[%s15524_s0 + $0x7c8] sm:$0xff]  }
 0x792   :  { %v7622_v56 = vmax.f32 %v6933_v8, 0.0  ;;  %v7623_v60 = vmax.f32 %v7334_v3, 0.0  ;;  %v4910_v8 = vadd.f32 %v14568_v16, %v10995_v10  ;;  %v5610_v3 = vmax.f32 %v5305_v33, 0.0 }
 0x793   :  { %8970 = vmatmul.msk.f32.gmra.mxu0 %vm293_vm1, %v10239_v2  ;;  %9099 = vmatmul.msk.f32.gmra.mxu1 %vm293_vm1, %v10239_v2  ;;  %v5612_v16 = vmax.f32 %v5308_v27, 0.0  ;;  %v5314_v61 = vadd.f32 %v14599_v45, %v10997_v11  ;;  %v5614_v12 = vmax.f32 %v5311_v4, 0.0  ;;  %v5615_v24 = vmax.f32 %v4913_v13, 0.0 }
 0x794   :  { %v7784_v52 = vadd.f32 %v7783_v29, %v7622_v56  ;;  %v7917_v46 = vadd.f32 %v7916_v54, %v7623_v60  ;;  %9355 = vmatmul.msk.f32.gmra.mxu2 %vm293_vm1, %v10494_v39  ;;  %9484 = vmatmul.msk.f32.gmra.mxu3 %vm293_vm1, %v10494_v39  ;;  %v5917_v29 = vadd.f32 %v5916_v19, %v5604_v36  ;;  %v5611_v39 = vmax.f32 %v4907_v53, 0.0 }
 0x795   :  { %v5785_v54 = vadd.f32 %v5784_v26, %v5605_v17  ;;  %v5613_v60 = vmax.f32 %v4910_v8, 0.0  ;;  %v4916_v17 = vadd.f32 %v14626_v35, %v10995_v10  ;;  %v10243_v26 = vunpack.c.h.bf16 %v15082_v44 }
 0x796   :  { %v5918_v2 = vadd.f32 %v5917_v29, %v5606_v1  ;;  %v10498_v53 = vunpack.c.l.bf16 %v15113_v62  ;;  %v5320_v44 = vadd.f32 %v14659_v32, %v10997_v11  ;;  %v15142_v32 = vld [vmem:[%s15524_s0 + $0x5d0] sm:$0xff]   ;;  %v4925_v27 = vadd.f32 %v14725_v31, %v10995_v10 }
 0x797   :  { %v6935_v0 = vpop.f32.mrf.mxu2  ;;  %v7336_v47 = vpop.f32.mrf.mxu3  ;;  %v5786_v9 = vadd.f32 %v5785_v54, %v5607_v37  ;;  %v5616_v54 = vmax.f32 %v5314_v61, 0.0  ;;  %v10246_v13 = vunpack.c.l.bf16 %v15142_v32 }
 0x798   :  { %v6936_v28 = vadd.f32 %v6935_v0, %v10995_v10  ;;  %v7337_v6 = vadd.f32 %v7336_v47, %v10997_v11  ;;  %v15091_v57 = vpop.f32.mrf.mxu0  ;;  %v15093_v51 = vpop.f32.mrf.mxu1  ;;  %v5919_v23 = vadd.f32 %v5918_v2, %v5608_v20  ;;  %v5617_v20 = vmax.f32 %v4916_v17, 0.0 }
 0x799   :  { %v5787_v48 = vadd.f32 %v5786_v9, %v5609_v25  ;;  %v5623_v61 = vmax.f32 %v4925_v27, 0.0 }
 0x79a   :  { %v7624_v63 = vmax.f32 %v6936_v28, 0.0  ;;  %v7625_v43 = vmax.f32 %v7337_v6, 0.0  ;;  %v5920_v58 = vadd.f32 %v5919_v23, %v5610_v3  ;;  %v4922_v6 = vadd.f32 %v14694_v22, %v10995_v10 }
 0x79b   :  { %8971 = vmatmul.msk.f32.gmra.mxu0 %vm293_vm1, %v10242_v14  ;;  %9100 = vmatmul.msk.f32.gmra.mxu1 %vm293_vm1, %v10242_v14  ;;  %v5788_v36 = vadd.f32 %v5787_v48, %v5611_v39  ;;  %v5620_v3 = vmax.f32 %v5320_v44, 0.0 }
 0x79c   :  { %v7785_v41 = vadd.f32 %v7784_v52, %v7624_v63  ;;  %v7918_v56 = vadd.f32 %v7917_v46, %v7625_v43  ;;  %9356 = vmatmul.msk.f32.gmra.mxu2 %vm293_vm1, %v10495_v21  ;;  %9485 = vmatmul.msk.f32.gmra.mxu3 %vm293_vm1, %v10495_v21  ;;  %v5317_v52 = vadd.f32 %v14628_v59, %v10997_v11  ;;  %v5621_v63 = vmax.f32 %v4922_v6, 0.0 }
 0x79d   :  { %v5921_v35 = vadd.f32 %v5920_v58, %v5612_v16  ;;  %v5789_v29 = vadd.f32 %v5788_v36, %v5613_v60  ;;  %v4919_v59 = vadd.f32 %v14657_v7, %v10995_v10  ;;  %v5323_v21 = vadd.f32 %v14696_v42, %v10997_v11 }
 0x79e   :  { %v5618_v28 = vmax.f32 %v5317_v52, 0.0  ;;  %v5326_v42 = vadd.f32 %v14727_v5, %v10997_v11  ;;  %v4928_v43 = vadd.f32 %v14754_v18, %v10995_v10  ;;  %v10499_v5 = vunpack.c.h.bf16 %v15113_v62 }
 0x79f   :  { %v6938_v46 = vpop.f32.mrf.mxu2  ;;  %v7339_v19 = vpop.f32.mrf.mxu3  ;;  %v5922_v14 = vadd.f32 %v5921_v35, %v5614_v12  ;;  %v5790_v25 = vadd.f32 %v5789_v29, %v5615_v24  ;;  %v5619_v22 = vmax.f32 %v4919_v59, 0.0  ;;  %v5622_v48 = vmax.f32 %v5323_v21, 0.0  ;;  %v15178_v29 = vld [vmem:[%s15524_s0 + $0x7d0] sm:$0xff]  }
 0x7a0   :  { %v6939_v45 = vadd.f32 %v6938_v46, %v10995_v10  ;;  %v7340_v1 = vadd.f32 %v7339_v19, %v10997_v11  ;;  %v15122_v37 = vpop.f32.mrf.mxu0  ;;  %v15124_v33 = vpop.f32.mrf.mxu1  ;;  %v5329_v18 = vadd.f32 %v14756_v30, %v10997_v11  ;;  %v4931_v58 = vadd.f32 %v14783_v38, %v10995_v10  ;;  %v7971_v38 = vld [vmem:[%s15527_s3 + $0x18] sm:$0xff] }
 0x7a1   :  { %v5923_v9 = vadd.f32 %v5922_v14, %v5616_v54  ;;  %v5791_v8 = vadd.f32 %v5790_v25, %v5617_v20  ;;  %v5624_v17 = vmax.f32 %v5326_v42, 0.0  ;;  %v5625_v46 = vmax.f32 %v4928_v43, 0.0  ;;  %8022 = vmatpush.msra.mxu0 %v7971_v38  ;;  %v7987_v54 = vld [vmem:[%s15527_s3 + $0x98] sm:$0xff]  ;;  %v16079_v20 = vld [vmem:[#allocation137_spill] sm:$0xff] }
 0x7a2   :  { %v7626_v0 = vmax.f32 %v6939_v45, 0.0  ;;  %v7627_v47 = vmax.f32 %v7340_v1, 0.0  ;;  %v5332_v19 = vadd.f32 %v14785_v40, %v10997_v11  ;;  %v4934_v62 = vadd.f32 %v14814_v34, %v10995_v10  ;;  %v16078_v34 = vld [vmem:[#allocation136_spill] sm:$0xff]  ;;  %8042 = vmatpush.msra.mxu1 %v7987_v54  ;;  %v16080_v21 = vld [vmem:[#allocation138_spill] sm:$0xff]  ;;  %v16081_v43 = vld [vmem:[#allocation139_spill] sm:$0xff] }
 0x7a3   :  { %8972 = vmatmul.msk.f32.gmra.mxu0 %vm293_vm1, %v10243_v26  ;;  %9101 = vmatmul.msk.f32.gmra.mxu1 %vm293_vm1, %v10243_v26  ;;  %v5924_v39 = vadd.f32 %v5923_v9, %v5618_v28  ;;  %v5792_v60 = vadd.f32 %v5791_v8, %v5619_v22  ;;  %v5626_v40 = vmax.f32 %v5329_v18, 0.0  ;;  %v5335_v35 = vadd.f32 %v16078_v34, %v10997_v11  ;;  %v15206_v18 = vld [vmem:[%s15524_s0 + $0x5d8] sm:$0xff]  }
 0x7a4   :  { %v7786_v7 = vadd.f32 %v7785_v41, %v7626_v0  ;;  %v7919_v2 = vadd.f32 %v7918_v56, %v7627_v47  ;;  %9357 = vmatmul.msk.f32.gmra.mxu2 %vm293_vm1, %v10498_v53  ;;  %9486 = vmatmul.msk.f32.gmra.mxu3 %vm293_vm1, %v10498_v53  ;;  %v5627_v53 = vmax.f32 %v4931_v58, 0.0  ;;  %v4937_v44 = vadd.f32 %v16079_v20, %v10995_v10  ;;  %v16083_v58 = vld [vmem:[#allocation141_spill] sm:$0xff] }
 0x7a5   :  { %v5925_v36 = vadd.f32 %v5924_v39, %v5620_v3  ;;  %v5793_v52 = vadd.f32 %v5792_v60, %v5621_v63  ;;  %v5628_v47 = vmax.f32 %v5332_v19, 0.0  ;;  %v5629_v14 = vmax.f32 %v4934_v62, 0.0  ;;  %v16085_v62 = vld [vmem:[#allocation7_spill] sm:$0xff] }
 0x7a6   :  { %v10247_v6 = vunpack.c.h.bf16 %v15142_v32  ;;  %v10502_v8 = vunpack.c.l.bf16 %v15178_v29  ;;  %v5630_v39 = vmax.f32 %v5335_v35, 0.0  ;;  %v5631_v63 = vmax.f32 %v4937_v44, 0.0 }
 0x7a7   :  { %v6941_v23 = vpop.f32.mrf.mxu2  ;;  %v7342_v4 = vpop.f32.mrf.mxu3  ;;  %v5926_v30 = vadd.f32 %v5925_v36, %v5622_v48  ;;  %v5794_v1 = vadd.f32 %v5793_v52, %v5623_v61  ;;  %v4940_v32 = vadd.f32 %v16081_v43, %v10995_v10  ;;  %v16082_v48 = vld [vmem:[#allocation140_spill] sm:$0xff]  ;;  %v4943_v36 = vadd.f32 %v16083_v58, %v10995_v10 }
 0x7a8   :  { %v6942_v41 = vadd.f32 %v6941_v23, %v10995_v10  ;;  %v7343_v56 = vadd.f32 %v7342_v4, %v10997_v11  ;;  %v15153_v31 = vpop.f32.mrf.mxu0  ;;  %v15155_v16 = vpop.f32.mrf.mxu1  ;;  %v10503_v20 = vunpack.c.h.bf16 %v15178_v29  ;;  %v16090_v29 = vld [vmem:[#allocation12_spill] sm:$0xff] }
 0x7a9   :  { %v5927_v59 = vadd.f32 %v5926_v30, %v5624_v17  ;;  %v5795_v0 = vadd.f32 %v5794_v1, %v5625_v46  ;;  %v16084_v17 = vld [vmem:[#allocation6_spill] sm:$0xff]  ;;  %v5633_v46 = vmax.f32 %v4940_v32, 0.0  ;;  %v4946_v30 = vadd.f32 %v16085_v62, %v10995_v10 }
 0x7aa   :  { %v7628_v12 = vmax.f32 %v6942_v41, 0.0  ;;  %v7629_v24 = vmax.f32 %v7343_v56, 0.0  ;;  %v5341_v41 = vadd.f32 %v16082_v48, %v10997_v11  ;;  %v5635_v44 = vmax.f32 %v4943_v36, 0.0  ;;  %v15239_v48 = vld [vmem:[%s15524_s0 + $0x7d8] sm:$0xff]  }
 0x7ab   :  { %8973 = vmatmul.msk.f32.gmra.mxu0 %vm293_vm1, %v10246_v13  ;;  %9102 = vmatmul.msk.f32.gmra.mxu1 %vm293_vm1, %v10246_v13  ;;  %v5928_v3 = vadd.f32 %v5927_v59, %v5626_v40  ;;  %v5796_v42 = vadd.f32 %v5795_v0, %v5627_v53  ;;  %v10250_v40 = vunpack.c.l.bf16 %v15206_v18 }
 0x7ac   :  { %v7787_v26 = vadd.f32 %v7786_v7, %v7628_v12  ;;  %v7920_v45 = vadd.f32 %v7919_v2, %v7629_v24  ;;  %9358 = vmatmul.msk.f32.gmra.mxu2 %vm293_vm1, %v10499_v5  ;;  %9487 = vmatmul.msk.f32.gmra.mxu3 %vm293_vm1, %v10499_v5  ;;  %v5338_v7 = vadd.f32 %v16080_v21, %v10997_v11  ;;  %v5634_v19 = vmax.f32 %v5341_v41, 0.0 }
 0x7ad   :  { %v5929_v13 = vadd.f32 %v5928_v3, %v5628_v47  ;;  %v5797_v56 = vadd.f32 %v5796_v42, %v5629_v14  ;;  %v5344_v12 = vadd.f32 %v16084_v17, %v10997_v11  ;;  %v16087_v47 = vld [vmem:[#allocation9_spill] sm:$0xff]  ;;  %v16089_v3 = vld [vmem:[#allocation11_spill] sm:$0xff]  ;;  %v4955_v41 = vadd.f32 %v15033_v15, %v10995_v10 }
 0x7ae   :  { %v5632_v5 = vmax.f32 %v5338_v7, 0.0  ;;  %v4949_v14 = vadd.f32 %v16087_v47, %v10995_v10  ;;  %v4952_v42 = vadd.f32 %v16089_v3, %v10995_v10  ;;  %v10251_v17 = vunpack.c.h.bf16 %v15206_v18 }
 0x7af   :  { %v6944_v25 = vpop.f32.mrf.mxu2  ;;  %v7345_v28 = vpop.f32.mrf.mxu3  ;;  %v5930_v24 = vadd.f32 %v5929_v13, %v5630_v39  ;;  %v5798_v52 = vadd.f32 %v5797_v56, %v5631_v63  ;;  %v5636_v0 = vmax.f32 %v5344_v12, 0.0  ;;  %v5353_v39 = vadd.f32 %v16090_v29, %v10997_v11 }
 0x7b0   :  { %v6945_v2 = vadd.f32 %v6944_v25, %v10995_v10  ;;  %v7346_v9 = vadd.f32 %v7345_v28, %v10997_v11  ;;  %v15190_v22 = vpop.f32.mrf.mxu0  ;;  %v15192_v27 = vpop.f32.mrf.mxu1  ;;  %v16088_v25 = vld [vmem:[#allocation10_spill] sm:$0xff]  ;;  %v5356_v56 = vadd.f32 %v15035_v55, %v10997_v11  ;;  %v10506_v15 = vunpack.c.l.bf16 %v15239_v48 }
 0x7b1   :  { %v5931_v53 = vadd.f32 %v5930_v24, %v5632_v5  ;;  %v5350_v28 = vadd.f32 %v16088_v25, %v10997_v11  ;;  %v5642_v12 = vmax.f32 %v5353_v39, 0.0  ;;  %v5643_v18 = vmax.f32 %v4955_v41, 0.0 }
 0x7b2   :  { %v7630_v23 = vmax.f32 %v6945_v2, 0.0  ;;  %v7631_v4 = vmax.f32 %v7346_v9, 0.0  ;;  %v5637_v9 = vmax.f32 %v4946_v30, 0.0  ;;  %v4958_v30 = vadd.f32 %v15062_v49, %v10995_v10 }
 0x7b3   :  { %8974 = vmatmul.msk.f32.gmra.mxu0 %vm293_vm1, %v10247_v6  ;;  %9103 = vmatmul.msk.f32.gmra.mxu1 %vm293_vm1, %v10247_v6  ;;  %v5799_v6 = vadd.f32 %v5798_v52, %v5633_v46  ;;  %v5932_v2 = vadd.f32 %v5931_v53, %v5634_v19  ;;  %v5640_v13 = vmax.f32 %v5350_v28, 0.0  ;;  %v4961_v53 = vadd.f32 %v15091_v57, %v10995_v10 }
 0x7b4   :  { %v7788_v60 = vadd.f32 %v7787_v26, %v7630_v23  ;;  %v7921_v61 = vadd.f32 %v7920_v45, %v7631_v4  ;;  %9359 = vmatmul.msk.f32.gmra.mxu2 %vm293_vm1, %v10502_v8  ;;  %9488 = vmatmul.msk.f32.gmra.mxu3 %vm293_vm1, %v10502_v8  ;;  %v16086_v26 = vld [vmem:[#allocation8_spill] sm:$0xff]  ;;  %v5639_v4 = vmax.f32 %v4949_v14, 0.0  ;;  %v5645_v57 = vmax.f32 %v4958_v30, 0.0 }
 0x7b5   :  { %v5347_v45 = vadd.f32 %v16086_v26, %v10997_v11  ;;  %v5800_v32 = vadd.f32 %v5799_v6, %v5635_v44  ;;  %v5933_v23 = vadd.f32 %v5932_v2, %v5636_v0  ;;  %v5359_v26 = vadd.f32 %v15064_v50, %v10997_v11  ;;  %v15268_v50 = vld [vmem:[%s15524_s0 + $0x5e0] sm:$0xff]  }
 0x7b6   :  { %v5365_v0 = vadd.f32 %v15124_v33, %v10997_v11  ;;  %v5647_v25 = vmax.f32 %v4961_v53, 0.0  ;;  %v4967_v6 = vadd.f32 %v15153_v31, %v10995_v10  ;;  %v10254_v2 = vunpack.c.l.bf16 %v15268_v50 }
 0x7b7   :  { %v6947_v38 = vpop.f32.mrf.mxu2  ;;  %v7348_v1 = vpop.f32.mrf.mxu3  ;;  %v5638_v8 = vmax.f32 %v5347_v45, 0.0  ;;  %v5801_v5 = vadd.f32 %v5800_v32, %v5637_v9  ;;  %v5644_v45 = vmax.f32 %v5356_v56, 0.0  ;;  %v5646_v44 = vmax.f32 %v5359_v26, 0.0 }
 0x7b8   :  { %v6948_v34 = vadd.f32 %v6947_v38, %v10995_v10  ;;  %v7349_v35 = vadd.f32 %v7348_v1, %v10997_v11  ;;  %v15219_v54 = vpop.f32.mrf.mxu0  ;;  %v15221_v59 = vpop.f32.mrf.mxu1  ;;  %v5368_v9 = vadd.f32 %v15155_v16, %v10997_v11  ;;  %v4970_v31 = vadd.f32 %v15190_v22, %v10995_v10 }
 0x7b9   :  { %v5802_v62 = vadd.f32 %v5801_v5, %v5639_v4  ;;  %v5371_v32 = vadd.f32 %v15192_v27, %v10997_v11  ;;  %v4973_v27 = vadd.f32 %v15219_v54, %v10995_v10 }
 0x7ba   :  { %v7632_v21 = vmax.f32 %v6948_v34, 0.0  ;;  %v7633_v7 = vmax.f32 %v7349_v35, 0.0  ;;  %v5362_v34 = vadd.f32 %v15093_v51, %v10997_v11  ;;  %v4964_v51 = vadd.f32 %v15122_v37, %v10995_v10 }
 0x7bb   :  { %8975 = vmatmul.msk.f32.gmra.mxu0 %vm293_vm1, %v10250_v40  ;;  %9104 = vmatmul.msk.f32.gmra.mxu1 %vm293_vm1, %v10250_v40 }
 0x7bc   :  { %v7789_v63 = vadd.f32 %v7788_v60, %v7632_v21  ;;  %v7922_v43 = vadd.f32 %v7921_v61, %v7633_v7  ;;  %9360 = vmatmul.msk.f32.gmra.mxu2 %vm293_vm1, %v10503_v20  ;;  %9489 = vmatmul.msk.f32.gmra.mxu3 %vm293_vm1, %v10503_v20  ;;  %v5934_v60 = vadd.f32 %v5933_v23, %v5638_v8  ;;  %v5641_v61 = vmax.f32 %v4952_v42, 0.0 }
 0x7bd   :  { %v5648_v28 = vmax.f32 %v5362_v34, 0.0  ;;  %v10507_v42 = vunpack.c.h.bf16 %v15239_v48  ;;  %v5652_v48 = vmax.f32 %v5368_v9, 0.0 }
 0x7be   :  { %v5935_v55 = vadd.f32 %v5934_v60, %v5640_v13  ;;  %v5803_v40 = vadd.f32 %v5802_v62, %v5641_v61  ;;  %v5651_v13 = vmax.f32 %v4967_v6, 0.0  ;;  %v5374_v60 = vadd.f32 %v15221_v59, %v10997_v11  ;;  %v15297_v61 = vld [vmem:[%s15524_s0 + $0x7e0] sm:$0xff]  }
 0x7bf   :  { %v6950_v58 = vpop.f32.mrf.mxu2  ;;  %v7351_v36 = vpop.f32.mrf.mxu3  ;;  %v10255_v62 = vunpack.c.h.bf16 %v15268_v50 }
 0x7c0   :  { %v6951_v24 = vadd.f32 %v6950_v58, %v10995_v10  ;;  %v7352_v52 = vadd.f32 %v7351_v36, %v10997_v11  ;;  %v15248_v46 = vpop.f32.mrf.mxu0  ;;  %v15250_v19 = vpop.f32.mrf.mxu1  ;;  %v5936_v35 = vadd.f32 %v5935_v55, %v5642_v12  ;;  %v5804_v47 = vadd.f32 %v5803_v40, %v5643_v18 }
 0x7c1   :  { %v5653_v36 = vmax.f32 %v4970_v31, 0.0 }
 0x7c2   :  { %v7634_v38 = vmax.f32 %v6951_v24, 0.0  ;;  %v7635_v1 = vmax.f32 %v7352_v52, 0.0  ;;  %v5937_v14 = vadd.f32 %v5936_v35, %v5644_v45  ;;  %v5805_v29 = vadd.f32 %v5804_v47, %v5645_v57 }
 0x7c3   :  { %8976 = vmatmul.msk.f32.gmra.mxu0 %vm293_vm1, %v10251_v17  ;;  %9105 = vmatmul.msk.f32.gmra.mxu1 %vm293_vm1, %v10251_v17  ;;  %v5654_v17 = vmax.f32 %v5371_v32, 0.0  ;;  %v4976_v24 = vadd.f32 %v15248_v46, %v10995_v10  ;;  %v5377_v52 = vadd.f32 %v15250_v19, %v10997_v11  ;;  %v10510_v45 = vunpack.c.l.bf16 %v15297_v61 }
 0x7c4   :  { %v7790_v49 = vadd.f32 %v7789_v63, %v7634_v38  ;;  %v7923_v20 = vadd.f32 %v7922_v43, %v7635_v1  ;;  %9361 = vmatmul.msk.f32.gmra.mxu2 %vm293_vm1, %v10506_v15  ;;  %9490 = vmatmul.msk.f32.gmra.mxu3 %vm293_vm1, %v10506_v15  ;;  %v5938_v39 = vadd.f32 %v5937_v14, %v5646_v44  ;;  %v5649_v63 = vmax.f32 %v4964_v51, 0.0  ;;  %v10712_v44 = vld [vmem:[%s15524_s0 + $0x5e8] sm:$0xff]  }
 0x7c5   :  { %v5650_v43 = vmax.f32 %v5365_v0, 0.0  ;;  %v5806_v4 = vadd.f32 %v5805_v29, %v5647_v25  ;;  %v5655_v38 = vmax.f32 %v4973_v27, 0.0  ;;  %v5656_v1 = vmax.f32 %v5374_v60, 0.0  ;;  %v10776_v60 = vld [vmem:[%s15524_s0 + $0x7e8] sm:$0xff]  }
 0x7c6   :  { %v5939_v41 = vadd.f32 %v5938_v39, %v5648_v28  ;;  %v10258_v6 = vunpack.c.l.bf16 %v10712_v44  ;;  %v10511_v39 = vunpack.c.h.bf16 %v15297_v61 }
 0x7c7   :  { %v6953_v21 = vpop.f32.mrf.mxu2  ;;  %v7354_v7 = vpop.f32.mrf.mxu3  ;;  %v5807_v22 = vadd.f32 %v5806_v4, %v5649_v63 }
 0x7c8   :  { %v6954_v8 = vadd.f32 %v6953_v21, %v10995_v10  ;;  %v7355_v37 = vadd.f32 %v7354_v7, %v10997_v11  ;;  %v4978_v3 = vpop.f32.mrf.mxu0  ;;  %v5379_v33 = vpop.f32.mrf.mxu1  ;;  %v5940_v58 = vadd.f32 %v5939_v41, %v5650_v43 }
 0x7c9   :  { %v5808_v12 = vadd.f32 %v5807_v22, %v5651_v13  ;;  %v4979_v46 = vadd.f32 %v4978_v3, %v10995_v10  ;;  %v5380_v40 = vadd.f32 %v5379_v33, %v10997_v11 }
 0x7ca   :  { %v7636_v23 = vmax.f32 %v6954_v8, 0.0  ;;  %v7637_v16 = vmax.f32 %v7355_v37, 0.0  ;;  %v5941_v59 = vadd.f32 %v5940_v58, %v5652_v48 }
 0x7cb   :  { %8977 = vmatmul.msk.f32.gmra.mxu0 %vm293_vm1, %v10254_v2  ;;  %9106 = vmatmul.msk.f32.gmra.mxu1 %vm293_vm1, %v10254_v2  ;;  %v5809_v19 = vadd.f32 %v5808_v12, %v5653_v36  ;;  %v5659_v25 = vmax.f32 %v4979_v46, 0.0  ;;  %v5660_v28 = vmax.f32 %v5380_v40, 0.0  ;;  %v10259_v36 = vunpack.c.h.bf16 %v10712_v44 }
 0x7cc   :  { %v7791_v56 = vadd.f32 %v7790_v49, %v7636_v23  ;;  %v7924_v5 = vadd.f32 %v7923_v20, %v7637_v16  ;;  %9362 = vmatmul.msk.f32.gmra.mxu2 %vm293_vm1, %v10507_v42  ;;  %9491 = vmatmul.msk.f32.gmra.mxu3 %vm293_vm1, %v10507_v42  ;;  %v5942_v53 = vadd.f32 %v5941_v59, %v5654_v17  ;;  %v5657_v49 = vmax.f32 %v4976_v24, 0.0 }
 0x7cd   :  { %v5658_v20 = vmax.f32 %v5377_v52, 0.0  ;;  %v5810_v47 = vadd.f32 %v5809_v19, %v5655_v38  ;;  %v10713_v38 = vld [vmem:[%s15524_s0 + $0x5f0] sm:$0xff]  }
 0x7ce   :  { %v5943_v14 = vadd.f32 %v5942_v53, %v5656_v1  ;;  %v10262_v53 = vunpack.c.l.bf16 %v10713_v38 }
 0x7cf   :  { %v6956_v15 = vpop.f32.mrf.mxu2  ;;  %v7357_v54 = vpop.f32.mrf.mxu3  ;;  %v5811_v21 = vadd.f32 %v5810_v47, %v5657_v49 }
 0x7d0   :  { %v6957_v55 = vadd.f32 %v6956_v15, %v10995_v10  ;;  %v7358_v30 = vadd.f32 %v7357_v54, %v10997_v11  ;;  %v4981_v26 = vpop.f32.mrf.mxu0  ;;  %v5382_v18 = vpop.f32.mrf.mxu1  ;;  %v5944_v7 = vadd.f32 %v5943_v14, %v5658_v20  ;;  %v10514_v15 = vunpack.c.l.bf16 %v10776_v60 }
 0x7d1   :  { %v4982_v50 = vadd.f32 %v4981_v26, %v10995_v10  ;;  %v5383_v57 = vadd.f32 %v5382_v18, %v10997_v11  ;;  %v5812_v63 = vadd.f32 %v5811_v21, %v5659_v25 }
 0x7d2   :  { %v7638_v34 = vmax.f32 %v6957_v55, 0.0  ;;  %v7639_v35 = vmax.f32 %v7358_v30, 0.0  ;;  %v5945_v43 = vadd.f32 %v5944_v7, %v5660_v28 }
 0x7d3   :  { %8978 = vmatmul.msk.f32.gmra.mxu0 %vm293_vm1, %v10255_v62  ;;  %9107 = vmatmul.msk.f32.gmra.mxu1 %vm293_vm1, %v10255_v62  ;;  %v5661_v2 = vmax.f32 %v4982_v50, 0.0  ;;  %v5662_v9 = vmax.f32 %v5383_v57, 0.0  ;;  %v10515_v50 = vunpack.c.h.bf16 %v10776_v60 }
 0x7d4   :  { %v7792_v51 = vadd.f32 %v7791_v56, %v7638_v34  ;;  %v7925_v0 = vadd.f32 %v7924_v5, %v7639_v35  ;;  %9363 = vmatmul.msk.f32.gmra.mxu2 %vm293_vm1, %v10510_v45  ;;  %9492 = vmatmul.msk.f32.gmra.mxu3 %vm293_vm1, %v10510_v45 }
 0x7d5   :  { %v5813_v4 = vadd.f32 %v5812_v63, %v5661_v2  ;;  %v5946_v13 = vadd.f32 %v5945_v43, %v5662_v9  ;;  %v10777_v2 = vld [vmem:[%s15524_s0 + $0x7f0] sm:$0xff]  }
 0x7d6   :  { %v7986_v9 = vld [vmem:[%s15527_s3 + $0x90] sm:$0xff]  ;;  %v10518_v63 = vunpack.c.l.bf16 %v10777_v2 }
 0x7d7   :  { %v6959_v8 = vpop.f32.mrf.mxu2  ;;  %v7360_v37 = vpop.f32.mrf.mxu3  ;;  %8043 = vmatpush.msra.mxu1 %v7986_v9 }
 0x7d8   :  { %v6960_v3 = vadd.f32 %v6959_v8, %v10995_v10  ;;  %v7361_v33 = vadd.f32 %v7360_v37, %v10997_v11  ;;  %v4984_v42 = vpop.f32.mrf.mxu0  ;;  %v5385_v29 = vpop.f32.mrf.mxu1 }
 0x7d9   :  { %v4985_v31 = vadd.f32 %v4984_v42, %v10995_v10  ;;  %v5386_v32 = vadd.f32 %v5385_v29, %v10997_v11 }
 0x7da   :  { %v7640_v23 = vmax.f32 %v6960_v3, 0.0  ;;  %v7641_v16 = vmax.f32 %v7361_v33, 0.0  ;;  %v10263_v3 = vunpack.c.h.bf16 %v10713_v38 }
 0x7db   :  { %v5663_v41 = vmax.f32 %v4985_v31, 0.0  ;;  %v5664_v48 = vmax.f32 %v5386_v32, 0.0  ;;  %8979 = vmatmul.msk.f32.gmra.mxu0 %vm293_vm1, %v10258_v6  ;;  %9108 = vmatmul.msk.f32.gmra.mxu1 %vm293_vm1, %v10258_v6  ;;  %v7970_v6 = vld [vmem:[%s15527_s3 + $0x10] sm:$0xff] }
 0x7dc   :  { %v7793_v56 = vadd.f32 %v7792_v51, %v7640_v23  ;;  %v7926_v5 = vadd.f32 %v7925_v0, %v7641_v16  ;;  %9364 = vmatmul.msk.f32.gmra.mxu2 %vm293_vm1, %v10511_v39  ;;  %9493 = vmatmul.msk.f32.gmra.mxu3 %vm293_vm1, %v10511_v39 }
 0x7dd   :  { %v5814_v22 = vadd.f32 %v5813_v4, %v5663_v41  ;;  %v5947_v27 = vadd.f32 %v5946_v13, %v5664_v48  ;;  %8023 = vmatpush.msra.mxu0 %v7970_v6  ;;  %v10714_v48 = vld [vmem:[%s15524_s0 + $0x5f8] sm:$0xff]  }
 0x7de   :  { %v10266_v60 = vunpack.c.l.bf16 %v10714_v48 }
 0x7df   :  { %v6962_v61 = vpop.f32.mrf.mxu2  ;;  %v7363_v58 = vpop.f32.mrf.mxu3 }
 0x7e0   :  { %v6963_v17 = vadd.f32 %v6962_v61, %v10995_v10  ;;  %v7364_v12 = vadd.f32 %v7363_v58, %v10997_v11  ;;  %v4987_v24 = vpop.f32.mrf.mxu0  ;;  %v5388_v52 = vpop.f32.mrf.mxu1 }
 0x7e1   :  { %v4988_v54 = vadd.f32 %v4987_v24, %v10995_v10  ;;  %v5389_v62 = vadd.f32 %v5388_v52, %v10997_v11 }
 0x7e2   :  { %v7642_v59 = vmax.f32 %v6963_v17, 0.0  ;;  %v7643_v55 = vmax.f32 %v7364_v12, 0.0  ;;  %v10519_v12 = vunpack.c.h.bf16 %v10777_v2 }
 0x7e3   :  { %v5665_v30 = vmax.f32 %v4988_v54, 0.0  ;;  %v5666_v26 = vmax.f32 %v5389_v62, 0.0  ;;  %8980 = vmatmul.msk.f32.gmra.mxu0 %vm293_vm1, %v10259_v36  ;;  %9109 = vmatmul.msk.f32.gmra.mxu1 %vm293_vm1, %v10259_v36 }
 0x7e4   :  { %v7794_v18 = vadd.f32 %v7793_v56, %v7642_v59  ;;  %v7927_v45 = vadd.f32 %v7926_v5, %v7643_v55  ;;  %9365 = vmatmul.msk.f32.gmra.mxu2 %vm293_vm1, %v10514_v15  ;;  %9494 = vmatmul.msk.f32.gmra.mxu3 %vm293_vm1, %v10514_v15 }
 0x7e5   :  { %v5815_v1 = vadd.f32 %v5814_v22, %v5665_v30  ;;  %v5948_v46 = vadd.f32 %v5947_v27, %v5666_v26 }
 0x7e7   :  { %v6965_v40 = vpop.f32.mrf.mxu2  ;;  %v7366_v19 = vpop.f32.mrf.mxu3 }
 0x7e8   :  { %v6966_v34 = vadd.f32 %v6965_v40, %v10995_v10  ;;  %v7367_v35 = vadd.f32 %v7366_v19, %v10997_v11  ;;  %v4990_v49 = vpop.f32.mrf.mxu0  ;;  %v5391_v20 = vpop.f32.mrf.mxu1 }
 0x7e9   :  { %v4991_v57 = vadd.f32 %v4990_v49, %v10995_v10  ;;  %v5392_v44 = vadd.f32 %v5391_v20, %v10997_v11 }
 0x7ea   :  { %v7644_v51 = vmax.f32 %v6966_v34, 0.0  ;;  %v7645_v0 = vmax.f32 %v7367_v35, 0.0 }
 0x7eb   :  { %v5667_v47 = vmax.f32 %v4991_v57, 0.0  ;;  %v5668_v14 = vmax.f32 %v5392_v44, 0.0  ;;  %8981 = vmatmul.msk.f32.gmra.mxu0 %vm293_vm1, %v10262_v53  ;;  %9110 = vmatmul.msk.f32.gmra.mxu1 %vm293_vm1, %v10262_v53 }
 0x7ec   :  { %v7795_v25 = vadd.f32 %v7794_v18, %v7644_v51  ;;  %v7928_v28 = vadd.f32 %v7927_v45, %v7645_v0  ;;  %9366 = vmatmul.msk.f32.gmra.mxu2 %vm293_vm1, %v10515_v50  ;;  %9495 = vmatmul.msk.f32.gmra.mxu3 %vm293_vm1, %v10515_v50  ;;  %v10778_v45 = vld [vmem:[%s15524_s0 + $0x7f8] sm:$0xff]  }
 0x7ed   :  { %v5816_v21 = vadd.f32 %v5815_v1, %v5667_v47  ;;  %v5949_v7 = vadd.f32 %v5948_v46, %v5668_v14  ;;  %v10267_v46 = vunpack.c.h.bf16 %v10714_v48  ;;  %v10522_v35 = vunpack.c.l.bf16 %v10778_v45 }
 0x7ef   :  { %v6968_v8 = vpop.f32.mrf.mxu2  ;;  %v7369_v37 = vpop.f32.mrf.mxu3 }
 0x7f0   :  { %v6969_v33 = vadd.f32 %v6968_v8, %v10995_v10  ;;  %v7370_v42 = vadd.f32 %v7369_v37, %v10997_v11  ;;  %v4993_v29 = vpop.f32.mrf.mxu0  ;;  %v5394_v39 = vpop.f32.mrf.mxu1  ;;  %v10523_v8 = vunpack.c.h.bf16 %v10778_v45 }
 0x7f1   :  { %v4994_v43 = vadd.f32 %v4993_v29, %v10995_v10  ;;  %v5395_v31 = vadd.f32 %v5394_v39, %v10997_v11 }
 0x7f2   :  { %v7646_v32 = vmax.f32 %v6969_v33, 0.0  ;;  %v7647_v23 = vmax.f32 %v7370_v42, 0.0 }
 0x7f3   :  { %v5669_v16 = vmax.f32 %v4994_v43, 0.0  ;;  %v5670_v4 = vmax.f32 %v5395_v31, 0.0  ;;  %8982 = vmatmul.msk.f32.gmra.mxu0 %vm293_vm1, %v10263_v3  ;;  %9111 = vmatmul.msk.f32.gmra.mxu1 %vm293_vm1, %v10263_v3 }
 0x7f4   :  { %v7796_v13 = vadd.f32 %v7795_v25, %v7646_v32  ;;  %v7929_v41 = vadd.f32 %v7928_v28, %v7647_v23  ;;  %9367 = vmatmul.msk.f32.gmra.mxu2 %vm293_vm1, %v10518_v63  ;;  %9496 = vmatmul.msk.f32.gmra.mxu3 %vm293_vm1, %v10518_v63 }
 0x7f5   :  { %v5817_v56 = vadd.f32 %v5816_v21, %v5669_v16  ;;  %v5950_v5 = vadd.f32 %v5949_v7, %v5670_v4 }
 0x7f7   :  { %v6971_v22 = vpop.f32.mrf.mxu2  ;;  %v7372_v27 = vpop.f32.mrf.mxu3 }
 0x7f8   :  { %v6972_v61 = vadd.f32 %v6971_v22, %v10995_v10  ;;  %v7373_v58 = vadd.f32 %v7372_v27, %v10997_v11  ;;  %v4996_v36 = vpop.f32.mrf.mxu0  ;;  %v5397_v17 = vpop.f32.mrf.mxu1 }
 0x7f9   :  { %v4997_v24 = vadd.f32 %v4996_v36, %v10995_v10  ;;  %v5398_v52 = vadd.f32 %v5397_v17, %v10997_v11 }
 0x7fa   :  { %v7648_v15 = vmax.f32 %v6972_v61, 0.0  ;;  %v7649_v54 = vmax.f32 %v7373_v58, 0.0 }
 0x7fb   :  { %v5671_v62 = vmax.f32 %v4997_v24, 0.0  ;;  %v5672_v59 = vmax.f32 %v5398_v52, 0.0  ;;  %8983 = vmatmul.msk.f32.gmra.mxu0 %vm293_vm1, %v10266_v60  ;;  %9112 = vmatmul.msk.f32.gmra.mxu1 %vm293_vm1, %v10266_v60 }
 0x7fc   :  { %v7797_v55 = vadd.f32 %v7796_v13, %v7648_v15  ;;  %v7930_v30 = vadd.f32 %v7929_v41, %v7649_v54  ;;  %9368 = vmatmul.msk.f32.gmra.mxu2 %vm293_vm1, %v10519_v12  ;;  %9497 = vmatmul.msk.f32.gmra.mxu3 %vm293_vm1, %v10519_v12 }
 0x7fd   :  { %v5818_v26 = vadd.f32 %v5817_v56, %v5671_v62  ;;  %v5951_v18 = vadd.f32 %v5950_v5, %v5672_v59 }
 0x7ff   :  { %v6974_v38 = vpop.f32.mrf.mxu2  ;;  %v7375_v1 = vpop.f32.mrf.mxu3 }
 0x800   :  { %v6975_v40 = vadd.f32 %v6974_v38, %v10995_v10  ;;  %v7376_v19 = vadd.f32 %v7375_v1, %v10997_v11  ;;  %v4999_v53 = vpop.f32.mrf.mxu0  ;;  %v5400_v34 = vpop.f32.mrf.mxu1 }
 0x801   :  { %v5000_v49 = vadd.f32 %v4999_v53, %v10995_v10  ;;  %v5401_v20 = vadd.f32 %v5400_v34, %v10997_v11 }
 0x802   :  { %v7650_v50 = vmax.f32 %v6975_v40, 0.0  ;;  %v7651_v57 = vmax.f32 %v7376_v19, 0.0 }
 0x803   :  { %v5673_v44 = vmax.f32 %v5000_v49, 0.0  ;;  %v5674_v51 = vmax.f32 %v5401_v20, 0.0  ;;  %8984 = vmatmul.msk.f32.gmra.mxu0 %vm293_vm1, %v10267_v46  ;;  %9113 = vmatmul.msk.f32.gmra.mxu1 %vm293_vm1, %v10267_v46 }
 0x804   :  { %v7798_v0 = vadd.f32 %v7797_v55, %v7650_v50  ;;  %v7931_v47 = vadd.f32 %v7930_v30, %v7651_v57  ;;  %9369 = vmatmul.msk.f32.gmra.mxu2 %vm293_vm1, %v10522_v35  ;;  %9498 = vmatmul.msk.f32.gmra.mxu3 %vm293_vm1, %v10522_v35 }
 0x805   :  { %v5819_v14 = vadd.f32 %v5818_v26, %v5673_v44  ;;  %v5952_v25 = vadd.f32 %v5951_v18, %v5674_v51 }
 0x807   :  { %v6977_v28 = vpop.f32.mrf.mxu2  ;;  %v7378_v6 = vpop.f32.mrf.mxu3 }
 0x808   :  { %v6978_v21 = vadd.f32 %v6977_v28, %v10995_v10  ;;  %v7379_v7 = vadd.f32 %v7378_v6, %v10997_v11  ;;  %v5002_v2 = vpop.f32.mrf.mxu0  ;;  %v5403_v9 = vpop.f32.mrf.mxu1 }
 0x809   :  { %v5003_v37 = vadd.f32 %v5002_v2, %v10995_v10  ;;  %v5404_v3 = vadd.f32 %v5403_v9, %v10997_v11 }
 0x80a   :  { %v7652_v33 = vmax.f32 %v6978_v21, 0.0  ;;  %v7653_v42 = vmax.f32 %v7379_v7, 0.0 }
 0x80b   :  { %v5675_v29 = vmax.f32 %v5003_v37, 0.0  ;;  %v5676_v39 = vmax.f32 %v5404_v3, 0.0 }
 0x80c   :  { %v7799_v63 = vadd.f32 %v7798_v0, %v7652_v33  ;;  %v7932_v43 = vadd.f32 %v7931_v47, %v7653_v42  ;;  %9370 = vmatmul.msk.f32.gmra.mxu2 %vm293_vm1, %v10523_v8  ;;  %9499 = vmatmul.msk.f32.gmra.mxu3 %vm293_vm1, %v10523_v8 }
 0x80d   :  { %v5820_v31 = vadd.f32 %v5819_v14, %v5675_v29  ;;  %v5953_v32 = vadd.f32 %v5952_v25, %v5676_v39 }
 0x80f   :  { %v6980_v23 = vpop.f32.mrf.mxu2  ;;  %v7381_v16 = vpop.f32.mrf.mxu3 }
 0x810   :  { %v6981_v4 = vadd.f32 %v6980_v23, %v10995_v10  ;;  %v7382_v13 = vadd.f32 %v7381_v16, %v10997_v11  ;;  %v5005_v41 = vpop.f32.mrf.mxu0  ;;  %v5406_v48 = vpop.f32.mrf.mxu1  ;;  %v7969_v23 = vld [vmem:[%s15527_s3 + $0x8] sm:$0xff] }
 0x811   :  { %v5006_v56 = vadd.f32 %v5005_v41, %v10995_v10  ;;  %v5407_v5 = vadd.f32 %v5406_v48, %v10997_v11  ;;  %8024 = vmatpush.msra.mxu0 %v7969_v23 }
 0x812   :  { %v7654_v22 = vmax.f32 %v6981_v4, 0.0  ;;  %v7655_v27 = vmax.f32 %v7382_v13, 0.0  ;;  %v7985_v13 = vld [vmem:[%s15527_s3 + $0x88] sm:$0xff] }
 0x813   :  { %v5677_v60 = vmax.f32 %v5006_v56, 0.0  ;;  %v5678_v61 = vmax.f32 %v5407_v5, 0.0  ;;  %8044 = vmatpush.msra.mxu1 %v7985_v13 }
 0x814   :  { %v7800_v58 = vadd.f32 %v7799_v63, %v7654_v22  ;;  %v7933_v36 = vadd.f32 %v7932_v43, %v7655_v27 }
 0x815   :  { %v5821_v17 = vadd.f32 %v5820_v31, %v5677_v60  ;;  %v5954_v12 = vadd.f32 %v5953_v32, %v5678_v61 }
 0x817   :  { %v6983_v24 = vpop.f32.mrf.mxu2  ;;  %v7384_v52 = vpop.f32.mrf.mxu3 }
 0x818   :  { %v6984_v15 = vadd.f32 %v6983_v24, %v10995_v10  ;;  %v7385_v54 = vadd.f32 %v7384_v52, %v10997_v11  ;;  %v5008_v62 = vpop.f32.mrf.mxu0  ;;  %v5409_v59 = vpop.f32.mrf.mxu1 }
 0x819   :  { %v5009_v55 = vadd.f32 %v5008_v62, %v10995_v10  ;;  %v5410_v30 = vadd.f32 %v5409_v59, %v10997_v11 }
 0x81a   :  { %v7656_v26 = vmax.f32 %v6984_v15, 0.0  ;;  %v7657_v18 = vmax.f32 %v7385_v54, 0.0 }
 0x81b   :  { %v5679_v45 = vmax.f32 %v5009_v55, 0.0  ;;  %v5680_v38 = vmax.f32 %v5410_v30, 0.0 }
 0x81c   :  { %v7801_v1 = vadd.f32 %v7800_v58, %v7656_v26  ;;  %v7934_v46 = vadd.f32 %v7933_v36, %v7657_v18 }
 0x81d   :  { %v5822_v40 = vadd.f32 %v5821_v17, %v5679_v45  ;;  %v5955_v19 = vadd.f32 %v5954_v12, %v5680_v38 }
 0x81f   :  { %v6986_v53 = vpop.f32.mrf.mxu2  ;;  %v7387_v34 = vpop.f32.mrf.mxu3 }
 0x820   :  { %v6987_v35 = vadd.f32 %v6986_v53, %v10995_v10  ;;  %v7388_v49 = vadd.f32 %v7387_v34, %v10997_v11  ;;  %v5011_v20 = vpop.f32.mrf.mxu0  ;;  %v5412_v50 = vpop.f32.mrf.mxu1 }
 0x821   :  { %v5012_v57 = vadd.f32 %v5011_v20, %v10995_v10  ;;  %v5413_v44 = vadd.f32 %v5412_v50, %v10997_v11 }
 0x822   :  { %v7658_v51 = vmax.f32 %v6987_v35, 0.0  ;;  %v7659_v0 = vmax.f32 %v7388_v49, 0.0 }
 0x823   :  { %v5681_v47 = vmax.f32 %v5012_v57, 0.0  ;;  %v5682_v14 = vmax.f32 %v5413_v44, 0.0 }
 0x824   :  { %v7802_v25 = vadd.f32 %v7801_v1, %v7658_v51  ;;  %v7935_v28 = vadd.f32 %v7934_v46, %v7659_v0 }
 0x825   :  { %v5823_v6 = vadd.f32 %v5822_v40, %v5681_v47  ;;  %v5956_v21 = vadd.f32 %v5955_v19, %v5682_v14 }
 0x827   :  { %v6989_v7 = vpop.f32.mrf.mxu2  ;;  %v7390_v2 = vpop.f32.mrf.mxu3 }
 0x828   :  { %v6990_v9 = vadd.f32 %v6989_v7, %v10995_v10  ;;  %v7391_v8 = vadd.f32 %v7390_v2, %v10997_v11  ;;  %v5014_v37 = vpop.f32.mrf.mxu0  ;;  %v5415_v3 = vpop.f32.mrf.mxu1 }
 0x829   :  { %v5015_v33 = vadd.f32 %v5014_v37, %v10995_v10  ;;  %v5416_v42 = vadd.f32 %v5415_v3, %v10997_v11 }
 0x82a   :  { %v7660_v29 = vmax.f32 %v6990_v9, 0.0  ;;  %v7661_v39 = vmax.f32 %v7391_v8, 0.0 }
 0x82b   :  { %v5683_v63 = vmax.f32 %v5015_v33, 0.0  ;;  %v5684_v43 = vmax.f32 %v5416_v42, 0.0 }
 0x82c   :  { %v7803_v31 = vadd.f32 %v7802_v25, %v7660_v29  ;;  %v7936_v32 = vadd.f32 %v7935_v28, %v7661_v39 }
 0x82d   :  { %v5824_v16 = vadd.f32 %v5823_v6, %v5683_v63  ;;  %v5957_v4 = vadd.f32 %v5956_v21, %v5684_v43 }
 0x82f   :  { %v6992_v41 = vpop.f32.mrf.mxu2  ;;  %v7393_v48 = vpop.f32.mrf.mxu3 }
 0x830   :  { %v6993_v56 = vadd.f32 %v6992_v41, %v10995_v10  ;;  %v7394_v5 = vadd.f32 %v7393_v48, %v10997_v11  ;;  %v5017_v22 = vpop.f32.mrf.mxu0  ;;  %v5418_v27 = vpop.f32.mrf.mxu1 }
 0x831   :  { %v5018_v25 = vadd.f32 %v5017_v22, %v10995_v10  ;;  %v5419_v28 = vadd.f32 %v5418_v27, %v10997_v11 }
 0x832   :  { %v7662_v60 = vmax.f32 %v6993_v56, 0.0  ;;  %v7663_v61 = vmax.f32 %v7394_v5, 0.0 }
 0x833   :  { %v5685_v37 = vmax.f32 %v5018_v25, 0.0  ;;  %v5686_v3 = vmax.f32 %v5419_v28, 0.0 }
 0x834   :  { %v7804_v58 = vadd.f32 %v7803_v31, %v7662_v60  ;;  %v7937_v36 = vadd.f32 %v7936_v32, %v7663_v61 }
 0x835   :  { %v5825_v63 = vadd.f32 %v5824_v16, %v5685_v37  ;;  %v5958_v43 = vadd.f32 %v5957_v4, %v5686_v3 }
 0x837   :  { %v6995_v17 = vpop.f32.mrf.mxu2  ;;  %v7396_v12 = vpop.f32.mrf.mxu3 }
 0x838   :  { %v6996_v24 = vadd.f32 %v6995_v17, %v10995_v10  ;;  %v7397_v52 = vadd.f32 %v7396_v12, %v10997_v11  ;;  %v5020_v15 = vpop.f32.mrf.mxu0  ;;  %v5421_v54 = vpop.f32.mrf.mxu1 }
 0x839   :  { %v5021_v9 = vadd.f32 %v5020_v15, %v10995_v10  ;;  %v5422_v8 = vadd.f32 %v5421_v54, %v10997_v11 }
 0x83a   :  { %v7664_v62 = vmax.f32 %v6996_v24, 0.0  ;;  %v7665_v59 = vmax.f32 %v7397_v52, 0.0 }
 0x83b   :  { %v5687_v29 = vmax.f32 %v5021_v9, 0.0  ;;  %v5688_v39 = vmax.f32 %v5422_v8, 0.0 }
 0x83c   :  { %v15420_v55 = vadd.f32 %v7804_v58, %v7664_v62  ;;  %v15422_v30 = vadd.f32 %v7937_v36, %v7665_v59 }
 0x83d   :  { %v5826_v60 = vadd.f32 %v5825_v63, %v5687_v29  ;;  %v5959_v61 = vadd.f32 %v5958_v43, %v5688_v39 }
 0x83f   :  { %v6998_v26 = vpop.f32.mrf.mxu2  ;;  %v7399_v18 = vpop.f32.mrf.mxu3 }
 0x840   :  { %v5023_v45 = vpop.f32.mrf.mxu0  ;;  %v5424_v38 = vpop.f32.mrf.mxu1  ;;  %v6999_v23 = vadd.f32 %v6998_v26, %v10995_v10  ;;  %v7400_v13 = vadd.f32 %v7399_v18, %v10997_v11 }
 0x841   :  { %v5024_v33 = vadd.f32 %v5023_v45, %v10995_v10  ;;  %v5425_v42 = vadd.f32 %v5424_v38, %v10997_v11 }
 0x842   :  { %v7666_v24 = vmax.f32 %v6999_v23, 0.0  ;;  %v7667_v52 = vmax.f32 %v7400_v13, 0.0 }
 0x843   :  { %v5689_v41 = vmax.f32 %v5024_v33, 0.0  ;;  %v5690_v48 = vmax.f32 %v5425_v42, 0.0 }
 0x845   :  { %v5827_v15 = vadd.f32 %v5826_v60, %v5689_v41  ;;  %v5960_v54 = vadd.f32 %v5959_v61, %v5690_v48 }
 0x847   :  { %v7001_v1 = vpop.f32.mrf.mxu2  ;;  %v7402_v46 = vpop.f32.mrf.mxu3 }
 0x848   :  { %v5026_v40 = vpop.f32.mrf.mxu0  ;;  %v5427_v19 = vpop.f32.mrf.mxu1  ;;  %v7002_v62 = vadd.f32 %v7001_v1, %v10995_v10  ;;  %v7403_v59 = vadd.f32 %v7402_v46, %v10997_v11 }
 0x849   :  { %v5027_v31 = vadd.f32 %v5026_v40, %v10995_v10  ;;  %v5428_v32 = vadd.f32 %v5427_v19, %v10997_v11 }
 0x84a   :  { %v7668_v9 = vmax.f32 %v7002_v62, 0.0 }
 0x84b   :  { %v5691_v58 = vmax.f32 %v5027_v31, 0.0  ;;  %v5692_v36 = vmax.f32 %v5428_v32, 0.0 }
 0x84d   :  { %v5828_v40 = vadd.f32 %v5827_v15, %v5691_v58  ;;  %v5961_v19 = vadd.f32 %v5960_v54, %v5692_v36 }
 0x84f   :  { %v15424_v53 = vpop.f32.mrf.mxu2  ;;  %v15426_v34 = vpop.f32.mrf.mxu3 }
 0x850   :  { %v5029_v35 = vpop.f32.mrf.mxu0  ;;  %v5430_v49 = vpop.f32.mrf.mxu1  ;;  %v7005_v29 = vadd.f32 %v15424_v53, %v10995_v10  ;;  %v7406_v39 = vadd.f32 %v15426_v34, %v10997_v11 }
 0x851   :  { %v5030_v22 = vadd.f32 %v5029_v35, %v10995_v10  ;;  %v5431_v27 = vadd.f32 %v5430_v49, %v10997_v11 }
 0x852   :  { %v7670_v60 = vmax.f32 %v7005_v29, 0.0  ;;  %v7671_v61 = vmax.f32 %v7406_v39, 0.0 }
 0x853   :  { %v5693_v26 = vmax.f32 %v5030_v22, 0.0  ;;  %v5694_v18 = vmax.f32 %v5431_v27, 0.0 }
 0x855   :  { %v5829_v8 = vadd.f32 %v5828_v40, %v5693_v26 }
 0x857   :  { %v15428_v20 = vpop.f32.mrf.mxu2  ;;  %v15430_v50 = vpop.f32.mrf.mxu3 }
 0x858   :  { %v5032_v57 = vpop.f32.mrf.mxu0  ;;  %v5433_v44 = vpop.f32.mrf.mxu1  ;;  %v7008_v22 = vadd.f32 %v15428_v20, %v10995_v10  ;;  %v7409_v27 = vadd.f32 %v15430_v50, %v10997_v11 }
 0x859   :  { %v5033_v17 = vadd.f32 %v5032_v57, %v10995_v10  ;;  %v5434_v12 = vadd.f32 %v5433_v44, %v10997_v11  ;;  %v7806_v57 = vadd.f32 %v15420_v55, %v7666_v24  ;;  %v7939_v44 = vadd.f32 %v15422_v30, %v7667_v52  ;;  %v7968_v55 = vld [vmem:[%s15527_s3] sm:$0xff] }
 0x85a   :  { %v7984_v30 = vld [vmem:[%s15527_s3 + $0x80] sm:$0xff]  ;;  %8025 = vmatpush.msra.mxu0 %v7968_v55  ;;  %v7672_v54 = vmax.f32 %v7008_v22, 0.0  ;;  %v7673_v50 = vmax.f32 %v7409_v27, 0.0 }
 0x85b   :  { %v5695_v35 = vmax.f32 %v5033_v17, 0.0  ;;  %v5696_v49 = vmax.f32 %v5434_v12, 0.0  ;;  %8045 = vmatpush.msra.mxu1 %v7984_v30  ;;  %v7807_v41 = vadd.f32 %v7806_v57, %v7668_v9 }
 0x85d   :  { %v5830_v63 = vadd.f32 %v5829_v8, %v5695_v35  ;;  %v7808_v40 = vadd.f32 %v7807_v41, %v7670_v60 }
 0x85f   :  { %v15432_v51 = vpop.f32.mrf.mxu2  ;;  %v15434_v0 = vpop.f32.mrf.mxu3 }
 0x860   :  { %v5035_v47 = vpop.f32.mrf.mxu0  ;;  %v5436_v14 = vpop.f32.mrf.mxu1  ;;  %v7011_v58 = vadd.f32 %v15432_v51, %v10995_v10  ;;  %v7412_v36 = vadd.f32 %v15434_v0, %v10997_v11 }
 0x861   :  { %v5036_v45 = vadd.f32 %v5035_v47, %v10995_v10  ;;  %v5437_v38 = vadd.f32 %v5436_v14, %v10997_v11  ;;  %v7669_v47 = vmax.f32 %v7403_v59, 0.0  ;;  %v5962_v14 = vadd.f32 %v5961_v19, %v5694_v18 }
 0x862   :  { %v7674_v35 = vmax.f32 %v7011_v58, 0.0 }
 0x863   :  { %v5963_v43 = vadd.f32 %v5962_v14, %v5696_v49  ;;  %v7940_v48 = vadd.f32 %v7939_v44, %v7669_v47  ;;  %v7675_v49 = vmax.f32 %v7412_v36, 0.0 }
 0x865   :  { %v7941_v19 = vadd.f32 %v7940_v48, %v7671_v61 }
 0x867   :  { %v15438_v6 = vpop.f32.mrf.mxu2  ;;  %v15440_v21 = vpop.f32.mrf.mxu3  ;;  %v7942_v9 = vadd.f32 %v7941_v19, %v7673_v50 }
 0x868   :  { %v5038_v7 = vpop.f32.mrf.mxu0  ;;  %v5439_v2 = vpop.f32.mrf.mxu1  ;;  %v7014_v62 = vadd.f32 %v15438_v6, %v10995_v10  ;;  %v7415_v59 = vadd.f32 %v15440_v21, %v10997_v11  ;;  %v7809_v6 = vadd.f32 %v7808_v40, %v7672_v54  ;;  %v5708_v40 = vld [vmem:[#allocation2 + $0x2] ss:$4 sm:$0x3] }
 0x869   :  { %v5039_v25 = vadd.f32 %v5038_v7, %v10995_v10  ;;  %v5440_v1 = vadd.f32 %v5439_v2, %v10997_v11  ;;  %v5697_v7 = vmax.f32 %v5036_v45, 0.0  ;;  %v5698_v2 = vmax.f32 %v5437_v38, 0.0 }
 0x86a   :  { %v7676_v8 = vmax.f32 %v7014_v62, 0.0  ;;  %v7677_v14 = vmax.f32 %v7415_v59, 0.0 }
 0x86b   :  { %v5699_v31 = vmax.f32 %v5039_v25, 0.0  ;;  %v5700_v32 = vmax.f32 %v5440_v1, 0.0  ;;  %v5831_v53 = vadd.f32 %v5830_v63, %v5697_v7  ;;  %v7810_v7 = vadd.f32 %v7809_v6, %v7674_v35 }
 0x86d   :  { %v5832_v17 = vadd.f32 %v5831_v53, %v5699_v31  ;;  %v7811_v31 = vadd.f32 %v7810_v7, %v7676_v8 }
 0x86f   :  { %v15450_v56 = vpop.f32.mrf.mxu2  ;;  %v15452_v5 = vpop.f32.mrf.mxu3 }
 0x870   :  { %v5041_v16 = vpop.f32.mrf.mxu0  ;;  %v5442_v4 = vpop.f32.mrf.mxu1  ;;  %v7017_v21 = vadd.f32 %v15450_v56, %v10995_v10  ;;  %v7418_v47 = vadd.f32 %v15452_v5, %v10997_v11 }
 0x871   :  { %v5042_v33 = vadd.f32 %v5041_v16, %v10995_v10  ;;  %v5443_v42 = vadd.f32 %v5442_v4, %v10997_v11  ;;  %v5964_v16 = vadd.f32 %v5963_v43, %v5698_v2  ;;  %v7943_v2 = vadd.f32 %v7942_v9, %v7675_v49 }
 0x872   :  { %v7678_v56 = vmax.f32 %v7017_v21, 0.0  ;;  %v7679_v63 = vmax.f32 %v7418_v47, 0.0 }
 0x873   :  { %v5701_v4 = vmax.f32 %v5042_v33, 0.0  ;;  %v5702_v34 = vmax.f32 %v5443_v42, 0.0  ;;  %v5965_v12 = vadd.f32 %v5964_v16, %v5700_v32  ;;  %v7944_v32 = vadd.f32 %v7943_v2, %v7677_v14 }
 0x874   :  { %v7812_v53 = vadd.f32 %v7811_v31, %v7678_v56 }
 0x875   :  { %v5833_v51 = vadd.f32 %v5832_v17, %v5701_v4  ;;  %v5966_v45 = vadd.f32 %v5965_v12, %v5702_v34  ;;  %v7945_v16 = vadd.f32 %v7944_v32, %v7679_v63  ;;  %v10781_v63 = vld [vmem:[%s15528_s4] ss:$0 sm:$0xff]  ;;  %s10811_s4 = smov [#allocation3]  }
 0x876   :  { %s8073_s6 = sshll.u32 %s10811_s4, 4  ;;  %s8074_s6 = int_to_ptr.vmem [resolvable:$true] %s8073_s6 }
 0x877   :  { %v15466_v28 = vpop.f32.mrf.mxu2  ;;  %v15468_v46 = vpop.f32.mrf.mxu3 }
 0x878   :  { %v5044_v37 = vpop.f32.mrf.mxu0  ;;  %v5445_v3 = vpop.f32.mrf.mxu1  ;;  %v7020_v55 = vadd.f32 %v15466_v28, %v10995_v10  ;;  %v7421_v30 = vadd.f32 %v15468_v46, %v10997_v11 }
 0x879   :  { %v5045_v23 = vadd.f32 %v5044_v37, %v10995_v10  ;;  %v5446_v13 = vadd.f32 %v5445_v3, %v10997_v11 }
 0x87a   :  { %v7680_v28 = vmax.f32 %v7020_v55, 0.0  ;;  %v7681_v41 = vmax.f32 %v7421_v30, 0.0  ;;  %v7689_v30 = vld [vmem:[#allocation2 + $0x3] ss:$4 sm:$0x3] }
 0x87b   :  { %v5703_v24 = vmax.f32 %v5045_v23, 0.0  ;;  %v5704_v52 = vmax.f32 %v5446_v13, 0.0 }
 0x87c   :  { %v7813_v58 = vadd.f32 %v7812_v53, %v7680_v28  ;;  %v7946_v36 = vadd.f32 %v7945_v16, %v7681_v41 }
 0x87d   :  { %v5834_v57 = vadd.f32 %v5833_v51, %v5703_v24  ;;  %v5967_v44 = vadd.f32 %v5966_v45, %v5704_v52 }
 0x87f   :  { %v7022_v20 = vpop.f32.mrf.mxu2  ;;  %v7423_v15 = vpop.f32.mrf.mxu3 }
 0x880   :  { %v5047_v26 = vpop.f32.mrf.mxu0  ;;  %v5448_v18 = vpop.f32.mrf.mxu1  ;;  %v7023_v5 = vadd.f32 %v7022_v20, %v10995_v10  ;;  %v7424_v43 = vadd.f32 %v7423_v15, %v10997_v11 }
 0x881   :  { %v5048_v0 = vadd.f32 %v5047_v26, %v10995_v10  ;;  %v5449_v38 = vadd.f32 %v5448_v18, %v10997_v11 }
 0x882   :  { %v7682_v4 = vmax.f32 %v7023_v5, 0.0  ;;  %v7683_v34 = vmax.f32 %v7424_v43, 0.0 }
 0x883   :  { %v5705_v25 = vmax.f32 %v5048_v0, 0.0  ;;  %v5706_v1 = vmax.f32 %v5449_v38, 0.0 }
 0x884   :  { %v7814_v54 = vadd.f32 %v7813_v58, %v7682_v4  ;;  %v7947_v50 = vadd.f32 %v7946_v36, %v7683_v34 }
 0x885   :  { %v5835_v37 = vadd.f32 %v5834_v57, %v5705_v25  ;;  %v5968_v3 = vadd.f32 %v5967_v44, %v5706_v1 }
 0x887   :  { %v5836_v33 = vrot.slane %v5835_v37, 4  ;;  %v5969_v42 = vrot.slane %v5968_v3, 4  ;;  %v7025_v29 = vpop.f32.mrf.mxu2  ;;  %v7426_v39 = vpop.f32.mrf.mxu3 }
 0x888   :  { %v7026_v46 = vadd.f32 %v7025_v29, %v10995_v10  ;;  %v7427_v48 = vadd.f32 %v7426_v39, %v10997_v11 }
 0x889   :  { %v5837_v23 = vadd.f32 %v5836_v33, %v5835_v37  ;;  %v5970_v13 = vadd.f32 %v5969_v42, %v5968_v3 }
 0x88a   :  { %v7684_v17 = vmax.f32 %v7026_v46, 0.0  ;;  %v7685_v12 = vmax.f32 %v7427_v48, 0.0 }
 0x88b   :  { %v5838_v22 = vrot.slane %v5837_v23, 2  ;;  %v5971_v27 = vrot.slane %v5970_v13, 2 }
 0x88c   :  { %v7815_v18 = vadd.f32 %v7814_v54, %v7684_v17  ;;  %v7948_v51 = vadd.f32 %v7947_v50, %v7685_v12 }
 0x88d   :  { %v5839_v60 = vadd.f32 %v5838_v22, %v5837_v23  ;;  %v5972_v61 = vadd.f32 %v5971_v27, %v5970_v13 }
 0x88f   :  { %v5840_v24 = vrot.slane %v5839_v60, 1  ;;  %v5973_v52 = vrot.slane %v5972_v61, 1  ;;  %v7028_v20 = vpop.f32.mrf.mxu2  ;;  %v7429_v15 = vpop.f32.mrf.mxu3 }
 0x890   :  { %v7029_v62 = vadd.f32 %v7028_v20, %v10995_v10  ;;  %v7430_v59 = vadd.f32 %v7429_v15, %v10997_v11 }
 0x891   :  { %v5974_v26 = vadd.f32 %v5973_v52, %v5972_v61  ;;  %v5841_v38 = vadd.f32 %v5840_v24, %v5839_v60 }
 0x892   :  { %v7686_v45 = vmax.f32 %v7029_v62, 0.0  ;;  %v7687_v0 = vmax.f32 %v7430_v59, 0.0 }
 0x893   :  { %v5977_v19 = vrot.slane %v5974_v26, 7 }
 0x894   :  { %v7816_v35 = vadd.f32 %v7815_v18, %v7686_v45  ;;  %v7949_v49 = vadd.f32 %v7948_v51, %v7687_v0 }
 0x895   :  { %v5978_v57 = vsel %vm2011_vm2, %v5841_v38, %v5977_v19 }
 0x896   :  { %v5980_v44 = vadd.f32 %v5978_v57, %v5708_v40  ;;  %v7817_v25 = vrot.slane %v7816_v35, 4  ;;  %v7950_v1 = vrot.slane %v7949_v49, 4 }
 0x898   :  { %5981 = vst.msk [vmem:[#allocation2 + $0x2] ss:$4 sm:$0x3] %vm13344_vm3, %v5980_v44  ;;  %v7818_v10 = vadd.f32 %v7817_v25, %v7816_v35  ;;  %v7951_v11 = vadd.f32 %v7950_v1, %v7949_v49 }
 0x89a   :  { %v7819_v9 = vrot.slane %v7818_v10, 2  ;;  %v7952_v21 = vrot.slane %v7951_v11, 2 }
 0x89c   :  { %v7820_v47 = vadd.f32 %v7819_v9, %v7818_v10  ;;  %v7953_v8 = vadd.f32 %v7952_v21, %v7951_v11 }
 0x89e   :  { %v7821_v14 = vrot.slane %v7820_v47, 1  ;;  %v7954_v37 = vrot.slane %v7953_v8, 1 }
 0x8a0   :  { %v7955_v3 = vadd.f32 %v7954_v37, %v7953_v8  ;;  %v7822_v55 = vadd.f32 %v7821_v14, %v7820_v47 }
 0x8a2   :  { %v7958_v7 = vrot.slane %v7955_v3, 7 }
 0x8a4   :  { %v7959_v2 = vsel %vm2011_vm2, %v7822_v55, %v7958_v7 }
 0x8a5   :  { %v7961_v33 = vadd.f32 %v7959_v2, %v7689_v30 }
 0x8a7   :  { %7962 = vst.msk [vmem:[#allocation2 + $0x3] ss:$4 sm:$0x3] %vm13344_vm3, %v7961_v33 }
 0x8ae   :  { %v7966_v42 = vld [vmem:[#allocation2] sm:$0xff] }
 0x8af   :  { %v7967_v29 = vmul.f32 0.0009765625, %v7966_v42 }
 0x8b1   :  { %8005 = vst [vmem:[#allocation1] ss:$2 sm:$0xff] %v7967_v29 }
 0x8b8   :  { %v8006_v39 = vld.sshfl [vmem:[#allocation1] sm:$0xff pattern:$0x75316420]  ;;  %v8007_v56 = vld.sshfl [vmem:[#allocation1 + $0x8] sm:$0xff pattern:$0x75316420] }
 0x8b9   :  { %8026 = vmatmul.f32.vlgmr.msra.gmra.mxu0 %v8006_v39  ;;  %8046 = vmatmul.f32.vlgmr.msra.gmra.mxu1 %v8007_v56 }
 0x936   :  { %v8027_v5 = vpop.f32.mrf.mxu0  ;;  %v8047_v31 = vpop.f32.mrf.mxu1 }
 0x937   :  { %v8028_v43 = vadd.f32 %v10781_v63, %v8027_v5 }
 0x939   :  { %v8048_v32 = vadd.f32 %v8047_v31, %v8028_v43 }
 0x93b   :  { %v8050_v23 = vmul.f32 %v8048_v32, %v8048_v32 }
 0x93d   :  { %v8052_v13 = vsel %vm8051_vm4, %v8050_v23, 0.0 }
 0x93e   :  { %8053 = vadd.xlane.f32.xlu0 %v8052_v13 }
 0x9b1   :  { %v8054_v28 = vpop.xlane.xlu0 %8053 }
 0x9b2   :  { %v8055_v41 = vmax.f32 %v8054_v28, 1e-24 }
 0x9b4   :  { %10782 = vrsqrt.f32 %v8055_v41  ;;  %vm8062_vm6 = vweird.f32 %v8055_v41 }
 0x9ba   :  { %v10783_v46 = vpop.eup %10782 }
 0x9bb   :  { %v8057_v48 = vmul.f32 %v10783_v46, %v8055_v41  ;;  %vm8063_vm5 = vweird.f32 %v10783_v46 }
 0x9bc   :  { %vm8064_vm7 = vmor %vm8062_vm6, %vm8063_vm5 }
 0x9bd   :  { %v8058_v22 = vmul.f32 %v10783_v46, %v8057_v48 }
 0x9bf   :  { %v8059_v27 = vmul.f32 0.5, %v8058_v22 }
 0x9c1   :  { %v8060_v53 = vsub.f32 1.5, %v8059_v27 }
 0x9c3   :  { %v8061_v16 = vmul.f32 %v10783_v46, %v8060_v53 }
 0x9c5   :  { %v8065_v4 = vsel %vm8064_vm7, %v10783_v46, %v8061_v16 }
 0x9c6   :  { %v8066_v34 = vmul.f32 %v8065_v4, %v8048_v32 }
 0x9c8   :  { %8067 = vst [vmem:[#allocation3] sm:$0xf] %v8066_v34 }
 0x9c9   :  { %8078 = dma.vmem_to_hbm [thread:$0]  %s8074_s6, 64, %s8076_s8, [#allocation4]  }
 0x9ca   :  { %10808 = dma.done.wait [#allocation4], 64  }
 0x9cb   :  { %10809 = vsyncadd [#allocation4], 4294967232 }
 0x9cc   :  { %8083 = vsyncpa [#allocation4], 1 }

</bundles_post_ra>
